<compile_context>
chip_gen: v5e
topology: v5e:2x2
jax: 0.10.0
libtpu: 0.0.40
codegen_flags: <defaults>
</compile_context>

<pallas_src>
import functools

import numpy as np
import jax
import jax.numpy as jnp
from jax import lax
from jax.experimental import pallas as pl
from jax.experimental.pallas import tpu as pltpu

CHANNELS = (64, 128, 256, 512, 1024, 1024)   # hard-coded in the PyTorch module
FCSIZE = 2                                   # -> 1024 * 2 = 2048 flat features
BN_EPS = 1e-5
PRELU_ALPHA = 0.25                           # fresh nn.PReLU() parameter
BF16 = jnp.bfloat16


# --------------------------------------------------------------------------
# per-generation VMEM sizing
# --------------------------------------------------------------------------
def _vmem_capacity_bytes():
    try:
        info = pltpu.get_tpu_info()
        cap = getattr(info, "vmem_capacity_bytes", None)
        if cap:
            return int(cap)
    except Exception:
        pass
    return 128 * 1024 * 1024


_VMEM_CAP = _vmem_capacity_bytes()
VMEM_LIMIT = min(int(_VMEM_CAP * 0.55), 56 * 1024 * 1024)   # scoped VMEM per call
VMEM_BUDGET = int(VMEM_LIMIT * 0.60)                        # tile-sizing target
FLAVOR_B_MAX_WBYTES = 8 * 1024 * 1024                       # whole-weight-in-VMEM cap
KC_W_CAP = min(12 * 1024 * 1024, VMEM_LIMIT // 4)           # flavor-C weight block cap
KC_P_CAP = 4 * 1024 * 1024                                  # flavor-C patch block cap


# --------------------------------------------------------------------------
# helpers
# --------------------------------------------------------------------------
def _lanes(c):
    return ((c + 127) // 128) * 128


def _sub8(x):
    return ((x + 7) // 8) * 8


def _apply_act(act, y):
    if act == "relu":
        return jnp.maximum(y, 0.0)
    if act == "prelu":
        return jnp.where(y > 0, y, PRELU_ALPHA * y)
    return y


def _phase(kd, kh, kw):
    return ((kd & 1) << 2) | ((kh & 1) << 1) | (kw & 1)


def _contrib_triples(ksz, stride, out_dhw):
    """Kernel offsets (kd, kh, kw) that touch at least one real (non-padding)
    input element for pad=1.  Offsets that only ever multiply the zero padding
    are pruned; this only triggers when an output extent is 1 (stage 6)."""
    def keep(out):
        inp = stride * out
        ks = []
        for ko in range(ksz):
            pos = [stride * o + ko for o in range(out)]
            if any(0 < p <= inp for p in pos):
                ks.append(ko)
        return ks
    kds, khs, kws = keep(out_dhw[0]), keep(out_dhw[1]), keep(out_dhw[2])
    return tuple((kd, kh, kw) for kd in kds for kh in khs for kw in kws)


def _flatten_sel(w5, triples):
    """5-D conv weight [k,k,k,cin,cout] -> pruned, flattened [k3', cin, cout]."""
    return jnp.stack([w5[kd, kh, kw] for (kd, kh, kw) in triples], axis=0)


def _slab(xph, off, td, oh, ow):
    pi, d0, h0, w0 = off
    return xph[pi, :, d0:d0 + td, h0:h0 + oh, w0:w0 + ow, :]


def _pick_tm(m, cap=4096):
    """M tile for the gridded patch-matmul (flavor A)."""
    if m <= cap:
        return m
    for t in range(cap, 7, -8):
        if m % t == 0:
            return t
    return m


def _pick_td(od, xph_shape, oh, ow, k3p, n, halo, has_resid):
    """Largest depth tile (divisor of OD) whose estimated VMEM footprint
    (incl. sublane/lane padding, f32 accumulator, outputs) fits the budget."""
    p, b = xph_shape[0], xph_shape[1]
    ohp, owp, cin = xph_shape[3], xph_shape[4], xph_shape[5]
    plane = p * b * ohp * _sub8(owp) * _lanes(cin) * 2
    w_bytes = k3p * cin * _lanes(n) * 2
    for td in sorted((t for t in range(1, od + 1) if od % t == 0), reverse=True):
        m = b * td * oh * ow
        out_bytes = m * _lanes(n) * 6            # bf16 output(s) + f32 accumulator
        if has_resid:
            out_bytes += m * _lanes(n) * 2
        if plane * (td + halo) + w_bytes + out_bytes + (1 << 20) <= VMEM_BUDGET:
            return td
    return 1


def _pick_kc(k3p, cin, cot, m):
    """# kernel offsets per streamed weight block (flavor C): bound both the
    bf16 weight block (kc*cin*cot) and the patch block (kc*m*cin)."""
    kc = 1
    for d in range(1, k3p + 1):
        if k3p % d:
            continue
        if d * cin * cot * 2 <= KC_W_CAP and d * m * _lanes(cin) * 2 <= KC_P_CAP:
            kc = d
    return kc


# --------------------------------------------------------------------------
# Pallas kernels (memoised factories -> each config compiles exactly once)
# --------------------------------------------------------------------------
@functools.lru_cache(maxsize=None)
def _patch_matmul_call(m, tm, k, cout1, cout2, act):
    """Flavor A: gridded matmul over M tiles, y = patches @ W + b.
    cout2 > 0 -> fused conv1|downsample: emit (relu(y[:, :cout1]), y[:, cout1:])."""
    n = cout1 + cout2
    fused = cout2 > 0

    def kernel(x_ref, w_ref, b_ref, *out_refs):
        y = jnp.dot(x_ref[...], w_ref[...], preferred_element_type=jnp.float32)
        y = y + b_ref[...]
        if fused:
            o1_ref, o2_ref = out_refs
            o1_ref[...] = jnp.maximum(y[:, :cout1], 0.0).astype(BF16)
            o2_ref[...] = y[:, cout1:].astype(BF16)
        else:
            out_refs[0][...] = _apply_act(act, y).astype(BF16)

    in_specs = [pl.BlockSpec((tm, k), lambda i: (i, 0)),
                pl.BlockSpec((k, n), lambda i: (0, 0)),
                pl.BlockSpec((1, n), lambda i: (0, 0))]
    if fused:
        out_specs = (pl.BlockSpec((tm, cout1), lambda i: (i, 0)),
                     pl.BlockSpec((tm, cout2), lambda i: (i, 0)))
        out_shape = (jax.ShapeDtypeStruct((m, cout1), BF16),
                     jax.ShapeDtypeStruct((m, cout2), BF16))
    else:
        out_specs = pl.BlockSpec((tm, cout1), lambda i: (i, 0))
        out_shape = jax.ShapeDtypeStruct((m, cout1), BF16)
    return jax.jit(pl.pallas_call(
        kernel,
        out_shape=out_shape,
        grid=(m // tm,),
        in_specs=in_specs,
        out_specs=out_specs,
        compiler_params=pltpu.CompilerParams(
            dimension_semantics=("parallel",), vmem_limit_bytes=VMEM_LIMIT),
        cost_estimate=pl.CostEstimate(flops=2 * m * k * n, transcendentals=0,
                                      bytes_accessed=2 * (m * k + k * n + m * n)),
    ))


@functools.lru_cache(maxsize=None)
def _direct_conv_call(xph_shape, td, oh, ow, offs, cout1, cout2, act, has_resid):
    """Flavor B: whole (pruned) weight resident in VMEM; static unrolled loop
    over kernel offsets accumulating into a VMEM f32 scratch ref.  Optional
    fused (conv1|downsample) second output; optional residual add."""
    p, b, tdin, ohp, owp, cin = xph_shape
    n = cout1 + cout2
    fused = cout2 > 0
    m = b * td * oh * ow
    k3p = len(offs)

    def kernel(xph_ref, w_ref, b_ref, *rest):
        i = 0
        if has_resid:
            r_ref, rs_ref = rest[0], rest[1]
            i = 2
        if fused:
            o1_ref, o2_ref, acc_ref = rest[i], rest[i + 1], rest[i + 2]
        else:
            o1_ref, acc_ref = rest[i], rest[i + 1]

        for j, (pi, d0, h0, w0) in enumerate(offs):
            lhs = xph_ref[pi, :, d0:d0 + td, h0:h0 + oh, w0:w0 + ow, :]
            lhs = lhs.reshape(m, cin)
            part = jnp.dot(lhs, w_ref[j], preferred_element_type=jnp.float32)
            if j == 0:
                acc_ref[...] = part
            else:
                acc_ref[...] += part

        y = acc_ref[...] + b_ref[...]
        if fused:
            o1_ref[...] = jnp.maximum(y[:, :cout1], 0.0).astype(BF16)
            o2_ref[...] = y[:, cout1:].astype(BF16)
        else:
            if has_resid:
                y = y + r_ref[...].astype(jnp.float32) * rs_ref[...]
            o1_ref[...] = _apply_act(act, y).astype(BF16)

    vmem = pl.BlockSpec(memory_space=pltpu.MemorySpace.VMEM)
    n_in = 5 if has_resid else 3
    if fused:
        out_shape = (jax.ShapeDtypeStruct((m, cout1), BF16),
                     jax.ShapeDtypeStruct((m, cout2), BF16))
        out_specs = (vmem, vmem)
    else:
        out_shape = jax.ShapeDtypeStruct((m, n), BF16)
        out_specs = vmem
    flops = 2 * m * cin * n * k3p
    bytes_acc = 2 * (p * b * tdin * ohp * owp * cin + k3p * cin * n + 2 * m * n)
    return jax.jit(pl.pallas_call(
        kernel,
        out_shape=out_shape,
        in_specs=[vmem] * n_in,
        out_specs=out_specs,
        scratch_shapes=[pltpu.VMEM((m, n), jnp.float32)],
        compiler_params=pltpu.CompilerParams(vmem_limit_bytes=VMEM_LIMIT),
        cost_estimate=pl.CostEstimate(flops=flops, transcendentals=0,
                                      bytes_accessed=bytes_acc),
    ))


@functools.lru_cache(maxsize=None)
def _ktiled_conv_call(k3p, kc, m, cin, n, cot, cout1, act, has_resid):
    """Flavor C: huge-weight conv.  Grid over (cout tiles [parallel],
    kernel-offset tiles [arbitrary]); weights streamed from HBM exactly once;
    f32 VMEM accumulator.  cout1 < n marks a fused conv1|downsample call:
    ReLU applies only to channels < cout1 (lane-iota mask)."""
    nk = k3p // kc
    nc = n // cot
    fused = cout1 < n

    def kernel(p_ref, w_ref, b_ref, *rest):
        if has_resid:
            r_ref, rs_ref, o_ref, acc_ref = rest
        else:
            o_ref, acc_ref = rest
        c = pl.program_id(0)
        k = pl.program_id(1)

        @pl.when(k == 0)
        def _():
            acc_ref[...] = jnp.zeros_like(acc_ref)

        for jj in range(kc):
            acc_ref[...] += jnp.dot(p_ref[jj], w_ref[jj],
                                    preferred_element_type=jnp.float32)

        @pl.when(k == nk - 1)
        def _():
            y = acc_ref[...] + b_ref[...]
            if has_resid:
                y = y + r_ref[...].astype(jnp.float32) * rs_ref[...]
            if fused:
                ch = c * cot + lax.broadcasted_iota(jnp.int32, (m, cot), 1)
                y = jnp.where(ch < cout1, jnp.maximum(y, 0.0), y)
            else:
                y = _apply_act(act, y)
            o_ref[...] = y.astype(BF16)

    in_specs = [
        pl.BlockSpec((kc, m, cin), lambda c, k: (k, 0, 0)),     # patch block
        pl.BlockSpec((kc, cin, cot), lambda c, k: (k, 0, c)),   # weight block
        pl.BlockSpec((1, cot), lambda c, k: (0, c)),            # bias
    ]
    if has_resid:
        in_specs += [pl.BlockSpec((m, cot), lambda c, k: (0, c)),
                     pl.BlockSpec((1, cot), lambda c, k: (0, c))]
    out_specs = pl.BlockSpec((m, cot), lambda c, k: (0, c))
    flops = 2 * m * cin * n * k3p
    bytes_acc = 2 * (k3p * m * cin + k3p * cin * n + m * n)
    return jax.jit(pl.pallas_call(
        kernel,
        out_shape=jax.ShapeDtypeStruct((m, n), BF16),
        grid=(nc, nk),
        in_specs=in_specs,
        out_specs=out_specs,
        scratch_shapes=[pltpu.VMEM((m, cot), jnp.float32)],
        compiler_params=pltpu.CompilerParams(
            dimension_semantics=("parallel", "arbitrary"),
            vmem_limit_bytes=VMEM_LIMIT),
        cost_estimate=pl.CostEstimate(flops=flops, transcendentals=0,
                                      bytes_accessed=bytes_acc),
    ))


@functools.lru_cache(maxsize=None)
def _heads_call(batch, feat, n_cls, n_ref, n_lat):
    """classOut (Linear+BN+LogSoftmax), refOut, latentOut in one kernel."""
    def kernel(x_ref, wc_ref, bc_ref, wr_ref, br_ref, wl_ref, bl_ref,
               cls_ref, ref_ref, lat_ref):
        x = x_ref[...]
        zc = jnp.dot(x, wc_ref[...], preferred_element_type=jnp.float32) + bc_ref[...]
        mx = jnp.max(zc, axis=-1, keepdims=True)
        lse = jnp.log(jnp.sum(jnp.exp(zc - mx), axis=-1, keepdims=True)) + mx
        cls_ref[...] = zc - lse
        ref_ref[...] = jnp.dot(x, wr_ref[...], preferred_element_type=jnp.float32) + br_ref[...]
        lat_ref[...] = jnp.dot(x, wl_ref[...], preferred_element_type=jnp.float32) + bl_ref[...]

    vmem = pl.BlockSpec(memory_space=pltpu.MemorySpace.VMEM)
    return jax.jit(pl.pallas_call(
        kernel,
        out_shape=(jax.ShapeDtypeStruct((batch, n_cls), jnp.float32),
                   jax.ShapeDtypeStruct((batch, n_ref), jnp.float32),
                   jax.ShapeDtypeStruct((batch, n_lat), jnp.float32)),
        in_specs=[vmem] * 7,
        out_specs=(vmem, vmem, vmem),
        compiler_params=pltpu.CompilerParams(vmem_limit_bytes=VMEM_LIMIT),
        cost_estimate=pl.CostEstimate(
            flops=2 * batch * feat * (n_cls + n_ref + n_lat),
            transcendentals=batch * n_cls,
            bytes_accessed=2 * feat * (batch + n_cls + n_ref + n_lat)),
    ))


# --------------------------------------------------------------------------
# Conv3d(pad=1) wrapper: padding / phase-split / patch gather is layout
# plumbing in the (jitted) JAX wrapper; all FLOPs run inside Pallas kernels.
# --------------------------------------------------------------------------
def conv_pallas(x, wk, bias, *, ksz, stride, cout1, cout2=0, act="none",
                resid=None, rscale=None):
    """conv3d(x, pad=1, stride) using the pruned, flattened weight wk
    [k3', cin, cout1+cout2].  cout2 > 0 -> fused conv1|downsample returning
    (relu(conv1), downsample); otherwise returns act(conv + resid*rscale)."""
    bsz, d, hh, ww, cin = x.shape
    n = cout1 + cout2
    fused = cout2 > 0
    has_resid = resid is not None
    od, oh, ow = d // stride, hh // stride, ww // stride
    triples = _contrib_triples(ksz, stride, (od, oh, ow))
    k3p = len(triples)
    assert wk.shape == (k3p, cin, n)

    xp = jnp.pad(x, ((0, 0), (1, 1), (1, 1), (1, 1), (0, 0)))
    if stride == 2:
        # even/odd phase split -> only unit-stride slices inside the kernels
        xph = xp.reshape(bsz, od + 1, 2, oh + 1, 2, ow + 1, 2, cin)
        xph = jnp.transpose(xph, (2, 4, 6, 0, 1, 3, 5, 7)).reshape(
            8, bsz, od + 1, oh + 1, ow + 1, cin)
        halo = 1
    else:
        xph = xp[None]
        halo = 2
    offs = tuple((_phase(kd, kh, kw) if stride == 2 else 0,
                  kd // stride, kh // stride, kw // stride)
                 for (kd, kh, kw) in triples)

    b2 = jnp.asarray(bias, jnp.float32).reshape(1, n)
    rs2 = None if rscale is None else jnp.asarray(rscale, jnp.float32).reshape(1, n)
    m_total = bsz * od * oh * ow
    wbytes = k3p * cin * n * 2

    # ---- flavor A: tiny K -> wrapper im2col + gridded (parallel) matmul ----
    if cin * k3p <= 512 and not has_resid:
        patches = jnp.concatenate(
            [_slab(xph, o, od, oh, ow).reshape(m_total, cin) for o in offs], axis=1)
        tm = _pick_tm(m_total)
        call = _patch_matmul_call(m_total, tm, k3p * cin, cout1, cout2, act)
        outs = call(patches, wk.reshape(k3p * cin, n), b2)
        if fused:
            return (outs[0].reshape(bsz, od, oh, ow, cout1),
                    outs[1].reshape(bsz, od, oh, ow, cout2))
        return outs.reshape(bsz, od, oh, ow, n)

    # ---- flavor C: huge weight -> stream weight tiles over a grid ----------
    if wbytes > FLAVOR_B_MAX_WBYTES:
        patches = jnp.stack(
            [_slab(xph, o, od, oh, ow).reshape(m_total, cin) for o in offs], axis=0)
        cot = 512 if (n % 512 == 0 and n > 512) else n
        kc = _pick_kc(k3p, cin, cot, m_total)
        call = _ktiled_conv_call(k3p, kc, m_total, cin, n, cot, cout1, act, has_resid)
        args = (patches, wk, b2)
        if has_resid:
            args += (resid.reshape(m_total, n), rs2)
        y = call(*args)
        if fused:
            y = y.reshape(bsz, od, oh, ow, n)
            return y[..., :cout1], y[..., cout1:]
        return y.reshape(bsz, od, oh, ow, n)

    # ---- flavor B: whole weight resident in VMEM; chunk depth if needed ----
    td = _pick_td(od, xph.shape, oh, ow, k3p, n, halo, has_resid)
    h_chunks, r_chunks, y_chunks = [], [], []
    for d0 in range(0, od, td):
        xc = xph[:, :, d0:d0 + td + halo]
        m = bsz * td * oh * ow
        call = _direct_conv_call(tuple(xc.shape), td, oh, ow, offs,
                                 cout1, cout2, act, has_resid)
        args = (xc, wk, b2)
        if has_resid:
            args += (resid[:, d0:d0 + td].reshape(m, n), rs2)
        out = call(*args)
        if fused:
            h_chunks.append(out[0].reshape(bsz, td, oh, ow, cout1))
            r_chunks.append(out[1].reshape(bsz, td, oh, ow, cout2))
        else:
            y_chunks.append(out.reshape(bsz, td, oh, ow, n))
    if fused:
        h = h_chunks[0] if len(h_chunks) == 1 else jnp.concatenate(h_chunks, axis=1)
        r = r_chunks[0] if len(r_chunks) == 1 else jnp.concatenate(r_chunks, axis=1)
        return h, r
    return y_chunks[0] if len(y_chunks) == 1 else jnp.concatenate(y_chunks, axis=1)


# --------------------------------------------------------------------------
# parameters (PyTorch-default init; BN folded in eval mode; bf16 weights;
# pruned+fused weights prepared once here so the forward streams them as-is)
# --------------------------------------------------------------------------
def init_params(key, nch, n_latent, n_classes, n_ref, insize):
    sbn = float(1.0 / np.sqrt(1.0 + BN_EPS))   # fresh BN (eval): gamma/sqrt(var+eps)

    def conv_w(k, ksz, cin, cout):
        kw, kb = jax.random.split(k)
        bound = 1.0 / np.sqrt(cin * ksz ** 3)
        w = jax.random.uniform(kw, (ksz, ksz, ksz, cin, cout), jnp.float32, -bound, bound)
        bb = jax.random.uniform(kb, (cout,), jnp.float32, -bound, bound)
        return w, bb

    def lin_w(k, fin, fout):
        kw, kb = jax.random.split(k)
        bound = 1.0 / np.sqrt(fin)
        w = jax.random.uniform(kw, (fin, fout), jnp.float32, -bound, bound)
        bb = jax.random.uniform(kb, (fout,), jnp.float32, -bound, bound)
        return w, bb

    stages = []
    cin = nch
    d, hh, ww = insize
    for cout in CHANNELS:
        od, oh, ow = d // 2, hh // 2, ww // 2
        key, k1, k2, k3 = jax.random.split(key, 4)
        w1, b1 = conv_w(k1, 4, cin, cout)    # ResidualBlock.conv1
        w2, b2 = conv_w(k2, 3, cout, cout)   # ResidualBlock.conv2
        wd, bd = conv_w(k3, 4, cin, cout)    # ResidualBlock.downsample

        w1b = (w1 * sbn).astype(BF16)                 # conv1 + bn1 fold
        w2b = (w2 * sbn * sbn).astype(BF16)           # conv2 + bn2 + stage-BN fold
        wdb = wd.astype(BF16)                         # downsample (stage BN via rs)
        b1f = b1 * sbn
        b2f = b2 * sbn * sbn

        tri1 = _contrib_triples(4, 2, (od, oh, ow))   # fused conv1|downsample
        tri2 = _contrib_triples(3, 1, (od, oh, ow))   # conv2
        wf = jnp.concatenate([_flatten_sel(w1b, tri1), _flatten_sel(wdb, tri1)],
                             axis=-1)                 # [k3', cin, 2*cout]
        bf = jnp.concatenate([b1f, bd], axis=0)
        w2k = _flatten_sel(w2b, tri2)                 # [k3'', cout, cout]

        stages.append(dict(
            wf=wf, bf=bf, w2k=w2k, b2=b2f,
            rs=jnp.full((cout,), sbn, jnp.float32),   # stage-BN scale on residual
            # full 5-D weights kept only for the pure-JAX reference
            w1_full=w1b, b1=b1f, wd_full=wdb, bd=bd, w2_full=w2b,
        ))
        cin = cout
        d, hh, ww = od, oh, ow

    feat = CHANNELS[-1] * FCSIZE
    key, kc, kr, kl = jax.random.split(key, 4)
    wc, bc = lin_w(kc, feat, n_classes)
    wr, br = lin_w(kr, feat, n_ref)
    wl, bl = lin_w(kl, feat, n_latent)
    heads = dict(wc=(wc * sbn).astype(BF16), bc=bc * sbn,   # Linear + BN1d(eval)
                 wr=(wr * sbn).astype(BF16), br=br * sbn,
                 wl=(wl * sbn).astype(BF16), bl=bl * sbn)
    return dict(stages=stages, heads=heads)


# --------------------------------------------------------------------------
# forward pass (Pallas) and pure-JAX reference
# --------------------------------------------------------------------------
def enc_forward(x_ncdhw, params):
    """x: [B, nch, D, H, W] f32 (PyTorch layout). Returns (classes, ref, latent).
    Note: the flatten before the heads is channels-last (equivalent to the
    PyTorch channels-first view up to a permutation of the random head weights)."""
    x = jnp.transpose(x_ncdhw, (0, 2, 3, 4, 1)).astype(BF16)   # NDHWC, bf16
    n_stages = len(params["stages"])
    for i, sp in enumerate(params["stages"]):
        act = "prelu" if i == n_stages - 1 else "relu"
        cout = sp["rs"].shape[0]
        # fused conv1 + downsample (k=4, stride=2): h gets ReLU, r stays raw
        h, r = conv_pallas(x, sp["wf"], sp["bf"], ksz=4, stride=2,
                           cout1=cout, cout2=cout)
        # conv2 (k=3, stride=1) + residual*stageBN + activation
        x = conv_pallas(h, sp["w2k"], sp["b2"], ksz=3, stride=1,
                        cout1=cout, act=act, resid=r, rscale=sp["rs"])
    bsz = x.shape[0]
    feats = x.reshape(bsz, -1)                    # [B, 1024*fcsize]
    hp = params["heads"]
    call = _heads_call(bsz, feats.shape[1], hp["wc"].shape[1],
                       hp["wr"].shape[1], hp["wl"].shape[1])
    return call(feats, hp["wc"], hp["bc"].reshape(1, -1),
                hp["wr"], hp["br"].reshape(1, -1),
                hp["wl"], hp["bl"].reshape(1, -1))


def _conv_ref(x, w, b, stride):
    y = lax.conv_general_dilated(
        x, w, window_strides=(stride,) * 3, padding=[(1, 1)] * 3,
        dimension_numbers=("NDHWC", "DHWIO", "NDHWC"),
        preferred_element_type=jnp.float32)
    return y + b.reshape(1, 1, 1, 1, -1)


def enc_reference(x_ncdhw, params):
    """Pure-JAX (XLA conv) reference with the same bf16/f32 numerics."""
    x = jnp.transpose(x_ncdhw, (0, 2, 3, 4, 1)).astype(BF16)
    n_stages = len(params["stages"])
    for i, sp in enumerate(params["stages"]):
        h = jnp.maximum(_conv_ref(x, sp["w1_full"], sp["b1"], 2), 0.0).astype(BF16)
        r = _conv_ref(x, sp["wd_full"], sp["bd"], 2).astype(BF16)
        z = _conv_ref(h, sp["w2_full"], sp["b2"], 1) + \
            r.astype(jnp.float32) * sp["rs"].reshape(1, 1, 1, 1, -1)
        if i == n_stages - 1:
            z = jnp.where(z > 0, z, PRELU_ALPHA * z)
        else:
            z = jnp.maximum(z, 0.0)
        x = z.astype(BF16)
    feats = x.reshape(x.shape[0], -1)
    hp = params["heads"]
    zc = jnp.dot(feats, hp["wc"], preferred_element_type=jnp.float32) + hp["bc"]
    zc = jax.nn.log_softmax(zc, axis=-1)
    zr = jnp.dot(feats, hp["wr"], preferred_element_type=jnp.float32) + hp["br"]
    zl = jnp.dot(feats, hp["wl"], preferred_element_type=jnp.float32) + hp["bl"]
    return zc, zr, zl


# --------------------------------------------------------------------------
if __name__ == "__main__":
    # Smallest shapes consistent with the module: six stride-2 blocks must
    # leave 2x1x1 spatial so that x.view(B, 1024*fcsize) holds -> 128x64x64.
    batch, nch = 2, 1
    insize = (128, 64, 64)
    n_latent, n_classes, n_ref = 16, 8, 2

    key = jax.random.PRNGKey(0)
    kx, kp = jax.random.split(key)
    x = jax.random.normal(kx, (batch, nch) + insize, jnp.float32)
    params = init_params(kp, nch, n_latent, n_classes, n_ref, insize)

    fwd = jax.jit(enc_forward)
    outs = jax.block_until_ready(fwd(x, params))
    refs = jax.block_until_ready(enc_reference(x, params))

    assert outs[0].shape == (batch, n_classes)
    assert outs[1].shape == (batch, n_ref)
    assert outs[2].shape == (batch, n_latent)
    for o, r in zip(outs, refs):
        assert jnp.allclose(o, r, rtol=1e-2, atol=1e-2), \
            float(jnp.max(jnp.abs(o - r)))
    assert bool(jnp.all(jnp.isfinite(outs[0])))

    print("KERNEL_OK")
</pallas_src>

<mosaic_0001>
module attributes {stable_mosaic.version = 11 : i64} {
  func.func @kernel(%arg0: i32, %arg1: memref<4096x64xbf16, #tpu.memory_space<vmem>>, %arg2: memref<64x128xbf16, #tpu.memory_space<vmem>>, %arg3: memref<1x128xf32, #tpu.memory_space<vmem>>, %arg4: memref<4096x64xbf16, #tpu.memory_space<vmem>>, %arg5: memref<4096x64xbf16, #tpu.memory_space<vmem>>) attributes {dimension_semantics = [#tpu.dimension_semantics<parallel>], iteration_bounds = array<i64: 32>, scalar_prefetch = 0 : i64, scratch_operands = 0 : i64, tpu.core_type = #tpu.core_type<tc>, window_params = [{transform_indices = @transform_0, window_bounds = array<i64: 4096, 64>}, {pipeline_mode = #tpu.pipeline_mode<synchronous>, transform_indices = @transform_1, window_bounds = array<i64: 64, 128>}, {pipeline_mode = #tpu.pipeline_mode<synchronous>, transform_indices = @transform_2, window_bounds = array<i64: 1, 128>}, {transform_indices = @transform_3, window_bounds = array<i64: 4096, 64>}, {transform_indices = @transform_4, window_bounds = array<i64: 4096, 64>}]} {
    %c0 = arith.constant 0 : index
    %c0_0 = arith.constant 0 : index
    %0 = vector.load %arg1[%c0, %c0_0] : memref<4096x64xbf16, #tpu.memory_space<vmem>>, vector<4096x64xbf16>
    %c0_1 = arith.constant 0 : index
    %c0_2 = arith.constant 0 : index
    %1 = vector.load %arg2[%c0_1, %c0_2] : memref<64x128xbf16, #tpu.memory_space<vmem>>, vector<64x128xbf16>
    %cst = arith.constant dense<0.000000e+00> : vector<4096x128xf32>
    %2 = tpu.matmul %0, %1, %cst {dimension_numbers = #tpu.dot_dimension_numbers<[1], [0], [0], [1], [0, 0, 1, 1], [], []>} : vector<4096x64xbf16>, vector<64x128xbf16>, vector<4096x128xf32> -> vector<4096x128xf32>
    %c0_3 = arith.constant 0 : index
    %c0_4 = arith.constant 0 : index
    %3 = vector.load %arg3[%c0_3, %c0_4] : memref<1x128xf32, #tpu.memory_space<vmem>>, vector<1x128xf32>
    %4 = vector.broadcast %3 : vector<1x128xf32> to vector<4096x128xf32>
    %5 = arith.addf %2, %4 : vector<4096x128xf32>
    %6 = vector.extract_strided_slice %5 {offsets = [0, 0], sizes = [4096, 64], strides = [1, 1]} : vector<4096x128xf32> to vector<4096x64xf32>
    %cst_5 = arith.constant 0.000000e+00 : f32
    %7 = vector.broadcast %cst_5 : f32 to vector<4096x64xf32>
    %8 = arith.maximumf %6, %7 : vector<4096x64xf32>
    %9 = arith.truncf %8 : vector<4096x64xf32> to vector<4096x64xbf16>
    %c0_6 = arith.constant 0 : index
    %c0_7 = arith.constant 0 : index
    %10 = vector.load %arg4[%c0_6, %c0_7] : memref<4096x64xbf16, #tpu.memory_space<vmem>>, vector<4096x64xbf16>
    tpu.vector_store %arg4[%c0_6, %c0_7], %9 {strides = array<i32>} : memref<4096x64xbf16, #tpu.memory_space<vmem>>, vector<4096x64xbf16>,
    %11 = vector.extract_strided_slice %5 {offsets = [0, 64], sizes = [4096, 64], strides = [1, 1]} : vector<4096x128xf32> to vector<4096x64xf32>
    %12 = arith.truncf %11 : vector<4096x64xf32> to vector<4096x64xbf16>
    %c0_8 = arith.constant 0 : index
    %c0_9 = arith.constant 0 : index
    %13 = vector.load %arg5[%c0_8, %c0_9] : memref<4096x64xbf16, #tpu.memory_space<vmem>>, vector<4096x64xbf16>
    tpu.vector_store %arg5[%c0_8, %c0_9], %12 {strides = array<i32>} : memref<4096x64xbf16, #tpu.memory_space<vmem>>, vector<4096x64xbf16>,
    return
  }
  func.func @transform_0(%arg0: i32) -> (i32, i32) {
    %c0_i32 = arith.constant 0 : i32
    %c0_i32_0 = arith.constant 0 : i32
    return %arg0, %c0_i32 : i32, i32
  }
  func.func @transform_1(%arg0: i32) -> (i32, i32) {
    %c0_i32 = arith.constant 0 : i32
    %c0_i32_0 = arith.constant 0 : i32
    %c0_i32_1 = arith.constant 0 : i32
    return %c0_i32, %c0_i32_0 : i32, i32
  }
  func.func @transform_2(%arg0: i32) -> (i32, i32) {
    %c0_i32 = arith.constant 0 : i32
    %c0_i32_0 = arith.constant 0 : i32
    %c0_i32_1 = arith.constant 0 : i32
    return %c0_i32, %c0_i32_0 : i32, i32
  }
  func.func @transform_3(%arg0: i32) -> (i32, i32) {
    %c0_i32 = arith.constant 0 : i32
    %c0_i32_0 = arith.constant 0 : i32
    return %arg0, %c0_i32 : i32, i32
  }
  func.func @transform_4(%arg0: i32) -> (i32, i32) {
    %c0_i32 = arith.constant 0 : i32
    %c0_i32_0 = arith.constant 0 : i32
    return %arg0, %c0_i32 : i32, i32
  }
}

</mosaic_0001>

<bundles_post_ra>
// kernel: tpu_custom_call.1
= control target key start
LH: loop header
LB: loop body
LE: loop exit
PB: predicated region body
PF: predicated region fallthrough
CT: control target
= control target key end

     0   :  { %10 = vsyncpa [#allocation3], 0  ;;  %s16784_s0 = inlined_call_operand.vmem [shape: bf16[131072,64], index: 0, kind: input, shape index: {}]   ;;  %s16785_s1 = inlined_call_operand.vmem [shape: bf16[64,128], index: 1, kind: input, shape index: {}]   ;;  %s16786_s2 = inlined_call_operand.vmem [shape: f32[1,128], index: 2, kind: input, shape index: {}]   ;;  %s16787_s3 = inlined_call_operand.hbm [shape: bf16[131072,64], index: 3, kind: output, shape index: {0}]   ;;  %s16788_s4 = inlined_call_operand.vmem [shape: bf16[131072,64], index: 4, kind: output, shape index: {1}]  }
   0x1   :  { %12 = vsyncpa [#allocation3 + $0x1], 0  ;;  %s10546_s15 = smov 0   ;;  %s10548_s16 = smov 0  }
   0x2   :  { %s10550_s17 = smov 0   ;;  %s10552_s18 = smov 0  }
   0x3 LB: > { %s10567_s19 = sadd.s32 4294967295, %s10517_s18   ;;  %s8821_s20 = sadd.s32 4294967294, %s10517_s18   ;;  %s10517_s18 = sphi %s10552_s18, %s16836_s18   ;;  %s10513_s17 = sphi %s10550_s17, %s16835_s17   ;;  %s10509_s16 = sphi %s10548_s16, %s16834_s16   ;;  %s10505_s15 = sphi %s10546_s15, %s16833_s15  }
   0x4   : > { %s10571_s21 = sadd.s32 1, %s10517_s18   ;;  %s93_s22 = sadd.s32 1, %s10513_s17 }
   0x5   : > { %s90_s23 = ssub.s32 %s10517_s18, %s10571_s21  ;;  %p103_p0 = scmp.ne.s32.totalorder %s10513_s17, %s10509_s16 }
   0x6   : > { %p91_p1 = scmp.eq.s32.totalorder %s90_s23, 0  ;;  %p104_p2 = scmp.eq.s32.totalorder %s10567_s19, 31 }
   0x7   : > { %p109_p3 = scmp.ne.s32.totalorder %s10509_s16, %s10505_s15  ;;  %p110_p4 = scmp.eq.s32.totalorder %s8821_s20, 31 }
   0x8   : > { %s10582_s24 = scalar_select %p91_p1, %s10513_s17, %s93_s22  }
   0x9   : > { %p10584_p5 = por %p104_p2, %p103_p0  ;;  %p10588_p6 = por %p110_p4, %p109_p3 }
   0xa   : > { %p8824_p7 = scmp.ge.s32.totalorder %s10517_s18, 1  ;;  %p169_p8 = scmp.lt.s32.totalorder %s10517_s18, 33 }
   0xc   : > { %p170_p9 = pnand %p8824_p7, %p169_p8 }
   0xe   : > { %173 = sbr.rel (%p170_p9) target bundleno = 1649 (0x671), region = 32 }
  0x13   : > { %v10390_v0 = vld [vmem:[%s16785_s1 + $0x18] sm:$0xff]  ;;  %s8826_s29 = sshll.u32 %s10567_s19, 9  ;;  %v10389_v1 = vld [vmem:[%s16785_s1 + $0x10] sm:$0xff]  ;;  %v10388_v2 = vld [vmem:[%s16785_s1 + $0x8] sm:$0xff]  ;;  %vm2042_vm0 = vcmask 523264   ;;  %s190_s22 = sand.u32 1, %s10509_s16  }
  0x14   : > { %p201_p10 = scmp.lt.s32.totalorder %s8826_s29, 16383  ;;  %2815 = vmatpush.bf16.msra.mxu0 %v10390_v0  ;;  %10393 = vmatpush.bf16.msra.mxu2 %v10390_v0  ;;  %v10387_v3 = vld [vmem:[%s16785_s1] sm:$0xff]  ;;  %s8825_s23 = sshll.u32 %s190_s22, 11  ;;  %vm5124_vm1 = vcmask 519168  }
  0x15   : > { %10394 = vmatpush.bf16.msra.mxu3 %v10390_v0  ;;  %10392 = vmatpush.bf16.msra.mxu1 %v10390_v0  ;;  %v10684_v36 = vld [vmem:[%s16786_s2] ss:$0 sm:$0xff]  ;;  %s10519_s27 = smov 64   ;;  %s10693_s28 = scalar_lea.vmem [#allocation2], %s8825_s23 }
  0x16   : > { %s16838_s29 = smov (!%p201_p10, %s8826_s29), 16383  ;;  %s10391_s11 = sshll.u32 %s10567_s19, 11 }
  0x17   : > { %s8827_s8 = sshll.u32 %s16838_s29, 2  ;;  %s8726_s20 = scalar_lea.hbm %s16787_s3, %s10391_s11 }
  0x18   : > { %2816 = vmatpush.bf16.msra.mxu0 %v10389_v1  ;;  %10396 = vmatpush.bf16.msra.mxu2 %v10389_v1  ;;  %s10615_s13 = scalar_lea.vmem %s16784_s0, %s8827_s8  ;;  %s11027_s6 = scalar_lea.vmem %s16788_s4, %s8827_s8 }
  0x19   : > { %10397 = vmatpush.bf16.msra.mxu3 %v10389_v1  ;;  %10395 = vmatpush.bf16.msra.mxu1 %v10389_v1  ;;  %v10131_v4 = vld [vmem:[%s10615_s13] sm:$0xff]  ;;  %v10132_v8 = vld [vmem:[%s10615_s13 + $0x8] sm:$0xff]  ;;  %v10133_v12 = vld [vmem:[%s10615_s13 + $0x10] sm:$0xff]  ;;  %s8727_s23 = sshll.u32 %s10693_s28, 4  ;;  %s8729_s30 = sshll.u32 %s8726_s20, 4  ;;  %s8728_s23 = int_to_ptr.vmem [resolvable:$true] %s8727_s23  ;;  %s8730_s30 = int_to_ptr.hbm [resolvable:$true] %s8729_s30 }
  0x1a   : > { %v10259_v5 = vld [vmem:[%s10615_s13 + $0x400] sm:$0xff]  ;;  %v10260_v9 = vld [vmem:[%s10615_s13 + $0x408] sm:$0xff]  ;;  %v10261_v13 = vld [vmem:[%s10615_s13 + $0x410] sm:$0xff]  ;;  %s8710_s19 = scalar_lea.sflag [#allocation3], %s190_s22  ;;  %s10469_s5 = sshra.s32 %s8730_s30, 4  ;;  %s10470_s5 = int_to_ptr.hbm [resolvable:$true] %s10469_s5 }
  0x1b   : > { %v10323_v6 = vld [vmem:[%s10615_s13 + $0x600] sm:$0xff]  ;;  %v10324_v10 = vld [vmem:[%s10615_s13 + $0x608] sm:$0xff]  ;;  %v10325_v14 = vld [vmem:[%s10615_s13 + $0x610] sm:$0xff]  ;;  %s10475_s8 = scalar_lea.hbm %s16787_s3, 65536  ;;  %p10476_p0 = scmp.lt.s32.totalorder %s10470_s5, %s16787_s3 }
  0x1c   : > { %2817 = vmatpush.bf16.msra.mxu0 %v10388_v2  ;;  %10399 = vmatpush.bf16.msra.mxu2 %v10388_v2  ;;  %v10195_v7 = vld [vmem:[%s10615_s13 + $0x200] sm:$0xff]  ;;  %v10196_v11 = vld [vmem:[%s10615_s13 + $0x208] sm:$0xff]  ;;  %v10197_v15 = vld [vmem:[%s10615_s13 + $0x210] sm:$0xff] }
  0x1d   : > { %10400 = vmatpush.bf16.msra.mxu3 %v10388_v2  ;;  %10398 = vmatpush.bf16.msra.mxu1 %v10388_v2  ;;  %v10262_v16 = vld [vmem:[%s10615_s13 + $0x418] sm:$0xff]  ;;  %v10263_v20 = vld [vmem:[%s10615_s13 + $0x420] sm:$0xff]  ;;  %v10136_v24 = vld [vmem:[%s10615_s13 + $0x28] sm:$0xff] }
  0x1e   : > { %v10134_v17 = vld [vmem:[%s10615_s13 + $0x18] sm:$0xff]  ;;  %v10135_v21 = vld [vmem:[%s10615_s13 + $0x20] sm:$0xff]  ;;  %v10264_v25 = vld [vmem:[%s10615_s13 + $0x428] sm:$0xff] }
  0x1f   : > { %v10326_v18 = vld [vmem:[%s10615_s13 + $0x618] sm:$0xff]  ;;  %v10199_v22 = vld [vmem:[%s10615_s13 + $0x220] sm:$0xff]  ;;  %v10328_v26 = vld [vmem:[%s10615_s13 + $0x628] sm:$0xff] }
  0x20   : > { %2818 = vmatpush.bf16.msra.mxu0 %v10387_v3  ;;  %10402 = vmatpush.bf16.msra.mxu2 %v10387_v3  ;;  %v10198_v19 = vld [vmem:[%s10615_s13 + $0x218] sm:$0xff]  ;;  %v10327_v23 = vld [vmem:[%s10615_s13 + $0x620] sm:$0xff]  ;;  %v10200_v27 = vld [vmem:[%s10615_s13 + $0x228] sm:$0xff] }
  0x21   : > { %10403 = vmatpush.bf16.msra.mxu3 %v10387_v3  ;;  %10401 = vmatpush.bf16.msra.mxu1 %v10387_v3  ;;  %v10265_v28 = vld [vmem:[%s10615_s13 + $0x430] sm:$0xff]  ;;  %v10266_v32 = vld [vmem:[%s10615_s13 + $0x438] sm:$0xff]  ;;  %v10139_v50 = vld [vmem:[%s10615_s13 + $0x40] sm:$0xff] }
  0x22   : > { %v10137_v29 = vld [vmem:[%s10615_s13 + $0x30] sm:$0xff]  ;;  %v10138_v33 = vld [vmem:[%s10615_s13 + $0x38] sm:$0xff]  ;;  %v10267_v51 = vld [vmem:[%s10615_s13 + $0x440] sm:$0xff] }
  0x23   : > { %9870 = vmatmul.msk.bf16.vlgmr.msra.gmra.mxu0 %vm2042_vm0, %v10131_v4  ;;  %9998 = vmatmul.msk.bf16.vlgmr.msra.gmra.mxu2 %vm2042_vm0, %v10259_v5  ;;  %v10329_v30 = vld [vmem:[%s10615_s13 + $0x630] sm:$0xff]  ;;  %v10202_v34 = vld [vmem:[%s10615_s13 + $0x238] sm:$0xff]  ;;  %v10331_v54 = vld [vmem:[%s10615_s13 + $0x640] sm:$0xff] }
  0x24   : > { %10062 = vmatmul.msk.bf16.vlgmr.msra.gmra.mxu3 %vm2042_vm0, %v10323_v6  ;;  %9934 = vmatmul.msk.bf16.vlgmr.msra.gmra.mxu1 %vm2042_vm0, %v10195_v7  ;;  %v10201_v31 = vld [vmem:[%s10615_s13 + $0x230] sm:$0xff]  ;;  %v10330_v35 = vld [vmem:[%s10615_s13 + $0x638] sm:$0xff]  ;;  %v10203_v5 = vld [vmem:[%s10615_s13 + $0x240] sm:$0xff] }
  0x33   : > { %9871 = vmatmul.msk.bf16.gmra.mxu0 %vm2042_vm0, %v10132_v8  ;;  %9999 = vmatmul.msk.bf16.gmra.mxu2 %vm2042_vm0, %v10260_v9 }
  0x34   : > { %10063 = vmatmul.msk.bf16.gmra.mxu3 %vm2042_vm0, %v10324_v10  ;;  %9935 = vmatmul.msk.bf16.gmra.mxu1 %vm2042_vm0, %v10196_v11 }
  0x43   : > { %9872 = vmatmul.msk.bf16.gmra.mxu0 %vm2042_vm0, %v10133_v12  ;;  %10000 = vmatmul.msk.bf16.gmra.mxu2 %vm2042_vm0, %v10261_v13 }
  0x44   : > { %10064 = vmatmul.msk.bf16.gmra.mxu3 %vm2042_vm0, %v10325_v14  ;;  %9936 = vmatmul.msk.bf16.gmra.mxu1 %vm2042_vm0, %v10197_v15 }
  0x53   : > { %10001 = vmatmul.msk.bf16.gmra.mxu2 %vm2042_vm0, %v10262_v16  ;;  %9873 = vmatmul.msk.bf16.gmra.mxu0 %vm2042_vm0, %v10134_v17 }
  0x54   : > { %10065 = vmatmul.msk.bf16.gmra.mxu3 %vm2042_vm0, %v10326_v18  ;;  %9937 = vmatmul.msk.bf16.gmra.mxu1 %vm2042_vm0, %v10198_v19 }
  0x63   : > { %10002 = vmatmul.msk.bf16.gmra.mxu2 %vm2042_vm0, %v10263_v20  ;;  %9874 = vmatmul.msk.bf16.gmra.mxu0 %vm2042_vm0, %v10135_v21 }
  0x64   : > { %9938 = vmatmul.msk.bf16.gmra.mxu1 %vm2042_vm0, %v10199_v22  ;;  %10066 = vmatmul.msk.bf16.gmra.mxu3 %vm2042_vm0, %v10327_v23 }
  0x73   : > { %9875 = vmatmul.msk.bf16.gmra.mxu0 %vm2042_vm0, %v10136_v24  ;;  %10003 = vmatmul.msk.bf16.gmra.mxu2 %vm2042_vm0, %v10264_v25  ;;  %v10268_v25 = vld [vmem:[%s10615_s13 + $0x448] sm:$0xff] }
  0x74   : > { %10067 = vmatmul.msk.bf16.gmra.mxu3 %vm2042_vm0, %v10328_v26  ;;  %9939 = vmatmul.msk.bf16.gmra.mxu1 %vm2042_vm0, %v10200_v27 }
  0x83   : > { %10004 = vmatmul.msk.bf16.gmra.mxu2 %vm2042_vm0, %v10265_v28  ;;  %9876 = vmatmul.msk.bf16.gmra.mxu0 %vm2042_vm0, %v10137_v29 }
  0x84   : > { %10068 = vmatmul.msk.bf16.gmra.mxu3 %vm2042_vm0, %v10329_v30  ;;  %9940 = vmatmul.msk.bf16.gmra.mxu1 %vm2042_vm0, %v10201_v31 }
  0x93   : > { %10005 = vmatmul.msk.bf16.gmra.mxu2 %vm2042_vm0, %v10266_v32  ;;  %9877 = vmatmul.msk.bf16.gmra.mxu0 %vm2042_vm0, %v10138_v33 }
  0x94   : > { %9941 = vmatmul.msk.bf16.gmra.mxu1 %vm2042_vm0, %v10202_v34  ;;  %10069 = vmatmul.msk.bf16.gmra.mxu3 %vm2042_vm0, %v10330_v35 }
  0xa0   : > { %v2820_v37 = vpop.f32.mrf.mxu0 }
  0xa1   : > { %v2821_v38 = vadd.f32 %v10684_v36, %v2820_v37  ;;  %v3140_v39 = vpop.f32.mrf.mxu1 }
  0xa2   : > { %v3141_v40 = vadd.f32 %v10684_v36, %v3140_v39 }
  0xa3   : > { %v4100_v41 = vmax.f32 %v2821_v38, 0.0  ;;  %v5637_v42 = vpack.c.bf16 %v2821_v38, %v2821_v38  ;;  %10006 = vmatmul.msk.bf16.gmra.mxu2 %vm2042_vm0, %v10267_v51  ;;  %9878 = vmatmul.msk.bf16.gmra.mxu0 %vm2042_vm0, %v10139_v50 }
  0xa4   : > { %v4228_v43 = vmax.f32 %v3141_v40, 0.0  ;;  %v5765_v44 = vpack.c.bf16 %v3141_v40, %v3141_v40  ;;  %10070 = vmatmul.msk.bf16.gmra.mxu3 %vm2042_vm0, %v10331_v54  ;;  %9942 = vmatmul.msk.bf16.gmra.mxu1 %vm2042_vm0, %v10203_v5 }
  0xa5   : > { %v4612_v45 = vpack.c.bf16 %v4100_v41, %v4100_v41  ;;  %6661 = vrot.lane.b32.xlu0 %v5637_v42, %s10519_s27 }
  0xa6   : > { %v4740_v46 = vpack.c.bf16 %v4228_v43, %v4228_v43  ;;  %v3460_v47 = vpop.f32.mrf.mxu2  ;;  %6917 = vrot.lane.b32.xlu2 %v5765_v44, %s10519_s27  ;;  %v10140_v44 = vld [vmem:[%s10615_s13 + $0x48] sm:$0xff] }
  0xa7   : > { %5125 = vst.msk [vmem:[%s10693_s28] sm:$0xf] %vm5124_vm1, %v4612_v45  ;;  %v3461_v48 = vadd.f32 %v10684_v36, %v3460_v47  ;;  %v3780_v49 = vpop.f32.mrf.mxu3  ;;  %v10332_v45 = vld [vmem:[%s10615_s13 + $0x648] sm:$0xff] }
  0xa8   : > { %5253 = vst.msk [vmem:[%s10693_s28 + $0x200] sm:$0xf] %vm5124_vm1, %v4740_v46  ;;  %v3781_v52 = vadd.f32 %v10684_v36, %v3780_v49  ;;  %v2822_v53 = vpop.f32.mrf.mxu0 }
  0xa9   : > { %v4356_v55 = vmax.f32 %v3461_v48, 0.0  ;;  %v2823_v56 = vadd.f32 %v10684_v36, %v2822_v53  ;;  %v5893_v57 = vpack.c.bf16 %v3461_v48, %v3461_v48  ;;  %v3142_v58 = vpop.f32.mrf.mxu1 }
  0xaa   : > { %v4484_v59 = vmax.f32 %v3781_v52, 0.0  ;;  %v10707_v60 = vadd.f32 %v10684_v36, %v3142_v58  ;;  %v6021_v62 = vpack.c.bf16 %v3781_v52, %v3781_v52 }
  0xab   : > { %v4868_v61 = vpack.c.bf16 %v4356_v55, %v4356_v55  ;;  %v4101_v63 = vmax.f32 %v2823_v56, 0.0  ;;  %7173 = vrot.lane.b32.xlu1 %v5893_v57, %s10519_s27  ;;  %v5638_v17 = vpack.c.bf16 %v2823_v56, %v2823_v56 }
  0xac   : > { %v4996_v0 = vpack.c.bf16 %v4484_v59, %v4484_v59  ;;  %v4229_v1 = vmax.f32 %v10707_v60, 0.0  ;;  %v5766_v38 = vpack.c.bf16 %v10707_v60, %v10707_v60 }
  0xad   : > { %5381 = vst.msk [vmem:[%s10693_s28 + $0x400] sm:$0xf] %vm5124_vm1, %v4868_v61  ;;  %v4613_v2 = vpack.c.bf16 %v4101_v63, %v4101_v63  ;;  %7429 = vrot.lane.b32.xlu0 %v6021_v62, %s10519_s27 }
  0xae   : > { %5509 = vst.msk [vmem:[%s10693_s28 + $0x600] sm:$0xf] %vm5124_vm1, %v4996_v0  ;;  %v4741_v3 = vpack.c.bf16 %v4229_v1, %v4229_v1  ;;  %v3462_v4 = vpop.f32.mrf.mxu2  ;;  %v10204_v1 = vld [vmem:[%s10615_s13 + $0x248] sm:$0xff] }
  0xaf   : > { %5126 = vst.msk [vmem:[%s10693_s28 + $0x4] sm:$0xf] %vm5124_vm1, %v4613_v2  ;;  %v3463_v6 = vadd.f32 %v10684_v36, %v3462_v4  ;;  %v3782_v7 = vpop.f32.mrf.mxu3 }
  0xb0   : > { %5254 = vst.msk [vmem:[%s10693_s28 + $0x204] sm:$0xf] %vm5124_vm1, %v4741_v3  ;;  %v3783_v8 = vadd.f32 %v10684_v36, %v3782_v7  ;;  %v2825_v9 = vpop.f32.mrf.mxu0 }
  0xb1   : > { %v4357_v10 = vmax.f32 %v3463_v6, 0.0  ;;  %v5894_v11 = vpack.c.bf16 %v3463_v6, %v3463_v6  ;;  %v2826_v12 = vadd.f32 %v10684_v36, %v2825_v9  ;;  %v3145_v13 = vpop.f32.mrf.mxu1 }
  0xb2   : > { %v4485_v14 = vmax.f32 %v3783_v8, 0.0  ;;  %v6022_v15 = vpack.c.bf16 %v3783_v8, %v3783_v8  ;;  %v10728_v16 = vadd.f32 %v10684_v36, %v3145_v13 }
  0xb3   : > { %v4869_v18 = vpack.c.bf16 %v4357_v10, %v4357_v10  ;;  %v4102_v19 = vmax.f32 %v2826_v12, 0.0  ;;  %7175 = vrot.lane.b32.xlu2 %v5894_v11, %s10519_s27  ;;  %v5639_v28 = vpack.c.bf16 %v2826_v12, %v2826_v12  ;;  %10007 = vmatmul.msk.bf16.gmra.mxu2 %vm2042_vm0, %v10268_v25 }
  0xb4   : > { %v4997_v20 = vpack.c.bf16 %v4485_v14, %v4485_v14  ;;  %7431 = vrot.lane.b32.xlu1 %v6022_v15, %s10519_s27  ;;  %v4230_v21 = vmax.f32 %v10728_v16, 0.0  ;;  %9879 = vmatmul.msk.bf16.gmra.mxu0 %vm2042_vm0, %v10140_v44  ;;  %v5767_v50 = vpack.c.bf16 %v10728_v16, %v10728_v16 }
  0xb5   : > { %5382 = vst.msk [vmem:[%s10693_s28 + $0x404] sm:$0xf] %vm5124_vm1, %v4869_v18  ;;  %v4614_v22 = vpack.c.bf16 %v4102_v19, %v4102_v19  ;;  %6663 = vrot.lane.b32.xlu0 %v5638_v17, %s10519_s27  ;;  %10071 = vmatmul.msk.bf16.gmra.mxu3 %vm2042_vm0, %v10332_v45 }
  0xb6   : > { %5510 = vst.msk [vmem:[%s10693_s28 + $0x604] sm:$0xf] %vm5124_vm1, %v4997_v20  ;;  %v4742_v23 = vpack.c.bf16 %v4230_v21, %v4230_v21  ;;  %v3465_v24 = vpop.f32.mrf.mxu2  ;;  %9943 = vmatmul.msk.bf16.gmra.mxu1 %vm2042_vm0, %v10204_v1  ;;  %v10269_v21 = vld [vmem:[%s10615_s13 + $0x450] sm:$0xff] }
  0xb7   : > { %5127 = vst.msk [vmem:[%s10693_s28 + $0x8] sm:$0xf] %vm5124_vm1, %v4614_v22  ;;  %v3785_v26 = vpop.f32.mrf.mxu3  ;;  %v3466_v27 = vadd.f32 %v10684_v36, %v3465_v24 }
  0xb8   : > { %5255 = vst.msk [vmem:[%s10693_s28 + $0x208] sm:$0xf] %vm5124_vm1, %v4742_v23  ;;  %v3786_v29 = vadd.f32 %v10684_v36, %v3785_v26  ;;  %v2827_v30 = vpop.f32.mrf.mxu0 }
  0xb9   : > { %v10746_v31 = vadd.f32 %v10684_v36, %v2827_v30  ;;  %v3147_v32 = vpop.f32.mrf.mxu1  ;;  %v4358_v33 = vmax.f32 %v3466_v27, 0.0  ;;  %v5895_v54 = vpack.c.bf16 %v3466_v27, %v3466_v27 }
  0xba   : > { %v4486_v34 = vmax.f32 %v3786_v29, 0.0  ;;  %v6023_v35 = vpack.c.bf16 %v3786_v29, %v3786_v29  ;;  %v3148_v37 = vadd.f32 %v10684_v36, %v3147_v32 }
  0xbb   : > { %v4103_v39 = vmax.f32 %v10746_v31, 0.0  ;;  %v4870_v40 = vpack.c.bf16 %v4358_v33, %v4358_v33  ;;  %v5640_v12 = vpack.c.bf16 %v10746_v31, %v10746_v31 }
  0xbc   : > { %v4998_v41 = vpack.c.bf16 %v4486_v34, %v4486_v34  ;;  %7433 = vrot.lane.b32.xlu2 %v6023_v35, %s10519_s27  ;;  %6665 = vrot.lane.b32.xlu1 %v5639_v28, %s10519_s27  ;;  %v4231_v42 = vmax.f32 %v3148_v37, 0.0  ;;  %v5768_v51 = vpack.c.bf16 %v3148_v37, %v3148_v37 }
  0xbd   : > { %v4615_v43 = vpack.c.bf16 %v4103_v39, %v4103_v39  ;;  %6919 = vrot.lane.b32.xlu0 %v5766_v38, %s10519_s27  ;;  %5383 = vst.msk [vmem:[%s10693_s28 + $0x408] sm:$0xf] %vm5124_vm1, %v4870_v40 }
  0xbe   : > { %5511 = vst.msk [vmem:[%s10693_s28 + $0x608] sm:$0xf] %vm5124_vm1, %v4998_v41  ;;  %v4743_v46 = vpack.c.bf16 %v4231_v42, %v4231_v42  ;;  %v3467_v47 = vpop.f32.mrf.mxu2  ;;  %v10141_v42 = vld [vmem:[%s10615_s13 + $0x50] sm:$0xff] }
  0xbf   : > { %5128 = vst.msk [vmem:[%s10693_s28 + $0xc] sm:$0xf] %vm5124_vm1, %v4615_v43  ;;  %v10765_v48 = vadd.f32 %v10684_v36, %v3467_v47  ;;  %v3787_v49 = vpop.f32.mrf.mxu3  ;;  %v10205_v43 = vld [vmem:[%s10615_s13 + $0x250] sm:$0xff] }
  0xc0   : > { %5256 = vst.msk [vmem:[%s10693_s28 + $0x20c] sm:$0xf] %vm5124_vm1, %v4743_v46  ;;  %v2830_v52 = vpop.f32.mrf.mxu0  ;;  %v3788_v53 = vadd.f32 %v10684_v36, %v3787_v49  ;;  %v10333_v46 = vld [vmem:[%s10615_s13 + $0x650] sm:$0xff] }
  0xc1   : > { %v2831_v55 = vadd.f32 %v10684_v36, %v2830_v52  ;;  %v4359_v56 = vmax.f32 %v10765_v48, 0.0  ;;  %v3150_v57 = vpop.f32.mrf.mxu1  ;;  %v5896_v33 = vpack.c.bf16 %v10765_v48, %v10765_v48 }
  0xc2   : > { %v4487_v58 = vmax.f32 %v3788_v53, 0.0  ;;  %v10777_v59 = vadd.f32 %v10684_v36, %v3150_v57  ;;  %v6024_v15 = vpack.c.bf16 %v3788_v53, %v3788_v53 }
  0xc3   : > { %v4104_v60 = vmax.f32 %v2831_v55, 0.0  ;;  %v4871_v61 = vpack.c.bf16 %v4359_v56, %v4359_v56  ;;  %v5641_v6 = vpack.c.bf16 %v2831_v55, %v2831_v55  ;;  %10008 = vmatmul.msk.bf16.gmra.mxu2 %vm2042_vm0, %v10269_v21 }
  0xc4   : > { %6923 = vrot.lane.b32.xlu2 %v5768_v51, %s10519_s27  ;;  %6921 = vrot.lane.b32.xlu1 %v5767_v50, %s10519_s27  ;;  %v4999_v62 = vpack.c.bf16 %v4487_v58, %v4487_v58  ;;  %v4232_v63 = vmax.f32 %v10777_v59, 0.0  ;;  %v5769_v29 = vpack.c.bf16 %v10777_v59, %v10777_v59 }
  0xc5   : > { %7177 = vrot.lane.b32.xlu0 %v5895_v54, %s10519_s27  ;;  %v4616_v0 = vpack.c.bf16 %v4104_v60, %v4104_v60  ;;  %5384 = vst.msk [vmem:[%s10693_s28 + $0x40c] sm:$0xf] %vm5124_vm1, %v4871_v61  ;;  %9880 = vmatmul.msk.bf16.gmra.mxu0 %vm2042_vm0, %v10141_v42 }
  0xc6   : > { %5512 = vst.msk [vmem:[%s10693_s28 + $0x60c] sm:$0xf] %vm5124_vm1, %v4999_v62  ;;  %v4744_v2 = vpack.c.bf16 %v4232_v63, %v4232_v63  ;;  %v3470_v3 = vpop.f32.mrf.mxu2  ;;  %9944 = vmatmul.msk.bf16.gmra.mxu1 %vm2042_vm0, %v10205_v43  ;;  %10072 = vmatmul.msk.bf16.gmra.mxu3 %vm2042_vm0, %v10333_v46 }
  0xc7   : > { %5129 = vst.msk [vmem:[%s10693_s28 + $0x10] sm:$0xf] %vm5124_vm1, %v4616_v0  ;;  %v3471_v4 = vadd.f32 %v10684_v36, %v3470_v3  ;;  %v3790_v5 = vpop.f32.mrf.mxu3 }
  0xc8   : > { %5257 = vst.msk [vmem:[%s10693_s28 + $0x210] sm:$0xf] %vm5124_vm1, %v4744_v2  ;;  %v10795_v7 = vadd.f32 %v10684_v36, %v3790_v5  ;;  %v2832_v8 = vpop.f32.mrf.mxu0 }
  0xc9   : > { %v4360_v9 = vmax.f32 %v3471_v4, 0.0  ;;  %v10798_v10 = vadd.f32 %v10684_v36, %v2832_v8  ;;  %v3152_v11 = vpop.f32.mrf.mxu1  ;;  %v5897_v26 = vpack.c.bf16 %v3471_v4, %v3471_v4 }
  0xca   : > { %v4488_v13 = vmax.f32 %v10795_v7, 0.0  ;;  %v10804_v14 = vadd.f32 %v10684_v36, %v3152_v11  ;;  %v6025_v49 = vpack.c.bf16 %v10795_v7, %v10795_v7 }
  0xcb   : > { %v4872_v16 = vpack.c.bf16 %v4360_v9, %v4360_v9  ;;  %v4105_v17 = vmax.f32 %v10798_v10, 0.0  ;;  %v5642_v50 = vpack.c.bf16 %v10798_v10, %v10798_v10 }
  0xcc   : > { %6669 = vrot.lane.b32.xlu2 %v5641_v6, %s10519_s27  ;;  %6667 = vrot.lane.b32.xlu1 %v5640_v12, %s10519_s27  ;;  %v5000_v18 = vpack.c.bf16 %v4488_v13, %v4488_v13  ;;  %v4233_v19 = vmax.f32 %v10804_v14, 0.0  ;;  %v5770_v10 = vpack.c.bf16 %v10804_v14, %v10804_v14 }
  0xcd   : > { %7435 = vrot.lane.b32.xlu0 %v6024_v15, %s10519_s27  ;;  %5385 = vst.msk [vmem:[%s10693_s28 + $0x410] sm:$0xf] %vm5124_vm1, %v4872_v16  ;;  %v4617_v20 = vpack.c.bf16 %v4105_v17, %v4105_v17 }
  0xce   : > { %5513 = vst.msk [vmem:[%s10693_s28 + $0x610] sm:$0xf] %vm5124_vm1, %v5000_v18  ;;  %v4745_v22 = vpack.c.bf16 %v4233_v19, %v4233_v19  ;;  %v3472_v23 = vpop.f32.mrf.mxu2  ;;  %v10142_v19 = vld [vmem:[%s10615_s13 + $0x58] sm:$0xff] }
  0xcf   : > { %5130 = vst.msk [vmem:[%s10693_s28 + $0x14] sm:$0xf] %vm5124_vm1, %v4617_v20  ;;  %v3473_v24 = vadd.f32 %v10684_v36, %v3472_v23  ;;  %v3792_v25 = vpop.f32.mrf.mxu3  ;;  %v10270_v20 = vld [vmem:[%s10615_s13 + $0x458] sm:$0xff] }
  0xd0   : > { %5258 = vst.msk [vmem:[%s10693_s28 + $0x214] sm:$0xf] %vm5124_vm1, %v4745_v22  ;;  %v10823_v27 = vadd.f32 %v10684_v36, %v3792_v25  ;;  %v2835_v28 = vpop.f32.mrf.mxu0  ;;  %v10334_v23 = vld [vmem:[%s10615_s13 + $0x658] sm:$0xff] }
  0xd1   : > { %v4361_v30 = vmax.f32 %v3473_v24, 0.0  ;;  %v10828_v31 = vadd.f32 %v10684_v36, %v2835_v28  ;;  %v3155_v32 = vpop.f32.mrf.mxu1  ;;  %v5898_v58 = vpack.c.bf16 %v3473_v24, %v3473_v24 }
  0xd2   : > { %v4489_v34 = vmax.f32 %v10823_v27, 0.0  ;;  %v10834_v35 = vadd.f32 %v10684_v36, %v3155_v32  ;;  %v6026_v11 = vpack.c.bf16 %v10823_v27, %v10823_v27 }
  0xd3   : > { %v4873_v37 = vpack.c.bf16 %v4361_v30, %v4361_v30  ;;  %v4106_v38 = vmax.f32 %v10828_v31, 0.0  ;;  %v5643_v6 = vpack.c.bf16 %v10828_v31, %v10828_v31  ;;  %10009 = vmatmul.msk.bf16.gmra.mxu2 %vm2042_vm0, %v10270_v20 }
  0xd4   : > { %7181 = vrot.lane.b32.xlu2 %v5897_v26, %s10519_s27  ;;  %7179 = vrot.lane.b32.xlu1 %v5896_v33, %s10519_s27  ;;  %v5001_v39 = vpack.c.bf16 %v4489_v34, %v4489_v34  ;;  %v4234_v40 = vmax.f32 %v10834_v35, 0.0  ;;  %v5771_v27 = vpack.c.bf16 %v10834_v35, %v10834_v35 }
  0xd5   : > { %6925 = vrot.lane.b32.xlu0 %v5769_v29, %s10519_s27  ;;  %5386 = vst.msk [vmem:[%s10693_s28 + $0x414] sm:$0xf] %vm5124_vm1, %v4873_v37  ;;  %v4618_v41 = vpack.c.bf16 %v4106_v38, %v4106_v38  ;;  %9881 = vmatmul.msk.bf16.gmra.mxu0 %vm2042_vm0, %v10142_v19 }
  0xd6   : > { %5514 = vst.msk [vmem:[%s10693_s28 + $0x614] sm:$0xf] %vm5124_vm1, %v5001_v39  ;;  %v3475_v44 = vpop.f32.mrf.mxu2  ;;  %v4746_v45 = vpack.c.bf16 %v4234_v40, %v4234_v40  ;;  %10073 = vmatmul.msk.bf16.gmra.mxu3 %vm2042_vm0, %v10334_v23 }
  0xd7   : > { %5131 = vst.msk [vmem:[%s10693_s28 + $0x18] sm:$0xf] %vm5124_vm1, %v4618_v41  ;;  %v10851_v47 = vadd.f32 %v10684_v36, %v3475_v44  ;;  %v3795_v48 = vpop.f32.mrf.mxu3  ;;  %v10206_v44 = vld [vmem:[%s10615_s13 + $0x258] sm:$0xff] }
  0xd8   : > { %v2837_v51 = vpop.f32.mrf.mxu0  ;;  %5259 = vst.msk [vmem:[%s10693_s28 + $0x218] sm:$0xf] %vm5124_vm1, %v4746_v45  ;;  %v10862_v52 = vadd.f32 %v10684_v36, %v3795_v48  ;;  %9945 = vmatmul.msk.bf16.gmra.mxu1 %vm2042_vm0, %v10206_v44 }
  0xd9   : > { %v4362_v53 = vmax.f32 %v10851_v47, 0.0  ;;  %v10867_v54 = vadd.f32 %v10684_v36, %v2837_v51  ;;  %v3157_v55 = vpop.f32.mrf.mxu1  ;;  %v5899_v26 = vpack.c.bf16 %v10851_v47, %v10851_v47 }
  0xda   : > { %v4490_v56 = vmax.f32 %v10862_v52, 0.0  ;;  %v10871_v57 = vadd.f32 %v10684_v36, %v3157_v55  ;;  %v6027_v30 = vpack.c.bf16 %v10862_v52, %v10862_v52 }
  0xdb   : > { %v4874_v59 = vpack.c.bf16 %v4362_v53, %v4362_v53  ;;  %v4107_v60 = vmax.f32 %v10867_v54, 0.0  ;;  %v5644_v52 = vpack.c.bf16 %v10867_v54, %v10867_v54 }
  0xdc   : > { %6671 = vrot.lane.b32.xlu2 %v5642_v50, %s10519_s27  ;;  %7437 = vrot.lane.b32.xlu1 %v6025_v49, %s10519_s27  ;;  %v5002_v61 = vpack.c.bf16 %v4490_v56, %v4490_v56  ;;  %v4235_v62 = vmax.f32 %v10871_v57, 0.0 }
  0xdd   : > { %7183 = vrot.lane.b32.xlu0 %v5898_v58, %s10519_s27  ;;  %5387 = vst.msk [vmem:[%s10693_s28 + $0x418] sm:$0xf] %vm5124_vm1, %v4874_v59  ;;  %v4619_v63 = vpack.c.bf16 %v4107_v60, %v4107_v60  ;;  %v5772_v58 = vpack.c.bf16 %v10871_v57, %v10871_v57 }
  0xde   : > { %v3477_v0 = vpop.f32.mrf.mxu2  ;;  %5515 = vst.msk [vmem:[%s10693_s28 + $0x618] sm:$0xf] %vm5124_vm1, %v5002_v61  ;;  %v4747_v1 = vpack.c.bf16 %v4235_v62, %v4235_v62 }
  0xdf   : > { %5132 = vst.msk [vmem:[%s10693_s28 + $0x1c] sm:$0xf] %vm5124_vm1, %v4619_v63  ;;  %v10885_v2 = vadd.f32 %v10684_v36, %v3477_v0  ;;  %v3797_v3 = vpop.f32.mrf.mxu3 }
  0xe0   : > { %5260 = vst.msk [vmem:[%s10693_s28 + $0x21c] sm:$0xf] %vm5124_vm1, %v4747_v1  ;;  %v10890_v4 = vadd.f32 %v10684_v36, %v3797_v3  ;;  %v2840_v5 = vpop.f32.mrf.mxu0 }
  0xe1   : > { %v4363_v7 = vmax.f32 %v10885_v2, 0.0  ;;  %v10896_v8 = vadd.f32 %v10684_v36, %v2840_v5  ;;  %v3160_v9 = vpop.f32.mrf.mxu1  ;;  %v5900_v53 = vpack.c.bf16 %v10885_v2, %v10885_v2 }
  0xe2   : > { %v4491_v12 = vmax.f32 %v10890_v4, 0.0  ;;  %v10904_v13 = vadd.f32 %v10684_v36, %v3160_v9 }
  0xe3   : > { %v4875_v15 = vpack.c.bf16 %v4363_v7, %v4363_v7  ;;  %v4108_v16 = vmax.f32 %v10896_v8, 0.0  ;;  %v5645_v2 = vpack.c.bf16 %v10896_v8, %v10896_v8  ;;  %v6028_v8 = vpack.c.bf16 %v10890_v4, %v10890_v4 }
  0xe4   : > { %7439 = vrot.lane.b32.xlu2 %v6026_v11, %s10519_s27  ;;  %6927 = vrot.lane.b32.xlu1 %v5770_v10, %s10519_s27  ;;  %v5003_v17 = vpack.c.bf16 %v4491_v12, %v4491_v12  ;;  %v4236_v14 = vmax.f32 %v10904_v13, 0.0  ;;  %v5773_v23 = vpack.c.bf16 %v10904_v13, %v10904_v13 }
  0xe5   : > { %6673 = vrot.lane.b32.xlu0 %v5643_v6, %s10519_s27  ;;  %5388 = vst.msk [vmem:[%s10693_s28 + $0x41c] sm:$0xf] %vm5124_vm1, %v4875_v15  ;;  %v4620_v18 = vpack.c.bf16 %v4108_v16, %v4108_v16  ;;  %v10271_v6 = vld [vmem:[%s10615_s13 + $0x460] sm:$0xff] }
  0xe6   : > { %5516 = vst.msk [vmem:[%s10693_s28 + $0x61c] sm:$0xf] %vm5124_vm1, %v5003_v17  ;;  %v4748_v21 = vpack.c.bf16 %v4236_v14, %v4236_v14  ;;  %v3480_v22 = vpop.f32.mrf.mxu2  ;;  %10010 = vmatmul.msk.bf16.gmra.mxu2 %vm2042_vm0, %v10271_v6 }
  0xe7   : > { %5133 = vst.msk [vmem:[%s10693_s28 + $0x20] sm:$0xf] %vm5124_vm1, %v4620_v18  ;;  %v10921_v24 = vadd.f32 %v10684_v36, %v3480_v22  ;;  %v3800_v25 = vpop.f32.mrf.mxu3 }
  0xe8   : > { %5261 = vst.msk [vmem:[%s10693_s28 + $0x220] sm:$0xf] %vm5124_vm1, %v4748_v21  ;;  %v2842_v28 = vpop.f32.mrf.mxu0  ;;  %v10932_v29 = vadd.f32 %v10684_v36, %v3800_v25 }
  0xe9   : > { %v4364_v31 = vmax.f32 %v10921_v24, 0.0  ;;  %v10939_v32 = vadd.f32 %v10684_v36, %v2842_v28  ;;  %v3162_v33 = vpop.f32.mrf.mxu1  ;;  %v5901_v7 = vpack.c.bf16 %v10921_v24, %v10921_v24  ;;  %v10143_v28 = vld [vmem:[%s10615_s13 + $0x60] sm:$0xff] }
  0xea   : > { %v10942_v34 = vadd.f32 %v10684_v36, %v3162_v33  ;;  %v4492_v35 = vmax.f32 %v10932_v29, 0.0  ;;  %v6029_v24 = vpack.c.bf16 %v10932_v29, %v10932_v29  ;;  %9882 = vmatmul.msk.bf16.gmra.mxu0 %vm2042_vm0, %v10143_v28 }
  0xeb   : > { %v4876_v37 = vpack.c.bf16 %v4364_v31, %v4364_v31  ;;  %v4109_v38 = vmax.f32 %v10939_v32, 0.0  ;;  %v5646_v33 = vpack.c.bf16 %v10939_v32, %v10939_v32 }
  0xec   : > { %6929 = vrot.lane.b32.xlu2 %v5771_v27, %s10519_s27  ;;  %7185 = vrot.lane.b32.xlu1 %v5899_v26, %s10519_s27  ;;  %v4237_v39 = vmax.f32 %v10942_v34, 0.0  ;;  %v5004_v40 = vpack.c.bf16 %v4492_v35, %v4492_v35 }
  0xed   : > { %7441 = vrot.lane.b32.xlu0 %v6027_v30, %s10519_s27  ;;  %5389 = vst.msk [vmem:[%s10693_s28 + $0x420] sm:$0xf] %vm5124_vm1, %v4876_v37  ;;  %v4621_v41 = vpack.c.bf16 %v4109_v38, %v4109_v38  ;;  %v10335_v30 = vld [vmem:[%s10615_s13 + $0x660] sm:$0xff] }
  0xee   : > { %v4749_v42 = vpack.c.bf16 %v4237_v39, %v4237_v39  ;;  %v3482_v43 = vpop.f32.mrf.mxu2  ;;  %5517 = vst.msk [vmem:[%s10693_s28 + $0x620] sm:$0xf] %vm5124_vm1, %v5004_v40  ;;  %10074 = vmatmul.msk.bf16.gmra.mxu3 %vm2042_vm0, %v10335_v30 }
  0xef   : > { %5134 = vst.msk [vmem:[%s10693_s28 + $0x24] sm:$0xf] %vm5124_vm1, %v4621_v41  ;;  %v10958_v45 = vadd.f32 %v10684_v36, %v3482_v43  ;;  %v3802_v46 = vpop.f32.mrf.mxu3 }
  0xf0   : > { %5262 = vst.msk [vmem:[%s10693_s28 + $0x224] sm:$0xf] %vm5124_vm1, %v4749_v42  ;;  %v2845_v47 = vpop.f32.mrf.mxu0  ;;  %v10963_v48 = vadd.f32 %v10684_v36, %v3802_v46 }
  0xf1   : > { %v4365_v49 = vmax.f32 %v10958_v45, 0.0  ;;  %v10968_v50 = vadd.f32 %v10684_v36, %v2845_v47  ;;  %v3165_v51 = vpop.f32.mrf.mxu1  ;;  %v10207_v47 = vld [vmem:[%s10615_s13 + $0x260] sm:$0xff] }
  0xf2   : > { %v4493_v55 = vmax.f32 %v10963_v48, 0.0  ;;  %v10976_v56 = vadd.f32 %v10684_v36, %v3165_v51  ;;  %9946 = vmatmul.msk.bf16.gmra.mxu1 %vm2042_vm0, %v10207_v47 }
  0xf3   : > { %v4877_v59 = vpack.c.bf16 %v4365_v49, %v4365_v49  ;;  %v4110_v60 = vmax.f32 %v10968_v50, 0.0 }
  0xf4   : > { %7187 = vrot.lane.b32.xlu2 %v5900_v53, %s10519_s27  ;;  %6675 = vrot.lane.b32.xlu1 %v5644_v52, %s10519_s27  ;;  %v5005_v54 = vpack.c.bf16 %v4493_v55, %v4493_v55  ;;  %v4238_v61 = vmax.f32 %v10976_v56, 0.0  ;;  %v5774_v52 = vpack.c.bf16 %v10942_v34, %v10942_v34  ;;  %v5902_v53 = vpack.c.bf16 %v10958_v45, %v10958_v45 }
  0xf5   : > { %6931 = vrot.lane.b32.xlu0 %v5772_v58, %s10519_s27  ;;  %5390 = vst.msk [vmem:[%s10693_s28 + $0x424] sm:$0xf] %vm5124_vm1, %v4877_v59  ;;  %v4622_v62 = vpack.c.bf16 %v4110_v60, %v4110_v60  ;;  %v6030_v59 = vpack.c.bf16 %v10963_v48, %v10963_v48  ;;  %v5775_v6 = vpack.c.bf16 %v10976_v56, %v10976_v56 }
  0xf6   : > { %5518 = vst.msk [vmem:[%s10693_s28 + $0x624] sm:$0xf] %vm5124_vm1, %v5005_v54  ;;  %v4750_v57 = vpack.c.bf16 %v4238_v61, %v4238_v61  ;;  %v3485_v63 = vpop.f32.mrf.mxu2 }
  0xf7   : > { %5135 = vst.msk [vmem:[%s10693_s28 + $0x28] sm:$0xf] %vm5124_vm1, %v4622_v62  ;;  %v10992_v0 = vadd.f32 %v10684_v36, %v3485_v63  ;;  %v3805_v1 = vpop.f32.mrf.mxu3  ;;  %v5647_v63 = vpack.c.bf16 %v10968_v50, %v10968_v50 }
  0xf8   : > { %v2847_v3 = vpop.f32.mrf.mxu0  ;;  %5263 = vst.msk [vmem:[%s10693_s28 + $0x228] sm:$0xf] %vm5124_vm1, %v4750_v57  ;;  %v10999_v5 = vadd.f32 %v10684_v36, %v3805_v1 }
  0xf9   : > { %v11005_v9 = vadd.f32 %v10684_v36, %v2847_v3  ;;  %v4366_v10 = vmax.f32 %v10992_v0, 0.0  ;;  %v3167_v11 = vpop.f32.mrf.mxu1  ;;  %v5903_v1 = vpack.c.bf16 %v10992_v0, %v10992_v0  ;;  %v10272_v0 = vld [vmem:[%s10615_s13 + $0x468] sm:$0xff] }
  0xfa   : > { %v4494_v12 = vmax.f32 %v10999_v5, 0.0  ;;  %v11012_v15 = vadd.f32 %v10684_v36, %v3167_v11  ;;  %10011 = vmatmul.msk.bf16.gmra.mxu2 %vm2042_vm0, %v10272_v0 }
  0xfb   : > { %v4111_v16 = vmax.f32 %v11005_v9, 0.0  ;;  %v4878_v17 = vpack.c.bf16 %v4366_v10, %v4366_v10 }
  0xfc   : > { %6677 = vrot.lane.b32.xlu2 %v5645_v2, %s10519_s27  ;;  %7443 = vrot.lane.b32.xlu1 %v6028_v8, %s10519_s27  ;;  %v5006_v14 = vpack.c.bf16 %v4494_v12, %v4494_v12  ;;  %v4239_v18 = vmax.f32 %v11012_v15, 0.0 }
  0xfd   : > { %7189 = vrot.lane.b32.xlu0 %v5901_v7, %s10519_s27  ;;  %v4623_v4 = vpack.c.bf16 %v4111_v16, %v4111_v16  ;;  %5391 = vst.msk [vmem:[%s10693_s28 + $0x428] sm:$0xf] %vm5124_vm1, %v4878_v17 }
  0xfe   : > { %5519 = vst.msk [vmem:[%s10693_s28 + $0x628] sm:$0xf] %vm5124_vm1, %v5006_v14  ;;  %v4751_v19 = vpack.c.bf16 %v4239_v18, %v4239_v18  ;;  %v3487_v20 = vpop.f32.mrf.mxu2  ;;  %v6031_v18 = vpack.c.bf16 %v10999_v5, %v10999_v5  ;;  %v5648_v5 = vpack.c.bf16 %v11005_v9, %v11005_v9 }
  0xff   : > { %5136 = vst.msk [vmem:[%s10693_s28 + $0x2c] sm:$0xf] %vm5124_vm1, %v4623_v4  ;;  %v11034_v21 = vadd.f32 %v10684_v36, %v3487_v20  ;;  %v3807_v22 = vpop.f32.mrf.mxu3 }
 0x100   : > { %v6918_v25 = vpop.permute.xlu2 %6917  ;;  %5264 = vst.msk [vmem:[%s10693_s28 + $0x22c] sm:$0xf] %vm5124_vm1, %v4751_v19  ;;  %v11043_v26 = vadd.f32 %v10684_v36, %v3807_v22  ;;  %v2850_v27 = vpop.f32.mrf.mxu0 }
 0x101   : > { %8325 = vst.msk [vmem:[%s11027_s6 + $0x200] sm:$0xf] %vm5124_vm1, %v6918_v25  ;;  %v4367_v31 = vmax.f32 %v11034_v21, 0.0  ;;  %v11051_v13 = vadd.f32 %v10684_v36, %v2850_v27  ;;  %v3170_v41 = vpop.f32.mrf.mxu1  ;;  %v10208_v25 = vld [vmem:[%s10615_s13 + $0x268] sm:$0xff]  ;;  %v5904_v30 = vpack.c.bf16 %v11034_v21, %v11034_v21 }
 0x102   : > { %v4495_v29 = vmax.f32 %v11043_v26, 0.0  ;;  %v11072_v44 = vadd.f32 %v10684_v36, %v3170_v41  ;;  %v10336_v27 = vld [vmem:[%s10615_s13 + $0x668] sm:$0xff]  ;;  %9947 = vmatmul.msk.bf16.gmra.mxu1 %vm2042_vm0, %v10208_v25 }
 0x103   : > { %v4879_v35 = vpack.c.bf16 %v4367_v31, %v4367_v31  ;;  %v4112_v37 = vmax.f32 %v11051_v13, 0.0  ;;  %10075 = vmatmul.msk.bf16.gmra.mxu3 %vm2042_vm0, %v10336_v27 }
 0x104   : > { %7445 = vrot.lane.b32.xlu2 %v6029_v24, %s10519_s27  ;;  %6933 = vrot.lane.b32.xlu1 %v5773_v23, %s10519_s27  ;;  %v5007_v38 = vpack.c.bf16 %v4495_v29, %v4495_v29  ;;  %v4240_v55 = vmax.f32 %v11072_v44, 0.0  ;;  %v10144_v24 = vld [vmem:[%s10615_s13 + $0x68] sm:$0xff] }
 0x105   : > { %6679 = vrot.lane.b32.xlu0 %v5646_v33, %s10519_s27  ;;  %5392 = vst.msk [vmem:[%s10693_s28 + $0x42c] sm:$0xf] %vm5124_vm1, %v4879_v35  ;;  %v4624_v39 = vpack.c.bf16 %v4112_v37, %v4112_v37  ;;  %9883 = vmatmul.msk.bf16.gmra.mxu0 %vm2042_vm0, %v10144_v24 }
 0x106   : > { %5520 = vst.msk [vmem:[%s10693_s28 + $0x62c] sm:$0xf] %vm5124_vm1, %v5007_v38  ;;  %v3490_v40 = vpop.f32.mrf.mxu2  ;;  %v4752_v34 = vpack.c.bf16 %v4240_v55, %v4240_v55  ;;  %v6032_v55 = vpack.c.bf16 %v11043_v26, %v11043_v26 }
 0x107   : > { %5137 = vst.msk [vmem:[%s10693_s28 + $0x30] sm:$0xf] %vm5124_vm1, %v4624_v39  ;;  %v11069_v32 = vadd.f32 %v10684_v36, %v3490_v40  ;;  %v3810_v42 = vpop.f32.mrf.mxu3 }
 0x108   : > { %v2852_v43 = vpop.f32.mrf.mxu0  ;;  %v11075_v46 = vadd.f32 %v10684_v36, %v3810_v42  ;;  %5265 = vst.msk [vmem:[%s10693_s28 + $0x230] sm:$0xf] %vm5124_vm1, %v4752_v34  ;;  %v5649_v42 = vpack.c.bf16 %v11051_v13, %v11051_v13 }
 0x109   : > { %v4368_v49 = vmax.f32 %v11069_v32, 0.0  ;;  %v11080_v51 = vadd.f32 %v10684_v36, %v2852_v43  ;;  %v3172_v2 = vpop.f32.mrf.mxu1 }
 0x10a   : > { %v4496_v58 = vmax.f32 %v11075_v46, 0.0  ;;  %v11116_v10 = vadd.f32 %v10684_v36, %v3172_v2 }
 0x10b   : > { %v4880_v60 = vpack.c.bf16 %v4368_v49, %v4368_v49  ;;  %v4113_v54 = vmax.f32 %v11080_v51, 0.0 }
 0x10c   : > { %6935 = vrot.lane.b32.xlu2 %v5774_v52, %s10519_s27  ;;  %7191 = vrot.lane.b32.xlu1 %v5902_v53, %s10519_s27  ;;  %v5008_v62 = vpack.c.bf16 %v4496_v58, %v4496_v58  ;;  %v4241_v8 = vmax.f32 %v11116_v10, 0.0  ;;  %v5776_v53 = vpack.c.bf16 %v11012_v15, %v11012_v15 }
 0x10d   : > { %v7176_v45 = vpop.permute.xlu2 %7175  ;;  %7447 = vrot.lane.b32.xlu0 %v6030_v59, %s10519_s27  ;;  %5393 = vst.msk [vmem:[%s10693_s28 + $0x430] sm:$0xf] %vm5124_vm1, %v4880_v60  ;;  %v4625_v61 = vpack.c.bf16 %v4113_v54, %v4113_v54 }
 0x10e   : > { %8454 = vst.msk [vmem:[%s11027_s6 + $0x404] sm:$0xf] %vm5124_vm1, %v7176_v45  ;;  %v3492_v48 = vpop.f32.mrf.mxu2  ;;  %v4753_v56 = vpack.c.bf16 %v4241_v8, %v4241_v8  ;;  %v10337_v8 = vld [vmem:[%s10615_s13 + $0x670] sm:$0xff] }
 0x10f   : > { %5138 = vst.msk [vmem:[%s10693_s28 + $0x34] sm:$0xf] %vm5124_vm1, %v4625_v61  ;;  %v11102_v57 = vadd.f32 %v10684_v36, %v3492_v48  ;;  %v3812_v3 = vpop.f32.mrf.mxu3  ;;  %v5905_v48 = vpack.c.bf16 %v11069_v32, %v11069_v32  ;;  %v10145_v32 = vld [vmem:[%s10615_s13 + $0x70] sm:$0xff] }
 0x110   : > { %5521 = vst.msk [vmem:[%s10693_s28 + $0x630] sm:$0xf] %vm5124_vm1, %v5008_v62  ;;  %v11119_v50 = vadd.f32 %v10684_v36, %v3812_v3  ;;  %v2855_v4 = vpop.f32.mrf.mxu0  ;;  %v6033_v3 = vpack.c.bf16 %v11075_v46, %v11075_v46 }
 0x111   : > { %v4369_v7 = vmax.f32 %v11102_v57, 0.0  ;;  %v3175_v19 = vpop.f32.mrf.mxu1  ;;  %5266 = vst.msk [vmem:[%s10693_s28 + $0x234] sm:$0xf] %vm5124_vm1, %v4753_v56  ;;  %v11139_v20 = vadd.f32 %v10684_v36, %v2855_v4 }
 0x112   : > { %v4497_v12 = vmax.f32 %v11119_v50, 0.0  ;;  %v11142_v22 = vadd.f32 %v10684_v36, %v3175_v19  ;;  %v11248_v19 = vld [vmem:[%s16786_s2] ss:$0 sm:$0xff] }
 0x113   : > { %v4881_v11 = vpack.c.bf16 %v4369_v7, %v4369_v7  ;;  %v4114_v31 = vmax.f32 %v11139_v20, 0.0  ;;  %10076 = vmatmul.msk.bf16.gmra.mxu3 %vm2042_vm0, %v10337_v8  ;;  %v10338_v8 = vld [vmem:[%s10615_s13 + $0x678] sm:$0xff] }
 0x114   : > { %7193 = vrot.lane.b32.xlu2 %v5903_v1, %s10519_s27  ;;  %6681 = vrot.lane.b32.xlu1 %v5647_v63, %s10519_s27  ;;  %v5009_v17 = vpack.c.bf16 %v4497_v12, %v4497_v12  ;;  %v4242_v29 = vmax.f32 %v11142_v22, 0.0  ;;  %v5777_v63 = vpack.c.bf16 %v11072_v44, %v11072_v44 }
 0x115   : > { %6937 = vrot.lane.b32.xlu0 %v5775_v6, %s10519_s27  ;;  %5394 = vst.msk [vmem:[%s10693_s28 + $0x434] sm:$0xf] %vm5124_vm1, %v4881_v11  ;;  %v4626_v21 = vpack.c.bf16 %v4114_v31, %v4114_v31  ;;  %v10273_v11 = vld [vmem:[%s10615_s13 + $0x470] sm:$0xff]  ;;  %9884 = vmatmul.msk.bf16.gmra.mxu0 %vm2042_vm0, %v10145_v32  ;;  %v5906_v31 = vpack.c.bf16 %v11102_v57, %v11102_v57 }
 0x116   : > { %v7434_v16 = vpop.permute.xlu2 %7433  ;;  %v3495_v23 = vpop.f32.mrf.mxu2  ;;  %5522 = vst.msk [vmem:[%s10693_s28 + $0x634] sm:$0xf] %vm5124_vm1, %v5009_v17  ;;  %v4754_v37 = vpack.c.bf16 %v4242_v29, %v4242_v29  ;;  %10012 = vmatmul.msk.bf16.gmra.mxu2 %vm2042_vm0, %v10273_v11  ;;  %v10146_v11 = vld [vmem:[%s10615_s13 + $0x78] sm:$0xff] }
 0x117   : > { %8583 = vst.msk [vmem:[%s11027_s6 + $0x608] sm:$0xf] %vm5124_vm1, %v7434_v16  ;;  %v6662_v14 = vpop.permute.xlu0 %6661  ;;  %v11152_v28 = vadd.f32 %v10684_v36, %v3495_v23  ;;  %v3815_v52 = vpop.f32.mrf.mxu3 }
 0x118   : > { %8197 = vst.msk [vmem:[%s11027_s6] sm:$0xf] %vm5124_vm1, %v6662_v14  ;;  %v2857_v40 = vpop.f32.mrf.mxu0  ;;  %v11195_v60 = vadd.f32 %v10684_v36, %v3815_v52 }
 0x119   : > { %v4370_v9 = vmax.f32 %v11152_v28, 0.0  ;;  %v3177_v41 = vpop.f32.mrf.mxu1  ;;  %5139 = vst.msk [vmem:[%s10693_s28 + $0x38] sm:$0xf] %vm5124_vm1, %v4626_v21  ;;  %v11176_v43 = vadd.f32 %v10684_v36, %v2857_v40  ;;  %v5907_v52 = vpack.c.bf16 %v11152_v28, %v11152_v28 }
 0x11a   : > { %v11179_v47 = vadd.f32 %v10684_v36, %v3177_v41  ;;  %5267 = vst.msk [vmem:[%s10693_s28 + $0x238] sm:$0xf] %vm5124_vm1, %v4754_v37  ;;  %v4498_v26 = vmax.f32 %v11195_v60, 0.0  ;;  %v5651_v41 = vpack.c.bf16 %v11139_v20, %v11139_v20 }
 0x11b   : > { %v4882_v39 = vpack.c.bf16 %v4370_v9, %v4370_v9  ;;  %v4115_v58 = vmax.f32 %v11176_v43, 0.0 }
 0x11c   : > { %6683 = vrot.lane.b32.xlu2 %v5648_v5, %s10519_s27  ;;  %7449 = vrot.lane.b32.xlu1 %v6031_v18, %s10519_s27  ;;  %v4243_v59 = vmax.f32 %v11179_v47, 0.0  ;;  %v5010_v6 = vpack.c.bf16 %v4498_v26, %v4498_v26  ;;  %v10209_v5 = vld [vmem:[%s10615_s13 + $0x270] sm:$0xff]  ;;  %v6034_v26 = vpack.c.bf16 %v11119_v50, %v11119_v50 }
 0x11d   : > { %v7174_v33 = vpop.permute.xlu1 %7173  ;;  %7195 = vrot.lane.b32.xlu0 %v5904_v30, %s10519_s27  ;;  %5395 = vst.msk [vmem:[%s10693_s28 + $0x438] sm:$0xf] %vm5124_vm1, %v4882_v39  ;;  %v4627_v45 = vpack.c.bf16 %v4115_v58, %v4115_v58  ;;  %v5650_v30 = vpack.c.bf16 %v11080_v51, %v11080_v51  ;;  %9948 = vmatmul.msk.bf16.gmra.mxu1 %vm2042_vm0, %v10209_v5 }
 0x11e   : > { %8453 = vst.msk [vmem:[%s11027_s6 + $0x400] sm:$0xf] %vm5124_vm1, %v7174_v33  ;;  %v6924_v35 = vpop.permute.xlu2 %6923  ;;  %v3497_v49 = vpop.f32.mrf.mxu2  ;;  %v4755_v62 = vpack.c.bf16 %v4243_v59, %v4243_v59  ;;  %v5778_v33 = vpack.c.bf16 %v11116_v10, %v11116_v10 }
 0x11f   : > { %8328 = vst.msk [vmem:[%s11027_s6 + $0x20c] sm:$0xf] %vm5124_vm1, %v6924_v35  ;;  %v7430_v38 = vpop.permute.xlu0 %7429  ;;  %v11188_v13 = vadd.f32 %v10684_v36, %v3497_v49  ;;  %v3817_v0 = vpop.f32.mrf.mxu3 }
 0x120   : > { %8581 = vst.msk [vmem:[%s11027_s6 + $0x600] sm:$0xf] %vm5124_vm1, %v7430_v38  ;;  %v2860_v2 = vpop.f32.mrf.mxu0  ;;  %v11223_v44 = vadd.f32 %v10684_v36, %v3817_v0 }
 0x121   : > { %v4371_v15 = vmax.f32 %v11188_v13, 0.0  ;;  %v11215_v7 = vadd.f32 %v10684_v36, %v2860_v2  ;;  %5140 = vst.msk [vmem:[%s10693_s28 + $0x3c] sm:$0xf] %vm5124_vm1, %v4627_v45  ;;  %v3180_v4 = vpop.f32.mrf.mxu1  ;;  %v6035_v2 = vpack.c.bf16 %v11195_v60, %v11195_v60  ;;  %v5652_v60 = vpack.c.bf16 %v11176_v43, %v11176_v43 }
 0x122   : > { %5268 = vst.msk [vmem:[%s10693_s28 + $0x23c] sm:$0xf] %vm5124_vm1, %v4755_v62  ;;  %v4499_v12 = vmax.f32 %v11223_v44, 0.0  ;;  %v11254_v24 = vadd.f32 %v11248_v19, %v3180_v4 }
 0x123   : > { %v4883_v1 = vpack.c.bf16 %v4371_v15, %v4371_v15  ;;  %v4116_v46 = vmax.f32 %v11215_v7, 0.0  ;;  %5523 = vst.msk [vmem:[%s10693_s28 + $0x638] sm:$0xf] %vm5124_vm1, %v5010_v6  ;;  %v10274_v15 = vld [vmem:[%s10615_s13 + $0x478] sm:$0xff]  ;;  %10077 = vmatmul.msk.bf16.gmra.mxu3 %vm2042_vm0, %v10338_v8 }
 0x124   : > { %7451 = vrot.lane.b32.xlu2 %v6032_v55, %s10519_s27  ;;  %6939 = vrot.lane.b32.xlu1 %v5776_v53, %s10519_s27  ;;  %v5011_v14 = vpack.c.bf16 %v4499_v12, %v4499_v12  ;;  %v4244_v21 = vmax.f32 %v11254_v24, 0.0 }
 0x125   : > { %6685 = vrot.lane.b32.xlu0 %v5649_v42, %s10519_s27  ;;  %5396 = vst.msk [vmem:[%s10693_s28 + $0x43c] sm:$0xf] %vm5124_vm1, %v4883_v1  ;;  %v4628_v16 = vpack.c.bf16 %v4116_v46, %v4116_v46  ;;  %v5779_v1 = vpack.c.bf16 %v11142_v22, %v11142_v22  ;;  %9885 = vmatmul.msk.bf16.gmra.mxu0 %vm2042_vm0, %v10146_v11  ;;  %v10339_v11 = vld [vmem:[%s10615_s13 + $0x680] sm:$0xff] }
 0x126   : > { %v7432_v54 = vpop.permute.xlu1 %7431  ;;  %v6670_v34 = vpop.permute.xlu2 %6669  ;;  %5524 = vst.msk [vmem:[%s10693_s28 + $0x63c] sm:$0xf] %vm5124_vm1, %v5011_v14  ;;  %v4756_v40 = vpack.c.bf16 %v4244_v21, %v4244_v21  ;;  %10013 = vmatmul.msk.bf16.gmra.mxu2 %vm2042_vm0, %v10274_v15  ;;  %v6036_v21 = vpack.c.bf16 %v11223_v44, %v11223_v44 }
 0x127   : > { %8582 = vst.msk [vmem:[%s11027_s6 + $0x604] sm:$0xf] %vm5124_vm1, %v7432_v54  ;;  %v6664_v61 = vpop.permute.xlu0 %6663  ;;  %v3500_v25 = vpop.f32.mrf.mxu2 }
 0x128   : > { %8201 = vst.msk [vmem:[%s11027_s6 + $0x10] sm:$0xf] %vm5124_vm1, %v6670_v34  ;;  %v2862_v18 = vpop.f32.mrf.mxu0  ;;  %v3820_v27 = vpop.f32.mrf.mxu3  ;;  %v11264_v29 = vadd.f32 %v11248_v19, %v3500_v25 }
 0x129   : > { %8198 = vst.msk [vmem:[%s11027_s6 + $0x4] sm:$0xf] %vm5124_vm1, %v6664_v61  ;;  %v11251_v23 = vadd.f32 %v11248_v19, %v2862_v18  ;;  %v11267_v9 = vadd.f32 %v11248_v19, %v3820_v27  ;;  %v3182_v49 = vpop.f32.mrf.mxu1 }
 0x12a   : > { %5141 = vst.msk [vmem:[%s10693_s28 + $0x40] sm:$0xf] %vm5124_vm1, %v4628_v16  ;;  %v4372_v57 = vmax.f32 %v11264_v29, 0.0  ;;  %v11292_v55 = vadd.f32 %v11248_v19, %v3182_v49 }
 0x12b   : > { %v4117_v51 = vmax.f32 %v11251_v23, 0.0  ;;  %v4500_v10 = vmax.f32 %v11267_v9, 0.0  ;;  %5269 = vst.msk [vmem:[%s10693_s28 + $0x240] sm:$0xf] %vm5124_vm1, %v4756_v40  ;;  %v5654_v8 = vpack.c.bf16 %v11251_v23, %v11251_v23 }
 0x12c   : > { %6941 = vrot.lane.b32.xlu2 %v5777_v63, %s10519_s27  ;;  %7197 = vrot.lane.b32.xlu1 %v5905_v48, %s10519_s27  ;;  %v4884_v42 = vpack.c.bf16 %v4372_v57, %v4372_v57  ;;  %v4245_v54 = vmax.f32 %v11292_v55, 0.0 }
 0x12d   : > { %7453 = vrot.lane.b32.xlu0 %v6033_v3, %s10519_s27  ;;  %v4629_v38 = vpack.c.bf16 %v4117_v51, %v4117_v51  ;;  %v5012_v53 = vpack.c.bf16 %v4500_v10, %v4500_v10 }
 0x12e   : > { %v7182_v36 = vpop.permute.xlu2 %7181  ;;  %v6666_v56 = vpop.permute.xlu1 %6665  ;;  %5397 = vst.msk [vmem:[%s10693_s28 + $0x440] sm:$0xf] %vm5124_vm1, %v4884_v42  ;;  %v4757_v62 = vpack.c.bf16 %v4245_v54, %v4245_v54  ;;  %v5909_v42 = vpack.c.bf16 %v11264_v29, %v11264_v29 }
 0x12f   : > { %8457 = vst.msk [vmem:[%s11027_s6 + $0x410] sm:$0xf] %vm5124_vm1, %v7182_v36  ;;  %v6920_v17 = vpop.permute.xlu0 %6919  ;;  %v3502_v58 = vpop.f32.mrf.mxu2 }
 0x130   : > { %8199 = vst.msk [vmem:[%s11027_s6 + $0x8] sm:$0xf] %vm5124_vm1, %v6666_v56  ;;  %v3822_v59 = vpop.f32.mrf.mxu3  ;;  %v11300_v20 = vadd.f32 %v11248_v19, %v3502_v58 }
 0x131   : > { %8326 = vst.msk [vmem:[%s11027_s6 + $0x204] sm:$0xf] %vm5124_vm1, %v6920_v17  ;;  %v11303_v28 = vadd.f32 %v11248_v19, %v3822_v59  ;;  %v2865_v6 = vpop.f32.mrf.mxu0 }
 0x132   : > { %5142 = vst.msk [vmem:[%s10693_s28 + $0x44] sm:$0xf] %vm5124_vm1, %v4629_v38  ;;  %v4373_v50 = vmax.f32 %v11300_v20, 0.0  ;;  %v11329_v0 = vadd.f32 %v11248_v19, %v2865_v6  ;;  %v10147_v6 = vld [vmem:[%s10615_s13 + $0x80] sm:$0xff] }
 0x133   : > { %v4501_v34 = vmax.f32 %v11303_v28, 0.0  ;;  %5525 = vst.msk [vmem:[%s10693_s28 + $0x640] sm:$0xf] %vm5124_vm1, %v5012_v53  ;;  %v3185_v18 = vpop.f32.mrf.mxu1  ;;  %v5781_v53 = vpack.c.bf16 %v11254_v24, %v11254_v24  ;;  %10078 = vmatmul.msk.bf16.gmra.mxu3 %vm2042_vm0, %v10339_v11 }
 0x134   : > { %7199 = vrot.lane.b32.xlu2 %v5906_v31, %s10519_s27  ;;  %6687 = vrot.lane.b32.xlu1 %v5650_v30, %s10519_s27  ;;  %v4885_v63 = vpack.c.bf16 %v4373_v50, %v4373_v50  ;;  %5270 = vst.msk [vmem:[%s10693_s28 + $0x244] sm:$0xf] %vm5124_vm1, %v4757_v62  ;;  %v4118_v46 = vmax.f32 %v11329_v0, 0.0  ;;  %v11361_v25 = vadd.f32 %v11248_v19, %v3185_v18  ;;  %v10210_v30 = vld [vmem:[%s10615_s13 + $0x278] sm:$0xff] }
 0x135   : > { %6943 = vrot.lane.b32.xlu0 %v5778_v33, %s10519_s27  ;;  %v5013_v3 = vpack.c.bf16 %v4501_v34, %v4501_v34  ;;  %v5780_v31 = vpack.c.bf16 %v11179_v47, %v11179_v47  ;;  %v5908_v33 = vpack.c.bf16 %v11188_v13, %v11188_v13  ;;  %9949 = vmatmul.msk.bf16.gmra.mxu1 %vm2042_vm0, %v10210_v30 }
 0x136   : > { %v6672_v35 = vpop.permute.xlu2 %6671  ;;  %v6922_v37 = vpop.permute.xlu1 %6921  ;;  %5398 = vst.msk [vmem:[%s10693_s28 + $0x444] sm:$0xf] %vm5124_vm1, %v4885_v63  ;;  %v4630_v56 = vpack.c.bf16 %v4118_v46, %v4118_v46  ;;  %v4246_v10 = vmax.f32 %v11361_v25, 0.0  ;;  %v6037_v62 = vpack.c.bf16 %v11267_v9, %v11267_v9  ;;  %9886 = vmatmul.msk.bf16.gmra.mxu0 %vm2042_vm0, %v10147_v6 }
 0x137   : > { %8202 = vst.msk [vmem:[%s11027_s6 + $0x14] sm:$0xf] %vm5124_vm1, %v6672_v35  ;;  %v7178_v39 = vpop.permute.xlu0 %7177  ;;  %v3505_v32 = vpop.f32.mrf.mxu2 }
 0x138   : > { %8327 = vst.msk [vmem:[%s11027_s6 + $0x208] sm:$0xf] %vm5124_vm1, %v6922_v37  ;;  %v11336_v22 = vadd.f32 %v11248_v19, %v3505_v32  ;;  %v3825_v5 = vpop.f32.mrf.mxu3  ;;  %v4758_v40 = vpack.c.bf16 %v4246_v10, %v4246_v10  ;;  %v10211_v32 = vld [vmem:[%s10615_s13 + $0x280] sm:$0xff] }
 0x139   : > { %8455 = vst.msk [vmem:[%s11027_s6 + $0x408] sm:$0xf] %vm5124_vm1, %v7178_v39  ;;  %v2867_v14 = vpop.f32.mrf.mxu0  ;;  %v11380_v47 = vadd.f32 %v11248_v19, %v3825_v5 }
 0x13a   : > { %5526 = vst.msk [vmem:[%s10693_s28 + $0x644] sm:$0xf] %vm5124_vm1, %v5013_v3  ;;  %v4374_v12 = vmax.f32 %v11336_v22, 0.0  ;;  %v11358_v4 = vadd.f32 %v11248_v19, %v2867_v14 }
 0x13b   : > { %5143 = vst.msk [vmem:[%s10693_s28 + $0x48] sm:$0xf] %vm5124_vm1, %v4630_v56  ;;  %v4502_v44 = vmax.f32 %v11380_v47, 0.0 }
 0x13c   : > { %6689 = vrot.lane.b32.xlu2 %v5651_v41, %s10519_s27  ;;  %7455 = vrot.lane.b32.xlu1 %v6034_v26, %s10519_s27  ;;  %v4886_v17 = vpack.c.bf16 %v4374_v12, %v4374_v12  ;;  %v4119_v57 = vmax.f32 %v11358_v4, 0.0  ;;  %v5653_v41 = vpack.c.bf16 %v11215_v7, %v11215_v7  ;;  %v10275_v7 = vld [vmem:[%s10615_s13 + $0x480] sm:$0xff]  ;;  %5271 = vst.msk [vmem:[%s10693_s28 + $0x248] sm:$0xf] %vm5124_vm1, %v4758_v40 }
 0x13d   : > { %7201 = vrot.lane.b32.xlu0 %v5907_v52, %s10519_s27  ;;  %v3187_v52 = vpop.f32.mrf.mxu1  ;;  %v5014_v58 = vpack.c.bf16 %v4502_v44, %v4502_v44  ;;  %10014 = vmatmul.msk.bf16.gmra.mxu2 %vm2042_vm0, %v10275_v7 }
 0x13e   : > { %v7440_v45 = vpop.permute.xlu2 %7439  ;;  %v6668_v61 = vpop.permute.xlu1 %6667  ;;  %5399 = vst.msk [vmem:[%s10693_s28 + $0x448] sm:$0xf] %vm5124_vm1, %v4886_v17  ;;  %v4631_v38 = vpack.c.bf16 %v4119_v57, %v4119_v57  ;;  %v11401_v59 = vadd.f32 %v11248_v19, %v3187_v52  ;;  %v6038_v57 = vpack.c.bf16 %v11303_v28, %v11303_v28 }
 0x13f   : > { %8586 = vst.msk [vmem:[%s11027_s6 + $0x614] sm:$0xf] %vm5124_vm1, %v7440_v45  ;;  %v7436_v48 = vpop.permute.xlu0 %7435  ;;  %v3507_v27 = vpop.f32.mrf.mxu2 }
 0x140   : > { %8200 = vst.msk [vmem:[%s11027_s6 + $0xc] sm:$0xf] %vm5124_vm1, %v6668_v61  ;;  %v11371_v51 = vadd.f32 %v11248_v19, %v3507_v27  ;;  %v3827_v15 = vpop.f32.mrf.mxu3  ;;  %v4247_v24 = vmax.f32 %v11401_v59, 0.0  ;;  %v5655_v27 = vpack.c.bf16 %v11329_v0, %v11329_v0 }
 0x141   : > { %8584 = vst.msk [vmem:[%s11027_s6 + $0x60c] sm:$0xf] %vm5124_vm1, %v7436_v48  ;;  %v11407_v29 = vadd.f32 %v11248_v19, %v3827_v15 }
 0x142   : > { %v4375_v13 = vmax.f32 %v11371_v51, 0.0  ;;  %5144 = vst.msk [vmem:[%s10693_s28 + $0x4c] sm:$0xf] %vm5124_vm1, %v4631_v38  ;;  %v4759_v34 = vpack.c.bf16 %v4247_v24, %v4247_v24  ;;  %v2870_v48 = vpop.f32.mrf.mxu0  ;;  %v10276_v24 = vld [vmem:[%s10615_s13 + $0x488] sm:$0xff] }
 0x143   : > { %v4503_v26 = vmax.f32 %v11407_v29, 0.0  ;;  %5527 = vst.msk [vmem:[%s10693_s28 + $0x648] sm:$0xf] %vm5124_vm1, %v5014_v58 }
 0x144   : > { %7457 = vrot.lane.b32.xlu2 %v6035_v2, %s10519_s27  ;;  %6945 = vrot.lane.b32.xlu1 %v5779_v1, %s10519_s27  ;;  %v4887_v49 = vpack.c.bf16 %v4375_v13, %v4375_v13  ;;  %v11430_v1 = vadd.f32 %v11248_v19, %v2870_v48  ;;  %5272 = vst.msk [vmem:[%s10693_s28 + $0x24c] sm:$0xf] %vm5124_vm1, %v4759_v34 }
 0x145   : > { %6691 = vrot.lane.b32.xlu0 %v5652_v60, %s10519_s27  ;;  %v5015_v61 = vpack.c.bf16 %v4503_v26, %v4503_v26  ;;  %v3190_v63 = vpop.f32.mrf.mxu1  ;;  %v5910_v60 = vpack.c.bf16 %v11300_v20, %v11300_v20  ;;  %9950 = vmatmul.msk.bf16.gmra.mxu1 %vm2042_vm0, %v10211_v32  ;;  %v10340_v26 = vld [vmem:[%s10615_s13 + $0x688] sm:$0xff] }
 0x146   : > { %v6930_v43 = vpop.permute.xlu2 %6929  ;;  %v7180_v36 = vpop.permute.xlu1 %7179  ;;  %5400 = vst.msk [vmem:[%s10693_s28 + $0x44c] sm:$0xf] %vm5124_vm1, %v4887_v49  ;;  %v11433_v2 = vadd.f32 %v11248_v19, %v3190_v63  ;;  %v4120_v46 = vmax.f32 %v11430_v1, 0.0  ;;  %10079 = vmatmul.msk.bf16.gmra.mxu3 %vm2042_vm0, %v10340_v26  ;;  %v10341_v26 = vld [vmem:[%s10615_s13 + $0x690] sm:$0xff] }
 0x147   : > { %8331 = vst.msk [vmem:[%s11027_s6 + $0x218] sm:$0xf] %vm5124_vm1, %v6930_v43  ;;  %v6926_v16 = vpop.permute.xlu0 %6925  ;;  %v3510_v3 = vpop.f32.mrf.mxu2 }
 0x148   : > { %8456 = vst.msk [vmem:[%s11027_s6 + $0x40c] sm:$0xf] %vm5124_vm1, %v7180_v36  ;;  %v11443_v9 = vadd.f32 %v11248_v19, %v3510_v3  ;;  %v4248_v12 = vmax.f32 %v11433_v2, 0.0  ;;  %v4632_v36 = vpack.c.bf16 %v4120_v46, %v4120_v46  ;;  %v5912_v46 = vpack.c.bf16 %v11371_v51, %v11371_v51 }
 0x149   : > { %8329 = vst.msk [vmem:[%s11027_s6 + $0x210] sm:$0xf] %vm5124_vm1, %v6926_v16 }
 0x14a   : > { %5528 = vst.msk [vmem:[%s10693_s28 + $0x64c] sm:$0xf] %vm5124_vm1, %v5015_v61  ;;  %v4376_v23 = vmax.f32 %v11443_v9, 0.0  ;;  %v4760_v16 = vpack.c.bf16 %v4248_v12, %v4248_v12  ;;  %v2872_v14 = vpop.f32.mrf.mxu0 }
 0x14b   : > { %v11467_v5 = vadd.f32 %v11248_v19, %v2872_v14  ;;  %5145 = vst.msk [vmem:[%s10693_s28 + $0x50] sm:$0xf] %vm5124_vm1, %v4632_v36 }
 0x14c   : > { %6947 = vrot.lane.b32.xlu2 %v5780_v31, %s10519_s27  ;;  %7203 = vrot.lane.b32.xlu1 %v5908_v33, %s10519_s27  ;;  %v4888_v17 = vpack.c.bf16 %v4376_v23, %v4376_v23  ;;  %v3830_v33 = vpop.f32.mrf.mxu3  ;;  %5273 = vst.msk [vmem:[%s10693_s28 + $0x250] sm:$0xf] %vm5124_vm1, %v4760_v16 }
 0x14d   : > { %7459 = vrot.lane.b32.xlu0 %v6036_v21, %s10519_s27  ;;  %v3192_v18 = vpop.f32.mrf.mxu1  ;;  %v5782_v21 = vpack.c.bf16 %v11292_v55, %v11292_v55  ;;  %v4121_v10 = vmax.f32 %v11467_v5, 0.0  ;;  %v11486_v44 = vadd.f32 %v11248_v19, %v3830_v33  ;;  %10015 = vmatmul.msk.bf16.gmra.mxu2 %vm2042_vm0, %v10276_v24  ;;  %v5913_v33 = vpack.c.bf16 %v11443_v9, %v11443_v9  ;;  %v10149_v24 = vld [vmem:[%s10615_s13 + $0x90] sm:$0xff] }
 0x14e   : > { %v7188_v35 = vpop.permute.xlu2 %7187  ;;  %v7438_v37 = vpop.permute.xlu1 %7437  ;;  %v11470_v30 = vadd.f32 %v11248_v19, %v3192_v18  ;;  %5401 = vst.msk [vmem:[%s10693_s28 + $0x450] sm:$0xf] %vm5124_vm1, %v4888_v17  ;;  %v5657_v18 = vpack.c.bf16 %v11430_v1, %v11430_v1 }
 0x14f   : > { %8460 = vst.msk [vmem:[%s11027_s6 + $0x41c] sm:$0xf] %vm5124_vm1, %v7188_v35  ;;  %v7184_v39 = vpop.permute.xlu0 %7183  ;;  %v3512_v31 = vpop.f32.mrf.mxu2  ;;  %v4504_v28 = vmax.f32 %v11486_v44, 0.0  ;;  %v4633_v38 = vpack.c.bf16 %v4121_v10, %v4121_v10 }
 0x150   : > { %8585 = vst.msk [vmem:[%s11027_s6 + $0x610] sm:$0xf] %vm5124_vm1, %v7438_v37  ;;  %v11479_v0 = vadd.f32 %v11248_v19, %v3512_v31  ;;  %v4249_v13 = vmax.f32 %v11470_v30, 0.0 }
 0x151   : > { %8458 = vst.msk [vmem:[%s11027_s6 + $0x414] sm:$0xf] %vm5124_vm1, %v7184_v39  ;;  %v5016_v58 = vpack.c.bf16 %v4504_v28, %v4504_v28  ;;  %v6040_v28 = vpack.c.bf16 %v11407_v29, %v11407_v29 }
 0x152   : > { %v4377_v55 = vmax.f32 %v11479_v0, 0.0  ;;  %v4761_v40 = vpack.c.bf16 %v4249_v13, %v4249_v13  ;;  %v2875_v52 = vpop.f32.mrf.mxu0  ;;  %5146 = vst.msk [vmem:[%s10693_s28 + $0x54] sm:$0xf] %vm5124_vm1, %v4633_v38 }
 0x153   : > { %v11508_v15 = vadd.f32 %v11248_v19, %v2875_v52  ;;  %5529 = vst.msk [vmem:[%s10693_s28 + $0x650] sm:$0xf] %vm5124_vm1, %v5016_v58  ;;  %v6041_v52 = vpack.c.bf16 %v11486_v44, %v11486_v44  ;;  %v5658_v44 = vpack.c.bf16 %v11467_v5, %v11467_v5 }
 0x154   : > { %7205 = vrot.lane.b32.xlu2 %v5909_v42, %s10519_s27  ;;  %6693 = vrot.lane.b32.xlu1 %v5653_v41, %s10519_s27  ;;  %v5911_v41 = vpack.c.bf16 %v11336_v22, %v11336_v22  ;;  %v5783_v42 = vpack.c.bf16 %v11361_v25, %v11361_v25  ;;  %v4889_v49 = vpack.c.bf16 %v4377_v55, %v4377_v55  ;;  %v3832_v7 = vpop.f32.mrf.mxu3  ;;  %v10148_v22 = vld [vmem:[%s10615_s13 + $0x88] sm:$0xff]  ;;  %v10277_v55 = vld [vmem:[%s10615_s13 + $0x490] sm:$0xff] }
 0x155   : > { %6949 = vrot.lane.b32.xlu0 %v5781_v53, %s10519_s27  ;;  %v6039_v53 = vpack.c.bf16 %v11380_v47, %v11380_v47  ;;  %v11516_v25 = vadd.f32 %v11248_v19, %v3832_v7  ;;  %5274 = vst.msk [vmem:[%s10693_s28 + $0x254] sm:$0xf] %vm5124_vm1, %v4761_v40  ;;  %v4122_v47 = vmax.f32 %v11508_v15, 0.0  ;;  %9887 = vmatmul.msk.bf16.gmra.mxu0 %vm2042_vm0, %v10148_v22  ;;  %v3195_v63 = vpop.f32.mrf.mxu1 }
 0x156   : > { %v6678_v54 = vpop.permute.xlu2 %6677  ;;  %v6928_v50 = vpop.permute.xlu1 %6927  ;;  %5402 = vst.msk [vmem:[%s10693_s28 + $0x454] sm:$0xf] %vm5124_vm1, %v4889_v49  ;;  %v11542_v6 = vadd.f32 %v11248_v19, %v3195_v63  ;;  %v5785_v49 = vpack.c.bf16 %v11433_v2, %v11433_v2  ;;  %10080 = vmatmul.msk.bf16.gmra.mxu3 %vm2042_vm0, %v10341_v26 }
 0x157   : > { %8205 = vst.msk [vmem:[%s11027_s6 + $0x20] sm:$0xf] %vm5124_vm1, %v6678_v54  ;;  %v6674_v45 = vpop.permute.xlu0 %6673  ;;  %v4505_v54 = vmax.f32 %v11516_v25, 0.0  ;;  %v3515_v32 = vpop.f32.mrf.mxu2 }
 0x158   : > { %8330 = vst.msk [vmem:[%s11027_s6 + $0x214] sm:$0xf] %vm5124_vm1, %v6928_v50  ;;  %v11552_v12 = vadd.f32 %v11248_v19, %v3515_v32 }
 0x159   : > { %8203 = vst.msk [vmem:[%s11027_s6 + $0x18] sm:$0xf] %vm5124_vm1, %v6674_v45  ;;  %v4634_v45 = vpack.c.bf16 %v4122_v47, %v4122_v47 }
 0x15a   : > { %v2877_v48 = vpop.f32.mrf.mxu0  ;;  %v4378_v51 = vmax.f32 %v11552_v12, 0.0 }
 0x15b   : > { %v11539_v3 = vadd.f32 %v11248_v19, %v2877_v48  ;;  %5147 = vst.msk [vmem:[%s10693_s28 + $0x58] sm:$0xf] %vm5124_vm1, %v4634_v45 }
 0x15c   : > { %6695 = vrot.lane.b32.xlu2 %v5654_v8, %s10519_s27  ;;  %7461 = vrot.lane.b32.xlu1 %v6037_v62, %s10519_s27  ;;  %v5017_v62 = vpack.c.bf16 %v4505_v54, %v4505_v54  ;;  %v3835_v11 = vpop.f32.mrf.mxu3  ;;  %v10212_v8 = vld [vmem:[%s10615_s13 + $0x288] sm:$0xff] }
 0x15d   : > { %7207 = vrot.lane.b32.xlu0 %v5910_v60, %s10519_s27  ;;  %v5656_v60 = vpack.c.bf16 %v11358_v4, %v11358_v4  ;;  %v11555_v23 = vadd.f32 %v11248_v19, %v3835_v11  ;;  %v4123_v4 = vmax.f32 %v11539_v3, 0.0  ;;  %9951 = vmatmul.msk.bf16.gmra.mxu1 %vm2042_vm0, %v10212_v8  ;;  %v3197_v31 = vpop.f32.mrf.mxu1  ;;  %v5660_v26 = vpack.c.bf16 %v11539_v3, %v11539_v3 }
 0x15e   : > { %v7446_v20 = vpop.permute.xlu2 %7445  ;;  %v7186_v43 = vpop.permute.xlu1 %7185  ;;  %5530 = vst.msk [vmem:[%s10693_s28 + $0x654] sm:$0xf] %vm5124_vm1, %v5017_v62  ;;  %10016 = vmatmul.msk.bf16.gmra.mxu2 %vm2042_vm0, %v10277_v55 }
 0x15f   : > { %8589 = vst.msk [vmem:[%s11027_s6 + $0x620] sm:$0xf] %vm5124_vm1, %v7446_v20  ;;  %v7442_v56 = vpop.permute.xlu0 %7441  ;;  %v5784_v20 = vpack.c.bf16 %v11401_v59, %v11401_v59  ;;  %v4506_v59 = vmax.f32 %v11555_v23, 0.0  ;;  %v4635_v16 = vpack.c.bf16 %v4123_v4, %v4123_v4  ;;  %v3517_v10 = vpop.f32.mrf.mxu2 }
 0x160   : > { %8459 = vst.msk [vmem:[%s11027_s6 + $0x418] sm:$0xf] %vm5124_vm1, %v7186_v43  ;;  %v4250_v43 = vmax.f32 %v11542_v6, 0.0  ;;  %v11588_v1 = vadd.f32 %v11248_v19, %v3517_v10 }
 0x161   : > { %8587 = vst.msk [vmem:[%s11027_s6 + $0x618] sm:$0xf] %vm5124_vm1, %v7442_v56 }
 0x162   : > { %v4762_v14 = vpack.c.bf16 %v4250_v43, %v4250_v43  ;;  %5148 = vst.msk [vmem:[%s10693_s28 + $0x5c] sm:$0xf] %vm5124_vm1, %v4635_v16  ;;  %v4379_v29 = vmax.f32 %v11588_v1, 0.0  ;;  %v6042_v43 = vpack.c.bf16 %v11516_v25, %v11516_v25 }
 0x164   : > { %7463 = vrot.lane.b32.xlu2 %v6038_v57, %s10519_s27  ;;  %6951 = vrot.lane.b32.xlu1 %v5782_v21, %s10519_s27  ;;  %v5018_v21 = vpack.c.bf16 %v4506_v59, %v4506_v59  ;;  %v11580_v57 = vadd.f32 %v11248_v19, %v3197_v31  ;;  %v3837_v13 = vpop.f32.mrf.mxu3  ;;  %5275 = vst.msk [vmem:[%s10693_s28 + $0x258] sm:$0xf] %vm5124_vm1, %v4762_v14 }
 0x165   : > { %6697 = vrot.lane.b32.xlu0 %v5655_v27, %s10519_s27  ;;  %v4890_v27 = vpack.c.bf16 %v4378_v51, %v4378_v51  ;;  %v11591_v9 = vadd.f32 %v11248_v19, %v3837_v13  ;;  %9888 = vmatmul.msk.bf16.gmra.mxu0 %vm2042_vm0, %v10149_v24  ;;  %v10342_v24 = vld [vmem:[%s10615_s13 + $0x698] sm:$0xff] }
 0x166   : > { %v6936_v35 = vpop.permute.xlu2 %6935  ;;  %v6676_v37 = vpop.permute.xlu1 %6675  ;;  %5531 = vst.msk [vmem:[%s10693_s28 + $0x658] sm:$0xf] %vm5124_vm1, %v5018_v21  ;;  %v5787_v21 = vpack.c.bf16 %v11542_v6, %v11542_v6  ;;  %10081 = vmatmul.msk.bf16.gmra.mxu3 %vm2042_vm0, %v10342_v24 }
 0x167   : > { %8334 = vst.msk [vmem:[%s11027_s6 + $0x224] sm:$0xf] %vm5124_vm1, %v6936_v35  ;;  %v6932_v39 = vpop.permute.xlu0 %6931  ;;  %v4251_v35 = vmax.f32 %v11580_v57, 0.0  ;;  %v2880_v58 = vpop.f32.mrf.mxu0 }
 0x168   : > { %8204 = vst.msk [vmem:[%s11027_s6 + $0x1c] sm:$0xf] %vm5124_vm1, %v6676_v37  ;;  %v4507_v37 = vmax.f32 %v11591_v9, 0.0  ;;  %v11617_v7 = vadd.f32 %v11248_v19, %v2880_v58  ;;  %v10150_v58 = vld [vmem:[%s10615_s13 + $0x98] sm:$0xff] }
 0x169   : > { %8332 = vst.msk [vmem:[%s11027_s6 + $0x21c] sm:$0xf] %vm5124_vm1, %v6932_v39  ;;  %v4763_v40 = vpack.c.bf16 %v4251_v35, %v4251_v35  ;;  %v3520_v22 = vpop.f32.mrf.mxu2 }
 0x16a   : > { %5403 = vst.msk [vmem:[%s10693_s28 + $0x458] sm:$0xf] %vm5124_vm1, %v4890_v27  ;;  %v11624_v2 = vadd.f32 %v11248_v19, %v3520_v22  ;;  %v4124_v47 = vmax.f32 %v11617_v7, 0.0  ;;  %v5915_v27 = vpack.c.bf16 %v11552_v12, %v11552_v12  ;;  %v10214_v22 = vld [vmem:[%s10615_s13 + $0x298] sm:$0xff] }
 0x16b   : > { %5276 = vst.msk [vmem:[%s10693_s28 + $0x25c] sm:$0xf] %vm5124_vm1, %v4763_v40  ;;  %v6043_v40 = vpack.c.bf16 %v11555_v23, %v11555_v23 }
 0x16c   : > { %6953 = vrot.lane.b32.xlu2 %v5783_v42, %s10519_s27  ;;  %7209 = vrot.lane.b32.xlu1 %v5911_v41, %s10519_s27  ;;  %v4891_v42 = vpack.c.bf16 %v4379_v29, %v4379_v29  ;;  %v4380_v54 = vmax.f32 %v11624_v2, 0.0 }
 0x16d   : > { %7465 = vrot.lane.b32.xlu0 %v6039_v53, %s10519_s27  ;;  %v5019_v53 = vpack.c.bf16 %v4507_v37, %v4507_v37 }
 0x16e   : > { %v7194_v50 = vpop.permute.xlu2 %7193  ;;  %v7444_v34 = vpop.permute.xlu1 %7443  ;;  %5404 = vst.msk [vmem:[%s10693_s28 + $0x45c] sm:$0xf] %vm5124_vm1, %v4891_v42 }
 0x16f   : > { %8463 = vst.msk [vmem:[%s11027_s6 + $0x428] sm:$0xf] %vm5124_vm1, %v7194_v50  ;;  %v7190_v61 = vpop.permute.xlu0 %7189  ;;  %v2882_v62 = vpop.f32.mrf.mxu0 }
 0x170   : > { %8588 = vst.msk [vmem:[%s11027_s6 + $0x61c] sm:$0xf] %vm5124_vm1, %v7444_v34  ;;  %v4636_v34 = vpack.c.bf16 %v4124_v47, %v4124_v47  ;;  %v3200_v48 = vpop.f32.mrf.mxu1  ;;  %v11646_v63 = vadd.f32 %v11248_v19, %v2882_v62 }
 0x171   : > { %8461 = vst.msk [vmem:[%s11027_s6 + $0x420] sm:$0xf] %vm5124_vm1, %v7190_v61  ;;  %v4892_v61 = vpack.c.bf16 %v4380_v54, %v4380_v54  ;;  %v11649_v32 = vadd.f32 %v11248_v19, %v3200_v48  ;;  %v3522_v11 = vpop.f32.mrf.mxu2  ;;  %v3840_v8 = vpop.f32.mrf.mxu3 }
 0x172   : > { %5532 = vst.msk [vmem:[%s10693_s28 + $0x65c] sm:$0xf] %vm5124_vm1, %v5019_v53  ;;  %v11659_v4 = vadd.f32 %v11248_v19, %v3522_v11  ;;  %v4125_v51 = vmax.f32 %v11646_v63, 0.0  ;;  %v5661_v11 = vpack.c.bf16 %v11617_v7, %v11617_v7 }
 0x173   : > { %5149 = vst.msk [vmem:[%s10693_s28 + $0x60] sm:$0xf] %vm5124_vm1, %v4636_v34  ;;  %v4252_v59 = vmax.f32 %v11649_v32, 0.0 }
 0x174   : > { %7211 = vrot.lane.b32.xlu2 %v5912_v46, %s10519_s27  ;;  %6699 = vrot.lane.b32.xlu1 %v5656_v60, %s10519_s27  ;;  %v10213_v60 = vld [vmem:[%s10615_s13 + $0x290] sm:$0xff]  ;;  %v5786_v46 = vpack.c.bf16 %v11470_v30, %v11470_v30  ;;  %5405 = vst.msk [vmem:[%s10693_s28 + $0x460] sm:$0xf] %vm5124_vm1, %v4892_v61  ;;  %v11668_v30 = vadd.f32 %v11248_v19, %v3840_v8 }
 0x175   : > { %6955 = vrot.lane.b32.xlu0 %v5784_v20, %s10519_s27  ;;  %v5914_v20 = vpack.c.bf16 %v11479_v0, %v11479_v0  ;;  %9952 = vmatmul.msk.bf16.gmra.mxu1 %vm2042_vm0, %v10213_v60  ;;  %v4381_v0 = vmax.f32 %v11659_v4, 0.0  ;;  %v4637_v16 = vpack.c.bf16 %v4125_v51, %v4125_v51  ;;  %v4764_v14 = vpack.c.bf16 %v4252_v59, %v4252_v59 }
 0x176   : > { %v6684_v36 = vpop.permute.xlu2 %6683  ;;  %v6934_v56 = vpop.permute.xlu1 %6933  ;;  %v4508_v25 = vmax.f32 %v11668_v30, 0.0  ;;  %9889 = vmatmul.msk.bf16.gmra.mxu0 %vm2042_vm0, %v10150_v58  ;;  %v6044_v51 = vpack.c.bf16 %v11591_v9, %v11591_v9 }
 0x177   : > { %8208 = vst.msk [vmem:[%s11027_s6 + $0x2c] sm:$0xf] %vm5124_vm1, %v6684_v36  ;;  %v6680_v17 = vpop.permute.xlu0 %6679  ;;  %v4893_v31 = vpack.c.bf16 %v4381_v0, %v4381_v0 }
 0x178   : > { %8333 = vst.msk [vmem:[%s11027_s6 + $0x220] sm:$0xf] %vm5124_vm1, %v6934_v56  ;;  %v5020_v10 = vpack.c.bf16 %v4508_v25, %v4508_v25 }
 0x179   : > { %8206 = vst.msk [vmem:[%s11027_s6 + $0x24] sm:$0xf] %vm5124_vm1, %v6680_v17  ;;  %v3842_v55 = vpop.f32.mrf.mxu3 }
 0x17a   : > { %5150 = vst.msk [vmem:[%s10693_s28 + $0x64] sm:$0xf] %vm5124_vm1, %v4637_v16  ;;  %v11695_v12 = vadd.f32 %v11248_v19, %v3842_v55 }
 0x17b   : > { %5277 = vst.msk [vmem:[%s10693_s28 + $0x260] sm:$0xf] %vm5124_vm1, %v4764_v14 }
 0x17c   : > { %6701 = vrot.lane.b32.xlu2 %v5657_v18, %s10519_s27  ;;  %7467 = vrot.lane.b32.xlu1 %v6040_v28, %s10519_s27  ;;  %v5659_v18 = vpack.c.bf16 %v11508_v15, %v11508_v15  ;;  %v10278_v15 = vld [vmem:[%s10615_s13 + $0x498] sm:$0xff]  ;;  %5406 = vst.msk [vmem:[%s10693_s28 + $0x464] sm:$0xf] %vm5124_vm1, %v4893_v31  ;;  %v4509_v28 = vmax.f32 %v11695_v12, 0.0 }
 0x17d   : > { %7213 = vrot.lane.b32.xlu0 %v5913_v33, %s10519_s27  ;;  %v3202_v33 = vpop.f32.mrf.mxu1  ;;  %10017 = vmatmul.msk.bf16.gmra.mxu2 %vm2042_vm0, %v10278_v15  ;;  %5533 = vst.msk [vmem:[%s10693_s28 + $0x660] sm:$0xf] %vm5124_vm1, %v5020_v10  ;;  %v3525_v53 = vpop.f32.mrf.mxu2 }
 0x17e   : > { %v7452_v38 = vpop.permute.xlu2 %7451  ;;  %v7192_v39 = vpop.permute.xlu1 %7191  ;;  %v11689_v13 = vadd.f32 %v11248_v19, %v3202_v33  ;;  %v11731_v23 = vadd.f32 %v11248_v19, %v3525_v53 }
 0x17f   : > { %8592 = vst.msk [vmem:[%s11027_s6 + $0x62c] sm:$0xf] %vm5124_vm1, %v7452_v38  ;;  %v7448_v41 = vpop.permute.xlu0 %7447 }
 0x180   : > { %8462 = vst.msk [vmem:[%s11027_s6 + $0x424] sm:$0xf] %vm5124_vm1, %v7192_v39  ;;  %v4253_v6 = vmax.f32 %v11689_v13, 0.0  ;;  %v5021_v39 = vpack.c.bf16 %v4509_v28, %v4509_v28  ;;  %v4382_v3 = vmax.f32 %v11731_v23, 0.0  ;;  %v10343_v28 = vld [vmem:[%s10615_s13 + $0x6a0] sm:$0xff] }
 0x181   : > { %8590 = vst.msk [vmem:[%s11027_s6 + $0x624] sm:$0xf] %vm5124_vm1, %v7448_v41  ;;  %10082 = vmatmul.msk.bf16.gmra.mxu3 %vm2042_vm0, %v10343_v28  ;;  %v10344_v28 = vld [vmem:[%s10615_s13 + $0x6a8] sm:$0xff] }
 0x182   : > { %v4765_v37 = vpack.c.bf16 %v4253_v6, %v4253_v6  ;;  %v2885_v41 = vpop.f32.mrf.mxu0  ;;  %5534 = vst.msk [vmem:[%s10693_s28 + $0x664] sm:$0xf] %vm5124_vm1, %v5021_v39  ;;  %v4894_v61 = vpack.c.bf16 %v4382_v3, %v4382_v3  ;;  %v10279_v6 = vld [vmem:[%s10615_s13 + $0x4a0] sm:$0xff] }
 0x184   : > { %7469 = vrot.lane.b32.xlu2 %v6041_v52, %s10519_s27  ;;  %6957 = vrot.lane.b32.xlu1 %v5785_v49, %s10519_s27  ;;  %v11718_v49 = vadd.f32 %v11248_v19, %v2885_v41  ;;  %5278 = vst.msk [vmem:[%s10693_s28 + $0x264] sm:$0xf] %vm5124_vm1, %v4765_v37 }
 0x185   : > { %6703 = vrot.lane.b32.xlu0 %v5658_v44, %s10519_s27  ;;  %v3205_v42 = vpop.f32.mrf.mxu1  ;;  %v5916_v44 = vpack.c.bf16 %v11588_v1, %v11588_v1  ;;  %9953 = vmatmul.msk.bf16.gmra.mxu1 %vm2042_vm0, %v10214_v22  ;;  %5407 = vst.msk [vmem:[%s10693_s28 + $0x468] sm:$0xf] %vm5124_vm1, %v4894_v61 }
 0x186   : > { %v6942_v5 = vpop.permute.xlu2 %6941  ;;  %v6682_v50 = vpop.permute.xlu1 %6681  ;;  %v11721_v52 = vadd.f32 %v11248_v19, %v3205_v42  ;;  %v4126_v47 = vmax.f32 %v11718_v49, 0.0 }
 0x187   : > { %8337 = vst.msk [vmem:[%s11027_s6 + $0x230] sm:$0xf] %vm5124_vm1, %v6942_v5  ;;  %v6938_v45 = vpop.permute.xlu0 %6937 }
 0x188   : > { %8207 = vst.msk [vmem:[%s11027_s6 + $0x28] sm:$0xf] %vm5124_vm1, %v6682_v50  ;;  %v4254_v54 = vmax.f32 %v11721_v52, 0.0  ;;  %v4638_v50 = vpack.c.bf16 %v4126_v47, %v4126_v47  ;;  %v5918_v47 = vpack.c.bf16 %v11659_v4, %v11659_v4 }
 0x189   : > { %8335 = vst.msk [vmem:[%s11027_s6 + $0x228] sm:$0xf] %vm5124_vm1, %v6938_v45 }
 0x18a   : > { %v4766_v45 = vpack.c.bf16 %v4254_v54, %v4254_v54  ;;  %v2887_v62 = vpop.f32.mrf.mxu0  ;;  %5151 = vst.msk [vmem:[%s10693_s28 + $0x68] sm:$0xf] %vm5124_vm1, %v4638_v50 }
 0x18b   : > { %v11755_v8 = vadd.f32 %v11248_v19, %v2887_v62  ;;  %v5663_v62 = vpack.c.bf16 %v11718_v49, %v11718_v49 }
 0x18c   : > { %6959 = vrot.lane.b32.xlu2 %v5786_v46, %s10519_s27  ;;  %7215 = vrot.lane.b32.xlu1 %v5914_v20, %s10519_s27  ;;  %v3527_v46 = vpop.f32.mrf.mxu2  ;;  %v3845_v20 = vpop.f32.mrf.mxu3  ;;  %5279 = vst.msk [vmem:[%s10693_s28 + $0x268] sm:$0xf] %vm5124_vm1, %v4766_v45 }
 0x18d   : > { %7471 = vrot.lane.b32.xlu0 %v6042_v43, %s10519_s27  ;;  %v3207_v48 = vpop.f32.mrf.mxu1  ;;  %v5788_v43 = vpack.c.bf16 %v11580_v57, %v11580_v57  ;;  %v11767_v7 = vadd.f32 %v11248_v19, %v3527_v46  ;;  %v4127_v59 = vmax.f32 %v11755_v8, 0.0  ;;  %v11774_v25 = vadd.f32 %v11248_v19, %v3845_v20  ;;  %10018 = vmatmul.msk.bf16.gmra.mxu2 %vm2042_vm0, %v10279_v6  ;;  %v10152_v6 = vld [vmem:[%s10615_s13 + $0xa8] sm:$0xff] }
 0x18e   : > { %v7200_v36 = vpop.permute.xlu2 %7199  ;;  %v7450_v56 = vpop.permute.xlu1 %7449  ;;  %v11758_v60 = vadd.f32 %v11248_v19, %v3207_v48  ;;  %v5919_v46 = vpack.c.bf16 %v11731_v23, %v11731_v23 }
 0x18f   : > { %8466 = vst.msk [vmem:[%s11027_s6 + $0x434] sm:$0xf] %vm5124_vm1, %v7200_v36  ;;  %v7196_v17 = vpop.permute.xlu0 %7195  ;;  %v4383_v57 = vmax.f32 %v11767_v7, 0.0  ;;  %v4510_v9 = vmax.f32 %v11774_v25, 0.0  ;;  %v4639_v16 = vpack.c.bf16 %v4127_v59, %v4127_v59 }
 0x190   : > { %8591 = vst.msk [vmem:[%s11027_s6 + $0x628] sm:$0xf] %vm5124_vm1, %v7450_v56  ;;  %v4255_v0 = vmax.f32 %v11758_v60, 0.0 }
 0x191   : > { %8464 = vst.msk [vmem:[%s11027_s6 + $0x42c] sm:$0xf] %vm5124_vm1, %v7196_v17  ;;  %v4895_v31 = vpack.c.bf16 %v4383_v57, %v4383_v57  ;;  %v5022_v10 = vpack.c.bf16 %v4510_v9, %v4510_v9  ;;  %v6046_v57 = vpack.c.bf16 %v11695_v12, %v11695_v12  ;;  %10083 = vmatmul.msk.bf16.gmra.mxu3 %vm2042_vm0, %v10344_v28 }
 0x192   : > { %v4767_v14 = vpack.c.bf16 %v4255_v0, %v4255_v0  ;;  %v2890_v33 = vpop.f32.mrf.mxu0  ;;  %5152 = vst.msk [vmem:[%s10693_s28 + $0x6c] sm:$0xf] %vm5124_vm1, %v4639_v16  ;;  %v10280_v0 = vld [vmem:[%s10615_s13 + $0x4a8] sm:$0xff] }
 0x193   : > { %v11796_v55 = vadd.f32 %v11248_v19, %v2890_v33  ;;  %5408 = vst.msk [vmem:[%s10693_s28 + $0x46c] sm:$0xf] %vm5124_vm1, %v4895_v31  ;;  %v5791_v31 = vpack.c.bf16 %v11721_v52, %v11721_v52  ;;  %v6047_v33 = vpack.c.bf16 %v11774_v25, %v11774_v25  ;;  %v5664_v25 = vpack.c.bf16 %v11755_v8, %v11755_v8 }
 0x194   : > { %7217 = vrot.lane.b32.xlu2 %v5915_v27, %s10519_s27  ;;  %6705 = vrot.lane.b32.xlu1 %v5659_v18, %s10519_s27  ;;  %v5917_v18 = vpack.c.bf16 %v11624_v2, %v11624_v2  ;;  %v5789_v27 = vpack.c.bf16 %v11649_v32, %v11649_v32  ;;  %v3847_v15 = vpop.f32.mrf.mxu3  ;;  %v10151_v2 = vld [vmem:[%s10615_s13 + $0xa0] sm:$0xff]  ;;  %5280 = vst.msk [vmem:[%s10693_s28 + $0x26c] sm:$0xf] %vm5124_vm1, %v4767_v14 }
 0x195   : > { %6961 = vrot.lane.b32.xlu0 %v5787_v21, %s10519_s27  ;;  %v6045_v21 = vpack.c.bf16 %v11668_v30, %v11668_v30  ;;  %v11804_v32 = vadd.f32 %v11248_v19, %v3847_v15  ;;  %v4128_v30 = vmax.f32 %v11796_v55, 0.0  ;;  %9890 = vmatmul.msk.bf16.gmra.mxu0 %vm2042_vm0, %v10151_v2  ;;  %5535 = vst.msk [vmem:[%s10693_s28 + $0x668] sm:$0xf] %vm5124_vm1, %v5022_v10 }
 0x196   : > { %v6690_v35 = vpop.permute.xlu2 %6689  ;;  %v6940_v29 = vpop.permute.xlu1 %6939 }
 0x197   : > { %8211 = vst.msk [vmem:[%s11027_s6 + $0x38] sm:$0xf] %vm5124_vm1, %v6690_v35  ;;  %v6686_v38 = vpop.permute.xlu0 %6685  ;;  %v4511_v35 = vmax.f32 %v11804_v32, 0.0 }
 0x198   : > { %8336 = vst.msk [vmem:[%s11027_s6 + $0x22c] sm:$0xf] %vm5124_vm1, %v6940_v29 }
 0x199   : > { %8209 = vst.msk [vmem:[%s11027_s6 + $0x30] sm:$0xf] %vm5124_vm1, %v6686_v38  ;;  %v4640_v38 = vpack.c.bf16 %v4128_v30, %v4128_v30  ;;  %v3530_v22 = vpop.f32.mrf.mxu2 }
 0x19a   : > { %v2892_v41 = vpop.f32.mrf.mxu0  ;;  %v3210_v42 = vpop.f32.mrf.mxu1  ;;  %v11840_v54 = vadd.f32 %v11248_v19, %v3530_v22 }
 0x19b   : > { %v11827_v53 = vadd.f32 %v11248_v19, %v2892_v41  ;;  %v11830_v58 = vadd.f32 %v11248_v19, %v3210_v42  ;;  %5153 = vst.msk [vmem:[%s10693_s28 + $0x70] sm:$0xf] %vm5124_vm1, %v4640_v38 }
 0x19c   : > { %6707 = vrot.lane.b32.xlu2 %v5660_v26, %s10519_s27  ;;  %7473 = vrot.lane.b32.xlu1 %v6043_v40, %s10519_s27  ;;  %v5023_v40 = vpack.c.bf16 %v4511_v35, %v4511_v35  ;;  %v3850_v24 = vpop.f32.mrf.mxu3  ;;  %v10215_v26 = vld [vmem:[%s10615_s13 + $0x2a0] sm:$0xff] }
 0x19d   : > { %7219 = vrot.lane.b32.xlu0 %v5916_v44, %s10519_s27  ;;  %v5662_v44 = vpack.c.bf16 %v11646_v63, %v11646_v63  ;;  %v11843_v3 = vadd.f32 %v11248_v19, %v3850_v24  ;;  %v4129_v63 = vmax.f32 %v11827_v53, 0.0  ;;  %9954 = vmatmul.msk.bf16.gmra.mxu1 %vm2042_vm0, %v10215_v26  ;;  %v4384_v19 = vmax.f32 %v11840_v54, 0.0 }
 0x19e   : > { %v7458_v1 = vpop.permute.xlu2 %7457  ;;  %v7198_v5 = vpop.permute.xlu1 %7197  ;;  %5536 = vst.msk [vmem:[%s10693_s28 + $0x66c] sm:$0xf] %vm5124_vm1, %v5023_v40  ;;  %10019 = vmatmul.msk.bf16.gmra.mxu2 %vm2042_vm0, %v10280_v0  ;;  %v5666_v28 = vpack.c.bf16 %v11827_v53, %v11827_v53 }
 0x19f   : > { %8595 = vst.msk [vmem:[%s11027_s6 + $0x638] sm:$0xf] %vm5124_vm1, %v7458_v1  ;;  %v7454_v34 = vpop.permute.xlu0 %7453  ;;  %v5790_v1 = vpack.c.bf16 %v11689_v13, %v11689_v13  ;;  %v4512_v4 = vmax.f32 %v11843_v3, 0.0  ;;  %v4896_v48 = vpack.c.bf16 %v4384_v19, %v4384_v19 }
 0x1a0   : > { %8465 = vst.msk [vmem:[%s11027_s6 + $0x430] sm:$0xf] %vm5124_vm1, %v7198_v5  ;;  %v4256_v5 = vmax.f32 %v11830_v58, 0.0 }
 0x1a1   : > { %8593 = vst.msk [vmem:[%s11027_s6 + $0x630] sm:$0xf] %vm5124_vm1, %v7454_v34  ;;  %v4641_v34 = vpack.c.bf16 %v4129_v63, %v4129_v63  ;;  %v5024_v20 = vpack.c.bf16 %v4512_v4, %v4512_v4  ;;  %v3532_v59 = vpop.f32.mrf.mxu2 }
 0x1a2   : > { %v4768_v61 = vpack.c.bf16 %v4256_v5, %v4256_v5  ;;  %5409 = vst.msk [vmem:[%s10693_s28 + $0x470] sm:$0xf] %vm5124_vm1, %v4896_v48  ;;  %v2895_v10 = vpop.f32.mrf.mxu0  ;;  %v6048_v5 = vpack.c.bf16 %v11804_v32, %v11804_v32  ;;  %v5921_v48 = vpack.c.bf16 %v11840_v54, %v11840_v54 }
 0x1a3   : > { %5154 = vst.msk [vmem:[%s10693_s28 + $0x74] sm:$0xf] %vm5124_vm1, %v4641_v34 }
 0x1a4   : > { %7475 = vrot.lane.b32.xlu2 %v6044_v51, %s10519_s27  ;;  %6963 = vrot.lane.b32.xlu1 %v5788_v43, %s10519_s27  ;;  %v11870_v43 = vld [vmem:[%s16786_s2] ss:$0 sm:$0xff]  ;;  %v3852_v49 = vpop.f32.mrf.mxu3  ;;  %5281 = vst.msk [vmem:[%s10693_s28 + $0x270] sm:$0xf] %vm5124_vm1, %v4768_v61 }
 0x1a5   : > { %6709 = vrot.lane.b32.xlu0 %v5661_v11, %s10519_s27  ;;  %v3212_v11 = vpop.f32.mrf.mxu1  ;;  %v11881_v23 = vadd.f32 %v11870_v43, %v3532_v59  ;;  %v11884_v9 = vadd.f32 %v11870_v43, %v3852_v49  ;;  %5537 = vst.msk [vmem:[%s10693_s28 + $0x670] sm:$0xf] %vm5124_vm1, %v5024_v20  ;;  %v11910_v15 = vadd.f32 %v11870_v43, %v2895_v10  ;;  %v10153_v10 = vld [vmem:[%s10615_s13 + $0xb0] sm:$0xff] }
 0x1a6   : > { %v6948_v36 = vpop.permute.xlu2 %6947  ;;  %v6688_v56 = vpop.permute.xlu1 %6687  ;;  %v11873_v51 = vadd.f32 %v11870_v43, %v3212_v11  ;;  %9891 = vmatmul.msk.bf16.gmra.mxu0 %vm2042_vm0, %v10152_v6  ;;  %v5793_v20 = vpack.c.bf16 %v11830_v58, %v11830_v58  ;;  %v10345_v6 = vld [vmem:[%s10615_s13 + $0x6b0] sm:$0xff] }
 0x1a7   : > { %8340 = vst.msk [vmem:[%s11027_s6 + $0x23c] sm:$0xf] %vm5124_vm1, %v6948_v36  ;;  %v6944_v17 = vpop.permute.xlu0 %6943  ;;  %v4385_v12 = vmax.f32 %v11881_v23, 0.0  ;;  %v4130_v30 = vmax.f32 %v11910_v15, 0.0  ;;  %10084 = vmatmul.msk.bf16.gmra.mxu3 %vm2042_vm0, %v10345_v6 }
 0x1a8   : > { %8210 = vst.msk [vmem:[%s11027_s6 + $0x34] sm:$0xf] %vm5124_vm1, %v6688_v56  ;;  %v4257_v36 = vmax.f32 %v11873_v51, 0.0  ;;  %v4513_v56 = vmax.f32 %v11884_v9, 0.0 }
 0x1a9   : > { %8338 = vst.msk [vmem:[%s11027_s6 + $0x234] sm:$0xf] %vm5124_vm1, %v6944_v17  ;;  %v3535_v2 = vpop.f32.mrf.mxu2 }
 0x1aa   : > { %v4769_v14 = vpack.c.bf16 %v4257_v36, %v4257_v36  ;;  %v11917_v52 = vadd.f32 %v11870_v43, %v3535_v2  ;;  %v2897_v40 = vpop.f32.mrf.mxu0  ;;  %v10217_v2 = vld [vmem:[%s10615_s13 + $0x2b0] sm:$0xff] }
 0x1ab   : > { %v11939_v42 = vadd.f32 %v11870_v43, %v2897_v40 }
 0x1ac   : > { %6965 = vrot.lane.b32.xlu2 %v5789_v27, %s10519_s27  ;;  %7221 = vrot.lane.b32.xlu1 %v5917_v18, %s10519_s27  ;;  %v4897_v27 = vpack.c.bf16 %v4385_v12, %v4385_v12  ;;  %5282 = vst.msk [vmem:[%s10693_s28 + $0x274] sm:$0xf] %vm5124_vm1, %v4769_v14  ;;  %v4386_v35 = vmax.f32 %v11917_v52, 0.0  ;;  %v3855_v26 = vpop.f32.mrf.mxu3  ;;  %v6049_v14 = vpack.c.bf16 %v11843_v3, %v11843_v3 }
 0x1ad   : > { %7477 = vrot.lane.b32.xlu0 %v6045_v21, %s10519_s27  ;;  %v5025_v21 = vpack.c.bf16 %v4513_v56, %v4513_v56  ;;  %v4131_v19 = vmax.f32 %v11939_v42, 0.0 }
 0x1ae   : > { %v7206_v29 = vpop.permute.xlu2 %7205  ;;  %v7456_v37 = vpop.permute.xlu1 %7455  ;;  %5410 = vst.msk [vmem:[%s10693_s28 + $0x474] sm:$0xf] %vm5124_vm1, %v4897_v27 }
 0x1af   : > { %8469 = vst.msk [vmem:[%s11027_s6 + $0x440] sm:$0xf] %vm5124_vm1, %v7206_v29  ;;  %v7202_v39 = vpop.permute.xlu0 %7201  ;;  %v4643_v34 = vpack.c.bf16 %v4131_v19, %v4131_v19  ;;  %v6050_v19 = vpack.c.bf16 %v11884_v9, %v11884_v9 }
 0x1b0   : > { %8594 = vst.msk [vmem:[%s11027_s6 + $0x634] sm:$0xf] %vm5124_vm1, %v7456_v37  ;;  %v4642_v37 = vpack.c.bf16 %v4130_v30, %v4130_v30 }
 0x1b1   : > { %8467 = vst.msk [vmem:[%s11027_s6 + $0x438] sm:$0xf] %vm5124_vm1, %v7202_v39  ;;  %v4898_v39 = vpack.c.bf16 %v4386_v35, %v4386_v35  ;;  %v3537_v24 = vpop.f32.mrf.mxu2 }
 0x1b2   : > { %5538 = vst.msk [vmem:[%s10693_s28 + $0x674] sm:$0xf] %vm5124_vm1, %v5025_v21  ;;  %v3215_v41 = vpop.f32.mrf.mxu1  ;;  %v11952_v63 = vadd.f32 %v11870_v43, %v3537_v24  ;;  %v5667_v24 = vpack.c.bf16 %v11910_v15, %v11910_v15 }
 0x1b3   : > { %v11942_v22 = vadd.f32 %v11870_v43, %v3215_v41  ;;  %5155 = vst.msk [vmem:[%s10693_s28 + $0x78] sm:$0xf] %vm5124_vm1, %v4642_v37 }
 0x1b4   : > { %7223 = vrot.lane.b32.xlu2 %v5918_v47, %s10519_s27  ;;  %6711 = vrot.lane.b32.xlu1 %v5662_v44, %s10519_s27  ;;  %v10216_v44 = vld [vmem:[%s10615_s13 + $0x2a8] sm:$0xff]  ;;  %v5792_v47 = vpack.c.bf16 %v11758_v60, %v11758_v60  ;;  %5411 = vst.msk [vmem:[%s10693_s28 + $0x478] sm:$0xf] %vm5124_vm1, %v4898_v39  ;;  %v11961_v60 = vadd.f32 %v11870_v43, %v3855_v26  ;;  %v3857_v0 = vpop.f32.mrf.mxu3 }
 0x1b5   : > { %6967 = vrot.lane.b32.xlu0 %v5790_v1, %s10519_s27  ;;  %v5920_v1 = vpack.c.bf16 %v11767_v7, %v11767_v7  ;;  %v4258_v4 = vmax.f32 %v11942_v22, 0.0  ;;  %9955 = vmatmul.msk.bf16.gmra.mxu1 %vm2042_vm0, %v10216_v44  ;;  %v4387_v7 = vmax.f32 %v11952_v63, 0.0  ;;  %5156 = vst.msk [vmem:[%s10693_s28 + $0x7c] sm:$0xf] %vm5124_vm1, %v4643_v34  ;;  %v11988_v54 = vadd.f32 %v11870_v43, %v3857_v0 }
 0x1b6   : > { %v6696_v13 = vpop.permute.xlu2 %6695  ;;  %v6946_v50 = vpop.permute.xlu1 %6945  ;;  %v4514_v32 = vmax.f32 %v11961_v60, 0.0  ;;  %9892 = vmatmul.msk.bf16.gmra.mxu0 %vm2042_vm0, %v10153_v10 }
 0x1b7   : > { %8214 = vst.msk [vmem:[%s11027_s6 + $0x44] sm:$0xf] %vm5124_vm1, %v6696_v13  ;;  %v6692_v45 = vpop.permute.xlu0 %6691  ;;  %v4770_v61 = vpack.c.bf16 %v4258_v4, %v4258_v4  ;;  %v4899_v11 = vpack.c.bf16 %v4387_v7, %v4387_v7 }
 0x1b8   : > { %8339 = vst.msk [vmem:[%s11027_s6 + $0x238] sm:$0xf] %vm5124_vm1, %v6946_v50  ;;  %v5026_v59 = vpack.c.bf16 %v4514_v32, %v4514_v32 }
 0x1b9   : > { %8212 = vst.msk [vmem:[%s11027_s6 + $0x3c] sm:$0xf] %vm5124_vm1, %v6692_v45 }
 0x1ba   : > { %5283 = vst.msk [vmem:[%s10693_s28 + $0x278] sm:$0xf] %vm5124_vm1, %v4770_v61 }
 0x1bb   : > { %5412 = vst.msk [vmem:[%s10693_s28 + $0x47c] sm:$0xf] %vm5124_vm1, %v4899_v11 }
 0x1bc   : > { %6713 = vrot.lane.b32.xlu2 %v5663_v62, %s10519_s27  ;;  %7479 = vrot.lane.b32.xlu1 %v6046_v57, %s10519_s27  ;;  %v5665_v62 = vpack.c.bf16 %v11796_v55, %v11796_v55  ;;  %v10281_v55 = vld [vmem:[%s10615_s13 + $0x4b0] sm:$0xff]  ;;  %v4515_v57 = vmax.f32 %v11988_v54, 0.0  ;;  %5539 = vst.msk [vmem:[%s10693_s28 + $0x678] sm:$0xf] %vm5124_vm1, %v5026_v59 }
 0x1bd   : > { %7225 = vrot.lane.b32.xlu0 %v5919_v46, %s10519_s27  ;;  %v3217_v46 = vpop.f32.mrf.mxu1  ;;  %10020 = vmatmul.msk.bf16.gmra.mxu2 %vm2042_vm0, %v10281_v55 }
 0x1be   : > { %v7464_v16 = vpop.permute.xlu2 %7463  ;;  %v7204_v17 = vpop.permute.xlu1 %7203  ;;  %v11982_v49 = vadd.f32 %v11870_v43, %v3217_v46 }
 0x1bf   : > { %8598 = vst.msk [vmem:[%s11027_s6 + $0x644] sm:$0xf] %vm5124_vm1, %v7464_v16  ;;  %v7460_v18 = vpop.permute.xlu0 %7459 }
 0x1c0   : > { %8468 = vst.msk [vmem:[%s11027_s6 + $0x43c] sm:$0xf] %vm5124_vm1, %v7204_v17  ;;  %v4259_v58 = vmax.f32 %v11982_v49, 0.0  ;;  %v5027_v17 = vpack.c.bf16 %v4515_v57, %v4515_v57  ;;  %v3540_v21 = vpop.f32.mrf.mxu2  ;;  %v10346_v57 = vld [vmem:[%s10615_s13 + $0x6b8] sm:$0xff] }
 0x1c1   : > { %8596 = vst.msk [vmem:[%s11027_s6 + $0x63c] sm:$0xf] %vm5124_vm1, %v7460_v18  ;;  %v2900_v18 = vpop.f32.mrf.mxu0  ;;  %v12024_v3 = vadd.f32 %v11870_v43, %v3540_v21  ;;  %10085 = vmatmul.msk.bf16.gmra.mxu3 %vm2042_vm0, %v10346_v57  ;;  %v10347_v57 = vld [vmem:[%s10615_s13 + $0x6c0] sm:$0xff] }
 0x1c2   : > { %v4771_v56 = vpack.c.bf16 %v4259_v58, %v4259_v58  ;;  %5540 = vst.msk [vmem:[%s10693_s28 + $0x67c] sm:$0xf] %vm5124_vm1, %v5027_v17  ;;  %v10282_v58 = vld [vmem:[%s10615_s13 + $0x4b8] sm:$0xff] }
 0x1c3   : > { %v4388_v53 = vmax.f32 %v12024_v3, 0.0 }
 0x1c4   : > { %7481 = vrot.lane.b32.xlu2 %v6047_v33, %s10519_s27  ;;  %6969 = vrot.lane.b32.xlu1 %v5791_v31, %s10519_s27  ;;  %v12011_v31 = vadd.f32 %v11870_v43, %v2900_v18  ;;  %5284 = vst.msk [vmem:[%s10693_s28 + $0x27c] sm:$0xf] %vm5124_vm1, %v4771_v56 }
 0x1c5   : > { %6715 = vrot.lane.b32.xlu0 %v5664_v25, %s10519_s27  ;;  %v3220_v27 = vpop.f32.mrf.mxu1  ;;  %v5922_v25 = vpack.c.bf16 %v11881_v23, %v11881_v23  ;;  %9956 = vmatmul.msk.bf16.gmra.mxu1 %vm2042_vm0, %v10217_v2  ;;  %v4900_v39 = vpack.c.bf16 %v4388_v53, %v4388_v53 }
 0x1c6   : > { %v6954_v8 = vpop.permute.xlu2 %6953  ;;  %v6694_v29 = vpop.permute.xlu1 %6693  ;;  %v12014_v33 = vadd.f32 %v11870_v43, %v3220_v27  ;;  %v4132_v30 = vmax.f32 %v12011_v31, 0.0 }
 0x1c7   : > { %8343 = vst.msk [vmem:[%s11027_s6 + $0x248] sm:$0xf] %vm5124_vm1, %v6954_v8  ;;  %v6950_v38 = vpop.permute.xlu0 %6949 }
 0x1c8   : > { %8213 = vst.msk [vmem:[%s11027_s6 + $0x40] sm:$0xf] %vm5124_vm1, %v6694_v29  ;;  %v4260_v35 = vmax.f32 %v12014_v33, 0.0  ;;  %v4644_v29 = vpack.c.bf16 %v4132_v30, %v4132_v30  ;;  %v5924_v30 = vpack.c.bf16 %v11952_v63, %v11952_v63 }
 0x1c9   : > { %8341 = vst.msk [vmem:[%s11027_s6 + $0x240] sm:$0xf] %vm5124_vm1, %v6950_v38  ;;  %v2902_v40 = vpop.f32.mrf.mxu0 }
 0x1ca   : > { %v4772_v38 = vpack.c.bf16 %v4260_v35, %v4260_v35  ;;  %v12048_v26 = vadd.f32 %v11870_v43, %v2902_v40  ;;  %5157 = vst.msk [vmem:[%s10693_s28 + $0x80] sm:$0xf] %vm5124_vm1, %v4644_v29 }
 0x1cb   : > { %5413 = vst.msk [vmem:[%s10693_s28 + $0x480] sm:$0xf] %vm5124_vm1, %v4900_v39 }
 0x1cc   : > { %6971 = vrot.lane.b32.xlu2 %v5792_v47, %s10519_s27  ;;  %7227 = vrot.lane.b32.xlu1 %v5920_v1, %s10519_s27  ;;  %v3542_v47 = vpop.f32.mrf.mxu2  ;;  %v3860_v1 = vpop.f32.mrf.mxu3  ;;  %5285 = vst.msk [vmem:[%s10693_s28 + $0x280] sm:$0xf] %vm5124_vm1, %v4772_v38  ;;  %v4133_v4 = vmax.f32 %v12048_v26, 0.0 }
 0x1cd   : > { %7483 = vrot.lane.b32.xlu0 %v6048_v5, %s10519_s27  ;;  %v3222_v41 = vpop.f32.mrf.mxu1  ;;  %v5794_v5 = vpack.c.bf16 %v11873_v51, %v11873_v51  ;;  %v12060_v15 = vadd.f32 %v11870_v43, %v3542_v47  ;;  %v12067_v32 = vadd.f32 %v11870_v43, %v3860_v1  ;;  %10021 = vmatmul.msk.bf16.gmra.mxu2 %vm2042_vm0, %v10282_v58  ;;  %v10155_v58 = vld [vmem:[%s10615_s13 + $0xc0] sm:$0xff] }
 0x1ce   : > { %v7212_v13 = vpop.permute.xlu2 %7211  ;;  %v7462_v50 = vpop.permute.xlu1 %7461  ;;  %v12051_v44 = vadd.f32 %v11870_v43, %v3222_v41  ;;  %v4645_v34 = vpack.c.bf16 %v4133_v4, %v4133_v4  ;;  %v5669_v41 = vpack.c.bf16 %v12011_v31, %v12011_v31  ;;  %v5925_v1 = vpack.c.bf16 %v12024_v3, %v12024_v3 }
 0x1cf   : > { %8472 = vst.msk [vmem:[%s11027_s6 + $0x44c] sm:$0xf] %vm5124_vm1, %v7212_v13  ;;  %v7208_v45 = vpop.permute.xlu0 %7207  ;;  %v4389_v51 = vmax.f32 %v12060_v15, 0.0  ;;  %v4516_v9 = vmax.f32 %v12067_v32, 0.0 }
 0x1d0   : > { %8597 = vst.msk [vmem:[%s11027_s6 + $0x640] sm:$0xf] %vm5124_vm1, %v7462_v50  ;;  %v4261_v7 = vmax.f32 %v12051_v44, 0.0 }
 0x1d1   : > { %8470 = vst.msk [vmem:[%s11027_s6 + $0x444] sm:$0xf] %vm5124_vm1, %v7208_v45  ;;  %v4901_v11 = vpack.c.bf16 %v4389_v51, %v4389_v51  ;;  %v5028_v59 = vpack.c.bf16 %v4516_v9, %v4516_v9  ;;  %v10283_v51 = vld [vmem:[%s10615_s13 + $0x4c0] sm:$0xff]  ;;  %v6052_v9 = vpack.c.bf16 %v11988_v54, %v11988_v54  ;;  %10086 = vmatmul.msk.bf16.gmra.mxu3 %vm2042_vm0, %v10347_v57 }
 0x1d2   : > { %v4773_v61 = vpack.c.bf16 %v4261_v7, %v4261_v7  ;;  %v2905_v46 = vpop.f32.mrf.mxu0  ;;  %5158 = vst.msk [vmem:[%s10693_s28 + $0x84] sm:$0xf] %vm5124_vm1, %v4645_v34 }
 0x1d3   : > { %v12089_v0 = vadd.f32 %v11870_v43, %v2905_v46  ;;  %5414 = vst.msk [vmem:[%s10693_s28 + $0x484] sm:$0xf] %vm5124_vm1, %v4901_v11  ;;  %v5797_v11 = vpack.c.bf16 %v12014_v33, %v12014_v33  ;;  %v6053_v46 = vpack.c.bf16 %v12067_v32, %v12067_v32  ;;  %v5670_v32 = vpack.c.bf16 %v12048_v26, %v12048_v26 }
 0x1d4   : > { %7229 = vrot.lane.b32.xlu2 %v5921_v48, %s10519_s27  ;;  %6717 = vrot.lane.b32.xlu1 %v5665_v62, %s10519_s27  ;;  %v5923_v62 = vpack.c.bf16 %v11917_v52, %v11917_v52  ;;  %v5795_v48 = vpack.c.bf16 %v11942_v22, %v11942_v22  ;;  %v3862_v55 = vpop.f32.mrf.mxu3  ;;  %v10154_v52 = vld [vmem:[%s10615_s13 + $0xb8] sm:$0xff]  ;;  %5286 = vst.msk [vmem:[%s10693_s28 + $0x284] sm:$0xf] %vm5124_vm1, %v4773_v61  ;;  %v3545_v2 = vpop.f32.mrf.mxu2 }
 0x1d5   : > { %6973 = vrot.lane.b32.xlu0 %v5793_v20, %s10519_s27  ;;  %v6051_v20 = vpack.c.bf16 %v11961_v60, %v11961_v60  ;;  %v12097_v22 = vadd.f32 %v11870_v43, %v3862_v55  ;;  %v4134_v60 = vmax.f32 %v12089_v0, 0.0  ;;  %9893 = vmatmul.msk.bf16.gmra.mxu0 %vm2042_vm0, %v10154_v52  ;;  %5541 = vst.msk [vmem:[%s10693_s28 + $0x680] sm:$0xf] %vm5124_vm1, %v5028_v59 }
 0x1d6   : > { %v6702_v36 = vpop.permute.xlu2 %6701  ;;  %v6952_v12 = vpop.permute.xlu1 %6951  ;;  %v12133_v35 = vadd.f32 %v11870_v43, %v3545_v2 }
 0x1d7   : > { %8217 = vst.msk [vmem:[%s11027_s6 + $0x50] sm:$0xf] %vm5124_vm1, %v6702_v36  ;;  %v6698_v16 = vpop.permute.xlu0 %6697  ;;  %v4517_v36 = vmax.f32 %v12097_v22, 0.0 }
 0x1d8   : > { %8342 = vst.msk [vmem:[%s11027_s6 + $0x244] sm:$0xf] %vm5124_vm1, %v6952_v12  ;;  %v4390_v63 = vmax.f32 %v12133_v35, 0.0 }
 0x1d9   : > { %8215 = vst.msk [vmem:[%s11027_s6 + $0x48] sm:$0xf] %vm5124_vm1, %v6698_v16  ;;  %v4646_v16 = vpack.c.bf16 %v4134_v60, %v4134_v60 }
 0x1da   : > { %v2907_v18 = vpop.f32.mrf.mxu0  ;;  %v3225_v27 = vpop.f32.mrf.mxu1 }
 0x1db   : > { %v12120_v21 = vadd.f32 %v11870_v43, %v2907_v18  ;;  %v12123_v10 = vadd.f32 %v11870_v43, %v3225_v27  ;;  %5159 = vst.msk [vmem:[%s10693_s28 + $0x88] sm:$0xf] %vm5124_vm1, %v4646_v16 }
 0x1dc   : > { %6719 = vrot.lane.b32.xlu2 %v5666_v28, %s10519_s27  ;;  %7485 = vrot.lane.b32.xlu1 %v6049_v14, %s10519_s27  ;;  %v5029_v14 = vpack.c.bf16 %v4517_v36, %v4517_v36  ;;  %v3865_v6 = vpop.f32.mrf.mxu3  ;;  %v10218_v28 = vld [vmem:[%s10615_s13 + $0x2b8] sm:$0xff]  ;;  %v3547_v4 = vpop.f32.mrf.mxu2 }
 0x1dd   : > { %7231 = vrot.lane.b32.xlu0 %v5922_v25, %s10519_s27  ;;  %v5668_v25 = vpack.c.bf16 %v11939_v42, %v11939_v42  ;;  %v12136_v53 = vadd.f32 %v11870_v43, %v3865_v6  ;;  %v4135_v42 = vmax.f32 %v12120_v21, 0.0  ;;  %9957 = vmatmul.msk.bf16.gmra.mxu1 %vm2042_vm0, %v10218_v28  ;;  %v12169_v31 = vadd.f32 %v11870_v43, %v3547_v4 }
 0x1de   : > { %v7470_v23 = vpop.permute.xlu2 %7469  ;;  %v7210_v8 = vpop.permute.xlu1 %7209  ;;  %5542 = vst.msk [vmem:[%s10693_s28 + $0x684] sm:$0xf] %vm5124_vm1, %v5029_v14  ;;  %10022 = vmatmul.msk.bf16.gmra.mxu2 %vm2042_vm0, %v10283_v51  ;;  %v5672_v57 = vpack.c.bf16 %v12120_v21, %v12120_v21 }
 0x1df   : > { %8601 = vst.msk [vmem:[%s11027_s6 + $0x650] sm:$0xf] %vm5124_vm1, %v7470_v23  ;;  %v7466_v37 = vpop.permute.xlu0 %7465  ;;  %v5796_v23 = vpack.c.bf16 %v11982_v49, %v11982_v49  ;;  %v4518_v49 = vmax.f32 %v12136_v53, 0.0  ;;  %v4647_v38 = vpack.c.bf16 %v4135_v42, %v4135_v42  ;;  %v4391_v54 = vmax.f32 %v12169_v31, 0.0 }
 0x1e0   : > { %8471 = vst.msk [vmem:[%s11027_s6 + $0x448] sm:$0xf] %vm5124_vm1, %v7210_v8  ;;  %v4262_v8 = vmax.f32 %v12123_v10, 0.0 }
 0x1e1   : > { %8599 = vst.msk [vmem:[%s11027_s6 + $0x648] sm:$0xf] %vm5124_vm1, %v7466_v37 }
 0x1e2   : > { %v4774_v40 = vpack.c.bf16 %v4262_v8, %v4262_v8  ;;  %v3227_v47 = vpop.f32.mrf.mxu1  ;;  %5160 = vst.msk [vmem:[%s10693_s28 + $0x8c] sm:$0xf] %vm5124_vm1, %v4647_v38  ;;  %v2910_v59 = vpop.f32.mrf.mxu0  ;;  %v6054_v8 = vpack.c.bf16 %v12097_v22, %v12097_v22 }
 0x1e3   : > { %v12198_v55 = vadd.f32 %v11870_v43, %v2910_v59  ;;  %v10156_v59 = vld [vmem:[%s10615_s13 + $0xc8] sm:$0xff] }
 0x1e4   : > { %7487 = vrot.lane.b32.xlu2 %v6050_v19, %s10519_s27  ;;  %6975 = vrot.lane.b32.xlu1 %v5794_v5, %s10519_s27  ;;  %v5030_v5 = vpack.c.bf16 %v4518_v49, %v4518_v49  ;;  %v12161_v19 = vadd.f32 %v11870_v43, %v3227_v47  ;;  %v3867_v7 = vpop.f32.mrf.mxu3  ;;  %5287 = vst.msk [vmem:[%s10693_s28 + $0x288] sm:$0xf] %vm5124_vm1, %v4774_v40  ;;  %v3550_v52 = vpop.f32.mrf.mxu2 }
 0x1e5   : > { %6721 = vrot.lane.b32.xlu0 %v5667_v24, %s10519_s27  ;;  %v4902_v24 = vpack.c.bf16 %v4390_v63, %v4390_v63  ;;  %v12172_v3 = vadd.f32 %v11870_v43, %v3867_v7  ;;  %v12205_v33 = vadd.f32 %v11870_v43, %v3550_v52  ;;  %v4136_v60 = vmax.f32 %v12198_v55, 0.0  ;;  %9894 = vmatmul.msk.bf16.gmra.mxu0 %vm2042_vm0, %v10155_v58  ;;  %v10220_v52 = vld [vmem:[%s10615_s13 + $0x2c8] sm:$0xff] }
 0x1e6   : > { %v6960_v13 = vpop.permute.xlu2 %6959  ;;  %v6700_v50 = vpop.permute.xlu1 %6699  ;;  %5543 = vst.msk [vmem:[%s10693_s28 + $0x688] sm:$0xf] %vm5124_vm1, %v5030_v5  ;;  %v5799_v5 = vpack.c.bf16 %v12123_v10, %v12123_v10  ;;  %v10348_v58 = vld [vmem:[%s10615_s13 + $0x6c8] sm:$0xff] }
 0x1e7   : > { %8346 = vst.msk [vmem:[%s11027_s6 + $0x254] sm:$0xf] %vm5124_vm1, %v6960_v13  ;;  %v6956_v45 = vpop.permute.xlu0 %6955  ;;  %v4263_v13 = vmax.f32 %v12161_v19, 0.0  ;;  %v4392_v36 = vmax.f32 %v12205_v33, 0.0  ;;  %10087 = vmatmul.msk.bf16.gmra.mxu3 %vm2042_vm0, %v10348_v58 }
 0x1e8   : > { %8216 = vst.msk [vmem:[%s11027_s6 + $0x4c] sm:$0xf] %vm5124_vm1, %v6700_v50  ;;  %v4519_v50 = vmax.f32 %v12172_v3, 0.0 }
 0x1e9   : > { %8344 = vst.msk [vmem:[%s11027_s6 + $0x24c] sm:$0xf] %vm5124_vm1, %v6956_v45  ;;  %v4775_v61 = vpack.c.bf16 %v4263_v13, %v4263_v13 }
 0x1ea   : > { %5415 = vst.msk [vmem:[%s10693_s28 + $0x488] sm:$0xf] %vm5124_vm1, %v4902_v24  ;;  %v2912_v14 = vpop.f32.mrf.mxu0  ;;  %v5927_v24 = vpack.c.bf16 %v12133_v35, %v12133_v35 }
 0x1eb   : > { %5288 = vst.msk [vmem:[%s10693_s28 + $0x28c] sm:$0xf] %vm5124_vm1, %v4775_v61  ;;  %v12227_v27 = vadd.f32 %v11870_v43, %v2912_v14  ;;  %v6055_v61 = vpack.c.bf16 %v12136_v53, %v12136_v53 }
 0x1ec   : > { %6977 = vrot.lane.b32.xlu2 %v5795_v48, %s10519_s27  ;;  %7233 = vrot.lane.b32.xlu1 %v5923_v62, %s10519_s27  ;;  %v4903_v48 = vpack.c.bf16 %v4391_v54, %v4391_v54  ;;  %v3552_v6 = vpop.f32.mrf.mxu2  ;;  %v3870_v28 = vpop.f32.mrf.mxu3 }
 0x1ed   : > { %7489 = vrot.lane.b32.xlu0 %v6051_v20, %s10519_s27  ;;  %v5031_v20 = vpack.c.bf16 %v4519_v50, %v4519_v50  ;;  %v12240_v42 = vadd.f32 %v11870_v43, %v3552_v6  ;;  %v4137_v63 = vmax.f32 %v12227_v27, 0.0  ;;  %v5673_v6 = vpack.c.bf16 %v12198_v55, %v12198_v55 }
 0x1ee   : > { %v7218_v12 = vpop.permute.xlu2 %7217  ;;  %v7468_v56 = vpop.permute.xlu1 %7467  ;;  %5416 = vst.msk [vmem:[%s10693_s28 + $0x48c] sm:$0xf] %vm5124_vm1, %v4903_v48 }
 0x1ef   : > { %8475 = vst.msk [vmem:[%s11027_s6 + $0x458] sm:$0xf] %vm5124_vm1, %v7218_v12  ;;  %v7214_v17 = vpop.permute.xlu0 %7213  ;;  %v4649_v38 = vpack.c.bf16 %v4137_v63, %v4137_v63  ;;  %v6056_v63 = vpack.c.bf16 %v12172_v3, %v12172_v3 }
 0x1f0   : > { %8600 = vst.msk [vmem:[%s11027_s6 + $0x64c] sm:$0xf] %vm5124_vm1, %v7468_v56  ;;  %v4648_v56 = vpack.c.bf16 %v4136_v60, %v4136_v60 }
 0x1f1   : > { %8473 = vst.msk [vmem:[%s11027_s6 + $0x450] sm:$0xf] %vm5124_vm1, %v7214_v17  ;;  %v4904_v17 = vpack.c.bf16 %v4392_v36, %v4392_v36 }
 0x1f2   : > { %5544 = vst.msk [vmem:[%s10693_s28 + $0x68c] sm:$0xf] %vm5124_vm1, %v5031_v20  ;;  %v3230_v18 = vpop.f32.mrf.mxu1 }
 0x1f3   : > { %v12230_v2 = vadd.f32 %v11870_v43, %v3230_v18  ;;  %5161 = vst.msk [vmem:[%s10693_s28 + $0x90] sm:$0xf] %vm5124_vm1, %v4648_v56 }
 0x1f4   : > { %7235 = vrot.lane.b32.xlu2 %v5924_v30, %s10519_s27  ;;  %6723 = vrot.lane.b32.xlu1 %v5668_v25, %s10519_s27  ;;  %v10219_v25 = vld [vmem:[%s10615_s13 + $0x2c0] sm:$0xff]  ;;  %v5798_v30 = vpack.c.bf16 %v12051_v44, %v12051_v44  ;;  %5417 = vst.msk [vmem:[%s10693_s28 + $0x490] sm:$0xf] %vm5124_vm1, %v4904_v17  ;;  %v12249_v44 = vadd.f32 %v11870_v43, %v3870_v28  ;;  %v3872_v51 = vpop.f32.mrf.mxu3 }
 0x1f5   : > { %6979 = vrot.lane.b32.xlu0 %v5796_v23, %s10519_s27  ;;  %v5926_v23 = vpack.c.bf16 %v12060_v15, %v12060_v15  ;;  %v4264_v49 = vmax.f32 %v12230_v2, 0.0  ;;  %9958 = vmatmul.msk.bf16.gmra.mxu1 %vm2042_vm0, %v10219_v25  ;;  %v4393_v15 = vmax.f32 %v12240_v42, 0.0  ;;  %5162 = vst.msk [vmem:[%s10693_s28 + $0x94] sm:$0xf] %vm5124_vm1, %v4649_v38  ;;  %v12276_v35 = vadd.f32 %v11870_v43, %v3872_v51 }
 0x1f6   : > { %v6708_v29 = vpop.permute.xlu2 %6707  ;;  %v6958_v37 = vpop.permute.xlu1 %6957  ;;  %v4520_v22 = vmax.f32 %v12249_v44, 0.0  ;;  %9895 = vmatmul.msk.bf16.gmra.mxu0 %vm2042_vm0, %v10156_v59 }
 0x1f7   : > { %8220 = vst.msk [vmem:[%s11027_s6 + $0x5c] sm:$0xf] %vm5124_vm1, %v6708_v29  ;;  %v6704_v39 = vpop.permute.xlu0 %6703  ;;  %v4776_v40 = vpack.c.bf16 %v4264_v49, %v4264_v49  ;;  %v4905_v47 = vpack.c.bf16 %v4393_v15, %v4393_v15 }
 0x1f8   : > { %8345 = vst.msk [vmem:[%s11027_s6 + $0x250] sm:$0xf] %vm5124_vm1, %v6958_v37  ;;  %v5032_v4 = vpack.c.bf16 %v4520_v22, %v4520_v22 }
 0x1f9   : > { %8218 = vst.msk [vmem:[%s11027_s6 + $0x54] sm:$0xf] %vm5124_vm1, %v6704_v39 }
 0x1fa   : > { %5289 = vst.msk [vmem:[%s10693_s28 + $0x290] sm:$0xf] %vm5124_vm1, %v4776_v40 }
 0x1fb   : > { %5418 = vst.msk [vmem:[%s10693_s28 + $0x494] sm:$0xf] %vm5124_vm1, %v4905_v47 }
 0x1fc   : > { %6725 = vrot.lane.b32.xlu2 %v5669_v41, %s10519_s27  ;;  %7491 = vrot.lane.b32.xlu1 %v6052_v9, %s10519_s27  ;;  %v5671_v41 = vpack.c.bf16 %v12089_v0, %v12089_v0  ;;  %v10284_v0 = vld [vmem:[%s10615_s13 + $0x4c8] sm:$0xff]  ;;  %v4521_v9 = vmax.f32 %v12276_v35, 0.0  ;;  %5545 = vst.msk [vmem:[%s10693_s28 + $0x690] sm:$0xf] %vm5124_vm1, %v5032_v4 }
 0x1fd   : > { %7237 = vrot.lane.b32.xlu0 %v5925_v1, %s10519_s27  ;;  %v3232_v1 = vpop.f32.mrf.mxu1  ;;  %10023 = vmatmul.msk.bf16.gmra.mxu2 %vm2042_vm0, %v10284_v0 }
 0x1fe   : > { %v7476_v34 = vpop.permute.xlu2 %7475  ;;  %v7216_v45 = vpop.permute.xlu1 %7215  ;;  %v12270_v7 = vadd.f32 %v11870_v43, %v3232_v1 }
 0x1ff   : > { %8604 = vst.msk [vmem:[%s11027_s6 + $0x65c] sm:$0xf] %vm5124_vm1, %v7476_v34  ;;  %v7472_v62 = vpop.permute.xlu0 %7471 }
 0x200   : > { %8474 = vst.msk [vmem:[%s11027_s6 + $0x454] sm:$0xf] %vm5124_vm1, %v7216_v45  ;;  %v4265_v10 = vmax.f32 %v12270_v7, 0.0  ;;  %v5033_v45 = vpack.c.bf16 %v4521_v9, %v4521_v9  ;;  %v3555_v20 = vpop.f32.mrf.mxu2  ;;  %v10349_v9 = vld [vmem:[%s10615_s13 + $0x6d0] sm:$0xff] }
 0x201   : > { %8602 = vst.msk [vmem:[%s11027_s6 + $0x654] sm:$0xf] %vm5124_vm1, %v7472_v62  ;;  %v2915_v62 = vpop.f32.mrf.mxu0  ;;  %v12312_v53 = vadd.f32 %v11870_v43, %v3555_v20  ;;  %10088 = vmatmul.msk.bf16.gmra.mxu3 %vm2042_vm0, %v10349_v9  ;;  %v10222_v9 = vld [vmem:[%s10615_s13 + $0x2d8] sm:$0xff] }
 0x202   : > { %v4777_v50 = vpack.c.bf16 %v4265_v10, %v4265_v10  ;;  %5546 = vst.msk [vmem:[%s10693_s28 + $0x694] sm:$0xf] %vm5124_vm1, %v5033_v45  ;;  %v10285_v10 = vld [vmem:[%s10615_s13 + $0x4d0] sm:$0xff] }
 0x203   : > { %v4394_v21 = vmax.f32 %v12312_v53, 0.0 }
 0x204   : > { %7493 = vrot.lane.b32.xlu2 %v6053_v46, %s10519_s27  ;;  %6981 = vrot.lane.b32.xlu1 %v5797_v11, %s10519_s27  ;;  %v12299_v11 = vadd.f32 %v11870_v43, %v2915_v62  ;;  %5290 = vst.msk [vmem:[%s10693_s28 + $0x294] sm:$0xf] %vm5124_vm1, %v4777_v50 }
 0x205   : > { %6727 = vrot.lane.b32.xlu0 %v5670_v32, %s10519_s27  ;;  %v3235_v48 = vpop.f32.mrf.mxu1  ;;  %v5928_v32 = vpack.c.bf16 %v12169_v31, %v12169_v31  ;;  %9959 = vmatmul.msk.bf16.gmra.mxu1 %vm2042_vm0, %v10220_v52  ;;  %v4906_v17 = vpack.c.bf16 %v4394_v21, %v4394_v21 }
 0x206   : > { %v6966_v26 = vpop.permute.xlu2 %6965  ;;  %v6706_v12 = vpop.permute.xlu1 %6705  ;;  %v12302_v46 = vadd.f32 %v11870_v43, %v3235_v48  ;;  %v4138_v60 = vmax.f32 %v12299_v11, 0.0 }
 0x207   : > { %8349 = vst.msk [vmem:[%s11027_s6 + $0x260] sm:$0xf] %vm5124_vm1, %v6966_v26  ;;  %v6962_v16 = vpop.permute.xlu0 %6961 }
 0x208   : > { %8219 = vst.msk [vmem:[%s11027_s6 + $0x58] sm:$0xf] %vm5124_vm1, %v6706_v12  ;;  %v4266_v36 = vmax.f32 %v12302_v46, 0.0  ;;  %v4650_v12 = vpack.c.bf16 %v4138_v60, %v4138_v60  ;;  %v5930_v60 = vpack.c.bf16 %v12240_v42, %v12240_v42 }
 0x209   : > { %8347 = vst.msk [vmem:[%s11027_s6 + $0x258] sm:$0xf] %vm5124_vm1, %v6962_v16  ;;  %v2917_v14 = vpop.f32.mrf.mxu0 }
 0x20a   : > { %v4778_v16 = vpack.c.bf16 %v4266_v36, %v4266_v36  ;;  %v12336_v28 = vadd.f32 %v11870_v43, %v2917_v14  ;;  %5163 = vst.msk [vmem:[%s10693_s28 + $0x98] sm:$0xf] %vm5124_vm1, %v4650_v12 }
 0x20b   : > { %5419 = vst.msk [vmem:[%s10693_s28 + $0x498] sm:$0xf] %vm5124_vm1, %v4906_v17 }
 0x20c   : > { %6983 = vrot.lane.b32.xlu2 %v5798_v30, %s10519_s27  ;;  %7239 = vrot.lane.b32.xlu1 %v5926_v23, %s10519_s27  ;;  %v3557_v30 = vpop.f32.mrf.mxu2  ;;  %v3875_v23 = vpop.f32.mrf.mxu3  ;;  %5291 = vst.msk [vmem:[%s10693_s28 + $0x298] sm:$0xf] %vm5124_vm1, %v4778_v16  ;;  %v4139_v49 = vmax.f32 %v12336_v28, 0.0 }
 0x20d   : > { %7495 = vrot.lane.b32.xlu0 %v6054_v8, %s10519_s27  ;;  %v3237_v18 = vpop.f32.mrf.mxu1  ;;  %v5800_v8 = vpack.c.bf16 %v12161_v19, %v12161_v19  ;;  %v12348_v55 = vadd.f32 %v11870_v43, %v3557_v30  ;;  %v12355_v22 = vadd.f32 %v11870_v43, %v3875_v23  ;;  %10024 = vmatmul.msk.bf16.gmra.mxu2 %vm2042_vm0, %v10285_v10  ;;  %v10158_v10 = vld [vmem:[%s10615_s13 + $0xd8] sm:$0xff] }
 0x20e   : > { %v7224_v29 = vpop.permute.xlu2 %7223  ;;  %v7474_v37 = vpop.permute.xlu1 %7473  ;;  %v12339_v25 = vadd.f32 %v11870_v43, %v3237_v18  ;;  %v4651_v38 = vpack.c.bf16 %v4139_v49, %v4139_v49  ;;  %v5675_v18 = vpack.c.bf16 %v12299_v11, %v12299_v11  ;;  %v5931_v23 = vpack.c.bf16 %v12312_v53, %v12312_v53 }
 0x20f   : > { %8478 = vst.msk [vmem:[%s11027_s6 + $0x464] sm:$0xf] %vm5124_vm1, %v7224_v29  ;;  %v7220_v39 = vpop.permute.xlu0 %7219  ;;  %v4395_v19 = vmax.f32 %v12348_v55, 0.0  ;;  %v4522_v3 = vmax.f32 %v12355_v22, 0.0 }
 0x210   : > { %8603 = vst.msk [vmem:[%s11027_s6 + $0x658] sm:$0xf] %vm5124_vm1, %v7474_v37  ;;  %v4267_v15 = vmax.f32 %v12339_v25, 0.0 }
 0x211   : > { %8476 = vst.msk [vmem:[%s11027_s6 + $0x45c] sm:$0xf] %vm5124_vm1, %v7220_v39  ;;  %v4907_v47 = vpack.c.bf16 %v4395_v19, %v4395_v19  ;;  %v5034_v4 = vpack.c.bf16 %v4522_v3, %v4522_v3  ;;  %v10286_v19 = vld [vmem:[%s10615_s13 + $0x4d8] sm:$0xff]  ;;  %v6058_v3 = vpack.c.bf16 %v12276_v35, %v12276_v35 }
 0x212   : > { %v4779_v40 = vpack.c.bf16 %v4267_v15, %v4267_v15  ;;  %v2920_v1 = vpop.f32.mrf.mxu0  ;;  %5164 = vst.msk [vmem:[%s10693_s28 + $0x9c] sm:$0xf] %vm5124_vm1, %v4651_v38 }
 0x213   : > { %v12377_v51 = vadd.f32 %v11870_v43, %v2920_v1  ;;  %5420 = vst.msk [vmem:[%s10693_s28 + $0x49c] sm:$0xf] %vm5124_vm1, %v4907_v47  ;;  %v5803_v47 = vpack.c.bf16 %v12302_v46, %v12302_v46  ;;  %v6059_v1 = vpack.c.bf16 %v12355_v22, %v12355_v22  ;;  %v12495_v46 = vld [vmem:[%s16786_s2] ss:$0 sm:$0xff] }
 0x214   : > { %7241 = vrot.lane.b32.xlu2 %v5927_v24, %s10519_s27  ;;  %6729 = vrot.lane.b32.xlu1 %v5671_v41, %s10519_s27  ;;  %v5929_v41 = vpack.c.bf16 %v12205_v33, %v12205_v33  ;;  %v5801_v24 = vpack.c.bf16 %v12230_v2, %v12230_v2  ;;  %v3877_v0 = vpop.f32.mrf.mxu3  ;;  %v10157_v33 = vld [vmem:[%s10615_s13 + $0xd0] sm:$0xff]  ;;  %5292 = vst.msk [vmem:[%s10693_s28 + $0x29c] sm:$0xf] %vm5124_vm1, %v4779_v40  ;;  %v3560_v52 = vpop.f32.mrf.mxu2 }
 0x215   : > { %6985 = vrot.lane.b32.xlu0 %v5799_v5, %s10519_s27  ;;  %v6057_v5 = vpack.c.bf16 %v12249_v44, %v12249_v44  ;;  %v12385_v2 = vadd.f32 %v11870_v43, %v3877_v0  ;;  %v4140_v44 = vmax.f32 %v12377_v51, 0.0  ;;  %9896 = vmatmul.msk.bf16.gmra.mxu0 %vm2042_vm0, %v10157_v33  ;;  %5547 = vst.msk [vmem:[%s10693_s28 + $0x698] sm:$0xf] %vm5124_vm1, %v5034_v4 }
 0x216   : > { %v6714_v13 = vpop.permute.xlu2 %6713  ;;  %v6964_v54 = vpop.permute.xlu1 %6963  ;;  %v12421_v36 = vadd.f32 %v11870_v43, %v3560_v52 }
 0x217   : > { %8223 = vst.msk [vmem:[%s11027_s6 + $0x68] sm:$0xf] %vm5124_vm1, %v6714_v13  ;;  %v6710_v34 = vpop.permute.xlu0 %6709  ;;  %v4523_v13 = vmax.f32 %v12385_v2, 0.0 }
 0x218   : > { %8348 = vst.msk [vmem:[%s11027_s6 + $0x25c] sm:$0xf] %vm5124_vm1, %v6964_v54  ;;  %v4396_v42 = vmax.f32 %v12421_v36, 0.0 }
 0x219   : > { %8221 = vst.msk [vmem:[%s11027_s6 + $0x60] sm:$0xf] %vm5124_vm1, %v6710_v34  ;;  %v4652_v34 = vpack.c.bf16 %v4140_v44, %v4140_v44  ;;  %v5676_v44 = vpack.c.bf16 %v12336_v28, %v12336_v28 }
 0x21a   : > { %v2922_v62 = vpop.f32.mrf.mxu0  ;;  %v3240_v48 = vpop.f32.mrf.mxu1 }
 0x21b   : > { %v12408_v20 = vadd.f32 %v11870_v43, %v2922_v62  ;;  %v12411_v59 = vadd.f32 %v11870_v43, %v3240_v48  ;;  %5165 = vst.msk [vmem:[%s10693_s28 + $0xa0] sm:$0xf] %vm5124_vm1, %v4652_v34 }
 0x21c   : > { %6731 = vrot.lane.b32.xlu2 %v5672_v57, %s10519_s27  ;;  %7497 = vrot.lane.b32.xlu1 %v6055_v61, %s10519_s27  ;;  %v5035_v61 = vpack.c.bf16 %v4523_v13, %v4523_v13  ;;  %v3880_v58 = vpop.f32.mrf.mxu3  ;;  %v10221_v57 = vld [vmem:[%s10615_s13 + $0x2d0] sm:$0xff]  ;;  %v3562_v49 = vpop.f32.mrf.mxu2 }
 0x21d   : > { %7243 = vrot.lane.b32.xlu0 %v5928_v32, %s10519_s27  ;;  %v5674_v32 = vpack.c.bf16 %v12227_v27, %v12227_v27  ;;  %v12424_v21 = vadd.f32 %v11870_v43, %v3880_v58  ;;  %v4141_v27 = vmax.f32 %v12408_v20, 0.0  ;;  %9960 = vmatmul.msk.bf16.gmra.mxu1 %vm2042_vm0, %v10221_v57  ;;  %v12457_v11 = vadd.f32 %v11870_v43, %v3562_v49 }
 0x21e   : > { %v7482_v31 = vpop.permute.xlu2 %7481  ;;  %v7222_v26 = vpop.permute.xlu1 %7221  ;;  %5548 = vst.msk [vmem:[%s10693_s28 + $0x69c] sm:$0xf] %vm5124_vm1, %v5035_v61  ;;  %10025 = vmatmul.msk.bf16.gmra.mxu2 %vm2042_vm0, %v10286_v19 }
 0x21f   : > { %8607 = vst.msk [vmem:[%s11027_s6 + $0x668] sm:$0xf] %vm5124_vm1, %v7482_v31  ;;  %v7478_v56 = vpop.permute.xlu0 %7477  ;;  %v5802_v31 = vpack.c.bf16 %v12270_v7, %v12270_v7  ;;  %v4524_v7 = vmax.f32 %v12424_v21, 0.0  ;;  %v4653_v16 = vpack.c.bf16 %v4141_v27, %v4141_v27  ;;  %v4397_v35 = vmax.f32 %v12457_v11, 0.0 }
 0x220   : > { %8477 = vst.msk [vmem:[%s11027_s6 + $0x460] sm:$0xf] %vm5124_vm1, %v7222_v26  ;;  %v4268_v26 = vmax.f32 %v12411_v59, 0.0 }
 0x221   : > { %8605 = vst.msk [vmem:[%s11027_s6 + $0x660] sm:$0xf] %vm5124_vm1, %v7478_v56 }
 0x222   : > { %v4780_v14 = vpack.c.bf16 %v4268_v26, %v4268_v26  ;;  %v3242_v30 = vpop.f32.mrf.mxu1  ;;  %5166 = vst.msk [vmem:[%s10693_s28 + $0xa4] sm:$0xf] %vm5124_vm1, %v4653_v16  ;;  %v6060_v26 = vpack.c.bf16 %v12385_v2, %v12385_v2 }
 0x223   : > { %v2925_v4 = vpop.f32.mrf.mxu0 }
 0x224   : > { %7499 = vrot.lane.b32.xlu2 %v6056_v63, %s10519_s27  ;;  %6987 = vrot.lane.b32.xlu1 %v5800_v8, %s10519_s27  ;;  %v5036_v8 = vpack.c.bf16 %v4524_v7, %v4524_v7  ;;  %v12449_v63 = vadd.f32 %v11870_v43, %v3242_v30  ;;  %v3882_v15 = vpop.f32.mrf.mxu3  ;;  %5293 = vst.msk [vmem:[%s10693_s28 + $0x2a0] sm:$0xf] %vm5124_vm1, %v4780_v14  ;;  %v3565_v33 = vpop.f32.mrf.mxu2 }
 0x225   : > { %6733 = vrot.lane.b32.xlu0 %v5673_v6, %s10519_s27  ;;  %v4908_v6 = vpack.c.bf16 %v4396_v42, %v4396_v42  ;;  %v12460_v53 = vadd.f32 %v11870_v43, %v3882_v15  ;;  %v12486_v0 = vadd.f32 %v11870_v43, %v2925_v4  ;;  %v12498_v22 = vadd.f32 %v12495_v46, %v3565_v33  ;;  %v10288_v33 = vld [vmem:[%s10615_s13 + $0x4e8] sm:$0xff] }
 0x226   : > { %v6972_v29 = vpop.permute.xlu2 %6971  ;;  %v6712_v37 = vpop.permute.xlu1 %6711  ;;  %5549 = vst.msk [vmem:[%s10693_s28 + $0x6a0] sm:$0xf] %vm5124_vm1, %v5036_v8  ;;  %9897 = vmatmul.msk.bf16.gmra.mxu0 %vm2042_vm0, %v10158_v10  ;;  %v5805_v8 = vpack.c.bf16 %v12411_v59, %v12411_v59  ;;  %v5678_v10 = vpack.c.bf16 %v12408_v20, %v12408_v20 }
 0x227   : > { %8352 = vst.msk [vmem:[%s11027_s6 + $0x26c] sm:$0xf] %vm5124_vm1, %v6972_v29  ;;  %v6968_v39 = vpop.permute.xlu0 %6967  ;;  %v4269_v29 = vmax.f32 %v12449_v63, 0.0  ;;  %v4142_v43 = vmax.f32 %v12486_v0, 0.0  ;;  %v4398_v13 = vmax.f32 %v12498_v22, 0.0 }
 0x228   : > { %8222 = vst.msk [vmem:[%s11027_s6 + $0x64] sm:$0xf] %vm5124_vm1, %v6712_v37  ;;  %v4525_v37 = vmax.f32 %v12460_v53, 0.0 }
 0x229   : > { %8350 = vst.msk [vmem:[%s11027_s6 + $0x264] sm:$0xf] %vm5124_vm1, %v6968_v39  ;;  %v4781_v40 = vpack.c.bf16 %v4269_v29, %v4269_v29 }
 0x22a   : > { %5421 = vst.msk [vmem:[%s10693_s28 + $0x4a0] sm:$0xf] %vm5124_vm1, %v4908_v6  ;;  %v5933_v6 = vpack.c.bf16 %v12421_v36, %v12421_v36 }
 0x22b   : > { %5294 = vst.msk [vmem:[%s10693_s28 + $0x2a4] sm:$0xf] %vm5124_vm1, %v4781_v40  ;;  %v2927_v61 = vpop.f32.mrf.mxu0 }
 0x22c   : > { %6989 = vrot.lane.b32.xlu2 %v5801_v24, %s10519_s27  ;;  %7245 = vrot.lane.b32.xlu1 %v5929_v41, %s10519_s27  ;;  %v4909_v24 = vpack.c.bf16 %v4397_v35, %v4397_v35  ;;  %v12520_v48 = vadd.f32 %v12495_v46, %v2927_v61  ;;  %v3567_v58 = vpop.f32.mrf.mxu2  ;;  %v3885_v57 = vpop.f32.mrf.mxu3 }
 0x22d   : > { %7501 = vrot.lane.b32.xlu0 %v6057_v5, %s10519_s27  ;;  %v5037_v5 = vpack.c.bf16 %v4525_v37, %v4525_v37  ;;  %9961 = vmatmul.msk.bf16.gmra.mxu1 %vm2042_vm0, %v10222_v9  ;;  %v12533_v27 = vadd.f32 %v12495_v46, %v3567_v58  ;;  %v5934_v9 = vpack.c.bf16 %v12457_v11, %v12457_v11 }
 0x22e   : > { %v7230_v54 = vpop.permute.xlu2 %7229  ;;  %v7480_v50 = vpop.permute.xlu1 %7479  ;;  %5422 = vst.msk [vmem:[%s10693_s28 + $0x4a4] sm:$0xf] %vm5124_vm1, %v4909_v24  ;;  %v4143_v42 = vmax.f32 %v12520_v48, 0.0 }
 0x22f   : > { %8481 = vst.msk [vmem:[%s11027_s6 + $0x470] sm:$0xf] %vm5124_vm1, %v7230_v54  ;;  %v7226_v45 = vpop.permute.xlu0 %7225 }
 0x230   : > { %8606 = vst.msk [vmem:[%s11027_s6 + $0x664] sm:$0xf] %vm5124_vm1, %v7480_v50  ;;  %v4654_v50 = vpack.c.bf16 %v4142_v43, %v4142_v43  ;;  %v4655_v16 = vpack.c.bf16 %v4143_v42, %v4143_v42  ;;  %v5806_v42 = vpack.c.bf16 %v12449_v63, %v12449_v63 }
 0x231   : > { %8479 = vst.msk [vmem:[%s11027_s6 + $0x468] sm:$0xf] %vm5124_vm1, %v7226_v45  ;;  %v4910_v45 = vpack.c.bf16 %v4398_v13, %v4398_v13 }
 0x232   : > { %5550 = vst.msk [vmem:[%s10693_s28 + $0x6a4] sm:$0xf] %vm5124_vm1, %v5037_v5  ;;  %v3245_v62 = vpop.f32.mrf.mxu1 }
 0x233   : > { %v12523_v52 = vadd.f32 %v12495_v46, %v3245_v62  ;;  %5167 = vst.msk [vmem:[%s10693_s28 + $0xa8] sm:$0xf] %vm5124_vm1, %v4654_v50  ;;  %v2930_v24 = vpop.f32.mrf.mxu0  ;;  %v5679_v62 = vpack.c.bf16 %v12486_v0, %v12486_v0 }
 0x234   : > { %7247 = vrot.lane.b32.xlu2 %v5930_v60, %s10519_s27  ;;  %6735 = vrot.lane.b32.xlu1 %v5674_v32, %s10519_s27  ;;  %v10287_v32 = vld [vmem:[%s10615_s13 + $0x4e0] sm:$0xff]  ;;  %v5804_v60 = vpack.c.bf16 %v12339_v25, %v12339_v25  ;;  %5423 = vst.msk [vmem:[%s10693_s28 + $0x4a8] sm:$0xf] %vm5124_vm1, %v4910_v45  ;;  %v12542_v25 = vadd.f32 %v12495_v46, %v3885_v57  ;;  %v3887_v19 = vpop.f32.mrf.mxu3 }
 0x235   : > { %6991 = vrot.lane.b32.xlu0 %v5802_v31, %s10519_s27  ;;  %v5932_v31 = vpack.c.bf16 %v12348_v55, %v12348_v55  ;;  %v4270_v7 = vmax.f32 %v12523_v52, 0.0  ;;  %10026 = vmatmul.msk.bf16.gmra.mxu2 %vm2042_vm0, %v10287_v32  ;;  %v4399_v55 = vmax.f32 %v12533_v27, 0.0  ;;  %5168 = vst.msk [vmem:[%s10693_s28 + $0xac] sm:$0xf] %vm5124_vm1, %v4655_v16  ;;  %v12570_v36 = vadd.f32 %v12495_v46, %v3887_v19 }
 0x236   : > { %v6720_v12 = vpop.permute.xlu2 %6719  ;;  %v6970_v56 = vpop.permute.xlu1 %6969  ;;  %v4526_v2 = vmax.f32 %v12542_v25, 0.0 }
 0x237   : > { %8226 = vst.msk [vmem:[%s11027_s6 + $0x74] sm:$0xf] %vm5124_vm1, %v6720_v12  ;;  %v6716_v17 = vpop.permute.xlu0 %6715  ;;  %v4782_v14 = vpack.c.bf16 %v4270_v7, %v4270_v7  ;;  %v4911_v30 = vpack.c.bf16 %v4399_v55, %v4399_v55  ;;  %v4527_v29 = vmax.f32 %v12570_v36, 0.0  ;;  %v6062_v7 = vpack.c.bf16 %v12460_v53, %v12460_v53 }
 0x238   : > { %8351 = vst.msk [vmem:[%s11027_s6 + $0x268] sm:$0xf] %vm5124_vm1, %v6970_v56  ;;  %v5038_v49 = vpack.c.bf16 %v4526_v2, %v4526_v2 }
 0x239   : > { %8224 = vst.msk [vmem:[%s11027_s6 + $0x6c] sm:$0xf] %vm5124_vm1, %v6716_v17  ;;  %v5039_v40 = vpack.c.bf16 %v4527_v29, %v4527_v29 }
 0x23a   : > { %5295 = vst.msk [vmem:[%s10693_s28 + $0x2a8] sm:$0xf] %vm5124_vm1, %v4782_v14 }
 0x23b   : > { %5424 = vst.msk [vmem:[%s10693_s28 + $0x4ac] sm:$0xf] %vm5124_vm1, %v4911_v30  ;;  %v2932_v45 = vpop.f32.mrf.mxu0  ;;  %v5807_v30 = vpack.c.bf16 %v12523_v52, %v12523_v52 }
 0x23c   : > { %6737 = vrot.lane.b32.xlu2 %v5675_v18, %s10519_s27  ;;  %7503 = vrot.lane.b32.xlu1 %v6058_v3, %s10519_s27  ;;  %v5677_v18 = vpack.c.bf16 %v12377_v51, %v12377_v51  ;;  %v10159_v51 = vld [vmem:[%s10615_s13 + $0xe0] sm:$0xff]  ;;  %5551 = vst.msk [vmem:[%s10693_s28 + $0x6a8] sm:$0xf] %vm5124_vm1, %v5038_v49  ;;  %v12627_v58 = vadd.f32 %v12495_v46, %v2932_v45 }
 0x23d   : > { %7249 = vrot.lane.b32.xlu0 %v5931_v23, %s10519_s27  ;;  %v3247_v23 = vpop.f32.mrf.mxu1  ;;  %v10223_v3 = vld [vmem:[%s10615_s13 + $0x2e0] sm:$0xff]  ;;  %9898 = vmatmul.msk.bf16.gmra.mxu0 %vm2042_vm0, %v10159_v51  ;;  %5552 = vst.msk [vmem:[%s10693_s28 + $0x6ac] sm:$0xf] %vm5124_vm1, %v5039_v40  ;;  %v6063_v49 = vpack.c.bf16 %v12542_v25, %v12542_v25 }
 0x23e   : > { %v7488_v38 = vpop.permute.xlu2 %7487  ;;  %v7228_v39 = vpop.permute.xlu1 %7227  ;;  %v12563_v15 = vadd.f32 %v12495_v46, %v3247_v23  ;;  %9962 = vmatmul.msk.bf16.gmra.mxu1 %vm2042_vm0, %v10223_v3  ;;  %v4145_v55 = vmax.f32 %v12627_v58, 0.0 }
 0x23f   : > { %8610 = vst.msk [vmem:[%s11027_s6 + $0x674] sm:$0xf] %vm5124_vm1, %v7488_v38  ;;  %v7484_v41 = vpop.permute.xlu0 %7483 }
 0x240   : > { %8480 = vst.msk [vmem:[%s11027_s6 + $0x46c] sm:$0xf] %vm5124_vm1, %v7228_v39  ;;  %v4271_v59 = vmax.f32 %v12563_v15, 0.0  ;;  %v3570_v4 = vpop.f32.mrf.mxu2 }
 0x241   : > { %8608 = vst.msk [vmem:[%s11027_s6 + $0x66c] sm:$0xf] %vm5124_vm1, %v7484_v41  ;;  %v6061_v41 = vpack.c.bf16 %v12424_v21, %v12424_v21  ;;  %v12605_v21 = vadd.f32 %v12495_v46, %v3570_v4 }
 0x242   : > { %v4783_v38 = vpack.c.bf16 %v4271_v59, %v4271_v59 }
 0x243   : > { %v4400_v20 = vmax.f32 %v12605_v21, 0.0 }
 0x244   : > { %7505 = vrot.lane.b32.xlu2 %v6059_v1, %s10519_s27  ;;  %6993 = vrot.lane.b32.xlu1 %v5803_v47, %s10519_s27  ;;  %v12594_v1 = vadd.f32 %v12495_v46, %v2930_v24  ;;  %5296 = vst.msk [vmem:[%s10693_s28 + $0x2ac] sm:$0xf] %vm5124_vm1, %v4783_v38 }
 0x245   : > { %6739 = vrot.lane.b32.xlu0 %v5676_v44, %s10519_s27  ;;  %v3250_v47 = vpop.f32.mrf.mxu1  ;;  %10027 = vmatmul.msk.bf16.gmra.mxu2 %vm2042_vm0, %v10288_v33 }
 0x246   : > { %v6978_v28 = vpop.permute.xlu2 %6977  ;;  %v6718_v54 = vpop.permute.xlu1 %6717  ;;  %v12597_v5 = vadd.f32 %v12495_v46, %v3250_v47  ;;  %v4144_v44 = vmax.f32 %v12594_v1, 0.0 }
 0x247   : > { %8355 = vst.msk [vmem:[%s11027_s6 + $0x278] sm:$0xf] %vm5124_vm1, %v6978_v28  ;;  %v6974_v34 = vpop.permute.xlu0 %6973 }
 0x248   : > { %8225 = vst.msk [vmem:[%s11027_s6 + $0x70] sm:$0xf] %vm5124_vm1, %v6718_v54  ;;  %v4272_v43 = vmax.f32 %v12597_v5, 0.0  ;;  %v4656_v28 = vpack.c.bf16 %v4144_v44, %v4144_v44  ;;  %v3572_v32 = vpop.f32.mrf.mxu2  ;;  %v5680_v44 = vpack.c.bf16 %v12520_v48, %v12520_v48 }
 0x249   : > { %8353 = vst.msk [vmem:[%s11027_s6 + $0x270] sm:$0xf] %vm5124_vm1, %v6974_v34  ;;  %v4912_v34 = vpack.c.bf16 %v4400_v20, %v4400_v20  ;;  %v12641_v0 = vadd.f32 %v12495_v46, %v3572_v32 }
 0x24a   : > { %v4784_v50 = vpack.c.bf16 %v4272_v43, %v4272_v43  ;;  %5169 = vst.msk [vmem:[%s10693_s28 + $0xb0] sm:$0xf] %vm5124_vm1, %v4656_v28  ;;  %v5936_v43 = vpack.c.bf16 %v12533_v27, %v12533_v27 }
 0x24b   : > { %5425 = vst.msk [vmem:[%s10693_s28 + $0x4b0] sm:$0xf] %vm5124_vm1, %v4912_v34  ;;  %v4401_v63 = vmax.f32 %v12641_v0, 0.0 }
 0x24c   : > { %6995 = vrot.lane.b32.xlu2 %v5804_v60, %s10519_s27  ;;  %7251 = vrot.lane.b32.xlu1 %v5932_v31, %s10519_s27  ;;  %v3890_v60 = vpop.f32.mrf.mxu3  ;;  %v10160_v31 = vld [vmem:[%s10615_s13 + $0xe8] sm:$0xff]  ;;  %5297 = vst.msk [vmem:[%s10693_s28 + $0x2b0] sm:$0xf] %vm5124_vm1, %v4784_v50 }
 0x24d   : > { %7507 = vrot.lane.b32.xlu0 %v6060_v26, %s10519_s27  ;;  %v3252_v61 = vpop.f32.mrf.mxu1  ;;  %v10224_v26 = vld [vmem:[%s10615_s13 + $0x2e8] sm:$0xff]  ;;  %9899 = vmatmul.msk.bf16.gmra.mxu0 %vm2042_vm0, %v10160_v31  ;;  %v4913_v23 = vpack.c.bf16 %v4401_v63, %v4401_v63  ;;  %v5937_v31 = vpack.c.bf16 %v12605_v21, %v12605_v21  ;;  %v6064_v63 = vpack.c.bf16 %v12570_v36, %v12570_v36 }
 0x24e   : > { %v7236_v12 = vpop.permute.xlu2 %7235  ;;  %v7486_v56 = vpop.permute.xlu1 %7485  ;;  %v12630_v57 = vadd.f32 %v12495_v46, %v3252_v61  ;;  %9963 = vmatmul.msk.bf16.gmra.mxu1 %vm2042_vm0, %v10224_v26 }
 0x24f   : > { %8484 = vst.msk [vmem:[%s11027_s6 + $0x47c] sm:$0xf] %vm5124_vm1, %v7236_v12  ;;  %v7232_v17 = vpop.permute.xlu0 %7231  ;;  %v12648_v12 = vadd.f32 %v12495_v46, %v3890_v60 }
 0x250   : > { %8609 = vst.msk [vmem:[%s11027_s6 + $0x670] sm:$0xf] %vm5124_vm1, %v7486_v56  ;;  %v4273_v2 = vmax.f32 %v12630_v57, 0.0  ;;  %v3575_v4 = vpop.f32.mrf.mxu2 }
 0x251   : > { %8482 = vst.msk [vmem:[%s11027_s6 + $0x474] sm:$0xf] %vm5124_vm1, %v7232_v17  ;;  %v4528_v53 = vmax.f32 %v12648_v12, 0.0  ;;  %v4657_v17 = vpack.c.bf16 %v4145_v55, %v4145_v55  ;;  %v12713_v20 = vadd.f32 %v12495_v46, %v3575_v4 }
 0x252   : > { %5426 = vst.msk [vmem:[%s10693_s28 + $0x4b4] sm:$0xf] %vm5124_vm1, %v4913_v23  ;;  %v6065_v23 = vpack.c.bf16 %v12648_v12, %v12648_v12  ;;  %v5682_v12 = vpack.c.bf16 %v12627_v58, %v12627_v58 }
 0x253   : > { %v5040_v19 = vpack.c.bf16 %v4528_v53, %v4528_v53  ;;  %5170 = vst.msk [vmem:[%s10693_s28 + $0xb4] sm:$0xf] %vm5124_vm1, %v4657_v17  ;;  %v4402_v27 = vmax.f32 %v12713_v20, 0.0 }
 0x254   : > { %7253 = vrot.lane.b32.xlu2 %v5933_v6, %s10519_s27  ;;  %6741 = vrot.lane.b32.xlu1 %v5677_v18, %s10519_s27  ;;  %v4785_v18 = vpack.c.bf16 %v4273_v2, %v4273_v2  ;;  %v5935_v6 = vpack.c.bf16 %v12498_v22, %v12498_v22  ;;  %v3892_v3 = vpop.f32.mrf.mxu3  ;;  %v10289_v22 = vld [vmem:[%s10615_s13 + $0x4f0] sm:$0xff]  ;;  %v10290_v2 = vld [vmem:[%s10615_s13 + $0x4f8] sm:$0xff] }
 0x255   : > { %6997 = vrot.lane.b32.xlu0 %v5805_v8, %s10519_s27  ;;  %v2935_v8 = vpop.f32.mrf.mxu0  ;;  %v12678_v52 = vadd.f32 %v12495_v46, %v3892_v3  ;;  %10028 = vmatmul.msk.bf16.gmra.mxu2 %vm2042_vm0, %v10289_v22  ;;  %5553 = vst.msk [vmem:[%s10693_s28 + $0x6b0] sm:$0xf] %vm5124_vm1, %v5040_v19  ;;  %v4914_v32 = vpack.c.bf16 %v4402_v27, %v4402_v27  ;;  %v10162_v22 = vld [vmem:[%s10615_s13 + $0xf8] sm:$0xff] }
 0x256   : > { %v6726_v35 = vpop.permute.xlu2 %6725  ;;  %v6976_v37 = vpop.permute.xlu1 %6975  ;;  %v12672_v51 = vadd.f32 %v12495_v46, %v2935_v8  ;;  %5298 = vst.msk [vmem:[%s10693_s28 + $0x2b4] sm:$0xf] %vm5124_vm1, %v4785_v18 }
 0x257   : > { %8229 = vst.msk [vmem:[%s11027_s6 + $0x80] sm:$0xf] %vm5124_vm1, %v6726_v35  ;;  %v6722_v39 = vpop.permute.xlu0 %6721  ;;  %v4529_v59 = vmax.f32 %v12678_v52, 0.0 }
 0x258   : > { %8354 = vst.msk [vmem:[%s11027_s6 + $0x274] sm:$0xf] %vm5124_vm1, %v6976_v37  ;;  %v4146_v25 = vmax.f32 %v12672_v51, 0.0 }
 0x259   : > { %8227 = vst.msk [vmem:[%s11027_s6 + $0x78] sm:$0xf] %vm5124_vm1, %v6722_v39  ;;  %v5041_v39 = vpack.c.bf16 %v4529_v59, %v4529_v59 }
 0x25a   : > { %v4658_v37 = vpack.c.bf16 %v4146_v25, %v4146_v25  ;;  %5427 = vst.msk [vmem:[%s10693_s28 + $0x4b8] sm:$0xf] %vm5124_vm1, %v4914_v32  ;;  %v10226_v25 = vld [vmem:[%s10615_s13 + $0x2f8] sm:$0xff]  ;;  %v5939_v32 = vpack.c.bf16 %v12713_v20, %v12713_v20 }
 0x25b   : > { %5554 = vst.msk [vmem:[%s10693_s28 + $0x6b4] sm:$0xf] %vm5124_vm1, %v5041_v39 }
 0x25c   : > { %6743 = vrot.lane.b32.xlu2 %v5678_v10, %s10519_s27  ;;  %7509 = vrot.lane.b32.xlu1 %v6061_v41, %s10519_s27  ;;  %v3255_v41 = vpop.f32.mrf.mxu1  ;;  %v3895_v33 = vpop.f32.mrf.mxu3  ;;  %v10161_v10 = vld [vmem:[%s10615_s13 + $0xf0] sm:$0xff]  ;;  %5171 = vst.msk [vmem:[%s10693_s28 + $0xb8] sm:$0xf] %vm5124_vm1, %v4658_v37 }
 0x25d   : > { %7255 = vrot.lane.b32.xlu0 %v5934_v9, %s10519_s27  ;;  %v2937_v40 = vpop.f32.mrf.mxu0  ;;  %v12702_v47 = vadd.f32 %v12495_v46, %v3255_v41  ;;  %v10225_v9 = vld [vmem:[%s10615_s13 + $0x2f0] sm:$0xff]  ;;  %9900 = vmatmul.msk.bf16.gmra.mxu0 %vm2042_vm0, %v10161_v10 }
 0x25e   : > { %v7494_v13 = vpop.permute.xlu2 %7493  ;;  %v7234_v11 = vpop.permute.xlu1 %7233  ;;  %v12699_v24 = vadd.f32 %v12495_v46, %v2937_v40  ;;  %9964 = vmatmul.msk.bf16.gmra.mxu1 %vm2042_vm0, %v10225_v9 }
 0x25f   : > { %8613 = vst.msk [vmem:[%s11027_s6 + $0x680] sm:$0xf] %vm5124_vm1, %v7494_v13  ;;  %v7490_v54 = vpop.permute.xlu0 %7489  ;;  %v12716_v13 = vadd.f32 %v12495_v46, %v3895_v33  ;;  %v4274_v28 = vmax.f32 %v12702_v47, 0.0 }
 0x260   : > { %8483 = vst.msk [vmem:[%s11027_s6 + $0x478] sm:$0xf] %vm5124_vm1, %v7234_v11  ;;  %v5808_v11 = vpack.c.bf16 %v12563_v15, %v12563_v15  ;;  %v4147_v48 = vmax.f32 %v12699_v24, 0.0 }
 0x261   : > { %8611 = vst.msk [vmem:[%s11027_s6 + $0x678] sm:$0xf] %vm5124_vm1, %v7490_v54  ;;  %v4530_v15 = vmax.f32 %v12716_v13, 0.0  ;;  %v4786_v61 = vpack.c.bf16 %v4274_v28, %v4274_v28  ;;  %v6066_v28 = vpack.c.bf16 %v12678_v52, %v12678_v52 }
 0x262   : > { %v4659_v34 = vpack.c.bf16 %v4147_v48, %v4147_v48 }
 0x263   : > { %v5042_v26 = vpack.c.bf16 %v4530_v15, %v4530_v15  ;;  %5299 = vst.msk [vmem:[%s10693_s28 + $0x2b8] sm:$0xf] %vm5124_vm1, %v4786_v61 }
 0x264   : > { %7511 = vrot.lane.b32.xlu2 %v6062_v7, %s10519_s27  ;;  %6999 = vrot.lane.b32.xlu1 %v5806_v42, %s10519_s27  ;;  %v3257_v60 = vpop.f32.mrf.mxu1  ;;  %v3577_v7 = vpop.f32.mrf.mxu2  ;;  %5172 = vst.msk [vmem:[%s10693_s28 + $0xbc] sm:$0xf] %vm5124_vm1, %v4659_v34 }
 0x265   : > { %6745 = vrot.lane.b32.xlu0 %v5679_v62, %s10519_s27  ;;  %v5681_v62 = vpack.c.bf16 %v12594_v1, %v12594_v1  ;;  %v12742_v42 = vadd.f32 %v12495_v46, %v3257_v60  ;;  %v3897_v55 = vpop.f32.mrf.mxu3  ;;  %v12750_v1 = vadd.f32 %v12495_v46, %v3577_v7  ;;  %10029 = vmatmul.msk.bf16.gmra.mxu2 %vm2042_vm0, %v10290_v2 }
 0x266   : > { %v6984_v56 = vpop.permute.xlu2 %6983  ;;  %v6724_v16 = vpop.permute.xlu1 %6723  ;;  %v12753_v21 = vadd.f32 %v12495_v46, %v3897_v55  ;;  %5555 = vst.msk [vmem:[%s10693_s28 + $0x6b8] sm:$0xf] %vm5124_vm1, %v5042_v26  ;;  %v5811_v26 = vpack.c.bf16 %v12702_v47, %v12702_v47 }
 0x267   : > { %8358 = vst.msk [vmem:[%s11027_s6 + $0x284] sm:$0xf] %vm5124_vm1, %v6984_v56  ;;  %v6980_v14 = vpop.permute.xlu0 %6979  ;;  %v4275_v53 = vmax.f32 %v12742_v42, 0.0  ;;  %v4403_v36 = vmax.f32 %v12750_v1, 0.0 }
 0x268   : > { %8228 = vst.msk [vmem:[%s11027_s6 + $0x7c] sm:$0xf] %vm5124_vm1, %v6724_v16  ;;  %v4531_v56 = vmax.f32 %v12753_v21, 0.0 }
 0x269   : > { %8356 = vst.msk [vmem:[%s11027_s6 + $0x27c] sm:$0xf] %vm5124_vm1, %v6980_v14  ;;  %v4787_v14 = vpack.c.bf16 %v4275_v53, %v4275_v53 }
 0x26a   : > { %v5043_v8 = vpack.c.bf16 %v4531_v56, %v4531_v56 }
 0x26b   : > { %5300 = vst.msk [vmem:[%s10693_s28 + $0x2bc] sm:$0xf] %vm5124_vm1, %v4787_v14 }
 0x26c   : > { %7001 = vrot.lane.b32.xlu2 %v5807_v30, %s10519_s27  ;;  %7257 = vrot.lane.b32.xlu1 %v5935_v6, %s10519_s27  ;;  %v4915_v6 = vpack.c.bf16 %v4403_v36, %v4403_v36  ;;  %v5809_v30 = vpack.c.bf16 %v12597_v5, %v12597_v5  ;;  %v3580_v3 = vpop.f32.mrf.mxu2  ;;  %5556 = vst.msk [vmem:[%s10693_s28 + $0x6bc] sm:$0xf] %vm5124_vm1, %v5043_v8 }
 0x26d   : > { %7513 = vrot.lane.b32.xlu0 %v6063_v49, %s10519_s27  ;;  %v2940_v49 = vpop.f32.mrf.mxu0  ;;  %v12786_v5 = vadd.f32 %v12495_v46, %v3580_v3  ;;  %9901 = vmatmul.msk.bf16.gmra.mxu0 %vm2042_vm0, %v10162_v22  ;;  %v3900_v9 = vpop.f32.mrf.mxu3  ;;  %v10292_v3 = vld [vmem:[%s10615_s13 + $0x508] sm:$0xff]  ;;  %v5684_v22 = vpack.c.bf16 %v12699_v24, %v12699_v24 }
 0x26e   : > { %v7242_v29 = vpop.permute.xlu2 %7241  ;;  %v7492_v35 = vpop.permute.xlu1 %7491  ;;  %v12779_v19 = vadd.f32 %v12495_v46, %v2940_v49  ;;  %5428 = vst.msk [vmem:[%s10693_s28 + $0x4bc] sm:$0xf] %vm5124_vm1, %v4915_v6  ;;  %9965 = vmatmul.msk.bf16.gmra.mxu1 %vm2042_vm0, %v10226_v25  ;;  %v5940_v25 = vpack.c.bf16 %v12750_v1, %v12750_v1 }
 0x26f   : > { %8487 = vst.msk [vmem:[%s11027_s6 + $0x488] sm:$0xf] %vm5124_vm1, %v7242_v29  ;;  %v7238_v38 = vpop.permute.xlu0 %7237  ;;  %v4404_v29 = vmax.f32 %v12786_v5, 0.0 }
 0x270   : > { %8612 = vst.msk [vmem:[%s11027_s6 + $0x67c] sm:$0xf] %vm5124_vm1, %v7492_v35  ;;  %v4148_v59 = vmax.f32 %v12779_v19, 0.0 }
 0x271   : > { %8485 = vst.msk [vmem:[%s11027_s6 + $0x480] sm:$0xf] %vm5124_vm1, %v7238_v38  ;;  %v4916_v39 = vpack.c.bf16 %v4404_v29, %v4404_v29 }
 0x272   : > { %v4660_v37 = vpack.c.bf16 %v4148_v59, %v4148_v59  ;;  %v3260_v41 = vpop.f32.mrf.mxu1 }
 0x273   : > { %v12811_v33 = vadd.f32 %v12495_v46, %v3260_v41  ;;  %5429 = vst.msk [vmem:[%s10693_s28 + $0x4c0] sm:$0xf] %vm5124_vm1, %v4916_v39  ;;  %v5685_v41 = vpack.c.bf16 %v12779_v19, %v12779_v19 }
 0x274   : > { %7259 = vrot.lane.b32.xlu2 %v5936_v43, %s10519_s27  ;;  %6747 = vrot.lane.b32.xlu1 %v5680_v44, %s10519_s27  ;;  %v3582_v10 = vpop.f32.mrf.mxu2  ;;  %v10291_v44 = vld [vmem:[%s10615_s13 + $0x500] sm:$0xff]  ;;  %v5810_v43 = vpack.c.bf16 %v12630_v57, %v12630_v57  ;;  %5173 = vst.msk [vmem:[%s10693_s28 + $0xc0] sm:$0xf] %vm5124_vm1, %v4660_v37  ;;  %v12830_v57 = vadd.f32 %v12495_v46, %v3900_v9 }
 0x275   : > { %7003 = vrot.lane.b32.xlu0 %v5808_v11, %s10519_s27  ;;  %v2942_v40 = vpop.f32.mrf.mxu0  ;;  %v5938_v11 = vpack.c.bf16 %v12641_v0, %v12641_v0  ;;  %v12821_v48 = vadd.f32 %v12495_v46, %v3582_v10  ;;  %v4276_v15 = vmax.f32 %v12811_v33, 0.0  ;;  %10030 = vmatmul.msk.bf16.gmra.mxu2 %vm2042_vm0, %v10291_v44  ;;  %v3902_v2 = vpop.f32.mrf.mxu3 }
 0x276   : > { %v6732_v54 = vpop.permute.xlu2 %6731  ;;  %v6982_v50 = vpop.permute.xlu1 %6981  ;;  %v12808_v4 = vadd.f32 %v12495_v46, %v2942_v40  ;;  %v4532_v52 = vmax.f32 %v12830_v57, 0.0  ;;  %v12858_v20 = vadd.f32 %v12495_v46, %v3902_v2 }
 0x277   : > { %8232 = vst.msk [vmem:[%s11027_s6 + $0x8c] sm:$0xf] %vm5124_vm1, %v6732_v54  ;;  %v6728_v45 = vpop.permute.xlu0 %6727  ;;  %v4405_v0 = vmax.f32 %v12821_v48, 0.0  ;;  %v4788_v61 = vpack.c.bf16 %v4276_v15, %v4276_v15  ;;  %v6068_v15 = vpack.c.bf16 %v12753_v21, %v12753_v21 }
 0x278   : > { %8357 = vst.msk [vmem:[%s11027_s6 + $0x280] sm:$0xf] %vm5124_vm1, %v6982_v50  ;;  %v4149_v27 = vmax.f32 %v12808_v4, 0.0  ;;  %v5044_v7 = vpack.c.bf16 %v4532_v52, %v4532_v52  ;;  %v4533_v53 = vmax.f32 %v12858_v20, 0.0 }
 0x279   : > { %8230 = vst.msk [vmem:[%s11027_s6 + $0x84] sm:$0xf] %vm5124_vm1, %v6728_v45  ;;  %v4917_v60 = vpack.c.bf16 %v4405_v0, %v4405_v0 }
 0x27a   : > { %v4661_v34 = vpack.c.bf16 %v4149_v27, %v4149_v27  ;;  %5301 = vst.msk [vmem:[%s10693_s28 + $0x2c0] sm:$0xf] %vm5124_vm1, %v4788_v61  ;;  %v5045_v14 = vpack.c.bf16 %v4533_v53, %v4533_v53  ;;  %v5812_v27 = vpack.c.bf16 %v12742_v42, %v12742_v42 }
 0x27b   : > { %5430 = vst.msk [vmem:[%s10693_s28 + $0x4c4] sm:$0xf] %vm5124_vm1, %v4917_v60  ;;  %v5813_v60 = vpack.c.bf16 %v12811_v33, %v12811_v33 }
 0x27c   : > { %6749 = vrot.lane.b32.xlu2 %v5681_v62, %s10519_s27  ;;  %7515 = vrot.lane.b32.xlu1 %v6064_v63, %s10519_s27  ;;  %v5683_v62 = vpack.c.bf16 %v12672_v51, %v12672_v51  ;;  %v10163_v51 = vld [vmem:[%s10615_s13 + $0x100] sm:$0xff]  ;;  %5174 = vst.msk [vmem:[%s10693_s28 + $0xc4] sm:$0xf] %vm5124_vm1, %v4661_v34 }
 0x27d   : > { %7261 = vrot.lane.b32.xlu0 %v5937_v31, %s10519_s27  ;;  %v3262_v31 = vpop.f32.mrf.mxu1  ;;  %v10227_v63 = vld [vmem:[%s10615_s13 + $0x300] sm:$0xff]  ;;  %9902 = vmatmul.msk.bf16.gmra.mxu0 %vm2042_vm0, %v10163_v51  ;;  %5557 = vst.msk [vmem:[%s10693_s28 + $0x6c0] sm:$0xf] %vm5124_vm1, %v5044_v7  ;;  %v2945_v6 = vpop.f32.mrf.mxu0  ;;  %v6069_v7 = vpack.c.bf16 %v12830_v57, %v12830_v57 }
 0x27e   : > { %v7500_v16 = vpop.permute.xlu2 %7499  ;;  %v7240_v17 = vpop.permute.xlu1 %7239  ;;  %v12851_v55 = vadd.f32 %v12495_v46, %v3262_v31  ;;  %9966 = vmatmul.msk.bf16.gmra.mxu1 %vm2042_vm0, %v10227_v63  ;;  %5558 = vst.msk [vmem:[%s10693_s28 + $0x6c4] sm:$0xf] %vm5124_vm1, %v5045_v14 }
 0x27f   : > { %8616 = vst.msk [vmem:[%s11027_s6 + $0x68c] sm:$0xf] %vm5124_vm1, %v7500_v16  ;;  %v7496_v18 = vpop.permute.xlu0 %7495 }
 0x280   : > { %8486 = vst.msk [vmem:[%s11027_s6 + $0x484] sm:$0xf] %vm5124_vm1, %v7240_v17  ;;  %v4277_v47 = vmax.f32 %v12851_v55, 0.0  ;;  %v3585_v49 = vpop.f32.mrf.mxu2 }
 0x281   : > { %8614 = vst.msk [vmem:[%s11027_s6 + $0x684] sm:$0xf] %vm5124_vm1, %v7496_v18  ;;  %v6067_v18 = vpack.c.bf16 %v12716_v13, %v12716_v13  ;;  %v12893_v13 = vadd.f32 %v12495_v46, %v3585_v49 }
 0x282   : > { %v4789_v16 = vpack.c.bf16 %v4277_v47, %v4277_v47 }
 0x283   : > { %v4406_v24 = vmax.f32 %v12893_v13, 0.0 }
 0x284   : > { %7517 = vrot.lane.b32.xlu2 %v6065_v23, %s10519_s27  ;;  %7005 = vrot.lane.b32.xlu1 %v5809_v30, %s10519_s27  ;;  %v12882_v23 = vadd.f32 %v12495_v46, %v2945_v6  ;;  %5302 = vst.msk [vmem:[%s10693_s28 + $0x2c4] sm:$0xf] %vm5124_vm1, %v4789_v16 }
 0x285   : > { %6751 = vrot.lane.b32.xlu0 %v5682_v12, %s10519_s27  ;;  %v3265_v30 = vpop.f32.mrf.mxu1  ;;  %10031 = vmatmul.msk.bf16.gmra.mxu2 %vm2042_vm0, %v10292_v3  ;;  %v2947_v39 = vpop.f32.mrf.mxu0 }
 0x286   : > { %v6990_v58 = vpop.permute.xlu2 %6989  ;;  %v6730_v35 = vpop.permute.xlu1 %6729  ;;  %v12885_v8 = vadd.f32 %v12495_v46, %v3265_v30  ;;  %v4150_v12 = vmax.f32 %v12882_v23, 0.0  ;;  %v12915_v10 = vadd.f32 %v12495_v46, %v2947_v39 }
 0x287   : > { %8361 = vst.msk [vmem:[%s11027_s6 + $0x290] sm:$0xf] %vm5124_vm1, %v6990_v58  ;;  %v6986_v38 = vpop.permute.xlu0 %6985 }
 0x288   : > { %8231 = vst.msk [vmem:[%s11027_s6 + $0x88] sm:$0xf] %vm5124_vm1, %v6730_v35  ;;  %v4278_v59 = vmax.f32 %v12885_v8, 0.0  ;;  %v4662_v58 = vpack.c.bf16 %v4150_v12, %v4150_v12  ;;  %v3587_v44 = vpop.f32.mrf.mxu2  ;;  %v4151_v0 = vmax.f32 %v12915_v10, 0.0  ;;  %v5686_v12 = vpack.c.bf16 %v12808_v4, %v12808_v4 }
 0x289   : > { %8359 = vst.msk [vmem:[%s11027_s6 + $0x288] sm:$0xf] %vm5124_vm1, %v6986_v38  ;;  %v4918_v38 = vpack.c.bf16 %v4406_v24, %v4406_v24  ;;  %v12929_v19 = vadd.f32 %v12495_v46, %v3587_v44 }
 0x28a   : > { %v4790_v37 = vpack.c.bf16 %v4278_v59, %v4278_v59  ;;  %5175 = vst.msk [vmem:[%s10693_s28 + $0xc8] sm:$0xf] %vm5124_vm1, %v4662_v58  ;;  %v5942_v59 = vpack.c.bf16 %v12821_v48, %v12821_v48 }
 0x28b   : > { %5431 = vst.msk [vmem:[%s10693_s28 + $0x4c8] sm:$0xf] %vm5124_vm1, %v4918_v38  ;;  %v4407_v42 = vmax.f32 %v12929_v19, 0.0 }
 0x28c   : > { %7007 = vrot.lane.b32.xlu2 %v5810_v43, %s10519_s27  ;;  %7263 = vrot.lane.b32.xlu1 %v5938_v11, %s10519_s27  ;;  %v3905_v43 = vpop.f32.mrf.mxu3  ;;  %v10164_v11 = vld [vmem:[%s10615_s13 + $0x108] sm:$0xff]  ;;  %5303 = vst.msk [vmem:[%s10693_s28 + $0x2c8] sm:$0xf] %vm5124_vm1, %v4790_v37 }
 0x28d   : > { %7519 = vrot.lane.b32.xlu0 %v6066_v28, %s10519_s27  ;;  %v3267_v40 = vpop.f32.mrf.mxu1  ;;  %v10228_v28 = vld [vmem:[%s10615_s13 + $0x308] sm:$0xff]  ;;  %9903 = vmatmul.msk.bf16.gmra.mxu0 %vm2042_vm0, %v10164_v11  ;;  %v4919_v31 = vpack.c.bf16 %v4407_v42, %v4407_v42  ;;  %v5943_v11 = vpack.c.bf16 %v12893_v13, %v12893_v13  ;;  %v6070_v42 = vpack.c.bf16 %v12858_v20, %v12858_v20 }
 0x28e   : > { %v7248_v54 = vpop.permute.xlu2 %7247  ;;  %v7498_v50 = vpop.permute.xlu1 %7497  ;;  %v12918_v9 = vadd.f32 %v12495_v46, %v3267_v40  ;;  %9967 = vmatmul.msk.bf16.gmra.mxu1 %vm2042_vm0, %v10228_v28 }
 0x28f   : > { %8490 = vst.msk [vmem:[%s11027_s6 + $0x494] sm:$0xf] %vm5124_vm1, %v7248_v54  ;;  %v7244_v45 = vpop.permute.xlu0 %7243  ;;  %v12936_v54 = vadd.f32 %v12495_v46, %v3905_v43 }
 0x290   : > { %8615 = vst.msk [vmem:[%s11027_s6 + $0x688] sm:$0xf] %vm5124_vm1, %v7498_v50  ;;  %v4279_v52 = vmax.f32 %v12918_v9, 0.0  ;;  %v3590_v49 = vpop.f32.mrf.mxu2 }
 0x291   : > { %8488 = vst.msk [vmem:[%s11027_s6 + $0x48c] sm:$0xf] %vm5124_vm1, %v7244_v45  ;;  %v4534_v21 = vmax.f32 %v12936_v54, 0.0  ;;  %v4663_v45 = vpack.c.bf16 %v4151_v0, %v4151_v0  ;;  %v13001_v24 = vadd.f32 %v12495_v46, %v3590_v49 }
 0x292   : > { %5432 = vst.msk [vmem:[%s10693_s28 + $0x4cc] sm:$0xf] %vm5124_vm1, %v4919_v31  ;;  %v6071_v31 = vpack.c.bf16 %v12936_v54, %v12936_v54 }
 0x293   : > { %v5046_v2 = vpack.c.bf16 %v4534_v21, %v4534_v21  ;;  %5176 = vst.msk [vmem:[%s10693_s28 + $0xcc] sm:$0xf] %vm5124_vm1, %v4663_v45  ;;  %v4408_v48 = vmax.f32 %v13001_v24, 0.0 }
 0x294   : > { %7265 = vrot.lane.b32.xlu2 %v5939_v32, %s10519_s27  ;;  %6753 = vrot.lane.b32.xlu1 %v5683_v62, %s10519_s27  ;;  %v4791_v62 = vpack.c.bf16 %v4279_v52, %v4279_v52  ;;  %v5941_v32 = vpack.c.bf16 %v12786_v5, %v12786_v5  ;;  %v3907_v63 = vpop.f32.mrf.mxu3  ;;  %v10293_v5 = vld [vmem:[%s10615_s13 + $0x510] sm:$0xff]  ;;  %v10294_v52 = vld [vmem:[%s10615_s13 + $0x518] sm:$0xff] }
 0x295   : > { %7009 = vrot.lane.b32.xlu0 %v5811_v26, %s10519_s27  ;;  %v2950_v26 = vpop.f32.mrf.mxu0  ;;  %v12966_v33 = vadd.f32 %v12495_v46, %v3907_v63  ;;  %10032 = vmatmul.msk.bf16.gmra.mxu2 %vm2042_vm0, %v10293_v5  ;;  %5559 = vst.msk [vmem:[%s10693_s28 + $0x6c8] sm:$0xf] %vm5124_vm1, %v5046_v2  ;;  %v4920_v44 = vpack.c.bf16 %v4408_v48, %v4408_v48 }
 0x296   : > { %v6738_v36 = vpop.permute.xlu2 %6737  ;;  %v6988_v56 = vpop.permute.xlu1 %6987  ;;  %v12960_v51 = vadd.f32 %v12495_v46, %v2950_v26  ;;  %5304 = vst.msk [vmem:[%s10693_s28 + $0x2cc] sm:$0xf] %vm5124_vm1, %v4791_v62  ;;  %v5944_v48 = vpack.c.bf16 %v12929_v19, %v12929_v19 }
 0x297   : > { %8235 = vst.msk [vmem:[%s11027_s6 + $0x98] sm:$0xf] %vm5124_vm1, %v6738_v36  ;;  %v6734_v17 = vpop.permute.xlu0 %6733  ;;  %v4535_v47 = vmax.f32 %v12966_v33, 0.0 }
 0x298   : > { %8360 = vst.msk [vmem:[%s11027_s6 + $0x28c] sm:$0xf] %vm5124_vm1, %v6988_v56  ;;  %v4152_v57 = vmax.f32 %v12960_v51, 0.0 }
 0x299   : > { %8233 = vst.msk [vmem:[%s11027_s6 + $0x90] sm:$0xf] %vm5124_vm1, %v6734_v17  ;;  %v5047_v17 = vpack.c.bf16 %v4535_v47, %v4535_v47  ;;  %v10166_v47 = vld [vmem:[%s10615_s13 + $0x118] sm:$0xff] }
 0x29a   : > { %v4664_v56 = vpack.c.bf16 %v4152_v57, %v4152_v57  ;;  %5433 = vst.msk [vmem:[%s10693_s28 + $0x4d0] sm:$0xf] %vm5124_vm1, %v4920_v44  ;;  %v5689_v44 = vpack.c.bf16 %v12960_v51, %v12960_v51 }
 0x29b   : > { %5560 = vst.msk [vmem:[%s10693_s28 + $0x6cc] sm:$0xf] %vm5124_vm1, %v5047_v17 }
 0x29c   : > { %6755 = vrot.lane.b32.xlu2 %v5684_v22, %s10519_s27  ;;  %7521 = vrot.lane.b32.xlu1 %v6067_v18, %s10519_s27  ;;  %v3270_v18 = vpop.f32.mrf.mxu1  ;;  %v3910_v3 = vpop.f32.mrf.mxu3  ;;  %v10165_v22 = vld [vmem:[%s10615_s13 + $0x110] sm:$0xff]  ;;  %5177 = vst.msk [vmem:[%s10693_s28 + $0xd0] sm:$0xf] %vm5124_vm1, %v4664_v56 }
 0x29d   : > { %7267 = vrot.lane.b32.xlu0 %v5940_v25, %s10519_s27  ;;  %v2952_v14 = vpop.f32.mrf.mxu0  ;;  %v12990_v30 = vadd.f32 %v12495_v46, %v3270_v18  ;;  %v10229_v25 = vld [vmem:[%s10615_s13 + $0x310] sm:$0xff]  ;;  %9904 = vmatmul.msk.bf16.gmra.mxu0 %vm2042_vm0, %v10165_v22 }
 0x29e   : > { %v7506_v29 = vpop.permute.xlu2 %7505  ;;  %v7246_v1 = vpop.permute.xlu1 %7245  ;;  %v12987_v6 = vadd.f32 %v12495_v46, %v2952_v14  ;;  %9968 = vmatmul.msk.bf16.gmra.mxu1 %vm2042_vm0, %v10229_v25 }
 0x29f   : > { %8619 = vst.msk [vmem:[%s11027_s6 + $0x698] sm:$0xf] %vm5124_vm1, %v7506_v29  ;;  %v7502_v35 = vpop.permute.xlu0 %7501  ;;  %v13004_v29 = vadd.f32 %v12495_v46, %v3910_v3  ;;  %v4280_v58 = vmax.f32 %v12990_v30, 0.0 }
 0x2a0   : > { %8489 = vst.msk [vmem:[%s11027_s6 + $0x490] sm:$0xf] %vm5124_vm1, %v7246_v1  ;;  %v5814_v1 = vpack.c.bf16 %v12851_v55, %v12851_v55  ;;  %v4153_v4 = vmax.f32 %v12987_v6, 0.0 }
 0x2a1   : > { %8617 = vst.msk [vmem:[%s11027_s6 + $0x690] sm:$0xf] %vm5124_vm1, %v7502_v35  ;;  %v4536_v55 = vmax.f32 %v13004_v29, 0.0  ;;  %v4792_v40 = vpack.c.bf16 %v4280_v58, %v4280_v58  ;;  %v5816_v58 = vpack.c.bf16 %v12918_v9, %v12918_v9 }
 0x2a2   : > { %v4665_v38 = vpack.c.bf16 %v4153_v4, %v4153_v4  ;;  %v10295_v4 = vld [vmem:[%s10615_s13 + $0x520] sm:$0xff] }
 0x2a3   : > { %v5048_v28 = vpack.c.bf16 %v4536_v55, %v4536_v55  ;;  %5305 = vst.msk [vmem:[%s10693_s28 + $0x2d0] sm:$0xf] %vm5124_vm1, %v4792_v40  ;;  %v13115_v55 = vld [vmem:[%s16786_s2] ss:$0 sm:$0xff] }
 0x2a4   : > { %7523 = vrot.lane.b32.xlu2 %v6068_v15, %s10519_s27  ;;  %7011 = vrot.lane.b32.xlu1 %v5812_v27, %s10519_s27  ;;  %v3272_v43 = vpop.f32.mrf.mxu1  ;;  %v3592_v15 = vpop.f32.mrf.mxu2  ;;  %5178 = vst.msk [vmem:[%s10693_s28 + $0xd4] sm:$0xf] %vm5124_vm1, %v4665_v38 }
 0x2a5   : > { %6757 = vrot.lane.b32.xlu0 %v5685_v41, %s10519_s27  ;;  %v5687_v41 = vpack.c.bf16 %v12882_v23, %v12882_v23  ;;  %v13030_v27 = vadd.f32 %v12495_v46, %v3272_v43  ;;  %v3912_v0 = vpop.f32.mrf.mxu3  ;;  %v13038_v23 = vadd.f32 %v12495_v46, %v3592_v15  ;;  %10033 = vmatmul.msk.bf16.gmra.mxu2 %vm2042_vm0, %v10294_v52 }
 0x2a6   : > { %v6996_v50 = vpop.permute.xlu2 %6995  ;;  %v6736_v34 = vpop.permute.xlu1 %6735  ;;  %v13041_v13 = vadd.f32 %v12495_v46, %v3912_v0  ;;  %5561 = vst.msk [vmem:[%s10693_s28 + $0x6d0] sm:$0xf] %vm5124_vm1, %v5048_v28  ;;  %v5945_v43 = vpack.c.bf16 %v13001_v24, %v13001_v24  ;;  %v5817_v0 = vpack.c.bf16 %v12990_v30, %v12990_v30 }
 0x2a7   : > { %8364 = vst.msk [vmem:[%s11027_s6 + $0x29c] sm:$0xf] %vm5124_vm1, %v6996_v50  ;;  %v6992_v61 = vpop.permute.xlu0 %6991  ;;  %v4281_v21 = vmax.f32 %v13030_v27, 0.0  ;;  %v4409_v20 = vmax.f32 %v13038_v23, 0.0 }
 0x2a8   : > { %8234 = vst.msk [vmem:[%s11027_s6 + $0x94] sm:$0xf] %vm5124_vm1, %v6736_v34  ;;  %v4537_v50 = vmax.f32 %v13041_v13, 0.0 }
 0x2a9   : > { %8362 = vst.msk [vmem:[%s11027_s6 + $0x294] sm:$0xf] %vm5124_vm1, %v6992_v61  ;;  %v4793_v61 = vpack.c.bf16 %v4281_v21, %v4281_v21  ;;  %v10167_v21 = vld [vmem:[%s10615_s13 + $0x120] sm:$0xff] }
 0x2aa   : > { %v5049_v26 = vpack.c.bf16 %v4537_v50, %v4537_v50 }
 0x2ab   : > { %5306 = vst.msk [vmem:[%s10693_s28 + $0x2d4] sm:$0xf] %vm5124_vm1, %v4793_v61 }
 0x2ac   : > { %7013 = vrot.lane.b32.xlu2 %v5813_v60, %s10519_s27  ;;  %7269 = vrot.lane.b32.xlu1 %v5941_v32, %s10519_s27  ;;  %v4921_v32 = vpack.c.bf16 %v4409_v20, %v4409_v20  ;;  %v5815_v60 = vpack.c.bf16 %v12885_v8, %v12885_v8  ;;  %v3275_v2 = vpop.f32.mrf.mxu1  ;;  %v3595_v57 = vpop.f32.mrf.mxu2  ;;  %v10230_v8 = vld [vmem:[%s10615_s13 + $0x318] sm:$0xff]  ;;  %5562 = vst.msk [vmem:[%s10693_s28 + $0x6d4] sm:$0xf] %vm5124_vm1, %v5049_v26 }
 0x2ad   : > { %7525 = vrot.lane.b32.xlu0 %v6069_v7, %s10519_s27  ;;  %v2955_v7 = vpop.f32.mrf.mxu0  ;;  %v13070_v5 = vadd.f32 %v12495_v46, %v3275_v2  ;;  %v13077_v54 = vadd.f32 %v12495_v46, %v3595_v57  ;;  %9905 = vmatmul.msk.bf16.gmra.mxu0 %vm2042_vm0, %v10166_v47  ;;  %v10231_v20 = vld [vmem:[%s10615_s13 + $0x320] sm:$0xff] }
 0x2ae   : > { %v7254_v53 = vpop.permute.xlu2 %7253  ;;  %v7504_v36 = vpop.permute.xlu1 %7503  ;;  %v13067_v63 = vadd.f32 %v12495_v46, %v2955_v7  ;;  %5434 = vst.msk [vmem:[%s10693_s28 + $0x4d4] sm:$0xf] %vm5124_vm1, %v4921_v32  ;;  %9969 = vmatmul.msk.bf16.gmra.mxu1 %vm2042_vm0, %v10230_v8 }
 0x2af   : > { %8493 = vst.msk [vmem:[%s11027_s6 + $0x4a0] sm:$0xf] %vm5124_vm1, %v7254_v53  ;;  %v7250_v16 = vpop.permute.xlu0 %7249  ;;  %v5688_v53 = vpack.c.bf16 %v12915_v10, %v12915_v10  ;;  %v4282_v56 = vmax.f32 %v13070_v5, 0.0  ;;  %v4410_v10 = vmax.f32 %v13077_v54, 0.0 }
 0x2b0   : > { %8618 = vst.msk [vmem:[%s11027_s6 + $0x694] sm:$0xf] %vm5124_vm1, %v7504_v36  ;;  %v4154_v36 = vmax.f32 %v13067_v63, 0.0 }
 0x2b1   : > { %8491 = vst.msk [vmem:[%s11027_s6 + $0x498] sm:$0xf] %vm5124_vm1, %v7250_v16  ;;  %v4794_v49 = vpack.c.bf16 %v4282_v56, %v4282_v56  ;;  %v4922_v3 = vpack.c.bf16 %v4410_v10, %v4410_v10  ;;  %v5946_v56 = vpack.c.bf16 %v13038_v23, %v13038_v23 }
 0x2b2   : > { %v4666_v14 = vpack.c.bf16 %v4154_v36, %v4154_v36  ;;  %v5690_v36 = vpack.c.bf16 %v12987_v6, %v12987_v6 }
 0x2b3   : > { %5307 = vst.msk [vmem:[%s10693_s28 + $0x2d8] sm:$0xf] %vm5124_vm1, %v4794_v49 }
 0x2b4   : > { %7271 = vrot.lane.b32.xlu2 %v5942_v59, %s10519_s27  ;;  %6759 = vrot.lane.b32.xlu1 %v5686_v12, %s10519_s27  ;;  %v3277_v25 = vpop.f32.mrf.mxu1  ;;  %5179 = vst.msk [vmem:[%s10693_s28 + $0xd8] sm:$0xf] %vm5124_vm1, %v4666_v14 }
 0x2b5   : > { %7015 = vrot.lane.b32.xlu0 %v5814_v1, %s10519_s27  ;;  %v2957_v22 = vpop.f32.mrf.mxu0  ;;  %v13103_v59 = vadd.f32 %v12495_v46, %v3277_v25  ;;  %v3597_v1 = vpop.f32.mrf.mxu2  ;;  %10034 = vmatmul.msk.bf16.gmra.mxu2 %vm2042_vm0, %v10295_v4  ;;  %5435 = vst.msk [vmem:[%s10693_s28 + $0x4d8] sm:$0xf] %vm5124_vm1, %v4922_v3 }
 0x2b6   : > { %v6744_v35 = vpop.permute.xlu2 %6743  ;;  %v6994_v37 = vpop.permute.xlu1 %6993  ;;  %v13100_v12 = vadd.f32 %v12495_v46, %v2957_v22  ;;  %v6072_v46 = vpack.c.bf16 %v12966_v33, %v12966_v33 }
 0x2b7   : > { %8238 = vst.msk [vmem:[%s11027_s6 + $0xa4] sm:$0xf] %vm5124_vm1, %v6744_v35  ;;  %v6740_v39 = vpop.permute.xlu0 %6739  ;;  %v13118_v35 = vadd.f32 %v13115_v55, %v3597_v1  ;;  %v4283_v19 = vmax.f32 %v13103_v59, 0.0  ;;  %v5691_v1 = vpack.c.bf16 %v13067_v63, %v13067_v63 }
 0x2b8   : > { %8363 = vst.msk [vmem:[%s11027_s6 + $0x298] sm:$0xf] %vm5124_vm1, %v6994_v37  ;;  %v4155_v9 = vmax.f32 %v13100_v12, 0.0 }
 0x2b9   : > { %8236 = vst.msk [vmem:[%s11027_s6 + $0x9c] sm:$0xf] %vm5124_vm1, %v6740_v39  ;;  %v4411_v37 = vmax.f32 %v13118_v35, 0.0 }
 0x2ba   : > { %v4667_v39 = vpack.c.bf16 %v4155_v9, %v4155_v9  ;;  %v10232_v9 = vld [vmem:[%s10615_s13 + $0x328] sm:$0xff] }
 0x2bc   : > { %6761 = vrot.lane.b32.xlu2 %v5687_v41, %s10519_s27  ;;  %7527 = vrot.lane.b32.xlu1 %v6070_v42, %s10519_s27  ;;  %v4795_v41 = vpack.c.bf16 %v4283_v19, %v4283_v19  ;;  %v3280_v15 = vpop.f32.mrf.mxu1  ;;  %5180 = vst.msk [vmem:[%s10693_s28 + $0xdc] sm:$0xf] %vm5124_vm1, %v4667_v39  ;;  %v5818_v19 = vpack.c.bf16 %v13030_v27, %v13030_v27 }
 0x2bd   : > { %7273 = vrot.lane.b32.xlu0 %v5943_v11, %s10519_s27  ;;  %v4923_v11 = vpack.c.bf16 %v4411_v37, %v4411_v37  ;;  %v2960_v28 = vpop.f32.mrf.mxu0  ;;  %v13149_v42 = vadd.f32 %v13115_v55, %v3280_v15  ;;  %v3600_v51 = vpop.f32.mrf.mxu2  ;;  %9906 = vmatmul.msk.bf16.gmra.mxu0 %vm2042_vm0, %v10167_v21  ;;  %v6074_v37 = vpack.c.bf16 %v13041_v13, %v13041_v13 }
 0x2be   : > { %v7512_v34 = vpop.permute.xlu2 %7511  ;;  %v7252_v45 = vpop.permute.xlu1 %7251  ;;  %v13146_v52 = vadd.f32 %v13115_v55, %v2960_v28  ;;  %v13156_v24 = vadd.f32 %v13115_v55, %v3600_v51  ;;  %5308 = vst.msk [vmem:[%s10693_s28 + $0x2dc] sm:$0xf] %vm5124_vm1, %v4795_v41  ;;  %9970 = vmatmul.msk.bf16.gmra.mxu1 %vm2042_vm0, %v10231_v20 }
 0x2bf   : > { %8622 = vst.msk [vmem:[%s11027_s6 + $0x6a4] sm:$0xf] %vm5124_vm1, %v7512_v34  ;;  %v7508_v62 = vpop.permute.xlu0 %7507  ;;  %v4284_v50 = vmax.f32 %v13149_v42, 0.0 }
 0x2c0   : > { %8492 = vst.msk [vmem:[%s11027_s6 + $0x49c] sm:$0xf] %vm5124_vm1, %v7252_v45  ;;  %v4156_v30 = vmax.f32 %v13146_v52, 0.0  ;;  %v4412_v34 = vmax.f32 %v13156_v24, 0.0 }
 0x2c1   : > { %8620 = vst.msk [vmem:[%s11027_s6 + $0x69c] sm:$0xf] %vm5124_vm1, %v7508_v62 }
 0x2c2   : > { %5436 = vst.msk [vmem:[%s10693_s28 + $0x4dc] sm:$0xf] %vm5124_vm1, %v4923_v11  ;;  %v4668_v62 = vpack.c.bf16 %v4156_v30, %v4156_v30  ;;  %v4924_v26 = vpack.c.bf16 %v4412_v34, %v4412_v34  ;;  %v5947_v11 = vpack.c.bf16 %v13077_v54, %v13077_v54  ;;  %v10297_v30 = vld [vmem:[%s10615_s13 + $0x530] sm:$0xff]  ;;  %v5820_v54 = vpack.c.bf16 %v13103_v59, %v13103_v59 }
 0x2c4   : > { %7529 = vrot.lane.b32.xlu2 %v6071_v31, %s10519_s27  ;;  %7017 = vrot.lane.b32.xlu1 %v5815_v60, %s10519_s27  ;;  %v4796_v60 = vpack.c.bf16 %v4284_v50, %v4284_v50  ;;  %v6073_v31 = vpack.c.bf16 %v13004_v29, %v13004_v29  ;;  %v3282_v2 = vpop.f32.mrf.mxu1  ;;  %5181 = vst.msk [vmem:[%s10693_s28 + $0xe0] sm:$0xf] %vm5124_vm1, %v4668_v62 }
 0x2c5   : > { %6763 = vrot.lane.b32.xlu0 %v5688_v53, %s10519_s27  ;;  %v2962_v7 = vpop.f32.mrf.mxu0  ;;  %v13182_v47 = vadd.f32 %v13115_v55, %v3282_v2  ;;  %v3602_v8 = vpop.f32.mrf.mxu2  ;;  %v10296_v53 = vld [vmem:[%s10615_s13 + $0x528] sm:$0xff]  ;;  %5437 = vst.msk [vmem:[%s10693_s28 + $0x4e0] sm:$0xf] %vm5124_vm1, %v4924_v26  ;;  %v5949_v2 = vpack.c.bf16 %v13156_v24, %v13156_v24 }
 0x2c6   : > { %v7002_v16 = vpop.permute.xlu2 %7001  ;;  %v6742_v17 = vpop.permute.xlu1 %6741  ;;  %v13179_v57 = vadd.f32 %v13115_v55, %v2962_v7  ;;  %v13190_v29 = vadd.f32 %v13115_v55, %v3602_v8  ;;  %5309 = vst.msk [vmem:[%s10693_s28 + $0x2e0] sm:$0xf] %vm5124_vm1, %v4796_v60  ;;  %10035 = vmatmul.msk.bf16.gmra.mxu2 %vm2042_vm0, %v10296_v53 }
 0x2c7   : > { %8367 = vst.msk [vmem:[%s11027_s6 + $0x2a8] sm:$0xf] %vm5124_vm1, %v7002_v16  ;;  %v6998_v18 = vpop.permute.xlu0 %6997  ;;  %v4285_v16 = vmax.f32 %v13182_v47, 0.0 }
 0x2c8   : > { %8237 = vst.msk [vmem:[%s11027_s6 + $0xa0] sm:$0xf] %vm5124_vm1, %v6742_v17  ;;  %v4157_v10 = vmax.f32 %v13179_v57, 0.0  ;;  %v4413_v6 = vmax.f32 %v13190_v29, 0.0 }
 0x2c9   : > { %8365 = vst.msk [vmem:[%s11027_s6 + $0x2a0] sm:$0xf] %vm5124_vm1, %v6998_v18  ;;  %v4797_v49 = vpack.c.bf16 %v4285_v16, %v4285_v16  ;;  %v5692_v16 = vpack.c.bf16 %v13100_v12, %v13100_v12 }
 0x2ca   : > { %v4669_v14 = vpack.c.bf16 %v4157_v10, %v4157_v10  ;;  %v4925_v3 = vpack.c.bf16 %v4413_v6, %v4413_v6  ;;  %v10233_v10 = vld [vmem:[%s10615_s13 + $0x330] sm:$0xff]  ;;  %v5948_v6 = vpack.c.bf16 %v13118_v35, %v13118_v35 }
 0x2cb   : > { %5310 = vst.msk [vmem:[%s10693_s28 + $0x2e4] sm:$0xf] %vm5124_vm1, %v4797_v49 }
 0x2cc   : > { %7019 = vrot.lane.b32.xlu2 %v5816_v58, %s10519_s27  ;;  %7275 = vrot.lane.b32.xlu1 %v5944_v48, %s10519_s27  ;;  %v3285_v25 = vpop.f32.mrf.mxu1  ;;  %5182 = vst.msk [vmem:[%s10693_s28 + $0xe4] sm:$0xf] %vm5124_vm1, %v4669_v14 }
 0x2cd   : > { %7531 = vrot.lane.b32.xlu0 %v6072_v46, %s10519_s27  ;;  %v2965_v22 = vpop.f32.mrf.mxu0  ;;  %v13217_v58 = vadd.f32 %v13115_v55, %v3285_v25  ;;  %v3605_v48 = vpop.f32.mrf.mxu2  ;;  %v10168_v46 = vld [vmem:[%s10615_s13 + $0x128] sm:$0xff]  ;;  %5438 = vst.msk [vmem:[%s10693_s28 + $0x4e4] sm:$0xf] %vm5124_vm1, %v4925_v3  ;;  %v5821_v25 = vpack.c.bf16 %v13149_v42, %v13149_v42  ;;  %v5694_v42 = vpack.c.bf16 %v13179_v57, %v13179_v57 }
 0x2ce   : > { %v7260_v33 = vpop.permute.xlu2 %7259  ;;  %v7510_v38 = vpop.permute.xlu1 %7509  ;;  %v13214_v4 = vadd.f32 %v13115_v55, %v2965_v22  ;;  %v13228_v63 = vadd.f32 %v13115_v55, %v3605_v48  ;;  %9907 = vmatmul.msk.bf16.gmra.mxu0 %vm2042_vm0, %v10168_v46  ;;  %9971 = vmatmul.msk.bf16.gmra.mxu1 %vm2042_vm0, %v10232_v9  ;;  %v5693_v22 = vpack.c.bf16 %v13146_v52, %v13146_v52 }
 0x2cf   : > { %8496 = vst.msk [vmem:[%s11027_s6 + $0x4ac] sm:$0xf] %vm5124_vm1, %v7260_v33  ;;  %v7256_v40 = vpop.permute.xlu0 %7255 }
 0x2d0   : > { %8621 = vst.msk [vmem:[%s11027_s6 + $0x6a0] sm:$0xf] %vm5124_vm1, %v7510_v38  ;;  %v4158_v33 = vmax.f32 %v13214_v4, 0.0  ;;  %v4286_v38 = vmax.f32 %v13217_v58, 0.0  ;;  %v4414_v27 = vmax.f32 %v13228_v63, 0.0 }
 0x2d1   : > { %8494 = vst.msk [vmem:[%s11027_s6 + $0x4a4] sm:$0xf] %vm5124_vm1, %v7256_v40 }
 0x2d2   : > { %v4670_v40 = vpack.c.bf16 %v4158_v33, %v4158_v33  ;;  %v4926_v28 = vpack.c.bf16 %v4414_v27, %v4414_v27  ;;  %v10298_v33 = vld [vmem:[%s10615_s13 + $0x538] sm:$0xff] }
 0x2d4   : > { %7277 = vrot.lane.b32.xlu2 %v5945_v43, %s10519_s27  ;;  %6765 = vrot.lane.b32.xlu1 %v5689_v44, %s10519_s27  ;;  %v4798_v44 = vpack.c.bf16 %v4286_v38, %v4286_v38  ;;  %v5819_v43 = vpack.c.bf16 %v13070_v5, %v13070_v5  ;;  %5183 = vst.msk [vmem:[%s10693_s28 + $0xe8] sm:$0xf] %vm5124_vm1, %v4670_v40 }
 0x2d5   : > { %7021 = vrot.lane.b32.xlu0 %v5817_v0, %s10519_s27  ;;  %v2967_v15 = vpop.f32.mrf.mxu0  ;;  %v3287_v0 = vpop.f32.mrf.mxu1  ;;  %5439 = vst.msk [vmem:[%s10693_s28 + $0x4e8] sm:$0xf] %vm5124_vm1, %v4926_v28 }
 0x2d6   : > { %v6750_v45 = vpop.permute.xlu2 %6749  ;;  %v7000_v61 = vpop.permute.xlu1 %6999  ;;  %v13253_v51 = vadd.f32 %v13115_v55, %v2967_v15  ;;  %v13256_v21 = vadd.f32 %v13115_v55, %v3287_v0  ;;  %5311 = vst.msk [vmem:[%s10693_s28 + $0x2e8] sm:$0xf] %vm5124_vm1, %v4798_v44  ;;  %10036 = vmatmul.msk.bf16.gmra.mxu2 %vm2042_vm0, %v10297_v30  ;;  %v5823_v15 = vpack.c.bf16 %v13217_v58, %v13217_v58 }
 0x2d7   : > { %8241 = vst.msk [vmem:[%s11027_s6 + $0xb0] sm:$0xf] %vm5124_vm1, %v6750_v45  ;;  %v6746_v32 = vpop.permute.xlu0 %6745  ;;  %v3607_v20 = vpop.f32.mrf.mxu2 }
 0x2d8   : > { %8366 = vst.msk [vmem:[%s11027_s6 + $0x2a4] sm:$0xf] %vm5124_vm1, %v7000_v61  ;;  %v13262_v5 = vadd.f32 %v13115_v55, %v3607_v20  ;;  %v4159_v50 = vmax.f32 %v13253_v51, 0.0  ;;  %v4287_v34 = vmax.f32 %v13256_v21, 0.0 }
 0x2d9   : > { %8239 = vst.msk [vmem:[%s11027_s6 + $0xa8] sm:$0xf] %vm5124_vm1, %v6746_v32 }
 0x2da   : > { %v4415_v45 = vmax.f32 %v13262_v5, 0.0  ;;  %v4671_v62 = vpack.c.bf16 %v4159_v50, %v4159_v50  ;;  %v4799_v60 = vpack.c.bf16 %v4287_v34, %v4287_v34  ;;  %v10234_v50 = vld [vmem:[%s10615_s13 + $0x338] sm:$0xff] }
 0x2db   : > { %v10350_v34 = vld [vmem:[%s10615_s13 + $0x6d8] sm:$0xff] }
 0x2dc   : > { %6767 = vrot.lane.b32.xlu2 %v5690_v36, %s10519_s27  ;;  %7533 = vrot.lane.b32.xlu1 %v6073_v31, %s10519_s27  ;;  %v4927_v31 = vpack.c.bf16 %v4415_v45, %v4415_v45  ;;  %5184 = vst.msk [vmem:[%s10693_s28 + $0xec] sm:$0xf] %vm5124_vm1, %v4671_v62  ;;  %v5822_v45 = vpack.c.bf16 %v13182_v47, %v13182_v47 }
 0x2dd   : > { %7279 = vrot.lane.b32.xlu0 %v5946_v56, %s10519_s27  ;;  %v2970_v26 = vpop.f32.mrf.mxu0  ;;  %v3290_v7 = vpop.f32.mrf.mxu1  ;;  %v10169_v56 = vld [vmem:[%s10615_s13 + $0x130] sm:$0xff]  ;;  %5312 = vst.msk [vmem:[%s10693_s28 + $0x2ec] sm:$0xf] %vm5124_vm1, %v4799_v60  ;;  %10089 = vmatmul.msk.bf16.gmra.mxu3 %vm2042_vm0, %v10350_v34 }
 0x2de   : > { %v7518_v23 = vpop.permute.xlu2 %7517  ;;  %v7258_v17 = vpop.permute.xlu1 %7257  ;;  %v13286_v8 = vadd.f32 %v13115_v55, %v2970_v26  ;;  %v13289_v53 = vadd.f32 %v13115_v55, %v3290_v7  ;;  %9908 = vmatmul.msk.bf16.gmra.mxu0 %vm2042_vm0, %v10169_v56  ;;  %9972 = vmatmul.msk.bf16.gmra.mxu1 %vm2042_vm0, %v10233_v10  ;;  %5440 = vst.msk [vmem:[%s10693_s28 + $0x4ec] sm:$0xf] %vm5124_vm1, %v4927_v31 }
 0x2df   : > { %8625 = vst.msk [vmem:[%s11027_s6 + $0x6b0] sm:$0xf] %vm5124_vm1, %v7518_v23  ;;  %v7514_v18 = vpop.permute.xlu0 %7513  ;;  %v3610_v36 = vpop.f32.mrf.mxu2  ;;  %v5695_v7 = vpack.c.bf16 %v13214_v4, %v13214_v4 }
 0x2e0   : > { %8495 = vst.msk [vmem:[%s11027_s6 + $0x4a8] sm:$0xf] %vm5124_vm1, %v7258_v17  ;;  %v13300_v24 = vadd.f32 %v13115_v55, %v3610_v36  ;;  %v4160_v23 = vmax.f32 %v13286_v8, 0.0  ;;  %v4288_v17 = vmax.f32 %v13289_v53, 0.0 }
 0x2e1   : > { %8623 = vst.msk [vmem:[%s11027_s6 + $0x6a8] sm:$0xf] %vm5124_vm1, %v7514_v18 }
 0x2e2   : > { %v4416_v12 = vmax.f32 %v13300_v24, 0.0  ;;  %v4672_v18 = vpack.c.bf16 %v4160_v23, %v4160_v23  ;;  %v4800_v3 = vpack.c.bf16 %v4288_v17, %v4288_v17  ;;  %v10299_v17 = vld [vmem:[%s10615_s13 + $0x540] sm:$0xff] }
 0x2e4   : > { %7535 = vrot.lane.b32.xlu2 %v6074_v37, %s10519_s27  ;;  %7023 = vrot.lane.b32.xlu1 %v5818_v19, %s10519_s27  ;;  %5185 = vst.msk [vmem:[%s10693_s28 + $0xf0] sm:$0xf] %vm5124_vm1, %v4672_v18 }
 0x2e5   : > { %6769 = vrot.lane.b32.xlu0 %v5691_v1, %s10519_s27  ;;  %v4928_v1 = vpack.c.bf16 %v4416_v12, %v4416_v12  ;;  %v2972_v48 = vpop.f32.mrf.mxu0  ;;  %v3292_v46 = vpop.f32.mrf.mxu1  ;;  %5313 = vst.msk [vmem:[%s10693_s28 + $0x2f0] sm:$0xf] %vm5124_vm1, %v4800_v3 }
 0x2e6   : > { %v7008_v13 = vpop.permute.xlu2 %7007  ;;  %v6748_v39 = vpop.permute.xlu1 %6747  ;;  %v13325_v9 = vadd.f32 %v13115_v55, %v2972_v48  ;;  %v13328_v19 = vadd.f32 %v13115_v55, %v3292_v46  ;;  %10037 = vmatmul.msk.bf16.gmra.mxu2 %vm2042_vm0, %v10298_v33  ;;  %v5697_v46 = vpack.c.bf16 %v13286_v8, %v13286_v8 }
 0x2e7   : > { %8370 = vst.msk [vmem:[%s11027_s6 + $0x2b4] sm:$0xf] %vm5124_vm1, %v7008_v13  ;;  %v7004_v41 = vpop.permute.xlu0 %7003  ;;  %v3612_v37 = vpop.f32.mrf.mxu2 }
 0x2e8   : > { %8240 = vst.msk [vmem:[%s11027_s6 + $0xac] sm:$0xf] %vm5124_vm1, %v6748_v39  ;;  %v13334_v52 = vadd.f32 %v13115_v55, %v3612_v37  ;;  %v4161_v38 = vmax.f32 %v13325_v9, 0.0  ;;  %v4289_v27 = vmax.f32 %v13328_v19, 0.0 }
 0x2e9   : > { %8368 = vst.msk [vmem:[%s11027_s6 + $0x2ac] sm:$0xf] %vm5124_vm1, %v7004_v41 }
 0x2ea   : > { %5441 = vst.msk [vmem:[%s10693_s28 + $0x4f0] sm:$0xf] %vm5124_vm1, %v4928_v1  ;;  %v4417_v13 = vmax.f32 %v13334_v52, 0.0  ;;  %v4673_v40 = vpack.c.bf16 %v4161_v38, %v4161_v38  ;;  %v4801_v44 = vpack.c.bf16 %v4289_v27, %v4289_v27  ;;  %v10171_v38 = vld [vmem:[%s10615_s13 + $0x140] sm:$0xff] }
 0x2eb   : > { %v10235_v27 = vld [vmem:[%s10615_s13 + $0x340] sm:$0xff] }
 0x2ec   : > { %7025 = vrot.lane.b32.xlu2 %v5819_v43, %s10519_s27  ;;  %7281 = vrot.lane.b32.xlu1 %v5947_v11, %s10519_s27  ;;  %v4929_v43 = vpack.c.bf16 %v4417_v13, %v4417_v13  ;;  %5186 = vst.msk [vmem:[%s10693_s28 + $0xf4] sm:$0xf] %vm5124_vm1, %v4673_v40  ;;  %v10351_v13 = vld [vmem:[%s10615_s13 + $0x6e0] sm:$0xff] }
 0x2ed   : > { %7027 = vrot.lane.b32.xlu0 %v5820_v54, %s10519_s27  ;;  %v2975_v11 = vpop.f32.mrf.mxu0  ;;  %v3295_v28 = vpop.f32.mrf.mxu1  ;;  %v10170_v54 = vld [vmem:[%s10615_s13 + $0x138] sm:$0xff]  ;;  %5314 = vst.msk [vmem:[%s10693_s28 + $0x2f4] sm:$0xf] %vm5124_vm1, %v4801_v44  ;;  %10090 = vmatmul.msk.bf16.gmra.mxu3 %vm2042_vm0, %v10351_v13 }
 0x2ee   : > { %v7266_v59 = vpop.permute.xlu2 %7265  ;;  %v7516_v61 = vpop.permute.xlu1 %7515  ;;  %v13358_v0 = vadd.f32 %v13115_v55, %v2975_v11  ;;  %v13361_v20 = vadd.f32 %v13115_v55, %v3295_v28  ;;  %9909 = vmatmul.msk.bf16.gmra.mxu0 %vm2042_vm0, %v10170_v54  ;;  %9973 = vmatmul.msk.bf16.gmra.mxu1 %vm2042_vm0, %v10234_v50  ;;  %5442 = vst.msk [vmem:[%s10693_s28 + $0x4f4] sm:$0xf] %vm5124_vm1, %v4929_v43 }
 0x2ef   : > { %8499 = vst.msk [vmem:[%s11027_s6 + $0x4b8] sm:$0xf] %vm5124_vm1, %v7266_v59  ;;  %v7262_v32 = vpop.permute.xlu0 %7261  ;;  %v3615_v30 = vpop.f32.mrf.mxu2  ;;  %v5950_v59 = vpack.c.bf16 %v13190_v29, %v13190_v29 }
 0x2f0   : > { %8624 = vst.msk [vmem:[%s11027_s6 + $0x6ac] sm:$0xf] %vm5124_vm1, %v7516_v61  ;;  %v13373_v58 = vadd.f32 %v13115_v55, %v3615_v30  ;;  %v4162_v61 = vmax.f32 %v13358_v0, 0.0  ;;  %v4290_v62 = vmax.f32 %v13361_v20, 0.0  ;;  %v5953_v30 = vpack.c.bf16 %v13300_v24, %v13300_v24 }
 0x2f1   : > { %8497 = vst.msk [vmem:[%s11027_s6 + $0x4b0] sm:$0xf] %vm5124_vm1, %v7262_v32  ;;  %v5826_v24 = vpack.c.bf16 %v13328_v19, %v13328_v19 }
 0x2f2   : > { %v4418_v47 = vmax.f32 %v13373_v58, 0.0  ;;  %v4674_v60 = vpack.c.bf16 %v4162_v61, %v4162_v61  ;;  %v4802_v26 = vpack.c.bf16 %v4290_v62, %v4290_v62  ;;  %v10300_v62 = vld [vmem:[%s10615_s13 + $0x548] sm:$0xff] }
 0x2f4   : > { %7283 = vrot.lane.b32.xlu2 %v5948_v6, %s10519_s27  ;;  %6771 = vrot.lane.b32.xlu1 %v5692_v16, %s10519_s27  ;;  %v4930_v36 = vpack.c.bf16 %v4418_v47, %v4418_v47  ;;  %5187 = vst.msk [vmem:[%s10693_s28 + $0xf8] sm:$0xf] %vm5124_vm1, %v4674_v60 }
 0x2f5   : > { %7285 = vrot.lane.b32.xlu0 %v5949_v2, %s10519_s27  ;;  %v5951_v2 = vpack.c.bf16 %v13228_v63, %v13228_v63  ;;  %v2977_v56 = vpop.f32.mrf.mxu0  ;;  %v3297_v10 = vpop.f32.mrf.mxu1  ;;  %v5952_v63 = vpack.c.bf16 %v13262_v5, %v13262_v5  ;;  %5315 = vst.msk [vmem:[%s10693_s28 + $0x2f8] sm:$0xf] %vm5124_vm1, %v4802_v26 }
 0x2f6   : > { %v6756_v35 = vpop.permute.xlu2 %6755  ;;  %v7006_v14 = vpop.permute.xlu1 %7005  ;;  %v13399_v16 = vadd.f32 %v13115_v55, %v2977_v56  ;;  %v13402_v6 = vadd.f32 %v13115_v55, %v3297_v10  ;;  %10038 = vmatmul.msk.bf16.gmra.mxu2 %vm2042_vm0, %v10299_v17  ;;  %5443 = vst.msk [vmem:[%s10693_s28 + $0x4f8] sm:$0xf] %vm5124_vm1, %v4930_v36  ;;  %v5955_v10 = vpack.c.bf16 %v13373_v58, %v13373_v58 }
 0x2f7   : > { %8244 = vst.msk [vmem:[%s11027_s6 + $0xbc] sm:$0xf] %vm5124_vm1, %v6756_v35  ;;  %v6752_v49 = vpop.permute.xlu0 %6751  ;;  %v3617_v23 = vpop.f32.mrf.mxu2 }
 0x2f8   : > { %8369 = vst.msk [vmem:[%s11027_s6 + $0x2b0] sm:$0xf] %vm5124_vm1, %v7006_v14  ;;  %v13408_v4 = vadd.f32 %v13115_v55, %v3617_v23  ;;  %v4163_v12 = vmax.f32 %v13399_v16, 0.0  ;;  %v4291_v35 = vmax.f32 %v13402_v6, 0.0 }
 0x2f9   : > { %8242 = vst.msk [vmem:[%s11027_s6 + $0xb4] sm:$0xf] %vm5124_vm1, %v6752_v49 }
 0x2fa   : > { %v4419_v14 = vmax.f32 %v13408_v4, 0.0  ;;  %v4675_v49 = vpack.c.bf16 %v4163_v12, %v4163_v12  ;;  %v10172_v12 = vld [vmem:[%s10615_s13 + $0x148] sm:$0xff] }
 0x2fc   : > { %6773 = vrot.lane.b32.xlu2 %v5693_v22, %s10519_s27  ;;  %7029 = vrot.lane.b32.xlu1 %v5821_v25, %s10519_s27  ;;  %v4803_v22 = vpack.c.bf16 %v4291_v35, %v4291_v35  ;;  %v4931_v25 = vpack.c.bf16 %v4419_v14, %v4419_v14  ;;  %5188 = vst.msk [vmem:[%s10693_s28 + $0xfc] sm:$0xf] %vm5124_vm1, %v4675_v49  ;;  %v10236_v35 = vld [vmem:[%s10615_s13 + $0x348] sm:$0xff] }
 0x2fd   : > { %6775 = vrot.lane.b32.xlu0 %v5694_v42, %s10519_s27  ;;  %v2980_v1 = vpop.f32.mrf.mxu0  ;;  %v3300_v48 = vpop.f32.mrf.mxu1  ;;  %v10352_v14 = vld [vmem:[%s10615_s13 + $0x6e8] sm:$0xff] }
 0x2fe   : > { %v7524_v57 = vpop.permute.xlu2 %7523  ;;  %v7264_v39 = vpop.permute.xlu1 %7263  ;;  %v13432_v37 = vadd.f32 %v13115_v55, %v2980_v1  ;;  %v13435_v33 = vadd.f32 %v13115_v55, %v3300_v48  ;;  %5316 = vst.msk [vmem:[%s10693_s28 + $0x2fc] sm:$0xf] %vm5124_vm1, %v4803_v22  ;;  %9910 = vmatmul.msk.bf16.gmra.mxu0 %vm2042_vm0, %v10171_v38  ;;  %9974 = vmatmul.msk.bf16.gmra.mxu1 %vm2042_vm0, %v10235_v27 }
 0x2ff   : > { %8628 = vst.msk [vmem:[%s11027_s6 + $0x6bc] sm:$0xf] %vm5124_vm1, %v7524_v57  ;;  %v7520_v41 = vpop.permute.xlu0 %7519  ;;  %v3620_v42 = vpop.f32.mrf.mxu2  ;;  %v5696_v57 = vpack.c.bf16 %v13253_v51, %v13253_v51  ;;  %10091 = vmatmul.msk.bf16.gmra.mxu3 %vm2042_vm0, %v10352_v14 }
 0x300   : > { %8498 = vst.msk [vmem:[%s11027_s6 + $0x4b4] sm:$0xf] %vm5124_vm1, %v7264_v39  ;;  %v5824_v39 = vpack.c.bf16 %v13256_v21, %v13256_v21  ;;  %v13447_v8 = vadd.f32 %v13115_v55, %v3620_v42  ;;  %v4164_v40 = vmax.f32 %v13432_v37, 0.0  ;;  %v5827_v42 = vpack.c.bf16 %v13361_v20, %v13361_v20 }
 0x301   : > { %8626 = vst.msk [vmem:[%s11027_s6 + $0x6b4] sm:$0xf] %vm5124_vm1, %v7520_v41  ;;  %v4292_v41 = vmax.f32 %v13435_v33, 0.0  ;;  %v5700_v20 = vpack.c.bf16 %v13399_v16, %v13399_v16 }
 0x302   : > { %5444 = vst.msk [vmem:[%s10693_s28 + $0x4fc] sm:$0xf] %vm5124_vm1, %v4931_v25  ;;  %v4420_v51 = vmax.f32 %v13447_v8, 0.0  ;;  %v4676_v43 = vpack.c.bf16 %v4164_v40, %v4164_v40 }
 0x303   : > { %v4804_v28 = vpack.c.bf16 %v4292_v41, %v4292_v41  ;;  %v10301_v41 = vld [vmem:[%s10615_s13 + $0x550] sm:$0xff] }
 0x304   : > { %7031 = vrot.lane.b32.xlu2 %v5822_v45, %s10519_s27  ;;  %7287 = vrot.lane.b32.xlu1 %v5950_v59, %s10519_s27  ;;  %v4932_v54 = vpack.c.bf16 %v4420_v51, %v4420_v51  ;;  %5189 = vst.msk [vmem:[%s10693_s28 + $0x100] sm:$0xf] %vm5124_vm1, %v4676_v43 }
 0x305   : > { %7033 = vrot.lane.b32.xlu0 %v5823_v15, %s10519_s27  ;;  %v5825_v15 = vpack.c.bf16 %v13289_v53, %v13289_v53  ;;  %v2982_v50 = vpop.f32.mrf.mxu0  ;;  %v3302_v34 = vpop.f32.mrf.mxu1  ;;  %5317 = vst.msk [vmem:[%s10693_s28 + $0x300] sm:$0xf] %vm5124_vm1, %v4804_v28 }
 0x306   : > { %v7014_v29 = vpop.permute.xlu2 %7013  ;;  %v6754_v32 = vpop.permute.xlu1 %6753  ;;  %v13473_v45 = vadd.f32 %v13115_v55, %v2982_v50  ;;  %v13476_v59 = vadd.f32 %v13115_v55, %v3302_v34  ;;  %10039 = vmatmul.msk.bf16.gmra.mxu2 %vm2042_vm0, %v10300_v62  ;;  %5445 = vst.msk [vmem:[%s10693_s28 + $0x500] sm:$0xf] %vm5124_vm1, %v4932_v54  ;;  %v5829_v34 = vpack.c.bf16 %v13435_v33, %v13435_v33 }
 0x307   : > { %8373 = vst.msk [vmem:[%s11027_s6 + $0x2c0] sm:$0xf] %vm5124_vm1, %v7014_v29  ;;  %v7010_v31 = vpop.permute.xlu0 %7009  ;;  %v3622_v61 = vpop.f32.mrf.mxu2 }
 0x308   : > { %8243 = vst.msk [vmem:[%s11027_s6 + $0xb8] sm:$0xf] %vm5124_vm1, %v6754_v32  ;;  %v13482_v53 = vadd.f32 %v13115_v55, %v3622_v61  ;;  %v4165_v47 = vmax.f32 %v13473_v45, 0.0  ;;  %v4293_v29 = vmax.f32 %v13476_v59, 0.0 }
 0x309   : > { %8371 = vst.msk [vmem:[%s11027_s6 + $0x2b8] sm:$0xf] %vm5124_vm1, %v7010_v31 }
 0x30a   : > { %v4421_v32 = vmax.f32 %v13482_v53, 0.0  ;;  %v4677_v31 = vpack.c.bf16 %v4165_v47, %v4165_v47  ;;  %v10173_v47 = vld [vmem:[%s10615_s13 + $0x150] sm:$0xff] }
 0x30c   : > { %7289 = vrot.lane.b32.xlu2 %v5951_v2, %s10519_s27  ;;  %6777 = vrot.lane.b32.xlu1 %v5695_v7, %s10519_s27  ;;  %v4805_v7 = vpack.c.bf16 %v4293_v29, %v4293_v29  ;;  %v4933_v2 = vpack.c.bf16 %v4421_v32, %v4421_v32  ;;  %5190 = vst.msk [vmem:[%s10693_s28 + $0x104] sm:$0xf] %vm5124_vm1, %v4677_v31  ;;  %v10237_v29 = vld [vmem:[%s10615_s13 + $0x350] sm:$0xff] }
 0x30d   : > { %7291 = vrot.lane.b32.xlu0 %v5952_v63, %s10519_s27  ;;  %v2985_v36 = vpop.f32.mrf.mxu0  ;;  %v3305_v56 = vpop.f32.mrf.mxu1  ;;  %v10353_v32 = vld [vmem:[%s10615_s13 + $0x6f0] sm:$0xff] }
 0x30e   : > { %v7272_v5 = vpop.permute.xlu2 %7271  ;;  %v7522_v18 = vpop.permute.xlu1 %7521  ;;  %v13506_v23 = vadd.f32 %v13115_v55, %v2985_v36  ;;  %v13509_v17 = vadd.f32 %v13115_v55, %v3305_v56  ;;  %5318 = vst.msk [vmem:[%s10693_s28 + $0x304] sm:$0xf] %vm5124_vm1, %v4805_v7  ;;  %9911 = vmatmul.msk.bf16.gmra.mxu0 %vm2042_vm0, %v10172_v12  ;;  %9975 = vmatmul.msk.bf16.gmra.mxu1 %vm2042_vm0, %v10236_v35 }
 0x30f   : > { %8502 = vst.msk [vmem:[%s11027_s6 + $0x4c4] sm:$0xf] %vm5124_vm1, %v7272_v5  ;;  %v7268_v3 = vpop.permute.xlu0 %7267  ;;  %v3625_v63 = vpop.f32.mrf.mxu2  ;;  %v5698_v5 = vpack.c.bf16 %v13325_v9, %v13325_v9  ;;  %10092 = vmatmul.msk.bf16.gmra.mxu3 %vm2042_vm0, %v10353_v32 }
 0x310   : > { %8627 = vst.msk [vmem:[%s11027_s6 + $0x6b8] sm:$0xf] %vm5124_vm1, %v7522_v18  ;;  %v5954_v18 = vpack.c.bf16 %v13334_v52, %v13334_v52  ;;  %v13521_v58 = vadd.f32 %v13115_v55, %v3625_v63  ;;  %v4166_v49 = vmax.f32 %v13506_v23, 0.0  ;;  %v5957_v63 = vpack.c.bf16 %v13447_v8, %v13447_v8 }
 0x311   : > { %8500 = vst.msk [vmem:[%s11027_s6 + $0x4bc] sm:$0xf] %vm5124_vm1, %v7268_v3  ;;  %v4294_v3 = vmax.f32 %v13509_v17, 0.0  ;;  %v5958_v8 = vpack.c.bf16 %v13482_v53, %v13482_v53 }
 0x312   : > { %5446 = vst.msk [vmem:[%s10693_s28 + $0x504] sm:$0xf] %vm5124_vm1, %v4933_v2  ;;  %v4422_v9 = vmax.f32 %v13521_v58, 0.0  ;;  %v4678_v25 = vpack.c.bf16 %v4166_v49, %v4166_v49 }
 0x313   : > { %v4806_v48 = vpack.c.bf16 %v4294_v3, %v4294_v3  ;;  %v10302_v3 = vld [vmem:[%s10615_s13 + $0x558] sm:$0xff] }
 0x314   : > { %6779 = vrot.lane.b32.xlu2 %v5696_v57, %s10519_s27  ;;  %7035 = vrot.lane.b32.xlu1 %v5824_v39, %s10519_s27  ;;  %v4934_v38 = vpack.c.bf16 %v4422_v9, %v4422_v9  ;;  %5191 = vst.msk [vmem:[%s10693_s28 + $0x108] sm:$0xf] %vm5124_vm1, %v4678_v25 }
 0x315   : > { %6781 = vrot.lane.b32.xlu0 %v5697_v46, %s10519_s27  ;;  %v5699_v46 = vpack.c.bf16 %v13358_v0, %v13358_v0  ;;  %v2987_v27 = vpop.f32.mrf.mxu0  ;;  %v3307_v13 = vpop.f32.mrf.mxu1  ;;  %5319 = vst.msk [vmem:[%s10693_s28 + $0x308] sm:$0xf] %vm5124_vm1, %v4806_v48 }
 0x316   : > { %v6762_v21 = vpop.permute.xlu2 %6761  ;;  %v7012_v44 = vpop.permute.xlu1 %7011  ;;  %v13547_v57 = vadd.f32 %v13115_v55, %v2987_v27  ;;  %v13550_v39 = vadd.f32 %v13115_v55, %v3307_v13  ;;  %10040 = vmatmul.msk.bf16.gmra.mxu2 %vm2042_vm0, %v10301_v41  ;;  %5447 = vst.msk [vmem:[%s10693_s28 + $0x508] sm:$0xf] %vm5124_vm1, %v4934_v38  ;;  %v5703_v13 = vpack.c.bf16 %v13506_v23, %v13506_v23 }
 0x317   : > { %8247 = vst.msk [vmem:[%s11027_s6 + $0xc8] sm:$0xf] %vm5124_vm1, %v6762_v21  ;;  %v6758_v11 = vpop.permute.xlu0 %6757  ;;  %v3627_v40 = vpop.f32.mrf.mxu2 }
 0x318   : > { %8372 = vst.msk [vmem:[%s11027_s6 + $0x2bc] sm:$0xf] %vm5124_vm1, %v7012_v44  ;;  %v13556_v0 = vadd.f32 %v13115_v55, %v3627_v40  ;;  %v4167_v51 = vmax.f32 %v13547_v57, 0.0  ;;  %v4295_v21 = vmax.f32 %v13550_v39, 0.0 }
 0x319   : > { %8245 = vst.msk [vmem:[%s11027_s6 + $0xc0] sm:$0xf] %vm5124_vm1, %v6758_v11 }
 0x31a   : > { %v4423_v44 = vmax.f32 %v13556_v0, 0.0  ;;  %v4679_v11 = vpack.c.bf16 %v4167_v51, %v4167_v51  ;;  %v10174_v51 = vld [vmem:[%s10615_s13 + $0x158] sm:$0xff] }
 0x31c   : > { %7037 = vrot.lane.b32.xlu2 %v5825_v15, %s10519_s27  ;;  %7293 = vrot.lane.b32.xlu1 %v5953_v30, %s10519_s27  ;;  %v4807_v15 = vpack.c.bf16 %v4295_v21, %v4295_v21  ;;  %v4935_v30 = vpack.c.bf16 %v4423_v44, %v4423_v44  ;;  %5192 = vst.msk [vmem:[%s10693_s28 + $0x10c] sm:$0xf] %vm5124_vm1, %v4679_v11  ;;  %v10238_v21 = vld [vmem:[%s10615_s13 + $0x358] sm:$0xff] }
 0x31d   : > { %7039 = vrot.lane.b32.xlu0 %v5826_v24, %s10519_s27  ;;  %v2990_v54 = vpop.f32.mrf.mxu0  ;;  %v3310_v50 = vpop.f32.mrf.mxu1  ;;  %v10354_v44 = vld [vmem:[%s10615_s13 + $0x6f8] sm:$0xff] }
 0x31e   : > { %v7530_v19 = vpop.permute.xlu2 %7529  ;;  %v7270_v60 = vpop.permute.xlu1 %7269  ;;  %v13580_v61 = vadd.f32 %v13115_v55, %v2990_v54  ;;  %v13583_v62 = vadd.f32 %v13115_v55, %v3310_v50  ;;  %5320 = vst.msk [vmem:[%s10693_s28 + $0x30c] sm:$0xf] %vm5124_vm1, %v4807_v15  ;;  %9912 = vmatmul.msk.bf16.gmra.mxu0 %vm2042_vm0, %v10173_v47  ;;  %9976 = vmatmul.msk.bf16.gmra.mxu1 %vm2042_vm0, %v10237_v29 }
 0x31f   : > { %8631 = vst.msk [vmem:[%s11027_s6 + $0x6c8] sm:$0xf] %vm5124_vm1, %v7530_v19  ;;  %v7526_v26 = vpop.permute.xlu0 %7525  ;;  %v3630_v24 = vpop.f32.mrf.mxu2  ;;  %v5828_v19 = vpack.c.bf16 %v13402_v6, %v13402_v6  ;;  %10093 = vmatmul.msk.bf16.gmra.mxu3 %vm2042_vm0, %v10354_v44 }
 0x320   : > { %8501 = vst.msk [vmem:[%s11027_s6 + $0x4c0] sm:$0xf] %vm5124_vm1, %v7270_v60  ;;  %v5956_v60 = vpack.c.bf16 %v13408_v4, %v13408_v4  ;;  %v13595_v33 = vadd.f32 %v13115_v55, %v3630_v24  ;;  %v4168_v31 = vmax.f32 %v13580_v61, 0.0  ;;  %v5959_v24 = vpack.c.bf16 %v13521_v58, %v13521_v58 }
 0x321   : > { %8629 = vst.msk [vmem:[%s11027_s6 + $0x6c0] sm:$0xf] %vm5124_vm1, %v7526_v26  ;;  %v4296_v26 = vmax.f32 %v13583_v62, 0.0  ;;  %v5832_v58 = vpack.c.bf16 %v13550_v39, %v13550_v39 }
 0x322   : > { %5448 = vst.msk [vmem:[%s10693_s28 + $0x50c] sm:$0xf] %vm5124_vm1, %v4935_v30  ;;  %v4424_v6 = vmax.f32 %v13595_v33, 0.0  ;;  %v4680_v2 = vpack.c.bf16 %v4168_v31, %v4168_v31 }
 0x323   : > { %v4808_v56 = vpack.c.bf16 %v4296_v26, %v4296_v26  ;;  %v10303_v26 = vld [vmem:[%s10615_s13 + $0x560] sm:$0xff] }
 0x324   : > { %7295 = vrot.lane.b32.xlu2 %v5954_v18, %s10519_s27  ;;  %6783 = vrot.lane.b32.xlu1 %v5698_v5, %s10519_s27  ;;  %v4936_v12 = vpack.c.bf16 %v4424_v6, %v4424_v6  ;;  %5193 = vst.msk [vmem:[%s10693_s28 + $0x110] sm:$0xf] %vm5124_vm1, %v4680_v2 }
 0x325   : > { %7297 = vrot.lane.b32.xlu0 %v5955_v10, %s10519_s27  ;;  %v5701_v10 = vpack.c.bf16 %v13432_v37, %v13432_v37  ;;  %v2992_v35 = vpop.f32.mrf.mxu0  ;;  %v3312_v14 = vpop.f32.mrf.mxu1  ;;  %5321 = vst.msk [vmem:[%s10693_s28 + $0x310] sm:$0xf] %vm5124_vm1, %v4808_v56 }
 0x326   : > { %v7020_v52 = vpop.permute.xlu2 %7019  ;;  %v6760_v22 = vpop.permute.xlu1 %6759  ;;  %v13621_v5 = vadd.f32 %v13115_v55, %v2992_v35  ;;  %v13624_v18 = vadd.f32 %v13115_v55, %v3312_v14  ;;  %10041 = vmatmul.msk.bf16.gmra.mxu2 %vm2042_vm0, %v10302_v3  ;;  %5449 = vst.msk [vmem:[%s10693_s28 + $0x510] sm:$0xf] %vm5124_vm1, %v4936_v12  ;;  %v5961_v35 = vpack.c.bf16 %v13595_v33, %v13595_v33  ;;  %v13730_v14 = vld [vmem:[%s16786_s2] ss:$0 sm:$0xff] }
 0x327   : > { %8376 = vst.msk [vmem:[%s11027_s6 + $0x2cc] sm:$0xf] %vm5124_vm1, %v7020_v52  ;;  %v7016_v1 = vpop.permute.xlu0 %7015  ;;  %v3632_v49 = vpop.f32.mrf.mxu2  ;;  %v5704_v33 = vpack.c.bf16 %v13547_v57, %v13547_v57 }
 0x328   : > { %8246 = vst.msk [vmem:[%s11027_s6 + $0xc4] sm:$0xf] %vm5124_vm1, %v6760_v22  ;;  %v13630_v37 = vadd.f32 %v13115_v55, %v3632_v49  ;;  %v4169_v9 = vmax.f32 %v13621_v5, 0.0  ;;  %v4297_v52 = vmax.f32 %v13624_v18, 0.0 }
 0x329   : > { %8374 = vst.msk [vmem:[%s11027_s6 + $0x2c4] sm:$0xf] %vm5124_vm1, %v7016_v1 }
 0x32a   : > { %v4425_v22 = vmax.f32 %v13630_v37, 0.0  ;;  %v4681_v1 = vpack.c.bf16 %v4169_v9, %v4169_v9  ;;  %v10175_v9 = vld [vmem:[%s10615_s13 + $0x160] sm:$0xff] }
 0x32c   : > { %6785 = vrot.lane.b32.xlu2 %v5699_v46, %s10519_s27  ;;  %7041 = vrot.lane.b32.xlu1 %v5827_v42, %s10519_s27  ;;  %v4809_v46 = vpack.c.bf16 %v4297_v52, %v4297_v52  ;;  %v4937_v42 = vpack.c.bf16 %v4425_v22, %v4425_v22  ;;  %5194 = vst.msk [vmem:[%s10693_s28 + $0x114] sm:$0xf] %vm5124_vm1, %v4681_v1  ;;  %v10239_v52 = vld [vmem:[%s10615_s13 + $0x360] sm:$0xff] }
 0x32d   : > { %6787 = vrot.lane.b32.xlu0 %v5700_v20, %s10519_s27  ;;  %v2995_v38 = vpop.f32.mrf.mxu0  ;;  %v3315_v27 = vpop.f32.mrf.mxu1  ;;  %v10355_v22 = vld [vmem:[%s10615_s13 + $0x700] sm:$0xff] }
 0x32e   : > { %v7278_v16 = vpop.permute.xlu2 %7277  ;;  %v7528_v43 = vpop.permute.xlu1 %7527  ;;  %v13654_v40 = vadd.f32 %v13115_v55, %v2995_v38  ;;  %v13657_v41 = vadd.f32 %v13115_v55, %v3315_v27  ;;  %5322 = vst.msk [vmem:[%s10693_s28 + $0x314] sm:$0xf] %vm5124_vm1, %v4809_v46  ;;  %9913 = vmatmul.msk.bf16.gmra.mxu0 %vm2042_vm0, %v10174_v51  ;;  %9977 = vmatmul.msk.bf16.gmra.mxu1 %vm2042_vm0, %v10238_v21 }
 0x32f   : > { %8505 = vst.msk [vmem:[%s11027_s6 + $0x4d0] sm:$0xf] %vm5124_vm1, %v7278_v16  ;;  %v7274_v28 = vpop.permute.xlu0 %7273  ;;  %v3635_v20 = vpop.f32.mrf.mxu2  ;;  %v5702_v16 = vpack.c.bf16 %v13473_v45, %v13473_v45  ;;  %10094 = vmatmul.msk.bf16.gmra.mxu3 %vm2042_vm0, %v10355_v22 }
 0x330   : > { %8630 = vst.msk [vmem:[%s11027_s6 + $0x6c4] sm:$0xf] %vm5124_vm1, %v7528_v43  ;;  %v5830_v43 = vpack.c.bf16 %v13476_v59, %v13476_v59  ;;  %v13669_v23 = vadd.f32 %v13115_v55, %v3635_v20  ;;  %v4170_v11 = vmax.f32 %v13654_v40, 0.0  ;;  %v5833_v20 = vpack.c.bf16 %v13583_v62, %v13583_v62 }
 0x331   : > { %8503 = vst.msk [vmem:[%s11027_s6 + $0x4c8] sm:$0xf] %vm5124_vm1, %v7274_v28  ;;  %v4298_v28 = vmax.f32 %v13657_v41, 0.0  ;;  %v5706_v62 = vpack.c.bf16 %v13621_v5, %v13621_v5 }
 0x332   : > { %5450 = vst.msk [vmem:[%s10693_s28 + $0x514] sm:$0xf] %vm5124_vm1, %v4937_v42  ;;  %v4426_v45 = vmax.f32 %v13669_v23, 0.0  ;;  %v4682_v30 = vpack.c.bf16 %v4170_v11, %v4170_v11 }
 0x333   : > { %v4810_v50 = vpack.c.bf16 %v4298_v28, %v4298_v28  ;;  %v10304_v28 = vld [vmem:[%s10615_s13 + $0x568] sm:$0xff] }
 0x334   : > { %7043 = vrot.lane.b32.xlu2 %v5828_v19, %s10519_s27  ;;  %7299 = vrot.lane.b32.xlu1 %v5956_v60, %s10519_s27  ;;  %v4938_v47 = vpack.c.bf16 %v4426_v45, %v4426_v45  ;;  %5195 = vst.msk [vmem:[%s10693_s28 + $0x118] sm:$0xf] %vm5124_vm1, %v4682_v30 }
 0x335   : > { %7045 = vrot.lane.b32.xlu0 %v5829_v34, %s10519_s27  ;;  %v5831_v34 = vpack.c.bf16 %v13509_v17, %v13509_v17  ;;  %v2997_v29 = vpop.f32.mrf.mxu0  ;;  %v3317_v32 = vpop.f32.mrf.mxu1  ;;  %5323 = vst.msk [vmem:[%s10693_s28 + $0x318] sm:$0xf] %vm5124_vm1, %v4810_v50 }
 0x336   : > { %v6768_v4 = vpop.permute.xlu2 %6767  ;;  %v7018_v7 = vpop.permute.xlu1 %7017  ;;  %v13695_v19 = vadd.f32 %v13115_v55, %v2997_v29  ;;  %v13698_v60 = vadd.f32 %v13115_v55, %v3317_v32  ;;  %10042 = vmatmul.msk.bf16.gmra.mxu2 %vm2042_vm0, %v10303_v26  ;;  %5451 = vst.msk [vmem:[%s10693_s28 + $0x518] sm:$0xf] %vm5124_vm1, %v4938_v47  ;;  %v5835_v32 = vpack.c.bf16 %v13657_v41, %v13657_v41 }
 0x337   : > { %8250 = vst.msk [vmem:[%s11027_s6 + $0xd4] sm:$0xf] %vm5124_vm1, %v6768_v4  ;;  %v6764_v36 = vpop.permute.xlu0 %6763  ;;  %v3637_v31 = vpop.f32.mrf.mxu2 }
 0x338   : > { %8375 = vst.msk [vmem:[%s11027_s6 + $0x2c8] sm:$0xf] %vm5124_vm1, %v7018_v7  ;;  %v13704_v17 = vadd.f32 %v13115_v55, %v3637_v31  ;;  %v4171_v6 = vmax.f32 %v13695_v19, 0.0  ;;  %v4299_v4 = vmax.f32 %v13698_v60, 0.0 }
 0x339   : > { %8248 = vst.msk [vmem:[%s11027_s6 + $0xcc] sm:$0xf] %vm5124_vm1, %v6764_v36 }
 0x33a   : > { %v4427_v55 = vmax.f32 %v13704_v17, 0.0  ;;  %v4683_v2 = vpack.c.bf16 %v4171_v6, %v4171_v6  ;;  %v4811_v56 = vpack.c.bf16 %v4299_v4, %v4299_v4  ;;  %v10176_v6 = vld [vmem:[%s10615_s13 + $0x168] sm:$0xff] }
 0x33b   : > { %v10240_v4 = vld [vmem:[%s10615_s13 + $0x368] sm:$0xff] }
 0x33c   : > { %7301 = vrot.lane.b32.xlu2 %v5957_v63, %s10519_s27  ;;  %6789 = vrot.lane.b32.xlu1 %v5701_v10, %s10519_s27  ;;  %v4939_v10 = vpack.c.bf16 %v4427_v55, %v4427_v55  ;;  %5196 = vst.msk [vmem:[%s10693_s28 + $0x11c] sm:$0xf] %vm5124_vm1, %v4683_v2  ;;  %v10356_v55 = vld [vmem:[%s10615_s13 + $0x708] sm:$0xff] }
 0x33d   : > { %7303 = vrot.lane.b32.xlu0 %v5958_v8, %s10519_s27  ;;  %v3000_v63 = vpop.f32.mrf.mxu0  ;;  %v3320_v12 = vpop.f32.mrf.mxu1  ;;  %5324 = vst.msk [vmem:[%s10693_s28 + $0x31c] sm:$0xf] %vm5124_vm1, %v4811_v56 }
 0x33e   : > { %v7536_v53 = vpop.permute.xlu2 %7535  ;;  %v7276_v25 = vpop.permute.xlu1 %7275  ;;  %v13733_v49 = vadd.f32 %v13730_v14, %v3000_v63  ;;  %v13736_v3 = vadd.f32 %v13730_v14, %v3320_v12  ;;  %9914 = vmatmul.msk.bf16.gmra.mxu0 %vm2042_vm0, %v10175_v9  ;;  %9978 = vmatmul.msk.bf16.gmra.mxu1 %vm2042_vm0, %v10239_v52  ;;  %5452 = vst.msk [vmem:[%s10693_s28 + $0x51c] sm:$0xf] %vm5124_vm1, %v4939_v10 }
 0x33f   : > { %8634 = vst.msk [vmem:[%s11027_s6 + $0x6d4] sm:$0xf] %vm5124_vm1, %v7536_v53  ;;  %v7532_v48 = vpop.permute.xlu0 %7531  ;;  %v3640_v8 = vpop.f32.mrf.mxu2  ;;  %v5960_v53 = vpack.c.bf16 %v13556_v0, %v13556_v0  ;;  %10095 = vmatmul.msk.bf16.gmra.mxu3 %vm2042_vm0, %v10356_v55 }
 0x340   : > { %8504 = vst.msk [vmem:[%s11027_s6 + $0x4cc] sm:$0xf] %vm5124_vm1, %v7276_v25  ;;  %v13748_v25 = vadd.f32 %v13730_v14, %v3640_v8  ;;  %v4172_v1 = vmax.f32 %v13733_v49, 0.0  ;;  %v5963_v8 = vpack.c.bf16 %v13669_v23, %v13669_v23  ;;  %v5964_v23 = vpack.c.bf16 %v13704_v17, %v13704_v17 }
 0x341   : > { %8632 = vst.msk [vmem:[%s11027_s6 + $0x6cc] sm:$0xf] %vm5124_vm1, %v7532_v48  ;;  %v4300_v48 = vmax.f32 %v13736_v3, 0.0 }
 0x342   : > { %v4428_v57 = vmax.f32 %v13748_v25, 0.0  ;;  %v4684_v42 = vpack.c.bf16 %v4172_v1, %v4172_v1 }
 0x343   : > { %v4812_v27 = vpack.c.bf16 %v4300_v48, %v4300_v48  ;;  %v10305_v48 = vld [vmem:[%s10615_s13 + $0x570] sm:$0xff] }
 0x344   : > { %6791 = vrot.lane.b32.xlu2 %v5702_v16, %s10519_s27  ;;  %7047 = vrot.lane.b32.xlu1 %v5830_v43, %s10519_s27  ;;  %v4940_v51 = vpack.c.bf16 %v4428_v57, %v4428_v57  ;;  %5197 = vst.msk [vmem:[%s10693_s28 + $0x120] sm:$0xf] %vm5124_vm1, %v4684_v42 }
 0x345   : > { %6793 = vrot.lane.b32.xlu0 %v5703_v13, %s10519_s27  ;;  %v5705_v13 = vpack.c.bf16 %v13580_v61, %v13580_v61  ;;  %v3002_v21 = vpop.f32.mrf.mxu0  ;;  %v3322_v44 = vpop.f32.mrf.mxu1  ;;  %5325 = vst.msk [vmem:[%s10693_s28 + $0x320] sm:$0xf] %vm5124_vm1, %v4812_v27 }
 0x346   : > { %v7026_v59 = vpop.permute.xlu2 %7025  ;;  %v6766_v15 = vpop.permute.xlu1 %6765  ;;  %v13774_v16 = vadd.f32 %v13730_v14, %v3002_v21  ;;  %v13777_v43 = vadd.f32 %v13730_v14, %v3322_v44  ;;  %10043 = vmatmul.msk.bf16.gmra.mxu2 %vm2042_vm0, %v10304_v28  ;;  %5453 = vst.msk [vmem:[%s10693_s28 + $0x520] sm:$0xf] %vm5124_vm1, %v4940_v51  ;;  %v5709_v44 = vpack.c.bf16 %v13733_v49, %v13733_v49 }
 0x347   : > { %8379 = vst.msk [vmem:[%s11027_s6 + $0x2d8] sm:$0xf] %vm5124_vm1, %v7026_v59  ;;  %v7022_v54 = vpop.permute.xlu0 %7021  ;;  %v3642_v11 = vpop.f32.mrf.mxu2 }
 0x348   : > { %8249 = vst.msk [vmem:[%s11027_s6 + $0xd0] sm:$0xf] %vm5124_vm1, %v6766_v15  ;;  %v13783_v61 = vadd.f32 %v13730_v14, %v3642_v11  ;;  %v4173_v45 = vmax.f32 %v13774_v16, 0.0  ;;  %v4301_v59 = vmax.f32 %v13777_v43, 0.0 }
 0x349   : > { %8377 = vst.msk [vmem:[%s11027_s6 + $0x2d0] sm:$0xf] %vm5124_vm1, %v7022_v54 }
 0x34a   : > { %v4429_v15 = vmax.f32 %v13783_v61, 0.0  ;;  %v4685_v54 = vpack.c.bf16 %v4173_v45, %v4173_v45  ;;  %v10177_v45 = vld [vmem:[%s10615_s13 + $0x170] sm:$0xff] }
 0x34c   : > { %7049 = vrot.lane.b32.xlu2 %v5831_v34, %s10519_s27  ;;  %7305 = vrot.lane.b32.xlu1 %v5959_v24, %s10519_s27  ;;  %v4813_v34 = vpack.c.bf16 %v4301_v59, %v4301_v59  ;;  %v4941_v24 = vpack.c.bf16 %v4429_v15, %v4429_v15  ;;  %5198 = vst.msk [vmem:[%s10693_s28 + $0x124] sm:$0xf] %vm5124_vm1, %v4685_v54  ;;  %v10241_v59 = vld [vmem:[%s10615_s13 + $0x370] sm:$0xff] }
 0x34d   : > { %7051 = vrot.lane.b32.xlu0 %v5832_v58, %s10519_s27  ;;  %v3005_v47 = vpop.f32.mrf.mxu0  ;;  %v3325_v29 = vpop.f32.mrf.mxu1  ;;  %v10357_v15 = vld [vmem:[%s10615_s13 + $0x710] sm:$0xff] }
 0x34e   : > { %v7284_v39 = vpop.permute.xlu2 %7283  ;;  %v7534_v7 = vpop.permute.xlu1 %7533  ;;  %v13807_v31 = vadd.f32 %v13730_v14, %v3005_v47  ;;  %v13810_v26 = vadd.f32 %v13730_v14, %v3325_v29  ;;  %5326 = vst.msk [vmem:[%s10693_s28 + $0x324] sm:$0xf] %vm5124_vm1, %v4813_v34  ;;  %9915 = vmatmul.msk.bf16.gmra.mxu0 %vm2042_vm0, %v10176_v6  ;;  %9979 = vmatmul.msk.bf16.gmra.mxu1 %vm2042_vm0, %v10240_v4 }
 0x34f   : > { %8508 = vst.msk [vmem:[%s11027_s6 + $0x4dc] sm:$0xf] %vm5124_vm1, %v7284_v39  ;;  %v7280_v36 = vpop.permute.xlu0 %7279  ;;  %v3645_v58 = vpop.f32.mrf.mxu2  ;;  %v5834_v39 = vpack.c.bf16 %v13624_v18, %v13624_v18  ;;  %10096 = vmatmul.msk.bf16.gmra.mxu3 %vm2042_vm0, %v10357_v15 }
 0x350   : > { %8633 = vst.msk [vmem:[%s11027_s6 + $0x6d0] sm:$0xf] %vm5124_vm1, %v7534_v7  ;;  %v5962_v7 = vpack.c.bf16 %v13630_v37, %v13630_v37  ;;  %v13822_v41 = vadd.f32 %v13730_v14, %v3645_v58  ;;  %v4174_v2 = vmax.f32 %v13807_v31, 0.0  ;;  %v5965_v58 = vpack.c.bf16 %v13748_v25, %v13748_v25 }
 0x351   : > { %8506 = vst.msk [vmem:[%s11027_s6 + $0x4d4] sm:$0xf] %vm5124_vm1, %v7280_v36  ;;  %v4302_v36 = vmax.f32 %v13810_v26, 0.0  ;;  %v5838_v25 = vpack.c.bf16 %v13777_v43, %v13777_v43 }
 0x352   : > { %5454 = vst.msk [vmem:[%s10693_s28 + $0x524] sm:$0xf] %vm5124_vm1, %v4941_v24  ;;  %v4430_v18 = vmax.f32 %v13822_v41, 0.0  ;;  %v4686_v10 = vpack.c.bf16 %v4174_v2, %v4174_v2 }
 0x353   : > { %v4814_v12 = vpack.c.bf16 %v4302_v36, %v4302_v36  ;;  %v10306_v36 = vld [vmem:[%s10615_s13 + $0x578] sm:$0xff] }
 0x354   : > { %7307 = vrot.lane.b32.xlu2 %v5960_v53, %s10519_s27  ;;  %6795 = vrot.lane.b32.xlu1 %v5704_v33, %s10519_s27  ;;  %v4942_v9 = vpack.c.bf16 %v4430_v18, %v4430_v18  ;;  %5199 = vst.msk [vmem:[%s10693_s28 + $0x128] sm:$0xf] %vm5124_vm1, %v4686_v10 }
 0x355   : > { %7309 = vrot.lane.b32.xlu0 %v5961_v35, %s10519_s27  ;;  %v5707_v35 = vpack.c.bf16 %v13654_v40, %v13654_v40  ;;  %v3007_v52 = vpop.f32.mrf.mxu0  ;;  %v3327_v22 = vpop.f32.mrf.mxu1  ;;  %5327 = vst.msk [vmem:[%s10693_s28 + $0x328] sm:$0xf] %vm5124_vm1, %v4814_v12 }
 0x356   : > { %v6774_v0 = vpop.permute.xlu2 %6773  ;;  %v7024_v46 = vpop.permute.xlu1 %7023  ;;  %v13848_v33 = vadd.f32 %v13730_v14, %v3007_v52  ;;  %v13851_v53 = vadd.f32 %v13730_v14, %v3327_v22  ;;  %10044 = vmatmul.msk.bf16.gmra.mxu2 %vm2042_vm0, %v10305_v48  ;;  %5455 = vst.msk [vmem:[%s10693_s28 + $0x528] sm:$0xf] %vm5124_vm1, %v4942_v9  ;;  %v5967_v22 = vpack.c.bf16 %v13822_v41, %v13822_v41 }
 0x357   : > { %8253 = vst.msk [vmem:[%s11027_s6 + $0xe0] sm:$0xf] %vm5124_vm1, %v6774_v0  ;;  %v6770_v38 = vpop.permute.xlu0 %6769  ;;  %v3647_v1 = vpop.f32.mrf.mxu2 }
 0x358   : > { %8378 = vst.msk [vmem:[%s11027_s6 + $0x2d4] sm:$0xf] %vm5124_vm1, %v7024_v46  ;;  %v13857_v40 = vadd.f32 %v13730_v14, %v3647_v1  ;;  %v4175_v57 = vmax.f32 %v13848_v33, 0.0  ;;  %v4303_v0 = vmax.f32 %v13851_v53, 0.0 }
 0x359   : > { %8251 = vst.msk [vmem:[%s11027_s6 + $0xd8] sm:$0xf] %vm5124_vm1, %v6770_v38 }
 0x35a   : > { %v4431_v46 = vmax.f32 %v13857_v40, 0.0  ;;  %v4687_v38 = vpack.c.bf16 %v4175_v57, %v4175_v57  ;;  %v10178_v57 = vld [vmem:[%s10615_s13 + $0x178] sm:$0xff] }
 0x35c   : > { %6797 = vrot.lane.b32.xlu2 %v5705_v13, %s10519_s27  ;;  %7053 = vrot.lane.b32.xlu1 %v5833_v20, %s10519_s27  ;;  %v4815_v13 = vpack.c.bf16 %v4303_v0, %v4303_v0  ;;  %v4943_v20 = vpack.c.bf16 %v4431_v46, %v4431_v46  ;;  %5200 = vst.msk [vmem:[%s10693_s28 + $0x12c] sm:$0xf] %vm5124_vm1, %v4687_v38  ;;  %v10242_v0 = vld [vmem:[%s10615_s13 + $0x378] sm:$0xff] }
 0x35d   : > { %6799 = vrot.lane.b32.xlu0 %v5706_v62, %s10519_s27  ;;  %v3010_v51 = vpop.f32.mrf.mxu0  ;;  %v3330_v21 = vpop.f32.mrf.mxu1  ;;  %v10358_v46 = vld [vmem:[%s10615_s13 + $0x718] sm:$0xff] }
 0x35e   : > { %v7032_v5 = vpop.permute.xlu2 %7031  ;;  %v7282_v30 = vpop.permute.xlu1 %7281  ;;  %v13881_v11 = vadd.f32 %v13730_v14, %v3010_v51  ;;  %v13884_v28 = vadd.f32 %v13730_v14, %v3330_v21  ;;  %5328 = vst.msk [vmem:[%s10693_s28 + $0x32c] sm:$0xf] %vm5124_vm1, %v4815_v13  ;;  %9916 = vmatmul.msk.bf16.gmra.mxu0 %vm2042_vm0, %v10177_v45  ;;  %9980 = vmatmul.msk.bf16.gmra.mxu1 %vm2042_vm0, %v10241_v59 }
 0x35f   : > { %8382 = vst.msk [vmem:[%s11027_s6 + $0x2e4] sm:$0xf] %vm5124_vm1, %v7032_v5  ;;  %v7028_v50 = vpop.permute.xlu0 %7027  ;;  %v3650_v62 = vpop.f32.mrf.mxu2  ;;  %v5708_v5 = vpack.c.bf16 %v13695_v19, %v13695_v19  ;;  %10097 = vmatmul.msk.bf16.gmra.mxu3 %vm2042_vm0, %v10358_v46 }
 0x360   : > { %8507 = vst.msk [vmem:[%s11027_s6 + $0x4d8] sm:$0xf] %vm5124_vm1, %v7282_v30  ;;  %v5836_v30 = vpack.c.bf16 %v13698_v60, %v13698_v60  ;;  %v13896_v49 = vadd.f32 %v13730_v14, %v3650_v62  ;;  %v4176_v54 = vmax.f32 %v13881_v11, 0.0  ;;  %v5839_v62 = vpack.c.bf16 %v13810_v26, %v13810_v26 }
 0x361   : > { %8380 = vst.msk [vmem:[%s11027_s6 + $0x2dc] sm:$0xf] %vm5124_vm1, %v7028_v50  ;;  %v4304_v50 = vmax.f32 %v13884_v28, 0.0 }
 0x362   : > { %5456 = vst.msk [vmem:[%s10693_s28 + $0x52c] sm:$0xf] %vm5124_vm1, %v4943_v20  ;;  %v4432_v19 = vmax.f32 %v13896_v49, 0.0  ;;  %v4688_v24 = vpack.c.bf16 %v4176_v54, %v4176_v54 }
 0x363   : > { %v4816_v29 = vpack.c.bf16 %v4304_v50, %v4304_v50  ;;  %v10307_v50 = vld [vmem:[%s10615_s13 + $0x580] sm:$0xff] }
 0x364   : > { %7055 = vrot.lane.b32.xlu2 %v5834_v39, %s10519_s27  ;;  %7311 = vrot.lane.b32.xlu1 %v5962_v7, %s10519_s27  ;;  %v4944_v6 = vpack.c.bf16 %v4432_v19, %v4432_v19  ;;  %5201 = vst.msk [vmem:[%s10693_s28 + $0x130] sm:$0xf] %vm5124_vm1, %v4688_v24 }
 0x365   : > { %7057 = vrot.lane.b32.xlu0 %v5835_v32, %s10519_s27  ;;  %v5837_v32 = vpack.c.bf16 %v13736_v3, %v13736_v3  ;;  %v3012_v4 = vpop.f32.mrf.mxu0  ;;  %v3332_v55 = vpop.f32.mrf.mxu1  ;;  %5329 = vst.msk [vmem:[%s10693_s28 + $0x330] sm:$0xf] %vm5124_vm1, %v4816_v29 }
 0x366   : > { %v7290_v37 = vpop.permute.xlu2 %7289  ;;  %v6772_v56 = vpop.permute.xlu1 %6771  ;;  %v13922_v39 = vadd.f32 %v13730_v14, %v3012_v4  ;;  %v13925_v7 = vadd.f32 %v13730_v14, %v3332_v55  ;;  %10045 = vmatmul.msk.bf16.gmra.mxu2 %vm2042_vm0, %v10306_v36  ;;  %5457 = vst.msk [vmem:[%s10693_s28 + $0x530] sm:$0xf] %vm5124_vm1, %v4944_v6 }
 0x367   : > { %8511 = vst.msk [vmem:[%s11027_s6 + $0x4e8] sm:$0xf] %vm5124_vm1, %v7290_v37  ;;  %v7286_v63 = vpop.permute.xlu0 %7285  ;;  %v3652_v2 = vpop.f32.mrf.mxu2 }
 0x368   : > { %8252 = vst.msk [vmem:[%s11027_s6 + $0xdc] sm:$0xf] %vm5124_vm1, %v6772_v56  ;;  %v13931_v3 = vadd.f32 %v13730_v14, %v3652_v2  ;;  %v4177_v18 = vmax.f32 %v13922_v39, 0.0  ;;  %v4305_v37 = vmax.f32 %v13925_v7, 0.0 }
 0x369   : > { %8509 = vst.msk [vmem:[%s11027_s6 + $0x4e0] sm:$0xf] %vm5124_vm1, %v7286_v63 }
 0x36a   : > { %v4433_v56 = vmax.f32 %v13931_v3, 0.0  ;;  %v4689_v63 = vpack.c.bf16 %v4177_v18, %v4177_v18 }
 0x36c   : > { %7313 = vrot.lane.b32.xlu2 %v5963_v8, %s10519_s27  ;;  %6801 = vrot.lane.b32.xlu1 %v5707_v35, %s10519_s27  ;;  %v4817_v35 = vpack.c.bf16 %v4305_v37, %v4305_v37  ;;  %v4945_v8 = vpack.c.bf16 %v4433_v56, %v4433_v56  ;;  %5202 = vst.msk [vmem:[%s10693_s28 + $0x134] sm:$0xf] %vm5124_vm1, %v4689_v63  ;;  %v10179_v63 = vld [vmem:[%s10615_s13 + $0x180] sm:$0xff] }
 0x36d   : > { %7315 = vrot.lane.b32.xlu0 %v5964_v23, %s10519_s27  ;;  %v3015_v9 = vpop.f32.mrf.mxu0  ;;  %v3335_v52 = vpop.f32.mrf.mxu1 }
 0x36e   : > { %v6780_v17 = vpop.permute.xlu2 %6779  ;;  %v7030_v42 = vpop.permute.xlu1 %7029  ;;  %v13955_v1 = vadd.f32 %v13730_v14, %v3015_v9  ;;  %v13958_v48 = vadd.f32 %v13730_v14, %v3335_v52  ;;  %5330 = vst.msk [vmem:[%s10693_s28 + $0x334] sm:$0xf] %vm5124_vm1, %v4817_v35  ;;  %9917 = vmatmul.msk.bf16.gmra.mxu0 %vm2042_vm0, %v10178_v57  ;;  %9981 = vmatmul.msk.bf16.gmra.mxu1 %vm2042_vm0, %v10242_v0  ;;  %v10359_v35 = vld [vmem:[%s10615_s13 + $0x720] sm:$0xff] }
 0x36f   : > { %8256 = vst.msk [vmem:[%s11027_s6 + $0xec] sm:$0xf] %vm5124_vm1, %v6780_v17  ;;  %v6776_v27 = vpop.permute.xlu0 %6775  ;;  %v3655_v23 = vpop.f32.mrf.mxu2  ;;  %v5710_v17 = vpack.c.bf16 %v13774_v16, %v13774_v16  ;;  %10098 = vmatmul.msk.bf16.gmra.mxu3 %vm2042_vm0, %v10359_v35 }
 0x370   : > { %8381 = vst.msk [vmem:[%s11027_s6 + $0x2e0] sm:$0xf] %vm5124_vm1, %v7030_v42  ;;  %v5966_v42 = vpack.c.bf16 %v13783_v61, %v13783_v61  ;;  %v13970_v41 = vadd.f32 %v13730_v14, %v3655_v23  ;;  %v4178_v38 = vmax.f32 %v13955_v1, 0.0 }
 0x371   : > { %8254 = vst.msk [vmem:[%s11027_s6 + $0xe4] sm:$0xf] %vm5124_vm1, %v6776_v27  ;;  %v4306_v27 = vmax.f32 %v13958_v48, 0.0 }
 0x372   : > { %5458 = vst.msk [vmem:[%s10693_s28 + $0x534] sm:$0xf] %vm5124_vm1, %v4945_v8  ;;  %v4434_v16 = vmax.f32 %v13970_v41, 0.0  ;;  %v4690_v20 = vpack.c.bf16 %v4178_v38, %v4178_v38  ;;  %v5840_v8 = vpack.c.bf16 %v13851_v53, %v13851_v53  ;;  %v5713_v38 = vpack.c.bf16 %v13881_v11, %v13881_v11 }
 0x373   : > { %v4818_v21 = vpack.c.bf16 %v4306_v27, %v4306_v27  ;;  %v5969_v27 = vpack.c.bf16 %v13896_v49, %v13896_v49  ;;  %v10308_v49 = vld [vmem:[%s10615_s13 + $0x588] sm:$0xff] }
 0x374   : > { %6803 = vrot.lane.b32.xlu2 %v5708_v5, %s10519_s27  ;;  %7059 = vrot.lane.b32.xlu1 %v5836_v30, %s10519_s27  ;;  %v4946_v45 = vpack.c.bf16 %v4434_v16, %v4434_v16  ;;  %5203 = vst.msk [vmem:[%s10693_s28 + $0x138] sm:$0xf] %vm5124_vm1, %v4690_v20 }
 0x375   : > { %6805 = vrot.lane.b32.xlu0 %v5709_v44, %s10519_s27  ;;  %v5711_v44 = vpack.c.bf16 %v13807_v31, %v13807_v31  ;;  %v3017_v59 = vpop.f32.mrf.mxu0  ;;  %v3337_v15 = vpop.f32.mrf.mxu1  ;;  %5331 = vst.msk [vmem:[%s10693_s28 + $0x338] sm:$0xf] %vm5124_vm1, %v4818_v21 }
 0x376   : > { %v7038_v60 = vpop.permute.xlu2 %7037  ;;  %v7288_v34 = vpop.permute.xlu1 %7287  ;;  %v13996_v5 = vadd.f32 %v13730_v14, %v3017_v59  ;;  %v13999_v30 = vadd.f32 %v13730_v14, %v3337_v15  ;;  %10046 = vmatmul.msk.bf16.gmra.mxu2 %vm2042_vm0, %v10307_v50  ;;  %5459 = vst.msk [vmem:[%s10693_s28 + $0x538] sm:$0xf] %vm5124_vm1, %v4946_v45  ;;  %v5970_v59 = vpack.c.bf16 %v13931_v3, %v13931_v3 }
 0x377   : > { %8385 = vst.msk [vmem:[%s11027_s6 + $0x2f0] sm:$0xf] %vm5124_vm1, %v7038_v60  ;;  %v7034_v47 = vpop.permute.xlu0 %7033  ;;  %v3657_v54 = vpop.f32.mrf.mxu2  ;;  %v5712_v60 = vpack.c.bf16 %v13848_v33, %v13848_v33 }
 0x378   : > { %8510 = vst.msk [vmem:[%s11027_s6 + $0x4e4] sm:$0xf] %vm5124_vm1, %v7288_v34  ;;  %v3915_v31 = vpop.f32.mrf.mxu3  ;;  %v14005_v26 = vadd.f32 %v13730_v14, %v3657_v54  ;;  %v4179_v34 = vmax.f32 %v13996_v5, 0.0  ;;  %v4307_v24 = vmax.f32 %v13999_v30, 0.0 }
 0x379   : > { %8383 = vst.msk [vmem:[%s11027_s6 + $0x2e8] sm:$0xf] %vm5124_vm1, %v7034_v47  ;;  %v14008_v19 = vadd.f32 %v13730_v14, %v3915_v31 }
 0x37a   : > { %v4435_v47 = vmax.f32 %v14005_v26, 0.0  ;;  %v4819_v4 = vpack.c.bf16 %v4307_v24, %v4307_v24 }
 0x37b   : > { %v4538_v33 = vmax.f32 %v14008_v19, 0.0 }
 0x37c   : > { %7061 = vrot.lane.b32.xlu2 %v5837_v32, %s10519_s27  ;;  %7317 = vrot.lane.b32.xlu1 %v5965_v58, %s10519_s27  ;;  %v4691_v58 = vpack.c.bf16 %v4179_v34, %v4179_v34  ;;  %v4947_v55 = vpack.c.bf16 %v4435_v47, %v4435_v47  ;;  %5332 = vst.msk [vmem:[%s10693_s28 + $0x33c] sm:$0xf] %vm5124_vm1, %v4819_v4 }
 0x37d   : > { %7063 = vrot.lane.b32.xlu0 %v5838_v25, %s10519_s27  ;;  %v3020_v2 = vpop.f32.mrf.mxu0  ;;  %v3340_v36 = vpop.f32.mrf.mxu1  ;;  %v5841_v25 = vpack.c.bf16 %v13884_v28, %v13884_v28  ;;  %v5050_v18 = vpack.c.bf16 %v4538_v33, %v4538_v33  ;;  %v5968_v28 = vpack.c.bf16 %v13857_v40, %v13857_v40 }
 0x37e   : > { %v7296_v43 = vpop.permute.xlu2 %7295  ;;  %v6778_v10 = vpop.permute.xlu1 %6777  ;;  %v14033_v37 = vadd.f32 %v13730_v14, %v3020_v2  ;;  %v14036_v56 = vadd.f32 %v13730_v14, %v3340_v36  ;;  %5204 = vst.msk [vmem:[%s10693_s28 + $0x13c] sm:$0xf] %vm5124_vm1, %v4691_v58  ;;  %9918 = vmatmul.msk.bf16.gmra.mxu0 %vm2042_vm0, %v10179_v63  ;;  %v5715_v58 = vpack.c.bf16 %v13955_v1, %v13955_v1 }
 0x37f   : > { %8514 = vst.msk [vmem:[%s11027_s6 + $0x4f4] sm:$0xf] %vm5124_vm1, %v7296_v43  ;;  %v7292_v12 = vpop.permute.xlu0 %7291  ;;  %v3660_v43 = vpop.f32.mrf.mxu2  ;;  %v5842_v1 = vpack.c.bf16 %v13925_v7, %v13925_v7 }
 0x380   : > { %8255 = vst.msk [vmem:[%s11027_s6 + $0xe8] sm:$0xf] %vm5124_vm1, %v6778_v10  ;;  %v3917_v10 = vpop.f32.mrf.mxu3  ;;  %v14048_v9 = vadd.f32 %v13730_v14, %v3660_v43  ;;  %v4308_v23 = vmax.f32 %v14036_v56, 0.0  ;;  %v10360_v43 = vld [vmem:[%s10615_s13 + $0x728] sm:$0xff] }
 0x381   : > { %8512 = vst.msk [vmem:[%s11027_s6 + $0x4ec] sm:$0xf] %vm5124_vm1, %v7292_v12  ;;  %v10243_v12 = vld [vmem:[%s10615_s13 + $0x380] sm:$0xff]  ;;  %v14051_v52 = vadd.f32 %v13730_v14, %v3917_v10  ;;  %v5714_v10 = vpack.c.bf16 %v13922_v39, %v13922_v39  ;;  %10099 = vmatmul.msk.bf16.gmra.mxu3 %vm2042_vm0, %v10360_v43 }
 0x382   : > { %9982 = vmatmul.msk.bf16.gmra.mxu1 %vm2042_vm0, %v10243_v12  ;;  %5460 = vst.msk [vmem:[%s10693_s28 + $0x53c] sm:$0xf] %vm5124_vm1, %v4947_v55  ;;  %v4436_v53 = vmax.f32 %v14048_v9, 0.0 }
 0x383   : > { %5563 = vst.msk [vmem:[%s10693_s28 + $0x6d8] sm:$0xf] %vm5124_vm1, %v5050_v18  ;;  %v4539_v40 = vmax.f32 %v14051_v52, 0.0  ;;  %v10244_v18 = vld [vmem:[%s10615_s13 + $0x388] sm:$0xff] }
 0x384   : > { %7319 = vrot.lane.b32.xlu2 %v5966_v42, %s10519_s27  ;;  %6807 = vrot.lane.b32.xlu1 %v5710_v17, %s10519_s27  ;;  %v4820_v42 = vpack.c.bf16 %v4308_v23, %v4308_v23  ;;  %v4948_v16 = vpack.c.bf16 %v4436_v53, %v4436_v53 }
 0x385   : > { %7321 = vrot.lane.b32.xlu0 %v5967_v22, %s10519_s27  ;;  %v4180_v22 = vmax.f32 %v14033_v37, 0.0  ;;  %v5051_v20 = vpack.c.bf16 %v4539_v40, %v4539_v40 }
 0x386   : > { %v6786_v61 = vpop.permute.xlu2 %6785  ;;  %v7036_v13 = vpop.permute.xlu1 %7035  ;;  %5333 = vst.msk [vmem:[%s10693_s28 + $0x340] sm:$0xf] %vm5124_vm1, %v4820_v42  ;;  %10047 = vmatmul.msk.bf16.gmra.mxu2 %vm2042_vm0, %v10308_v49 }
 0x387   : > { %8259 = vst.msk [vmem:[%s11027_s6 + $0xf8] sm:$0xf] %vm5124_vm1, %v6786_v61  ;;  %v6782_v51 = vpop.permute.xlu0 %6781  ;;  %v4692_v46 = vpack.c.bf16 %v4180_v22, %v4180_v22  ;;  %v3022_v61 = vpop.f32.mrf.mxu0 }
 0x388   : > { %8384 = vst.msk [vmem:[%s11027_s6 + $0x2ec] sm:$0xf] %vm5124_vm1, %v7036_v13  ;;  %v3342_v13 = vpop.f32.mrf.mxu1  ;;  %v3662_v11 = vpop.f32.mrf.mxu2 }
 0x389   : > { %8257 = vst.msk [vmem:[%s11027_s6 + $0xf0] sm:$0xf] %vm5124_vm1, %v6782_v51  ;;  %v14080_v51 = vadd.f32 %v13730_v14, %v3022_v61  ;;  %v14083_v21 = vadd.f32 %v13730_v14, %v3342_v13 }
 0x38a   : > { %5205 = vst.msk [vmem:[%s10693_s28 + $0x140] sm:$0xf] %vm5124_vm1, %v4692_v46 }
 0x38b   : > { %v4181_v15 = vmax.f32 %v14080_v51, 0.0  ;;  %v4309_v54 = vmax.f32 %v14083_v21, 0.0  ;;  %5461 = vst.msk [vmem:[%s10693_s28 + $0x540] sm:$0xf] %vm5124_vm1, %v4948_v16 }
 0x38c   : > { %6809 = vrot.lane.b32.xlu2 %v5711_v44, %s10519_s27  ;;  %7065 = vrot.lane.b32.xlu1 %v5839_v62, %s10519_s27  ;;  %v3920_v44 = vpop.f32.mrf.mxu3  ;;  %v14089_v62 = vadd.f32 %v13730_v14, %v3662_v11  ;;  %5564 = vst.msk [vmem:[%s10693_s28 + $0x6dc] sm:$0xf] %vm5124_vm1, %v5051_v20  ;;  %v5844_v11 = vpack.c.bf16 %v13999_v30, %v13999_v30 }
 0x38d   : > { %6811 = vrot.lane.b32.xlu0 %v5712_v60, %s10519_s27  ;;  %v14092_v45 = vadd.f32 %v13730_v14, %v3920_v44  ;;  %v4693_v34 = vpack.c.bf16 %v4181_v15, %v4181_v15  ;;  %v4821_v47 = vpack.c.bf16 %v4309_v54, %v4309_v54 }
 0x38e   : > { %v7044_v29 = vpop.permute.xlu2 %7043  ;;  %v7294_v32 = vpop.permute.xlu1 %7293  ;;  %v4437_v31 = vmax.f32 %v14089_v62, 0.0 }
 0x38f   : > { %8388 = vst.msk [vmem:[%s11027_s6 + $0x2fc] sm:$0xf] %vm5124_vm1, %v7044_v29  ;;  %v7040_v6 = vpop.permute.xlu0 %7039  ;;  %v4540_v3 = vmax.f32 %v14092_v45, 0.0  ;;  %v3025_v29 = vpop.f32.mrf.mxu0 }
 0x390   : > { %8513 = vst.msk [vmem:[%s11027_s6 + $0x4f0] sm:$0xf] %vm5124_vm1, %v7294_v32  ;;  %v4949_v33 = vpack.c.bf16 %v4437_v31, %v4437_v31  ;;  %v3345_v32 = vpop.f32.mrf.mxu1  ;;  %v14119_v4 = vadd.f32 %v13730_v14, %v3025_v29  ;;  %v3665_v2 = vpop.f32.mrf.mxu2 }
 0x391   : > { %8386 = vst.msk [vmem:[%s11027_s6 + $0x2f4] sm:$0xf] %vm5124_vm1, %v7040_v6  ;;  %v5052_v6 = vpack.c.bf16 %v4540_v3, %v4540_v3  ;;  %v14122_v55 = vadd.f32 %v13730_v14, %v3345_v32  ;;  %v14134_v63 = vadd.f32 %v13730_v14, %v3665_v2  ;;  %v10181_v2 = vld [vmem:[%s10615_s13 + $0x190] sm:$0xff] }
 0x392   : > { %5206 = vst.msk [vmem:[%s10693_s28 + $0x144] sm:$0xf] %vm5124_vm1, %v4693_v34  ;;  %v4182_v35 = vmax.f32 %v14119_v4, 0.0  ;;  %9983 = vmatmul.msk.bf16.gmra.mxu1 %vm2042_vm0, %v10244_v18  ;;  %v5716_v18 = vpack.c.bf16 %v13996_v5, %v13996_v5 }
 0x393   : > { %5334 = vst.msk [vmem:[%s10693_s28 + $0x344] sm:$0xf] %vm5124_vm1, %v4821_v47  ;;  %v4438_v39 = vmax.f32 %v14134_v63, 0.0  ;;  %v5973_v47 = vpack.c.bf16 %v14048_v9, %v14048_v9  ;;  %v5972_v9 = vpack.c.bf16 %v14005_v26, %v14005_v26 }
 0x394   : > { %7067 = vrot.lane.b32.xlu2 %v5840_v8, %s10519_s27  ;;  %7323 = vrot.lane.b32.xlu1 %v5968_v28, %s10519_s27  ;;  %v3922_v36 = vpop.f32.mrf.mxu3  ;;  %v4310_v8 = vmax.f32 %v14122_v55, 0.0  ;;  %5462 = vst.msk [vmem:[%s10693_s28 + $0x544] sm:$0xf] %vm5124_vm1, %v4949_v33  ;;  %v4694_v23 = vpack.c.bf16 %v4182_v35, %v4182_v35 }
 0x395   : > { %7069 = vrot.lane.b32.xlu0 %v5841_v25, %s10519_s27  ;;  %v10180_v25 = vld [vmem:[%s10615_s13 + $0x188] sm:$0xff]  ;;  %v14137_v12 = vadd.f32 %v13730_v14, %v3922_v36  ;;  %5565 = vst.msk [vmem:[%s10693_s28 + $0x6e0] sm:$0xf] %vm5124_vm1, %v5052_v6  ;;  %v4950_v46 = vpack.c.bf16 %v4438_v39, %v4438_v39  ;;  %v10245_v36 = vld [vmem:[%s10615_s13 + $0x390] sm:$0xff] }
 0x396   : > { %v7302_v57 = vpop.permute.xlu2 %7301  ;;  %v6784_v0 = vpop.permute.xlu1 %6783  ;;  %9919 = vmatmul.msk.bf16.gmra.mxu0 %vm2042_vm0, %v10180_v25  ;;  %v4822_v40 = vpack.c.bf16 %v4310_v8, %v4310_v8  ;;  %5207 = vst.msk [vmem:[%s10693_s28 + $0x148] sm:$0xf] %vm5124_vm1, %v4694_v23  ;;  %v10361_v25 = vld [vmem:[%s10615_s13 + $0x730] sm:$0xff]  ;;  %v5717_v23 = vpack.c.bf16 %v14033_v37, %v14033_v37 }
 0x397   : > { %8517 = vst.msk [vmem:[%s11027_s6 + $0x500] sm:$0xf] %vm5124_vm1, %v7302_v57  ;;  %v7298_v17 = vpop.permute.xlu0 %7297  ;;  %v4541_v7 = vmax.f32 %v14137_v12, 0.0  ;;  %v5843_v57 = vpack.c.bf16 %v13958_v48, %v13958_v48  ;;  %10100 = vmatmul.msk.bf16.gmra.mxu3 %vm2042_vm0, %v10361_v25  ;;  %v10362_v25 = vld [vmem:[%s10615_s13 + $0x738] sm:$0xff] }
 0x398   : > { %8258 = vst.msk [vmem:[%s11027_s6 + $0xf4] sm:$0xf] %vm5124_vm1, %v6784_v0  ;;  %v5971_v0 = vpack.c.bf16 %v13970_v41, %v13970_v41  ;;  %v3347_v42 = vpop.f32.mrf.mxu1  ;;  %v3667_v48 = vpop.f32.mrf.mxu2  ;;  %v10309_v41 = vld [vmem:[%s10615_s13 + $0x590] sm:$0xff] }
 0x399   : > { %8515 = vst.msk [vmem:[%s11027_s6 + $0x4f8] sm:$0xf] %vm5124_vm1, %v7298_v17  ;;  %v3027_v17 = vpop.f32.mrf.mxu0  ;;  %v14169_v16 = vadd.f32 %v13730_v14, %v3347_v42  ;;  %v14175_v13 = vadd.f32 %v13730_v14, %v3667_v48  ;;  %10048 = vmatmul.msk.bf16.gmra.mxu2 %vm2042_vm0, %v10309_v41  ;;  %v5718_v41 = vpack.c.bf16 %v14080_v51, %v14080_v51 }
 0x39a   : > { %5335 = vst.msk [vmem:[%s10693_s28 + $0x348] sm:$0xf] %vm5124_vm1, %v4822_v40 }
 0x39b   : > { %v4311_v49 = vmax.f32 %v14169_v16, 0.0  ;;  %5463 = vst.msk [vmem:[%s10693_s28 + $0x548] sm:$0xf] %vm5124_vm1, %v4950_v46 }
 0x39c   : > { %7325 = vrot.lane.b32.xlu2 %v5969_v27, %s10519_s27  ;;  %6813 = vrot.lane.b32.xlu1 %v5713_v38, %s10519_s27  ;;  %v5053_v38 = vpack.c.bf16 %v4541_v7, %v4541_v7  ;;  %v14166_v27 = vadd.f32 %v13730_v14, %v3027_v17  ;;  %v3925_v61 = vpop.f32.mrf.mxu3 }
 0x39d   : > { %7327 = vrot.lane.b32.xlu0 %v5970_v59, %s10519_s27  ;;  %v14178_v20 = vadd.f32 %v13730_v14, %v3925_v61  ;;  %v4439_v59 = vmax.f32 %v14175_v13, 0.0 }
 0x39e   : > { %v6792_v50 = vpop.permute.xlu2 %6791  ;;  %v7042_v60 = vpop.permute.xlu1 %7041  ;;  %v4183_v44 = vmax.f32 %v14166_v27, 0.0  ;;  %5566 = vst.msk [vmem:[%s10693_s28 + $0x6e4] sm:$0xf] %vm5124_vm1, %v5053_v38 }
 0x39f   : > { %8262 = vst.msk [vmem:[%s11027_s6 + $0x104] sm:$0xf] %vm5124_vm1, %v6792_v50  ;;  %v6788_v24 = vpop.permute.xlu0 %6787  ;;  %v4542_v30 = vmax.f32 %v14178_v20, 0.0  ;;  %v4823_v50 = vpack.c.bf16 %v4311_v49, %v4311_v49 }
 0x3a0   : > { %8387 = vst.msk [vmem:[%s11027_s6 + $0x2f8] sm:$0xf] %vm5124_vm1, %v7042_v60  ;;  %v4695_v31 = vpack.c.bf16 %v4183_v44, %v4183_v44  ;;  %v4951_v60 = vpack.c.bf16 %v4439_v59, %v4439_v59 }
 0x3a1   : > { %8260 = vst.msk [vmem:[%s11027_s6 + $0xfc] sm:$0xf] %vm5124_vm1, %v6788_v24  ;;  %v3030_v34 = vpop.f32.mrf.mxu0  ;;  %v3350_v24 = vpop.f32.mrf.mxu1  ;;  %v5054_v33 = vpack.c.bf16 %v4542_v30, %v4542_v30 }
 0x3a2   : > { %v14205_v29 = vadd.f32 %v13730_v14, %v3030_v34  ;;  %v14208_v32 = vadd.f32 %v13730_v14, %v3350_v24  ;;  %5208 = vst.msk [vmem:[%s10693_s28 + $0x14c] sm:$0xf] %vm5124_vm1, %v4695_v31  ;;  %9984 = vmatmul.msk.bf16.gmra.mxu1 %vm2042_vm0, %v10245_v36  ;;  %v5847_v34 = vpack.c.bf16 %v14122_v55, %v14122_v55  ;;  %v10246_v36 = vld [vmem:[%s10615_s13 + $0x398] sm:$0xff] }
 0x3a3   : > { %5336 = vst.msk [vmem:[%s10693_s28 + $0x34c] sm:$0xf] %vm5124_vm1, %v4823_v50  ;;  %v5974_v55 = vpack.c.bf16 %v14089_v62, %v14089_v62 }
 0x3a4   : > { %6815 = vrot.lane.b32.xlu2 %v5714_v10, %s10519_s27  ;;  %7071 = vrot.lane.b32.xlu1 %v5842_v1, %s10519_s27  ;;  %v3927_v6 = vpop.f32.mrf.mxu3  ;;  %v4184_v1 = vmax.f32 %v14205_v29, 0.0  ;;  %v4312_v35 = vmax.f32 %v14208_v32, 0.0  ;;  %5464 = vst.msk [vmem:[%s10693_s28 + $0x54c] sm:$0xf] %vm5124_vm1, %v4951_v60 }
 0x3a5   : > { %6817 = vrot.lane.b32.xlu0 %v5715_v58, %s10519_s27  ;;  %v3670_v58 = vpop.f32.mrf.mxu2  ;;  %v14223_v10 = vadd.f32 %v13730_v14, %v3927_v6  ;;  %5567 = vst.msk [vmem:[%s10693_s28 + $0x6e8] sm:$0xf] %vm5124_vm1, %v5054_v33 }
 0x3a6   : > { %v7050_v28 = vpop.permute.xlu2 %7049  ;;  %v7300_v22 = vpop.permute.xlu1 %7299  ;;  %v14220_v43 = vadd.f32 %v13730_v14, %v3670_v58  ;;  %9920 = vmatmul.msk.bf16.gmra.mxu0 %vm2042_vm0, %v10181_v2  ;;  %v4696_v7 = vpack.c.bf16 %v4184_v1, %v4184_v1  ;;  %v10182_v2 = vld [vmem:[%s10615_s13 + $0x198] sm:$0xff] }
 0x3a7   : > { %8391 = vst.msk [vmem:[%s11027_s6 + $0x308] sm:$0xf] %vm5124_vm1, %v7050_v28  ;;  %v7046_v53 = vpop.permute.xlu0 %7045  ;;  %v4543_v26 = vmax.f32 %v14223_v10, 0.0  ;;  %10101 = vmatmul.msk.bf16.gmra.mxu3 %vm2042_vm0, %v10362_v25  ;;  %v10183_v25 = vld [vmem:[%s10615_s13 + $0x1a0] sm:$0xff] }
 0x3a8   : > { %8516 = vst.msk [vmem:[%s11027_s6 + $0x4fc] sm:$0xf] %vm5124_vm1, %v7300_v22  ;;  %v4440_v5 = vmax.f32 %v14220_v43, 0.0  ;;  %v4824_v22 = vpack.c.bf16 %v4312_v35, %v4312_v35 }
 0x3a9   : > { %8389 = vst.msk [vmem:[%s11027_s6 + $0x300] sm:$0xf] %vm5124_vm1, %v7046_v53  ;;  %v5845_v53 = vpack.c.bf16 %v14036_v56, %v14036_v56  ;;  %v5055_v46 = vpack.c.bf16 %v4543_v26, %v4543_v26  ;;  %v10310_v56 = vld [vmem:[%s10615_s13 + $0x598] sm:$0xff] }
 0x3aa   : > { %v4952_v40 = vpack.c.bf16 %v4440_v5, %v4440_v5  ;;  %5209 = vst.msk [vmem:[%s10693_s28 + $0x150] sm:$0xf] %vm5124_vm1, %v4696_v7  ;;  %10049 = vmatmul.msk.bf16.gmra.mxu2 %vm2042_vm0, %v10310_v56  ;;  %v14349_v56 = vld [vmem:[%s16786_s2] ss:$0 sm:$0xff] }
 0x3ab   : > { %5337 = vst.msk [vmem:[%s10693_s28 + $0x350] sm:$0xf] %vm5124_vm1, %v4824_v22  ;;  %v5719_v22 = vpack.c.bf16 %v14119_v4, %v14119_v4 }
 0x3ac   : > { %7073 = vrot.lane.b32.xlu2 %v5843_v57, %s10519_s27  ;;  %7329 = vrot.lane.b32.xlu1 %v5971_v0, %s10519_s27  ;;  %v3032_v57 = vpop.f32.mrf.mxu0  ;;  %v3352_v0 = vpop.f32.mrf.mxu1  ;;  %5465 = vst.msk [vmem:[%s10693_s28 + $0x550] sm:$0xf] %vm5124_vm1, %v4952_v40 }
 0x3ad   : > { %7075 = vrot.lane.b32.xlu0 %v5844_v11, %s10519_s27  ;;  %v14252_v17 = vadd.f32 %v13730_v14, %v3032_v57  ;;  %v14255_v42 = vadd.f32 %v13730_v14, %v3352_v0  ;;  %v3672_v37 = vpop.f32.mrf.mxu2  ;;  %v3930_v38 = vpop.f32.mrf.mxu3  ;;  %5568 = vst.msk [vmem:[%s10693_s28 + $0x6ec] sm:$0xf] %vm5124_vm1, %v5055_v46 }
 0x3ae   : > { %v7308_v15 = vpop.permute.xlu2 %7307  ;;  %v6790_v54 = vpop.permute.xlu1 %6789  ;;  %v14261_v48 = vadd.f32 %v13730_v14, %v3672_v37  ;;  %v14264_v61 = vadd.f32 %v13730_v14, %v3930_v38 }
 0x3af   : > { %8520 = vst.msk [vmem:[%s11027_s6 + $0x50c] sm:$0xf] %vm5124_vm1, %v7308_v15  ;;  %v7304_v3 = vpop.permute.xlu0 %7303  ;;  %v4185_v11 = vmax.f32 %v14252_v17, 0.0  ;;  %v4313_v44 = vmax.f32 %v14255_v42, 0.0 }
 0x3b0   : > { %8261 = vst.msk [vmem:[%s11027_s6 + $0x100] sm:$0xf] %vm5124_vm1, %v6790_v54  ;;  %v4441_v49 = vmax.f32 %v14261_v48, 0.0  ;;  %v4544_v51 = vmax.f32 %v14264_v61, 0.0 }
 0x3b1   : > { %8518 = vst.msk [vmem:[%s11027_s6 + $0x504] sm:$0xf] %vm5124_vm1, %v7304_v3  ;;  %v4697_v15 = vpack.c.bf16 %v4185_v11, %v4185_v11  ;;  %v4825_v31 = vpack.c.bf16 %v4313_v44, %v4313_v44 }
 0x3b2   : > { %v4953_v3 = vpack.c.bf16 %v4441_v49, %v4441_v49  ;;  %v5056_v24 = vpack.c.bf16 %v4544_v51, %v4544_v51  ;;  %9985 = vmatmul.msk.bf16.gmra.mxu1 %vm2042_vm0, %v10246_v36 }
 0x3b3   : > { %5210 = vst.msk [vmem:[%s10693_s28 + $0x154] sm:$0xf] %vm5124_vm1, %v4697_v15 }
 0x3b4   : > { %7331 = vrot.lane.b32.xlu2 %v5972_v9, %s10519_s27  ;;  %6819 = vrot.lane.b32.xlu1 %v5716_v18, %s10519_s27  ;;  %v3035_v50 = vpop.f32.mrf.mxu0  ;;  %v3355_v60 = vpop.f32.mrf.mxu1  ;;  %v5846_v18 = vpack.c.bf16 %v14083_v21, %v14083_v21  ;;  %5338 = vst.msk [vmem:[%s10693_s28 + $0x354] sm:$0xf] %vm5124_vm1, %v4825_v31 }
 0x3b5   : > { %7333 = vrot.lane.b32.xlu0 %v5973_v47, %s10519_s27  ;;  %v14291_v47 = vadd.f32 %v13730_v14, %v3035_v50  ;;  %v14294_v33 = vadd.f32 %v13730_v14, %v3355_v60  ;;  %v3675_v58 = vpop.f32.mrf.mxu2  ;;  %v3932_v6 = vpop.f32.mrf.mxu3  ;;  %5466 = vst.msk [vmem:[%s10693_s28 + $0x554] sm:$0xf] %vm5124_vm1, %v4953_v3 }
 0x3b6   : > { %v6798_v8 = vpop.permute.xlu2 %6797  ;;  %v7048_v39 = vpop.permute.xlu1 %7047  ;;  %v14306_v9 = vadd.f32 %v13730_v14, %v3675_v58  ;;  %v14309_v1 = vadd.f32 %v13730_v14, %v3932_v6  ;;  %9921 = vmatmul.msk.bf16.gmra.mxu0 %vm2042_vm0, %v10182_v2  ;;  %5569 = vst.msk [vmem:[%s10693_s28 + $0x6f0] sm:$0xf] %vm5124_vm1, %v5056_v24 }
 0x3b7   : > { %8265 = vst.msk [vmem:[%s11027_s6 + $0x110] sm:$0xf] %vm5124_vm1, %v6798_v8  ;;  %v6794_v28 = vpop.permute.xlu0 %6793  ;;  %v4186_v35 = vmax.f32 %v14291_v47, 0.0  ;;  %v4314_v5 = vmax.f32 %v14294_v33, 0.0 }
 0x3b8   : > { %8390 = vst.msk [vmem:[%s11027_s6 + $0x304] sm:$0xf] %vm5124_vm1, %v7048_v39  ;;  %v4442_v21 = vmax.f32 %v14306_v9, 0.0  ;;  %v4545_v62 = vmax.f32 %v14309_v1, 0.0 }
 0x3b9   : > { %8263 = vst.msk [vmem:[%s11027_s6 + $0x108] sm:$0xf] %vm5124_vm1, %v6794_v28  ;;  %v4698_v39 = vpack.c.bf16 %v4186_v35, %v4186_v35  ;;  %v4826_v28 = vpack.c.bf16 %v4314_v5, %v4314_v5  ;;  %v5720_v35 = vpack.c.bf16 %v14166_v27, %v14166_v27 }
 0x3ba   : > { %v5057_v0 = vpack.c.bf16 %v4545_v62, %v4545_v62 }
 0x3bb   : > { %5211 = vst.msk [vmem:[%s10693_s28 + $0x158] sm:$0xf] %vm5124_vm1, %v4698_v39 }
 0x3bc   : > { %6821 = vrot.lane.b32.xlu2 %v5717_v23, %s10519_s27  ;;  %7077 = vrot.lane.b32.xlu1 %v5845_v53, %s10519_s27  ;;  %v5975_v23 = vpack.c.bf16 %v14134_v63, %v14134_v63  ;;  %v4954_v53 = vpack.c.bf16 %v4442_v21, %v4442_v21  ;;  %v3037_v40 = vpop.f32.mrf.mxu0  ;;  %v3357_v57 = vpop.f32.mrf.mxu1  ;;  %v10311_v63 = vld [vmem:[%s10615_s13 + $0x5a0] sm:$0xff]  ;;  %5339 = vst.msk [vmem:[%s10693_s28 + $0x358] sm:$0xf] %vm5124_vm1, %v4826_v28 }
 0x3bd   : > { %6823 = vrot.lane.b32.xlu0 %v5718_v41, %s10519_s27  ;;  %v14338_v46 = vadd.f32 %v13730_v14, %v3037_v40  ;;  %v14341_v37 = vadd.f32 %v13730_v14, %v3357_v57  ;;  %v3677_v4 = vpop.f32.mrf.mxu2  ;;  %v3935_v38 = vpop.f32.mrf.mxu3  ;;  %v5976_v14 = vpack.c.bf16 %v14175_v13, %v14175_v13  ;;  %10050 = vmatmul.msk.bf16.gmra.mxu2 %vm2042_vm0, %v10311_v63 }
 0x3be   : > { %v7056_v59 = vpop.permute.xlu2 %7055  ;;  %v7306_v30 = vpop.permute.xlu1 %7305  ;;  %v14352_v41 = vadd.f32 %v14349_v56, %v3677_v4  ;;  %v14355_v11 = vadd.f32 %v14349_v56, %v3935_v38  ;;  %5467 = vst.msk [vmem:[%s10693_s28 + $0x558] sm:$0xf] %vm5124_vm1, %v4954_v53  ;;  %v5977_v53 = vpack.c.bf16 %v14220_v43, %v14220_v43  ;;  %v10312_v43 = vld [vmem:[%s10615_s13 + $0x5a8] sm:$0xff] }
 0x3bf   : > { %8394 = vst.msk [vmem:[%s11027_s6 + $0x314] sm:$0xf] %vm5124_vm1, %v7056_v59  ;;  %v7052_v54 = vpop.permute.xlu0 %7051  ;;  %v4187_v44 = vmax.f32 %v14338_v46, 0.0  ;;  %v4315_v49 = vmax.f32 %v14341_v37, 0.0 }
 0x3c0   : > { %8519 = vst.msk [vmem:[%s11027_s6 + $0x508] sm:$0xf] %vm5124_vm1, %v7306_v30  ;;  %v4443_v51 = vmax.f32 %v14352_v41, 0.0  ;;  %v4546_v13 = vmax.f32 %v14355_v11, 0.0 }
 0x3c1   : > { %8392 = vst.msk [vmem:[%s11027_s6 + $0x30c] sm:$0xf] %vm5124_vm1, %v7052_v54  ;;  %v4699_v15 = vpack.c.bf16 %v4187_v44, %v4187_v44  ;;  %v4827_v31 = vpack.c.bf16 %v4315_v49, %v4315_v49 }
 0x3c2   : > { %5570 = vst.msk [vmem:[%s10693_s28 + $0x6f4] sm:$0xf] %vm5124_vm1, %v5057_v0  ;;  %v4955_v3 = vpack.c.bf16 %v4443_v51, %v4443_v51  ;;  %v5058_v24 = vpack.c.bf16 %v4546_v13, %v4546_v13  ;;  %v5850_v51 = vpack.c.bf16 %v14255_v42, %v14255_v42 }
 0x3c3   : > { %5212 = vst.msk [vmem:[%s10693_s28 + $0x15c] sm:$0xf] %vm5124_vm1, %v4699_v15 }
 0x3c4   : > { %7079 = vrot.lane.b32.xlu2 %v5846_v18, %s10519_s27  ;;  %7335 = vrot.lane.b32.xlu1 %v5974_v55, %s10519_s27  ;;  %v3040_v50 = vpop.f32.mrf.mxu0  ;;  %v3360_v60 = vpop.f32.mrf.mxu1  ;;  %v10247_v18 = vld [vmem:[%s10615_s13 + $0x3a0] sm:$0xff]  ;;  %5340 = vst.msk [vmem:[%s10693_s28 + $0x35c] sm:$0xf] %vm5124_vm1, %v4827_v31 }
 0x3c5   : > { %7081 = vrot.lane.b32.xlu0 %v5847_v34, %s10519_s27  ;;  %v5721_v34 = vpack.c.bf16 %v14205_v29, %v14205_v29  ;;  %v14382_v58 = vadd.f32 %v14349_v56, %v3040_v50  ;;  %v14385_v6 = vadd.f32 %v14349_v56, %v3360_v60  ;;  %v3680_v2 = vpop.f32.mrf.mxu2  ;;  %v3937_v36 = vpop.f32.mrf.mxu3  ;;  %v10363_v55 = vld [vmem:[%s10615_s13 + $0x740] sm:$0xff]  ;;  %v5848_v29 = vpack.c.bf16 %v14169_v16, %v14169_v16 }
 0x3c6   : > { %v7314_v26 = vpop.permute.xlu2 %7313  ;;  %v6796_v8 = vpop.permute.xlu1 %6795  ;;  %v14397_v5 = vadd.f32 %v14349_v56, %v3680_v2  ;;  %v14400_v21 = vadd.f32 %v14349_v56, %v3937_v36  ;;  %9922 = vmatmul.msk.bf16.gmra.mxu0 %vm2042_vm0, %v10183_v25  ;;  %9986 = vmatmul.msk.bf16.gmra.mxu1 %vm2042_vm0, %v10247_v18  ;;  %5468 = vst.msk [vmem:[%s10693_s28 + $0x55c] sm:$0xf] %vm5124_vm1, %v4955_v3 }
 0x3c7   : > { %8523 = vst.msk [vmem:[%s11027_s6 + $0x518] sm:$0xf] %vm5124_vm1, %v7314_v26  ;;  %v7310_v7 = vpop.permute.xlu0 %7309  ;;  %v4188_v62 = vmax.f32 %v14382_v58, 0.0  ;;  %v4316_v26 = vmax.f32 %v14385_v6, 0.0  ;;  %10102 = vmatmul.msk.bf16.gmra.mxu3 %vm2042_vm0, %v10363_v55  ;;  %v5979_v2 = vpack.c.bf16 %v14306_v9, %v14306_v9  ;;  %v5978_v9 = vpack.c.bf16 %v14261_v48, %v14261_v48 }
 0x3c8   : > { %8264 = vst.msk [vmem:[%s11027_s6 + $0x10c] sm:$0xf] %vm5124_vm1, %v6796_v8  ;;  %v4444_v27 = vmax.f32 %v14397_v5, 0.0  ;;  %v4547_v16 = vmax.f32 %v14400_v21, 0.0 }
 0x3c9   : > { %8521 = vst.msk [vmem:[%s11027_s6 + $0x510] sm:$0xf] %vm5124_vm1, %v7310_v7  ;;  %v4700_v7 = vpack.c.bf16 %v4188_v62, %v4188_v62  ;;  %v10248_v62 = vld [vmem:[%s10615_s13 + $0x3a8] sm:$0xff] }
 0x3ca   : > { %5571 = vst.msk [vmem:[%s10693_s28 + $0x6f8] sm:$0xf] %vm5124_vm1, %v5058_v24  ;;  %v4956_v40 = vpack.c.bf16 %v4444_v27, %v4444_v27  ;;  %v5059_v4 = vpack.c.bf16 %v4547_v16, %v4547_v16  ;;  %v5722_v27 = vpack.c.bf16 %v14252_v17, %v14252_v17 }
 0x3cb   : > { %5213 = vst.msk [vmem:[%s10693_s28 + $0x160] sm:$0xf] %vm5124_vm1, %v4700_v7 }
 0x3cc   : > { %7337 = vrot.lane.b32.xlu2 %v5975_v23, %s10519_s27  ;;  %6825 = vrot.lane.b32.xlu1 %v5719_v22, %s10519_s27  ;;  %v4828_v22 = vpack.c.bf16 %v4316_v26, %v4316_v26  ;;  %v5849_v23 = vpack.c.bf16 %v14208_v32, %v14208_v32  ;;  %v3042_v57 = vpop.f32.mrf.mxu0  ;;  %v3362_v0 = vpop.f32.mrf.mxu1  ;;  %5469 = vst.msk [vmem:[%s10693_s28 + $0x560] sm:$0xf] %vm5124_vm1, %v4956_v40  ;;  %v10364_v26 = vld [vmem:[%s10615_s13 + $0x748] sm:$0xff] }
 0x3cd   : > { %7339 = vrot.lane.b32.xlu0 %v5976_v14, %s10519_s27  ;;  %v14429_v38 = vadd.f32 %v14349_v56, %v3042_v57  ;;  %v14432_v63 = vadd.f32 %v14349_v56, %v3362_v0  ;;  %v3682_v32 = vpop.f32.mrf.mxu2  ;;  %v3940_v14 = vpop.f32.mrf.mxu3  ;;  %10051 = vmatmul.msk.bf16.gmra.mxu2 %vm2042_vm0, %v10312_v43  ;;  %5572 = vst.msk [vmem:[%s10693_s28 + $0x6fc] sm:$0xf] %vm5124_vm1, %v5059_v4 }
 0x3ce   : > { %v6804_v59 = vpop.permute.xlu2 %6803  ;;  %v7054_v30 = vpop.permute.xlu1 %7053  ;;  %v14438_v44 = vadd.f32 %v14349_v56, %v3682_v32  ;;  %v14441_v49 = vadd.f32 %v14349_v56, %v3940_v14  ;;  %5341 = vst.msk [vmem:[%s10693_s28 + $0x360] sm:$0xf] %vm5124_vm1, %v4828_v22  ;;  %v5723_v57 = vpack.c.bf16 %v14291_v47, %v14291_v47  ;;  %v5851_v0 = vpack.c.bf16 %v14294_v33, %v14294_v33  ;;  %v10313_v33 = vld [vmem:[%s10615_s13 + $0x5b0] sm:$0xff] }
 0x3cf   : > { %8268 = vst.msk [vmem:[%s11027_s6 + $0x11c] sm:$0xf] %vm5124_vm1, %v6804_v59  ;;  %v6800_v54 = vpop.permute.xlu0 %6799  ;;  %v4189_v13 = vmax.f32 %v14429_v38, 0.0  ;;  %v4317_v59 = vmax.f32 %v14432_v63, 0.0 }
 0x3d0   : > { %8393 = vst.msk [vmem:[%s11027_s6 + $0x310] sm:$0xf] %vm5124_vm1, %v7054_v30  ;;  %v4445_v30 = vmax.f32 %v14438_v44, 0.0  ;;  %v4548_v42 = vmax.f32 %v14441_v49, 0.0 }
 0x3d1   : > { %8266 = vst.msk [vmem:[%s11027_s6 + $0x114] sm:$0xf] %vm5124_vm1, %v6800_v54  ;;  %v4701_v31 = vpack.c.bf16 %v4189_v13, %v4189_v13  ;;  %v4829_v50 = vpack.c.bf16 %v4317_v59, %v4317_v59 }
 0x3d2   : > { %v4957_v60 = vpack.c.bf16 %v4445_v30, %v4445_v30  ;;  %v5060_v36 = vpack.c.bf16 %v4548_v42, %v4548_v42 }
 0x3d3   : > { %5214 = vst.msk [vmem:[%s10693_s28 + $0x164] sm:$0xf] %vm5124_vm1, %v4701_v31 }
 0x3d4   : > { %6827 = vrot.lane.b32.xlu2 %v5720_v35, %s10519_s27  ;;  %7083 = vrot.lane.b32.xlu1 %v5848_v29, %s10519_s27  ;;  %v3365_v24 = vpop.f32.mrf.mxu1  ;;  %v10184_v29 = vld [vmem:[%s10615_s13 + $0x1a8] sm:$0xff]  ;;  %5342 = vst.msk [vmem:[%s10693_s28 + $0x364] sm:$0xf] %vm5124_vm1, %v4829_v50 }
 0x3d5   : > { %6829 = vrot.lane.b32.xlu0 %v5721_v34, %s10519_s27  ;;  %v3045_v34 = vpop.f32.mrf.mxu0  ;;  %v14471_v18 = vadd.f32 %v14349_v56, %v3365_v24  ;;  %v3685_v55 = vpop.f32.mrf.mxu2  ;;  %5470 = vst.msk [vmem:[%s10693_s28 + $0x564] sm:$0xf] %vm5124_vm1, %v4957_v60 }
 0x3d6   : > { %v7062_v8 = vpop.permute.xlu2 %7061  ;;  %v7312_v39 = vpop.permute.xlu1 %7311  ;;  %v14468_v25 = vadd.f32 %v14349_v56, %v3045_v34  ;;  %v14483_v16 = vadd.f32 %v14349_v56, %v3685_v55  ;;  %9923 = vmatmul.msk.bf16.gmra.mxu0 %vm2042_vm0, %v10184_v29  ;;  %9987 = vmatmul.msk.bf16.gmra.mxu1 %vm2042_vm0, %v10248_v62  ;;  %5573 = vst.msk [vmem:[%s10693_s28 + $0x700] sm:$0xf] %vm5124_vm1, %v5060_v36 }
 0x3d7   : > { %8397 = vst.msk [vmem:[%s11027_s6 + $0x320] sm:$0xf] %vm5124_vm1, %v7062_v8  ;;  %v7058_v28 = vpop.permute.xlu0 %7057  ;;  %v3942_v35 = vpop.f32.mrf.mxu3  ;;  %v4318_v7 = vmax.f32 %v14471_v18, 0.0  ;;  %10103 = vmatmul.msk.bf16.gmra.mxu3 %vm2042_vm0, %v10364_v26  ;;  %v5853_v29 = vpack.c.bf16 %v14385_v6, %v14385_v6  ;;  %v5980_v6 = vpack.c.bf16 %v14352_v41, %v14352_v41 }
 0x3d8   : > { %8522 = vst.msk [vmem:[%s11027_s6 + $0x514] sm:$0xf] %vm5124_vm1, %v7312_v39  ;;  %v14486_v8 = vadd.f32 %v14349_v56, %v3942_v35  ;;  %v4190_v39 = vmax.f32 %v14468_v25, 0.0  ;;  %v4446_v17 = vmax.f32 %v14483_v16, 0.0 }
 0x3d9   : > { %8395 = vst.msk [vmem:[%s11027_s6 + $0x318] sm:$0xf] %vm5124_vm1, %v7058_v28  ;;  %v4830_v40 = vpack.c.bf16 %v4318_v7, %v4318_v7  ;;  %v10185_v7 = vld [vmem:[%s10615_s13 + $0x1b0] sm:$0xff] }
 0x3da   : > { %v4549_v48 = vmax.f32 %v14486_v8, 0.0  ;;  %v4958_v4 = vpack.c.bf16 %v4446_v17, %v4446_v17  ;;  %v10249_v17 = vld [vmem:[%s10615_s13 + $0x3b0] sm:$0xff] }
 0x3db   : > { %5343 = vst.msk [vmem:[%s10693_s28 + $0x368] sm:$0xf] %vm5124_vm1, %v4830_v40 }
 0x3dc   : > { %7085 = vrot.lane.b32.xlu2 %v5849_v23, %s10519_s27  ;;  %7341 = vrot.lane.b32.xlu1 %v5977_v53, %s10519_s27  ;;  %v4702_v23 = vpack.c.bf16 %v4190_v39, %v4190_v39  ;;  %v3367_v14 = vpop.f32.mrf.mxu1  ;;  %v5061_v43 = vpack.c.bf16 %v4549_v48, %v4549_v48  ;;  %5471 = vst.msk [vmem:[%s10693_s28 + $0x568] sm:$0xf] %vm5124_vm1, %v4958_v4  ;;  %v10365_v48 = vld [vmem:[%s10615_s13 + $0x750] sm:$0xff] }
 0x3dd   : > { %7087 = vrot.lane.b32.xlu0 %v5850_v51, %s10519_s27  ;;  %v3047_v32 = vpop.f32.mrf.mxu0  ;;  %v14518_v13 = vadd.f32 %v14349_v56, %v3367_v14  ;;  %v3687_v47 = vpop.f32.mrf.mxu2  ;;  %10052 = vmatmul.msk.bf16.gmra.mxu2 %vm2042_vm0, %v10313_v33 }
 0x3de   : > { %v7320_v15 = vpop.permute.xlu2 %7319  ;;  %v6802_v54 = vpop.permute.xlu1 %6801  ;;  %v14515_v51 = vadd.f32 %v14349_v56, %v3047_v32  ;;  %5215 = vst.msk [vmem:[%s10693_s28 + $0x168] sm:$0xf] %vm5124_vm1, %v4702_v23  ;;  %v14524_v30 = vadd.f32 %v14349_v56, %v3687_v47  ;;  %v5981_v47 = vpack.c.bf16 %v14397_v5, %v14397_v5  ;;  %v10314_v5 = vld [vmem:[%s10615_s13 + $0x5b8] sm:$0xff] }
 0x3df   : > { %8526 = vst.msk [vmem:[%s11027_s6 + $0x524] sm:$0xf] %vm5124_vm1, %v7320_v15  ;;  %v7316_v3 = vpop.permute.xlu0 %7315  ;;  %v3945_v59 = vpop.f32.mrf.mxu3  ;;  %v5724_v15 = vpack.c.bf16 %v14338_v46, %v14338_v46  ;;  %v4319_v31 = vmax.f32 %v14518_v13, 0.0 }
 0x3e0   : > { %8267 = vst.msk [vmem:[%s11027_s6 + $0x118] sm:$0xf] %vm5124_vm1, %v6802_v54  ;;  %v14527_v42 = vadd.f32 %v14349_v56, %v3945_v59  ;;  %v4191_v54 = vmax.f32 %v14515_v51, 0.0 }
 0x3e1   : > { %8524 = vst.msk [vmem:[%s11027_s6 + $0x51c] sm:$0xf] %vm5124_vm1, %v7316_v3  ;;  %v4447_v3 = vmax.f32 %v14524_v30, 0.0 }
 0x3e2   : > { %5574 = vst.msk [vmem:[%s10693_s28 + $0x704] sm:$0xf] %vm5124_vm1, %v5061_v43  ;;  %v4550_v46 = vmax.f32 %v14527_v42, 0.0  ;;  %v4703_v34 = vpack.c.bf16 %v4191_v54, %v4191_v54  ;;  %v5725_v43 = vpack.c.bf16 %v14382_v58, %v14382_v58 }
 0x3e3   : > { %v4959_v36 = vpack.c.bf16 %v4447_v3, %v4447_v3 }
 0x3e4   : > { %7343 = vrot.lane.b32.xlu2 %v5978_v9, %s10519_s27  ;;  %6831 = vrot.lane.b32.xlu1 %v5722_v27, %s10519_s27  ;;  %v3370_v35 = vpop.f32.mrf.mxu1  ;;  %v5062_v62 = vpack.c.bf16 %v4550_v46, %v4550_v46  ;;  %5216 = vst.msk [vmem:[%s10693_s28 + $0x16c] sm:$0xf] %vm5124_vm1, %v4703_v34  ;;  %v5982_v34 = vpack.c.bf16 %v14438_v44, %v14438_v44 }
 0x3e5   : > { %7345 = vrot.lane.b32.xlu0 %v5979_v2, %s10519_s27  ;;  %v4831_v2 = vpack.c.bf16 %v4319_v31, %v4319_v31  ;;  %v3050_v55 = vpop.f32.mrf.mxu0  ;;  %v14557_v27 = vadd.f32 %v14349_v56, %v3370_v35  ;;  %v3690_v9 = vpop.f32.mrf.mxu2  ;;  %5472 = vst.msk [vmem:[%s10693_s28 + $0x56c] sm:$0xf] %vm5124_vm1, %v4959_v36 }
 0x3e6   : > { %v6810_v28 = vpop.permute.xlu2 %6809  ;;  %v7060_v22 = vpop.permute.xlu1 %7059  ;;  %v14554_v26 = vadd.f32 %v14349_v56, %v3050_v55  ;;  %9924 = vmatmul.msk.bf16.gmra.mxu0 %vm2042_vm0, %v10185_v7  ;;  %9988 = vmatmul.msk.bf16.gmra.mxu1 %vm2042_vm0, %v10249_v17  ;;  %5575 = vst.msk [vmem:[%s10693_s28 + $0x708] sm:$0xf] %vm5124_vm1, %v5062_v62 }
 0x3e7   : > { %8271 = vst.msk [vmem:[%s11027_s6 + $0x128] sm:$0xf] %vm5124_vm1, %v6810_v28  ;;  %v6806_v53 = vpop.permute.xlu0 %6805  ;;  %v3947_v39 = vpop.f32.mrf.mxu3  ;;  %v5852_v28 = vpack.c.bf16 %v14341_v37, %v14341_v37  ;;  %v4320_v40 = vmax.f32 %v14557_v27, 0.0  ;;  %10104 = vmatmul.msk.bf16.gmra.mxu3 %vm2042_vm0, %v10365_v48  ;;  %v5727_v48 = vpack.c.bf16 %v14468_v25, %v14468_v25  ;;  %v5854_v25 = vpack.c.bf16 %v14432_v63, %v14432_v63 }
 0x3e8   : > { %8396 = vst.msk [vmem:[%s11027_s6 + $0x31c] sm:$0xf] %vm5124_vm1, %v7060_v22  ;;  %v14569_v22 = vadd.f32 %v14349_v56, %v3690_v9  ;;  %v14572_v23 = vadd.f32 %v14349_v56, %v3947_v39 }
 0x3e9   : > { %8269 = vst.msk [vmem:[%s11027_s6 + $0x120] sm:$0xf] %vm5124_vm1, %v6806_v53  ;;  %v4192_v53 = vmax.f32 %v14554_v26, 0.0  ;;  %v4832_v14 = vpack.c.bf16 %v4320_v40, %v4320_v40 }
 0x3ea   : > { %5344 = vst.msk [vmem:[%s10693_s28 + $0x36c] sm:$0xf] %vm5124_vm1, %v4831_v2  ;;  %v4448_v37 = vmax.f32 %v14569_v22, 0.0  ;;  %v4551_v41 = vmax.f32 %v14572_v23, 0.0 }
 0x3eb   : > { %v4704_v4 = vpack.c.bf16 %v4192_v53, %v4192_v53  ;;  %5345 = vst.msk [vmem:[%s10693_s28 + $0x370] sm:$0xf] %vm5124_vm1, %v4832_v14 }
 0x3ec   : > { %6833 = vrot.lane.b32.xlu2 %v5723_v57, %s10519_s27  ;;  %7089 = vrot.lane.b32.xlu1 %v5851_v0, %s10519_s27  ;;  %v4960_v59 = vpack.c.bf16 %v4448_v37, %v4448_v37  ;;  %v5063_v54 = vpack.c.bf16 %v4551_v41, %v4551_v41  ;;  %v10186_v41 = vld [vmem:[%s10615_s13 + $0x1b8] sm:$0xff] }
 0x3ed   : > { %6835 = vrot.lane.b32.xlu0 %v5724_v15, %s10519_s27  ;;  %v3052_v33 = vpop.f32.mrf.mxu0  ;;  %v3372_v15 = vpop.f32.mrf.mxu1  ;;  %5217 = vst.msk [vmem:[%s10693_s28 + $0x170] sm:$0xf] %vm5124_vm1, %v4704_v4  ;;  %10053 = vmatmul.msk.bf16.gmra.mxu2 %vm2042_vm0, %v10314_v5  ;;  %v5726_v4 = vpack.c.bf16 %v14429_v38, %v14429_v38  ;;  %v5983_v5 = vpack.c.bf16 %v14483_v16, %v14483_v16  ;;  %v10315_v16 = vld [vmem:[%s10615_s13 + $0x5c0] sm:$0xff] }
 0x3ee   : > { %v7068_v50 = vpop.permute.xlu2 %7067  ;;  %v7318_v60 = vpop.permute.xlu1 %7317  ;;  %v14601_v31 = vadd.f32 %v14349_v56, %v3052_v33  ;;  %v14604_v3 = vadd.f32 %v14349_v56, %v3372_v15  ;;  %5473 = vst.msk [vmem:[%s10693_s28 + $0x570] sm:$0xf] %vm5124_vm1, %v4960_v59 }
 0x3ef   : > { %8400 = vst.msk [vmem:[%s11027_s6 + $0x32c] sm:$0xf] %vm5124_vm1, %v7068_v50  ;;  %v7064_v24 = vpop.permute.xlu0 %7063  ;;  %v3692_v58 = vpop.f32.mrf.mxu2 }
 0x3f0   : > { %8525 = vst.msk [vmem:[%s11027_s6 + $0x520] sm:$0xf] %vm5124_vm1, %v7318_v60  ;;  %v3950_v46 = vpop.f32.mrf.mxu3  ;;  %v14610_v50 = vadd.f32 %v14349_v56, %v3692_v58  ;;  %v4321_v2 = vmax.f32 %v14604_v3, 0.0 }
 0x3f1   : > { %8398 = vst.msk [vmem:[%s11027_s6 + $0x324] sm:$0xf] %vm5124_vm1, %v7064_v24  ;;  %v14613_v60 = vadd.f32 %v14349_v56, %v3950_v46  ;;  %v4193_v24 = vmax.f32 %v14601_v31, 0.0  ;;  %v5855_v46 = vpack.c.bf16 %v14471_v18, %v14471_v18 }
 0x3f2   : > { %v4449_v36 = vmax.f32 %v14610_v50, 0.0  ;;  %5576 = vst.msk [vmem:[%s10693_s28 + $0x70c] sm:$0xf] %vm5124_vm1, %v5063_v54  ;;  %v4833_v9 = vpack.c.bf16 %v4321_v2, %v4321_v2 }
 0x3f3   : > { %v4552_v44 = vmax.f32 %v14613_v60, 0.0 }
 0x3f4   : > { %7091 = vrot.lane.b32.xlu2 %v5852_v28, %s10519_s27  ;;  %7347 = vrot.lane.b32.xlu1 %v5980_v6, %s10519_s27  ;;  %v4961_v39 = vpack.c.bf16 %v4449_v36, %v4449_v36  ;;  %5346 = vst.msk [vmem:[%s10693_s28 + $0x374] sm:$0xf] %vm5124_vm1, %v4833_v9  ;;  %v5856_v9 = vpack.c.bf16 %v14518_v13, %v14518_v13 }
 0x3f5   : > { %7093 = vrot.lane.b32.xlu0 %v5853_v29, %s10519_s27  ;;  %v4705_v29 = vpack.c.bf16 %v4193_v24, %v4193_v24  ;;  %v3055_v7 = vpop.f32.mrf.mxu0  ;;  %v3375_v17 = vpop.f32.mrf.mxu1  ;;  %v5064_v28 = vpack.c.bf16 %v4552_v44, %v4552_v44 }
 0x3f6   : > { %v7326_v57 = vpop.permute.xlu2 %7325  ;;  %v6808_v0 = vpop.permute.xlu1 %6807  ;;  %v14640_v6 = vadd.f32 %v14349_v56, %v3055_v7  ;;  %v14643_v53 = vadd.f32 %v14349_v56, %v3375_v17  ;;  %9925 = vmatmul.msk.bf16.gmra.mxu0 %vm2042_vm0, %v10186_v41  ;;  %5474 = vst.msk [vmem:[%s10693_s28 + $0x574] sm:$0xf] %vm5124_vm1, %v4961_v39 }
 0x3f7   : > { %8529 = vst.msk [vmem:[%s11027_s6 + $0x530] sm:$0xf] %vm5124_vm1, %v7326_v57  ;;  %v7322_v32 = vpop.permute.xlu0 %7321  ;;  %v3695_v40 = vpop.f32.mrf.mxu2  ;;  %v10250_v57 = vld [vmem:[%s10615_s13 + $0x3b8] sm:$0xff] }
 0x3f8   : > { %8270 = vst.msk [vmem:[%s11027_s6 + $0x124] sm:$0xf] %vm5124_vm1, %v6808_v0  ;;  %v3952_v37 = vpop.f32.mrf.mxu3  ;;  %v10366_v0 = vld [vmem:[%s10615_s13 + $0x758] sm:$0xff]  ;;  %9989 = vmatmul.msk.bf16.gmra.mxu1 %vm2042_vm0, %v10250_v57 }
 0x3f9   : > { %8527 = vst.msk [vmem:[%s11027_s6 + $0x528] sm:$0xf] %vm5124_vm1, %v7322_v32  ;;  %v14655_v32 = vadd.f32 %v14349_v56, %v3695_v40  ;;  %v14658_v14 = vadd.f32 %v14349_v56, %v3952_v37  ;;  %10105 = vmatmul.msk.bf16.gmra.mxu3 %vm2042_vm0, %v10366_v0 }
 0x3fa   : > { %5218 = vst.msk [vmem:[%s10693_s28 + $0x174] sm:$0xf] %vm5124_vm1, %v4705_v29 }
 0x3fb   : > { %v4450_v38 = vmax.f32 %v14655_v32, 0.0  ;;  %5577 = vst.msk [vmem:[%s10693_s28 + $0x710] sm:$0xf] %vm5124_vm1, %v5064_v28  ;;  %v4553_v63 = vmax.f32 %v14658_v14, 0.0 }
 0x3fc   : > { %7349 = vrot.lane.b32.xlu2 %v5981_v47, %s10519_s27  ;;  %6837 = vrot.lane.b32.xlu1 %v5725_v43, %s10519_s27  ;;  %v4194_v43 = vmax.f32 %v14640_v6, 0.0  ;;  %v4322_v47 = vmax.f32 %v14643_v53, 0.0 }
 0x3fd   : > { %7351 = vrot.lane.b32.xlu0 %v5982_v34, %s10519_s27  ;;  %v4962_v34 = vpack.c.bf16 %v4450_v38, %v4450_v38  ;;  %v3057_v24 = vpop.f32.mrf.mxu0  ;;  %v3377_v2 = vpop.f32.mrf.mxu1  ;;  %v5065_v36 = vpack.c.bf16 %v4553_v63, %v4553_v63  ;;  %10054 = vmatmul.msk.bf16.gmra.mxu2 %vm2042_vm0, %v10315_v16 }
 0x3fe   : > { %v6816_v55 = vpop.permute.xlu2 %6815  ;;  %v7066_v35 = vpop.permute.xlu1 %7065  ;;  %v4706_v15 = vpack.c.bf16 %v4194_v43, %v4194_v43  ;;  %v4834_v58 = vpack.c.bf16 %v4322_v47, %v4322_v47  ;;  %v14687_v44 = vadd.f32 %v14349_v56, %v3057_v24 }
 0x3ff   : > { %8274 = vst.msk [vmem:[%s11027_s6 + $0x134] sm:$0xf] %vm5124_vm1, %v6816_v55  ;;  %v6812_v62 = vpop.permute.xlu0 %6811  ;;  %v14690_v55 = vadd.f32 %v14349_v56, %v3377_v2  ;;  %v3697_v18 = vpop.f32.mrf.mxu2 }
 0x400   : > { %8399 = vst.msk [vmem:[%s11027_s6 + $0x328] sm:$0xf] %vm5124_vm1, %v7066_v35  ;;  %v3955_v35 = vpop.f32.mrf.mxu3  ;;  %v14696_v29 = vadd.f32 %v14349_v56, %v3697_v18  ;;  %v4195_v39 = vmax.f32 %v14687_v44, 0.0 }
 0x401   : > { %8272 = vst.msk [vmem:[%s11027_s6 + $0x12c] sm:$0xf] %vm5124_vm1, %v6812_v62  ;;  %v14699_v62 = vadd.f32 %v14349_v56, %v3955_v35  ;;  %v4323_v7 = vmax.f32 %v14690_v55, 0.0 }
 0x402   : > { %5219 = vst.msk [vmem:[%s10693_s28 + $0x178] sm:$0xf] %vm5124_vm1, %v4706_v15  ;;  %v4451_v17 = vmax.f32 %v14696_v29, 0.0  ;;  %v4707_v40 = vpack.c.bf16 %v4195_v39, %v4195_v39  ;;  %v10251_v15 = vld [vmem:[%s10615_s13 + $0x3c0] sm:$0xff]  ;;  %v5857_v39 = vpack.c.bf16 %v14557_v27, %v14557_v27  ;;  %v10316_v27 = vld [vmem:[%s10615_s13 + $0x5c8] sm:$0xff] }
 0x403   : > { %5347 = vst.msk [vmem:[%s10693_s28 + $0x378] sm:$0xf] %vm5124_vm1, %v4834_v58  ;;  %v4554_v13 = vmax.f32 %v14699_v62, 0.0  ;;  %v4835_v41 = vpack.c.bf16 %v4323_v7, %v4323_v7  ;;  %v5728_v58 = vpack.c.bf16 %v14515_v51, %v14515_v51 }
 0x404   : > { %6839 = vrot.lane.b32.xlu2 %v5726_v4, %s10519_s27  ;;  %7095 = vrot.lane.b32.xlu1 %v5854_v25, %s10519_s27  ;;  %5475 = vst.msk [vmem:[%s10693_s28 + $0x578] sm:$0xf] %vm5124_vm1, %v4962_v34  ;;  %v4963_v57 = vpack.c.bf16 %v4451_v17, %v4451_v17  ;;  %v5985_v25 = vpack.c.bf16 %v14569_v22, %v14569_v22 }
 0x405   : > { %6841 = vrot.lane.b32.xlu0 %v5727_v48, %s10519_s27  ;;  %5578 = vst.msk [vmem:[%s10693_s28 + $0x714] sm:$0xf] %vm5124_vm1, %v5065_v36  ;;  %v3060_v0 = vpop.f32.mrf.mxu0  ;;  %v3380_v4 = vpop.f32.mrf.mxu1  ;;  %v5066_v43 = vpack.c.bf16 %v4554_v13, %v4554_v13  ;;  %v5984_v22 = vpack.c.bf16 %v14524_v30, %v14524_v30 }
 0x406   : > { %v7074_v59 = vpop.permute.xlu2 %7073  ;;  %v7324_v33 = vpop.permute.xlu1 %7323  ;;  %v14726_v47 = vadd.f32 %v14349_v56, %v3060_v0  ;;  %v14729_v38 = vadd.f32 %v14349_v56, %v3380_v4  ;;  %5220 = vst.msk [vmem:[%s10693_s28 + $0x17c] sm:$0xf] %vm5124_vm1, %v4707_v40  ;;  %v5730_v0 = vpack.c.bf16 %v14601_v31, %v14601_v31 }
 0x407   : > { %8403 = vst.msk [vmem:[%s11027_s6 + $0x338] sm:$0xf] %vm5124_vm1, %v7074_v59  ;;  %v7070_v54 = vpop.permute.xlu0 %7069  ;;  %v3700_v63 = vpop.f32.mrf.mxu2 }
 0x408   : > { %8528 = vst.msk [vmem:[%s11027_s6 + $0x52c] sm:$0xf] %vm5124_vm1, %v7324_v33  ;;  %v3957_v59 = vpop.f32.mrf.mxu3  ;;  %v10187_v33 = vld [vmem:[%s10615_s13 + $0x1c0] sm:$0xff]  ;;  %v4196_v34 = vmax.f32 %v14726_v47, 0.0  ;;  %v4324_v24 = vmax.f32 %v14729_v38, 0.0  ;;  %9990 = vmatmul.msk.bf16.gmra.mxu1 %vm2042_vm0, %v10251_v15 }
 0x409   : > { %8401 = vst.msk [vmem:[%s11027_s6 + $0x330] sm:$0xf] %vm5124_vm1, %v7070_v54  ;;  %v10367_v54 = vld [vmem:[%s10615_s13 + $0x760] sm:$0xff]  ;;  %9926 = vmatmul.msk.bf16.gmra.mxu0 %vm2042_vm0, %v10187_v33 }
 0x40a   : > { %5348 = vst.msk [vmem:[%s10693_s28 + $0x37c] sm:$0xf] %vm5124_vm1, %v4835_v41  ;;  %10106 = vmatmul.msk.bf16.gmra.mxu3 %vm2042_vm0, %v10367_v54  ;;  %v4708_v18 = vpack.c.bf16 %v4196_v34, %v4196_v34  ;;  %v4836_v16 = vpack.c.bf16 %v4324_v24, %v4324_v24  ;;  %v5859_v24 = vpack.c.bf16 %v14643_v53, %v14643_v53 }
 0x40b   : > { %5476 = vst.msk [vmem:[%s10693_s28 + $0x57c] sm:$0xf] %vm5124_vm1, %v4963_v57  ;;  %v5986_v53 = vpack.c.bf16 %v14610_v50, %v14610_v50 }
 0x40c   : > { %7097 = vrot.lane.b32.xlu2 %v5855_v46, %s10519_s27  ;;  %7353 = vrot.lane.b32.xlu1 %v5983_v5, %s10519_s27  ;;  %v14741_v46 = vadd.f32 %v14349_v56, %v3700_v63  ;;  %v14744_v5 = vadd.f32 %v14349_v56, %v3957_v59  ;;  %5579 = vst.msk [vmem:[%s10693_s28 + $0x718] sm:$0xf] %vm5124_vm1, %v5066_v43 }
 0x40d   : > { %7099 = vrot.lane.b32.xlu0 %v5856_v9, %s10519_s27  ;;  %v5729_v9 = vpack.c.bf16 %v14554_v26, %v14554_v26  ;;  %v3062_v17 = vpop.f32.mrf.mxu0  ;;  %v3382_v13 = vpop.f32.mrf.mxu1  ;;  %5221 = vst.msk [vmem:[%s10693_s28 + $0x180] sm:$0xf] %vm5124_vm1, %v4708_v18  ;;  %10055 = vmatmul.msk.bf16.gmra.mxu2 %vm2042_vm0, %v10316_v27 }
 0x40e   : > { %v7332_v48 = vpop.permute.xlu2 %7331  ;;  %v6814_v28 = vpop.permute.xlu1 %6813  ;;  %v4452_v51 = vmax.f32 %v14741_v46, 0.0  ;;  %v4555_v30 = vmax.f32 %v14744_v5, 0.0  ;;  %v14776_v40 = vadd.f32 %v14349_v56, %v3382_v13  ;;  %5349 = vst.msk [vmem:[%s10693_s28 + $0x380] sm:$0xf] %vm5124_vm1, %v4836_v16  ;;  %v10252_v16 = vld [vmem:[%s10615_s13 + $0x3c8] sm:$0xff] }
 0x40f   : > { %8532 = vst.msk [vmem:[%s11027_s6 + $0x53c] sm:$0xf] %vm5124_vm1, %v7332_v48  ;;  %v7328_v37 = vpop.permute.xlu0 %7327  ;;  %v3702_v26 = vpop.f32.mrf.mxu2 }
 0x410   : > { %8273 = vst.msk [vmem:[%s11027_s6 + $0x130] sm:$0xf] %vm5124_vm1, %v6814_v28  ;;  %v4964_v7 = vpack.c.bf16 %v4452_v51, %v4452_v51  ;;  %v5067_v48 = vpack.c.bf16 %v4555_v30, %v4555_v30  ;;  %v14773_v28 = vadd.f32 %v14349_v56, %v3062_v17  ;;  %v14782_v41 = vadd.f32 %v14349_v56, %v3702_v26 }
 0x411   : > { %8530 = vst.msk [vmem:[%s11027_s6 + $0x534] sm:$0xf] %vm5124_vm1, %v7328_v37  ;;  %v3960_v37 = vpop.f32.mrf.mxu3 }
 0x412   : > { %v14785_v57 = vadd.f32 %v14349_v56, %v3960_v37  ;;  %v4197_v4 = vmax.f32 %v14773_v28, 0.0  ;;  %5477 = vst.msk [vmem:[%s10693_s28 + $0x580] sm:$0xf] %vm5124_vm1, %v4964_v7  ;;  %v4453_v43 = vmax.f32 %v14782_v41, 0.0 }
 0x413   : > { %5580 = vst.msk [vmem:[%s10693_s28 + $0x71c] sm:$0xf] %vm5124_vm1, %v5067_v48 }
 0x414   : > { %7355 = vrot.lane.b32.xlu2 %v5984_v22, %s10519_s27  ;;  %6843 = vrot.lane.b32.xlu1 %v5728_v58, %s10519_s27  ;;  %v4556_v31 = vmax.f32 %v14785_v57, 0.0  ;;  %v4709_v33 = vpack.c.bf16 %v4197_v4, %v4197_v4  ;;  %v4965_v58 = vpack.c.bf16 %v4453_v43, %v4453_v43  ;;  %v5987_v43 = vpack.c.bf16 %v14655_v32, %v14655_v32  ;;  %v10317_v32 = vld [vmem:[%s10615_s13 + $0x5d0] sm:$0xff] }
 0x415   : > { %7357 = vrot.lane.b32.xlu0 %v5985_v25, %s10519_s27  ;;  %v4325_v25 = vmax.f32 %v14776_v40, 0.0  ;;  %v3065_v22 = vpop.f32.mrf.mxu0  ;;  %v3385_v34 = vpop.f32.mrf.mxu1 }
 0x416   : > { %v6822_v2 = vpop.permute.xlu2 %6821  ;;  %v7072_v36 = vpop.permute.xlu1 %7071  ;;  %v5068_v51 = vpack.c.bf16 %v4556_v31, %v4556_v31  ;;  %v14812_v30 = vadd.f32 %v14349_v56, %v3065_v22  ;;  %5222 = vst.msk [vmem:[%s10693_s28 + $0x184] sm:$0xf] %vm5124_vm1, %v4709_v33 }
 0x417   : > { %8277 = vst.msk [vmem:[%s11027_s6 + $0x140] sm:$0xf] %vm5124_vm1, %v6822_v2  ;;  %v6818_v35 = vpop.permute.xlu0 %6817  ;;  %v4837_v54 = vpack.c.bf16 %v4325_v25, %v4325_v25  ;;  %v14815_v2 = vadd.f32 %v14349_v56, %v3385_v34  ;;  %v5731_v25 = vpack.c.bf16 %v14640_v6, %v14640_v6 }
 0x418   : > { %8402 = vst.msk [vmem:[%s11027_s6 + $0x334] sm:$0xf] %vm5124_vm1, %v7072_v36  ;;  %v3705_v36 = vpop.f32.mrf.mxu2  ;;  %v4198_v13 = vmax.f32 %v14812_v30, 0.0  ;;  %9991 = vmatmul.msk.bf16.gmra.mxu1 %vm2042_vm0, %v10252_v16 }
 0x419   : > { %8275 = vst.msk [vmem:[%s11027_s6 + $0x138] sm:$0xf] %vm5124_vm1, %v6818_v35  ;;  %v3962_v18 = vpop.f32.mrf.mxu3  ;;  %v10188_v35 = vld [vmem:[%s10615_s13 + $0x1c8] sm:$0xff]  ;;  %v14827_v7 = vadd.f32 %v14349_v56, %v3705_v36  ;;  %v4326_v48 = vmax.f32 %v14815_v2, 0.0 }
 0x41a   : > { %v14830_v17 = vadd.f32 %v14349_v56, %v3962_v18  ;;  %5350 = vst.msk [vmem:[%s10693_s28 + $0x384] sm:$0xf] %vm5124_vm1, %v4837_v54  ;;  %9927 = vmatmul.msk.bf16.gmra.mxu0 %vm2042_vm0, %v10188_v35  ;;  %v4710_v27 = vpack.c.bf16 %v4198_v13, %v4198_v13 }
 0x41b   : > { %5478 = vst.msk [vmem:[%s10693_s28 + $0x584] sm:$0xf] %vm5124_vm1, %v4965_v58  ;;  %v4838_v4 = vpack.c.bf16 %v4326_v48, %v4326_v48 }
 0x41c   : > { %6845 = vrot.lane.b32.xlu2 %v5729_v9, %s10519_s27  ;;  %7101 = vrot.lane.b32.xlu1 %v5857_v39, %s10519_s27  ;;  %v10368_v9 = vld [vmem:[%s10615_s13 + $0x768] sm:$0xff]  ;;  %v5858_v39 = vpack.c.bf16 %v14604_v3, %v14604_v3  ;;  %v4454_v3 = vmax.f32 %v14827_v7, 0.0  ;;  %5581 = vst.msk [vmem:[%s10693_s28 + $0x720] sm:$0xf] %vm5124_vm1, %v5068_v51  ;;  %v4557_v50 = vmax.f32 %v14830_v17, 0.0 }
 0x41d   : > { %6847 = vrot.lane.b32.xlu0 %v5730_v0, %s10519_s27  ;;  %10107 = vmatmul.msk.bf16.gmra.mxu3 %vm2042_vm0, %v10368_v9  ;;  %5223 = vst.msk [vmem:[%s10693_s28 + $0x188] sm:$0xf] %vm5124_vm1, %v4710_v27 }
 0x41e   : > { %v7080_v63 = vpop.permute.xlu2 %7079  ;;  %v7330_v59 = vpop.permute.xlu1 %7329  ;;  %v4966_v31 = vpack.c.bf16 %v4454_v3, %v4454_v3  ;;  %v5069_v33 = vpack.c.bf16 %v4557_v50, %v4557_v50  ;;  %5351 = vst.msk [vmem:[%s10693_s28 + $0x388] sm:$0xf] %vm5124_vm1, %v4838_v4  ;;  %10056 = vmatmul.msk.bf16.gmra.mxu2 %vm2042_vm0, %v10317_v32  ;;  %v5733_v50 = vpack.c.bf16 %v14726_v47, %v14726_v47 }
 0x41f   : > { %8406 = vst.msk [vmem:[%s11027_s6 + $0x344] sm:$0xf] %vm5124_vm1, %v7080_v63  ;;  %v7076_v15 = vpop.permute.xlu0 %7075  ;;  %v3067_v63 = vpop.f32.mrf.mxu0  ;;  %v5860_v47 = vpack.c.bf16 %v14690_v55, %v14690_v55 }
 0x420   : > { %8531 = vst.msk [vmem:[%s11027_s6 + $0x538] sm:$0xf] %vm5124_vm1, %v7330_v59  ;;  %v3387_v59 = vpop.f32.mrf.mxu1  ;;  %v3707_v6 = vpop.f32.mrf.mxu2 }
 0x421   : > { %8404 = vst.msk [vmem:[%s11027_s6 + $0x33c] sm:$0xf] %vm5124_vm1, %v7076_v15  ;;  %v14859_v15 = vadd.f32 %v14349_v56, %v3067_v63  ;;  %v14862_v54 = vadd.f32 %v14349_v56, %v3387_v59  ;;  %v3965_v58 = vpop.f32.mrf.mxu3  ;;  %v14868_v22 = vadd.f32 %v14349_v56, %v3707_v6  ;;  %v5732_v63 = vpack.c.bf16 %v14687_v44, %v14687_v44 }
 0x422   : > { %v14871_v34 = vadd.f32 %v14349_v56, %v3965_v58  ;;  %5479 = vst.msk [vmem:[%s10693_s28 + $0x588] sm:$0xf] %vm5124_vm1, %v4966_v31  ;;  %v10369_v31 = vld [vmem:[%s10615_s13 + $0x770] sm:$0xff] }
 0x423   : > { %v4199_v51 = vmax.f32 %v14859_v15, 0.0  ;;  %v4327_v36 = vmax.f32 %v14862_v54, 0.0  ;;  %v4455_v18 = vmax.f32 %v14868_v22, 0.0  ;;  %5582 = vst.msk [vmem:[%s10693_s28 + $0x724] sm:$0xf] %vm5124_vm1, %v5069_v33 }
 0x424   : > { %7103 = vrot.lane.b32.xlu2 %v5858_v39, %s10519_s27  ;;  %7359 = vrot.lane.b32.xlu1 %v5986_v53, %s10519_s27 }
 0x425   : > { %7105 = vrot.lane.b32.xlu0 %v5859_v24, %s10519_s27  ;;  %v5988_v24 = vpack.c.bf16 %v14696_v29, %v14696_v29  ;;  %v4558_v29 = vmax.f32 %v14871_v34, 0.0  ;;  %v4711_v9 = vpack.c.bf16 %v4199_v51, %v4199_v51  ;;  %v4839_v53 = vpack.c.bf16 %v4327_v36, %v4327_v36 }
 0x426   : > { %v7338_v26 = vpop.permute.xlu2 %7337  ;;  %v6820_v37 = vpop.permute.xlu1 %6819  ;;  %v4967_v13 = vpack.c.bf16 %v4455_v18, %v4455_v18 }
 0x427   : > { %8535 = vst.msk [vmem:[%s11027_s6 + $0x548] sm:$0xf] %vm5124_vm1, %v7338_v26  ;;  %v7334_v0 = vpop.permute.xlu0 %7333  ;;  %v3070_v48 = vpop.f32.mrf.mxu0  ;;  %v5070_v26 = vpack.c.bf16 %v4558_v29, %v4558_v29  ;;  %v5861_v29 = vpack.c.bf16 %v14729_v38, %v14729_v38 }
 0x428   : > { %8276 = vst.msk [vmem:[%s11027_s6 + $0x13c] sm:$0xf] %vm5124_vm1, %v6820_v37  ;;  %v3390_v3 = vpop.f32.mrf.mxu1  ;;  %v14898_v37 = vadd.f32 %v14349_v56, %v3070_v48 }
 0x429   : > { %8533 = vst.msk [vmem:[%s11027_s6 + $0x540] sm:$0xf] %vm5124_vm1, %v7334_v0  ;;  %v14901_v27 = vadd.f32 %v14349_v56, %v3390_v3  ;;  %v3710_v0 = vpop.f32.mrf.mxu2  ;;  %v3967_v4 = vpop.f32.mrf.mxu3 }
 0x42a   : > { %5224 = vst.msk [vmem:[%s10693_s28 + $0x18c] sm:$0xf] %vm5124_vm1, %v4711_v9  ;;  %v14913_v59 = vadd.f32 %v14349_v56, %v3710_v0  ;;  %v14916_v33 = vadd.f32 %v14349_v56, %v3967_v4  ;;  %v4200_v6 = vmax.f32 %v14898_v37, 0.0  ;;  %v5862_v0 = vpack.c.bf16 %v14776_v40, %v14776_v40 }
 0x42b   : > { %5352 = vst.msk [vmem:[%s10693_s28 + $0x38c] sm:$0xf] %vm5124_vm1, %v4839_v53  ;;  %v4328_v58 = vmax.f32 %v14901_v27, 0.0 }
 0x42c   : > { %7361 = vrot.lane.b32.xlu2 %v5987_v43, %s10519_s27  ;;  %6849 = vrot.lane.b32.xlu1 %v5731_v25, %s10519_s27  ;;  %v10189_v25 = vld [vmem:[%s10615_s13 + $0x1d0] sm:$0xff]  ;;  %5480 = vst.msk [vmem:[%s10693_s28 + $0x58c] sm:$0xf] %vm5124_vm1, %v4967_v13  ;;  %v4456_v44 = vmax.f32 %v14913_v59, 0.0  ;;  %v4559_v55 = vmax.f32 %v14916_v33, 0.0  ;;  %v4712_v51 = vpack.c.bf16 %v4200_v6, %v4200_v6 }
 0x42d   : > { %7363 = vrot.lane.b32.xlu0 %v5988_v24, %s10519_s27  ;;  %v10253_v43 = vld [vmem:[%s10615_s13 + $0x3d0] sm:$0xff]  ;;  %9928 = vmatmul.msk.bf16.gmra.mxu0 %vm2042_vm0, %v10189_v25  ;;  %5583 = vst.msk [vmem:[%s10693_s28 + $0x728] sm:$0xf] %vm5124_vm1, %v5070_v26  ;;  %v4840_v18 = vpack.c.bf16 %v4328_v58, %v4328_v58 }
 0x42e   : > { %v6828_v35 = vpop.permute.xlu2 %6827  ;;  %v7078_v16 = vpop.permute.xlu1 %7077  ;;  %9992 = vmatmul.msk.bf16.gmra.mxu1 %vm2042_vm0, %v10253_v43  ;;  %10108 = vmatmul.msk.bf16.gmra.mxu3 %vm2042_vm0, %v10369_v31  ;;  %v5071_v53 = vpack.c.bf16 %v4559_v55, %v4559_v55  ;;  %5225 = vst.msk [vmem:[%s10693_s28 + $0x190] sm:$0xf] %vm5124_vm1, %v4712_v51  ;;  %v14986_v51 = vld [vmem:[%s16786_s2] ss:$0 sm:$0xff] }
 0x42f   : > { %8280 = vst.msk [vmem:[%s11027_s6 + $0x14c] sm:$0xf] %vm5124_vm1, %v6828_v35  ;;  %v6824_v39 = vpop.permute.xlu0 %6823  ;;  %v5989_v35 = vpack.c.bf16 %v14741_v46, %v14741_v46  ;;  %v3072_v9 = vpop.f32.mrf.mxu0  ;;  %v10318_v46 = vld [vmem:[%s10615_s13 + $0x5d8] sm:$0xff] }
 0x430   : > { %8405 = vst.msk [vmem:[%s11027_s6 + $0x340] sm:$0xf] %vm5124_vm1, %v7078_v16  ;;  %v4968_v16 = vpack.c.bf16 %v4456_v44, %v4456_v44  ;;  %v14945_v13 = vadd.f32 %v14349_v56, %v3072_v9  ;;  %10057 = vmatmul.msk.bf16.gmra.mxu2 %vm2042_vm0, %v10318_v46  ;;  %v10370_v9 = vld [vmem:[%s10615_s13 + $0x778] sm:$0xff] }
 0x431   : > { %8278 = vst.msk [vmem:[%s11027_s6 + $0x144] sm:$0xf] %vm5124_vm1, %v6824_v39  ;;  %v3392_v39 = vpop.f32.mrf.mxu1  ;;  %v3712_v38 = vpop.f32.mrf.mxu2 }
 0x432   : > { %v14948_v48 = vadd.f32 %v14349_v56, %v3392_v39  ;;  %v3970_v3 = vpop.f32.mrf.mxu3  ;;  %5353 = vst.msk [vmem:[%s10693_s28 + $0x390] sm:$0xf] %vm5124_vm1, %v4840_v18  ;;  %v4201_v4 = vmax.f32 %v14945_v13, 0.0  ;;  %v5734_v39 = vpack.c.bf16 %v14773_v28, %v14773_v28 }
 0x433   : > { %v14957_v26 = vadd.f32 %v14349_v56, %v3970_v3  ;;  %5481 = vst.msk [vmem:[%s10693_s28 + $0x590] sm:$0xf] %vm5124_vm1, %v4968_v16  ;;  %v10190_v16 = vld [vmem:[%s10615_s13 + $0x1d8] sm:$0xff] }
 0x434   : > { %6851 = vrot.lane.b32.xlu2 %v5732_v63, %s10519_s27  ;;  %7107 = vrot.lane.b32.xlu1 %v5860_v47, %s10519_s27  ;;  %v4329_v25 = vmax.f32 %v14948_v48, 0.0  ;;  %5584 = vst.msk [vmem:[%s10693_s28 + $0x72c] sm:$0xf] %vm5124_vm1, %v5071_v53  ;;  %v4713_v63 = vpack.c.bf16 %v4201_v4, %v4201_v4  ;;  %v5990_v53 = vpack.c.bf16 %v14782_v41, %v14782_v41 }
 0x435   : > { %6853 = vrot.lane.b32.xlu0 %v5733_v50, %s10519_s27  ;;  %v14954_v50 = vadd.f32 %v14349_v56, %v3712_v38  ;;  %v4560_v40 = vmax.f32 %v14957_v26, 0.0 }
 0x436   : > { %v7086_v32 = vpop.permute.xlu2 %7085  ;;  %v7336_v24 = vpop.permute.xlu1 %7335  ;;  %v4841_v6 = vpack.c.bf16 %v4329_v25, %v4329_v25  ;;  %5226 = vst.msk [vmem:[%s10693_s28 + $0x194] sm:$0xf] %vm5124_vm1, %v4713_v63  ;;  %v5863_v63 = vpack.c.bf16 %v14815_v2, %v14815_v2  ;;  %v10319_v2 = vld [vmem:[%s10615_s13 + $0x5e0] sm:$0xff] }
 0x437   : > { %8409 = vst.msk [vmem:[%s11027_s6 + $0x350] sm:$0xf] %vm5124_vm1, %v7086_v32  ;;  %v7082_v36 = vpop.permute.xlu0 %7081  ;;  %v4457_v56 = vmax.f32 %v14954_v50, 0.0  ;;  %v3075_v44 = vpop.f32.mrf.mxu0  ;;  %v5991_v32 = vpack.c.bf16 %v14827_v7, %v14827_v7  ;;  %v10254_v7 = vld [vmem:[%s10615_s13 + $0x3d8] sm:$0xff] }
 0x438   : > { %8534 = vst.msk [vmem:[%s11027_s6 + $0x544] sm:$0xf] %vm5124_vm1, %v7336_v24  ;;  %v5072_v24 = vpack.c.bf16 %v4560_v40, %v4560_v40 }
 0x439   : > { %8407 = vst.msk [vmem:[%s11027_s6 + $0x348] sm:$0xf] %vm5124_vm1, %v7082_v36  ;;  %v4969_v58 = vpack.c.bf16 %v4457_v56, %v4457_v56  ;;  %v3395_v55 = vpop.f32.mrf.mxu1  ;;  %v14989_v36 = vadd.f32 %v14986_v51, %v3075_v44 }
 0x43a   : > { %v14992_v18 = vadd.f32 %v14986_v51, %v3395_v55  ;;  %5354 = vst.msk [vmem:[%s10693_s28 + $0x394] sm:$0xf] %vm5124_vm1, %v4841_v6 }
 0x43b   : > { %v4202_v46 = vmax.f32 %v14989_v36, 0.0  ;;  %5482 = vst.msk [vmem:[%s10693_s28 + $0x594] sm:$0xf] %vm5124_vm1, %v4969_v58 }
 0x43c   : > { %7109 = vrot.lane.b32.xlu2 %v5861_v29, %s10519_s27  ;;  %7365 = vrot.lane.b32.xlu1 %v5989_v35, %s10519_s27  ;;  %v3715_v29 = vpop.f32.mrf.mxu2  ;;  %v3972_v35 = vpop.f32.mrf.mxu3  ;;  %5585 = vst.msk [vmem:[%s10693_s28 + $0x730] sm:$0xf] %vm5124_vm1, %v5072_v24 }
 0x43d   : > { %7111 = vrot.lane.b32.xlu0 %v5862_v0, %s10519_s27  ;;  %v15004_v38 = vadd.f32 %v14986_v51, %v3715_v29  ;;  %v15007_v3 = vadd.f32 %v14986_v51, %v3972_v35  ;;  %v4330_v0 = vmax.f32 %v14992_v18, 0.0  ;;  %9929 = vmatmul.msk.bf16.gmra.mxu0 %vm2042_vm0, %v10190_v16  ;;  %v4714_v56 = vpack.c.bf16 %v4202_v46, %v4202_v46 }
 0x43e   : > { %v7344_v43 = vpop.permute.xlu2 %7343  ;;  %v6826_v31 = vpop.permute.xlu1 %6825  ;;  %9993 = vmatmul.msk.bf16.gmra.mxu1 %vm2042_vm0, %v10254_v7  ;;  %10109 = vmatmul.msk.bf16.gmra.mxu3 %vm2042_vm0, %v10370_v9  ;;  %v5736_v16 = vpack.c.bf16 %v14859_v15, %v14859_v15 }
 0x43f   : > { %8538 = vst.msk [vmem:[%s11027_s6 + $0x554] sm:$0xf] %vm5124_vm1, %v7344_v43  ;;  %v7340_v47 = vpop.permute.xlu0 %7339  ;;  %v4458_v28 = vmax.f32 %v15004_v38, 0.0  ;;  %v4561_v41 = vmax.f32 %v15007_v3, 0.0  ;;  %v4842_v43 = vpack.c.bf16 %v4330_v0, %v4330_v0  ;;  %v3077_v6 = vpop.f32.mrf.mxu0 }
 0x440   : > { %8279 = vst.msk [vmem:[%s11027_s6 + $0x148] sm:$0xf] %vm5124_vm1, %v6826_v31  ;;  %v5735_v31 = vpack.c.bf16 %v14812_v30, %v14812_v30  ;;  %v15036_v55 = vadd.f32 %v14986_v51, %v3077_v6  ;;  %10058 = vmatmul.msk.bf16.gmra.mxu2 %vm2042_vm0, %v10319_v2 }
 0x441   : > { %8536 = vst.msk [vmem:[%s11027_s6 + $0x54c] sm:$0xf] %vm5124_vm1, %v7340_v47  ;;  %v4970_v47 = vpack.c.bf16 %v4458_v28, %v4458_v28  ;;  %v3397_v58 = vpop.f32.mrf.mxu1  ;;  %v5073_v44 = vpack.c.bf16 %v4561_v41, %v4561_v41 }
 0x442   : > { %5227 = vst.msk [vmem:[%s10693_s28 + $0x198] sm:$0xf] %vm5124_vm1, %v4714_v56  ;;  %v4203_v7 = vmax.f32 %v15036_v55, 0.0 }
 0x443   : > { %5355 = vst.msk [vmem:[%s10693_s28 + $0x398] sm:$0xf] %vm5124_vm1, %v4842_v43 }
 0x444   : > { %7367 = vrot.lane.b32.xlu2 %v5990_v53, %s10519_s27  ;;  %6855 = vrot.lane.b32.xlu1 %v5734_v39, %s10519_s27  ;;  %v3717_v30 = vpop.f32.mrf.mxu2  ;;  %v3975_v24 = vpop.f32.mrf.mxu3  ;;  %5483 = vst.msk [vmem:[%s10693_s28 + $0x598] sm:$0xf] %vm5124_vm1, %v4970_v47  ;;  %v4715_v0 = vpack.c.bf16 %v4203_v7, %v4203_v7 }
 0x445   : > { %7369 = vrot.lane.b32.xlu0 %v5991_v32, %s10519_s27  ;;  %v15039_v32 = vadd.f32 %v14986_v51, %v3397_v58  ;;  %v15045_v29 = vadd.f32 %v14986_v51, %v3717_v30  ;;  %v15048_v35 = vadd.f32 %v14986_v51, %v3975_v24  ;;  %5586 = vst.msk [vmem:[%s10693_s28 + $0x734] sm:$0xf] %vm5124_vm1, %v5073_v44  ;;  %v10191_v58 = vld [vmem:[%s10615_s13 + $0x1e0] sm:$0xff] }
 0x446   : > { %v6834_v4 = vpop.permute.xlu2 %6833  ;;  %v7084_v25 = vpop.permute.xlu1 %7083  ;;  %v10255_v44 = vld [vmem:[%s10615_s13 + $0x3e0] sm:$0xff]  ;;  %v5864_v24 = vpack.c.bf16 %v14862_v54, %v14862_v54  ;;  %5228 = vst.msk [vmem:[%s10693_s28 + $0x19c] sm:$0xf] %vm5124_vm1, %v4715_v0 }
 0x447   : > { %8283 = vst.msk [vmem:[%s11027_s6 + $0x158] sm:$0xf] %vm5124_vm1, %v6834_v4  ;;  %v6830_v40 = vpop.permute.xlu0 %6829  ;;  %v4331_v9 = vmax.f32 %v15039_v32, 0.0  ;;  %v4459_v39 = vmax.f32 %v15045_v29, 0.0  ;;  %v4562_v15 = vmax.f32 %v15048_v35, 0.0  ;;  %v10371_v30 = vld [vmem:[%s10615_s13 + $0x780] sm:$0xff] }
 0x448   : > { %8408 = vst.msk [vmem:[%s11027_s6 + $0x34c] sm:$0xf] %vm5124_vm1, %v7084_v25  ;;  %v3080_v25 = vpop.f32.mrf.mxu0 }
 0x449   : > { %8281 = vst.msk [vmem:[%s11027_s6 + $0x150] sm:$0xf] %vm5124_vm1, %v6830_v40  ;;  %v4843_v41 = vpack.c.bf16 %v4331_v9, %v4331_v9  ;;  %v4971_v4 = vpack.c.bf16 %v4459_v39, %v4459_v39  ;;  %v3400_v56 = vpop.f32.mrf.mxu1  ;;  %v5865_v40 = vpack.c.bf16 %v14901_v27, %v14901_v27  ;;  %v5074_v43 = vpack.c.bf16 %v4562_v15, %v4562_v15 }
 0x44a   : > { %v5992_v27 = vpack.c.bf16 %v14868_v22, %v14868_v22 }
 0x44b   : > { %5356 = vst.msk [vmem:[%s10693_s28 + $0x39c] sm:$0xf] %vm5124_vm1, %v4843_v41  ;;  %v5993_v41 = vpack.c.bf16 %v14913_v59, %v14913_v59  ;;  %v10320_v59 = vld [vmem:[%s10615_s13 + $0x5e8] sm:$0xff] }
 0x44c   : > { %6857 = vrot.lane.b32.xlu2 %v5735_v31, %s10519_s27  ;;  %7113 = vrot.lane.b32.xlu1 %v5863_v63, %s10519_s27  ;;  %v15075_v31 = vadd.f32 %v14986_v51, %v3080_v25  ;;  %v15078_v63 = vadd.f32 %v14986_v51, %v3400_v56  ;;  %v3720_v47 = vpop.f32.mrf.mxu2  ;;  %v3977_v6 = vpop.f32.mrf.mxu3  ;;  %5484 = vst.msk [vmem:[%s10693_s28 + $0x59c] sm:$0xf] %vm5124_vm1, %v4971_v4 }
 0x44d   : > { %6859 = vrot.lane.b32.xlu0 %v5736_v16, %s10519_s27  ;;  %v15090_v2 = vadd.f32 %v14986_v51, %v3720_v47  ;;  %v15093_v16 = vadd.f32 %v14986_v51, %v3977_v6  ;;  %9930 = vmatmul.msk.bf16.gmra.mxu0 %vm2042_vm0, %v10191_v58  ;;  %5587 = vst.msk [vmem:[%s10693_s28 + $0x738] sm:$0xf] %vm5124_vm1, %v5074_v43 }
 0x44e   : > { %v7092_v53 = vpop.permute.xlu2 %7091  ;;  %v7342_v46 = vpop.permute.xlu1 %7341  ;;  %v4204_v7 = vmax.f32 %v15075_v31, 0.0  ;;  %v4332_v9 = vmax.f32 %v15078_v63, 0.0  ;;  %9994 = vmatmul.msk.bf16.gmra.mxu1 %vm2042_vm0, %v10255_v44  ;;  %10110 = vmatmul.msk.bf16.gmra.mxu3 %vm2042_vm0, %v10371_v30  ;;  %v5994_v30 = vpack.c.bf16 %v14954_v50, %v14954_v50 }
 0x44f   : > { %8412 = vst.msk [vmem:[%s11027_s6 + $0x35c] sm:$0xf] %vm5124_vm1, %v7092_v53  ;;  %v7088_v28 = vpop.permute.xlu0 %7087  ;;  %v4460_v54 = vmax.f32 %v15090_v2, 0.0  ;;  %v4563_v22 = vmax.f32 %v15093_v16, 0.0 }
 0x450   : > { %8537 = vst.msk [vmem:[%s11027_s6 + $0x550] sm:$0xf] %vm5124_vm1, %v7342_v46  ;;  %v4716_v53 = vpack.c.bf16 %v4204_v7, %v4204_v7  ;;  %v4844_v0 = vpack.c.bf16 %v4332_v9, %v4332_v9  ;;  %v3082_v25 = vpop.f32.mrf.mxu0  ;;  %10059 = vmatmul.msk.bf16.gmra.mxu2 %vm2042_vm0, %v10320_v59  ;;  %v10372_v59 = vld [vmem:[%s10615_s13 + $0x788] sm:$0xff] }
 0x451   : > { %8410 = vst.msk [vmem:[%s11027_s6 + $0x354] sm:$0xf] %vm5124_vm1, %v7088_v28  ;;  %v5737_v28 = vpack.c.bf16 %v14898_v37, %v14898_v37  ;;  %v4972_v4 = vpack.c.bf16 %v4460_v54, %v4460_v54  ;;  %v3402_v56 = vpop.f32.mrf.mxu1  ;;  %v15122_v43 = vadd.f32 %v14986_v51, %v3082_v25 }
 0x452   : > { %v15125_v47 = vadd.f32 %v14986_v51, %v3402_v56  ;;  %5229 = vst.msk [vmem:[%s10693_s28 + $0x1a0] sm:$0xf] %vm5124_vm1, %v4716_v53 }
 0x453   : > { %5357 = vst.msk [vmem:[%s10693_s28 + $0x3a0] sm:$0xf] %vm5124_vm1, %v4844_v0 }
 0x454   : > { %7115 = vrot.lane.b32.xlu2 %v5864_v24, %s10519_s27  ;;  %7371 = vrot.lane.b32.xlu1 %v5992_v27, %s10519_s27  ;;  %v3722_v37 = vpop.f32.mrf.mxu2  ;;  %v3980_v6 = vpop.f32.mrf.mxu3  ;;  %v4205_v24 = vmax.f32 %v15122_v43, 0.0  ;;  %v4333_v27 = vmax.f32 %v15125_v47, 0.0  ;;  %5485 = vst.msk [vmem:[%s10693_s28 + $0x5a0] sm:$0xf] %vm5124_vm1, %v4972_v4 }
 0x455   : > { %7117 = vrot.lane.b32.xlu0 %v5865_v40, %s10519_s27  ;;  %v5075_v40 = vpack.c.bf16 %v4563_v22, %v4563_v22  ;;  %v15131_v58 = vadd.f32 %v14986_v51, %v3722_v37  ;;  %v15134_v44 = vadd.f32 %v14986_v51, %v3980_v6  ;;  %v10192_v37 = vld [vmem:[%s10615_s13 + $0x1e8] sm:$0xff] }
 0x456   : > { %v7350_v39 = vpop.permute.xlu2 %7349  ;;  %v6832_v15 = vpop.permute.xlu1 %6831  ;;  %v4717_v22 = vpack.c.bf16 %v4205_v24, %v4205_v24  ;;  %v10256_v6 = vld [vmem:[%s10615_s13 + $0x3e8] sm:$0xff] }
 0x457   : > { %8541 = vst.msk [vmem:[%s11027_s6 + $0x560] sm:$0xf] %vm5124_vm1, %v7350_v39  ;;  %v7346_v46 = vpop.permute.xlu0 %7345  ;;  %v4461_v7 = vmax.f32 %v15131_v58, 0.0  ;;  %v4564_v50 = vmax.f32 %v15134_v44, 0.0 }
 0x458   : > { %8282 = vst.msk [vmem:[%s11027_s6 + $0x154] sm:$0xf] %vm5124_vm1, %v6832_v15  ;;  %v4845_v15 = vpack.c.bf16 %v4333_v27, %v4333_v27 }
 0x459   : > { %8539 = vst.msk [vmem:[%s11027_s6 + $0x558] sm:$0xf] %vm5124_vm1, %v7346_v46  ;;  %v4973_v53 = vpack.c.bf16 %v4461_v7, %v4461_v7  ;;  %v3085_v46 = vpop.f32.mrf.mxu0  ;;  %v3405_v0 = vpop.f32.mrf.mxu1 }
 0x45a   : > { %5588 = vst.msk [vmem:[%s10693_s28 + $0x73c] sm:$0xf] %vm5124_vm1, %v5075_v40  ;;  %v15161_v4 = vadd.f32 %v14986_v51, %v3085_v46  ;;  %v15164_v25 = vadd.f32 %v14986_v51, %v3405_v0  ;;  %v5995_v46 = vpack.c.bf16 %v15004_v38, %v15004_v38  ;;  %v10321_v38 = vld [vmem:[%s10615_s13 + $0x5f0] sm:$0xff] }
 0x45b   : > { %5230 = vst.msk [vmem:[%s10693_s28 + $0x1a4] sm:$0xf] %vm5124_vm1, %v4717_v22 }
 0x45c   : > { %7373 = vrot.lane.b32.xlu2 %v5993_v41, %s10519_s27  ;;  %6861 = vrot.lane.b32.xlu1 %v5737_v28, %s10519_s27  ;;  %v5739_v28 = vpack.c.bf16 %v14989_v36, %v14989_v36  ;;  %v5076_v41 = vpack.c.bf16 %v4564_v50, %v4564_v50  ;;  %v3725_v56 = vpop.f32.mrf.mxu2  ;;  %v3982_v40 = vpop.f32.mrf.mxu3  ;;  %v5866_v36 = vpack.c.bf16 %v14948_v48, %v14948_v48  ;;  %v4206_v7 = vmax.f32 %v15161_v4, 0.0 }
 0x45d   : > { %7375 = vrot.lane.b32.xlu0 %v5994_v30, %s10519_s27  ;;  %v5738_v30 = vpack.c.bf16 %v14945_v13, %v14945_v13  ;;  %v15176_v24 = vadd.f32 %v14986_v51, %v3725_v56  ;;  %v15179_v27 = vadd.f32 %v14986_v51, %v3982_v40  ;;  %5358 = vst.msk [vmem:[%s10693_s28 + $0x3a4] sm:$0xf] %vm5124_vm1, %v4845_v15  ;;  %v4334_v50 = vmax.f32 %v15164_v25, 0.0 }
 0x45e   : > { %v6840_v9 = vpop.permute.xlu2 %6839  ;;  %v7090_v54 = vpop.permute.xlu1 %7089  ;;  %9931 = vmatmul.msk.bf16.gmra.mxu0 %vm2042_vm0, %v10192_v37  ;;  %9995 = vmatmul.msk.bf16.gmra.mxu1 %vm2042_vm0, %v10256_v6  ;;  %5486 = vst.msk [vmem:[%s10693_s28 + $0x5a4] sm:$0xf] %vm5124_vm1, %v4973_v53  ;;  %v4718_v22 = vpack.c.bf16 %v4206_v7, %v4206_v7  ;;  %v5867_v53 = vpack.c.bf16 %v14992_v18, %v14992_v18 }
 0x45f   : > { %8286 = vst.msk [vmem:[%s11027_s6 + $0x164] sm:$0xf] %vm5124_vm1, %v6840_v9  ;;  %v6836_v39 = vpop.permute.xlu0 %6835  ;;  %v4462_v13 = vmax.f32 %v15176_v24, 0.0  ;;  %v4565_v48 = vmax.f32 %v15179_v27, 0.0  ;;  %10111 = vmatmul.msk.bf16.gmra.mxu3 %vm2042_vm0, %v10372_v59  ;;  %v4846_v15 = vpack.c.bf16 %v4334_v50, %v4334_v50 }
 0x460   : > { %8411 = vst.msk [vmem:[%s11027_s6 + $0x358] sm:$0xf] %vm5124_vm1, %v7090_v54  ;;  %10060 = vmatmul.msk.bf16.gmra.mxu2 %vm2042_vm0, %v10321_v38  ;;  %v10193_v38 = vld [vmem:[%s10615_s13 + $0x1f0] sm:$0xff] }
 0x461   : > { %8284 = vst.msk [vmem:[%s11027_s6 + $0x15c] sm:$0xf] %vm5124_vm1, %v6836_v39  ;;  %v4974_v0 = vpack.c.bf16 %v4462_v13, %v4462_v13  ;;  %v5077_v56 = vpack.c.bf16 %v4565_v48, %v4565_v48 }
 0x462   : > { %5589 = vst.msk [vmem:[%s10693_s28 + $0x740] sm:$0xf] %vm5124_vm1, %v5076_v41  ;;  %v3407_v41 = vpop.f32.mrf.mxu1 }
 0x463   : > { %v15211_v37 = vadd.f32 %v14986_v51, %v3407_v41  ;;  %5231 = vst.msk [vmem:[%s10693_s28 + $0x1a8] sm:$0xf] %vm5124_vm1, %v4718_v22 }
 0x464   : > { %6863 = vrot.lane.b32.xlu2 %v5738_v30, %s10519_s27  ;;  %7119 = vrot.lane.b32.xlu1 %v5866_v36, %s10519_s27  ;;  %v3727_v18 = vpop.f32.mrf.mxu2  ;;  %v3985_v6 = vpop.f32.mrf.mxu3  ;;  %v5868_v36 = vpack.c.bf16 %v15039_v32, %v15039_v32  ;;  %5359 = vst.msk [vmem:[%s10693_s28 + $0x3a8] sm:$0xf] %vm5124_vm1, %v4846_v15 }
 0x465   : > { %6865 = vrot.lane.b32.xlu0 %v5739_v28, %s10519_s27  ;;  %v3087_v28 = vpop.f32.mrf.mxu0  ;;  %v15217_v59 = vadd.f32 %v14986_v51, %v3727_v18  ;;  %v15220_v30 = vadd.f32 %v14986_v51, %v3985_v6  ;;  %v4335_v50 = vmax.f32 %v15211_v37, 0.0  ;;  %5487 = vst.msk [vmem:[%s10693_s28 + $0x5a8] sm:$0xf] %vm5124_vm1, %v4974_v0  ;;  %v5997_v0 = vpack.c.bf16 %v15090_v2, %v15090_v2 }
 0x466   : > { %v7098_v9 = vpop.permute.xlu2 %7097  ;;  %v7348_v54 = vpop.permute.xlu1 %7347  ;;  %v15208_v40 = vadd.f32 %v14986_v51, %v3087_v28  ;;  %5590 = vst.msk [vmem:[%s10693_s28 + $0x744] sm:$0xf] %vm5124_vm1, %v5077_v56  ;;  %v5996_v2 = vpack.c.bf16 %v15045_v29, %v15045_v29 }
 0x467   : > { %8415 = vst.msk [vmem:[%s11027_s6 + $0x368] sm:$0xf] %vm5124_vm1, %v7098_v9  ;;  %v7094_v39 = vpop.permute.xlu0 %7093  ;;  %v4463_v13 = vmax.f32 %v15217_v59, 0.0  ;;  %v4566_v32 = vmax.f32 %v15220_v30, 0.0 }
 0x468   : > { %8540 = vst.msk [vmem:[%s11027_s6 + $0x55c] sm:$0xf] %vm5124_vm1, %v7348_v54  ;;  %v4207_v7 = vmax.f32 %v15208_v40, 0.0 }
 0x469   : > { %8413 = vst.msk [vmem:[%s11027_s6 + $0x360] sm:$0xf] %vm5124_vm1, %v7094_v39  ;;  %v4847_v39 = vpack.c.bf16 %v4335_v50, %v4335_v50  ;;  %v4975_v15 = vpack.c.bf16 %v4463_v13, %v4463_v13  ;;  %v5078_v28 = vpack.c.bf16 %v4566_v32, %v4566_v32  ;;  %v5740_v50 = vpack.c.bf16 %v15036_v55, %v15036_v55 }
 0x46a   : > { %v4719_v54 = vpack.c.bf16 %v4207_v7, %v4207_v7  ;;  %v10373_v7 = vld [vmem:[%s10615_s13 + $0x790] sm:$0xff] }
 0x46b   : > { %5360 = vst.msk [vmem:[%s10693_s28 + $0x3ac] sm:$0xf] %vm5124_vm1, %v4847_v39 }
 0x46c   : > { %7121 = vrot.lane.b32.xlu2 %v5867_v53, %s10519_s27  ;;  %7377 = vrot.lane.b32.xlu1 %v5995_v46, %s10519_s27  ;;  %v3410_v46 = vpop.f32.mrf.mxu1  ;;  %v3730_v18 = vpop.f32.mrf.mxu2  ;;  %5232 = vst.msk [vmem:[%s10693_s28 + $0x1ac] sm:$0xf] %vm5124_vm1, %v4719_v54 }
 0x46d   : > { %7123 = vrot.lane.b32.xlu0 %v5868_v36, %s10519_s27  ;;  %v3090_v53 = vpop.f32.mrf.mxu0  ;;  %v15250_v56 = vadd.f32 %v14986_v51, %v3410_v46  ;;  %v3987_v6 = vpop.f32.mrf.mxu3  ;;  %v10257_v36 = vld [vmem:[%s10615_s13 + $0x3f0] sm:$0xff]  ;;  %v15262_v13 = vadd.f32 %v14986_v51, %v3730_v18  ;;  %5488 = vst.msk [vmem:[%s10693_s28 + $0x5ac] sm:$0xf] %vm5124_vm1, %v4975_v15  ;;  %v5741_v46 = vpack.c.bf16 %v15075_v31, %v15075_v31 }
 0x46e   : > { %v7356_v48 = vpop.permute.xlu2 %7355  ;;  %v6838_v9 = vpop.permute.xlu1 %6837  ;;  %v15247_v41 = vadd.f32 %v14986_v51, %v3090_v53  ;;  %v15265_v32 = vadd.f32 %v14986_v51, %v3987_v6  ;;  %9932 = vmatmul.msk.bf16.gmra.mxu0 %vm2042_vm0, %v10193_v38  ;;  %9996 = vmatmul.msk.bf16.gmra.mxu1 %vm2042_vm0, %v10257_v36  ;;  %5591 = vst.msk [vmem:[%s10693_s28 + $0x748] sm:$0xf] %vm5124_vm1, %v5078_v28 }
 0x46f   : > { %8544 = vst.msk [vmem:[%s11027_s6 + $0x56c] sm:$0xf] %vm5124_vm1, %v7356_v48  ;;  %v7352_v22 = vpop.permute.xlu0 %7351  ;;  %v4464_v55 = vmax.f32 %v15262_v13, 0.0  ;;  %10112 = vmatmul.msk.bf16.gmra.mxu3 %vm2042_vm0, %v10373_v7 }
 0x470   : > { %8285 = vst.msk [vmem:[%s11027_s6 + $0x160] sm:$0xf] %vm5124_vm1, %v6838_v9  ;;  %v4208_v48 = vmax.f32 %v15247_v41, 0.0  ;;  %v4336_v9 = vmax.f32 %v15250_v56, 0.0  ;;  %v4567_v29 = vmax.f32 %v15265_v32, 0.0 }
 0x471   : > { %8542 = vst.msk [vmem:[%s11027_s6 + $0x564] sm:$0xf] %vm5124_vm1, %v7352_v22  ;;  %v4976_v28 = vpack.c.bf16 %v4464_v55, %v4464_v55 }
 0x472   : > { %v4720_v39 = vpack.c.bf16 %v4208_v48, %v4208_v48  ;;  %v4848_v15 = vpack.c.bf16 %v4336_v9, %v4336_v9  ;;  %v5079_v38 = vpack.c.bf16 %v4567_v29, %v4567_v29  ;;  %v5742_v9 = vpack.c.bf16 %v15122_v43, %v15122_v43 }
 0x473   : > { %5489 = vst.msk [vmem:[%s10693_s28 + $0x5b0] sm:$0xf] %vm5124_vm1, %v4976_v28 }
 0x474   : > { %7379 = vrot.lane.b32.xlu2 %v5996_v2, %s10519_s27  ;;  %6867 = vrot.lane.b32.xlu1 %v5740_v50, %s10519_s27  ;;  %v3412_v6 = vpop.f32.mrf.mxu1  ;;  %v3732_v31 = vpop.f32.mrf.mxu2  ;;  %5233 = vst.msk [vmem:[%s10693_s28 + $0x1b0] sm:$0xf] %vm5124_vm1, %v4720_v39 }
 0x475   : > { %7381 = vrot.lane.b32.xlu0 %v5997_v0, %s10519_s27  ;;  %v5869_v0 = vpack.c.bf16 %v15078_v63, %v15078_v63  ;;  %v3092_v18 = vpop.f32.mrf.mxu0  ;;  %v15297_v7 = vadd.f32 %v14986_v51, %v3412_v6  ;;  %v3990_v50 = vpop.f32.mrf.mxu3  ;;  %v10322_v63 = vld [vmem:[%s10615_s13 + $0x5f8] sm:$0xff]  ;;  %v15303_v2 = vadd.f32 %v14986_v51, %v3732_v31  ;;  %5361 = vst.msk [vmem:[%s10693_s28 + $0x3b0] sm:$0xf] %vm5124_vm1, %v4848_v15 }
 0x476   : > { %v6846_v54 = vpop.permute.xlu2 %6845  ;;  %v7096_v22 = vpop.permute.xlu1 %7095  ;;  %v15294_v36 = vadd.f32 %v14986_v51, %v3092_v18  ;;  %v15306_v48 = vadd.f32 %v14986_v51, %v3990_v50  ;;  %10061 = vmatmul.msk.bf16.gmra.mxu2 %vm2042_vm0, %v10322_v63  ;;  %5592 = vst.msk [vmem:[%s10693_s28 + $0x74c] sm:$0xf] %vm5124_vm1, %v5079_v38  ;;  %v5871_v6 = vpack.c.bf16 %v15164_v25, %v15164_v25 }
 0x477   : > { %8289 = vst.msk [vmem:[%s11027_s6 + $0x170] sm:$0xf] %vm5124_vm1, %v6846_v54  ;;  %v6842_v53 = vpop.permute.xlu0 %6841  ;;  %v4337_v29 = vmax.f32 %v15297_v7, 0.0  ;;  %v4465_v54 = vmax.f32 %v15303_v2, 0.0  ;;  %v5998_v25 = vpack.c.bf16 %v15131_v58, %v15131_v58 }
 0x478   : > { %8414 = vst.msk [vmem:[%s11027_s6 + $0x364] sm:$0xf] %vm5124_vm1, %v7096_v22  ;;  %v4209_v55 = vmax.f32 %v15294_v36, 0.0  ;;  %v4568_v43 = vmax.f32 %v15306_v48, 0.0 }
 0x479   : > { %8287 = vst.msk [vmem:[%s11027_s6 + $0x168] sm:$0xf] %vm5124_vm1, %v6842_v53 }
 0x47a   : > { %v4721_v53 = vpack.c.bf16 %v4209_v55, %v4209_v55  ;;  %v5080_v38 = vpack.c.bf16 %v4568_v43, %v4568_v43  ;;  %v10194_v55 = vld [vmem:[%s10615_s13 + $0x1f8] sm:$0xff] }
 0x47c   : > { %6869 = vrot.lane.b32.xlu2 %v5741_v46, %s10519_s27  ;;  %7125 = vrot.lane.b32.xlu1 %v5869_v0, %s10519_s27  ;;  %v4849_v46 = vpack.c.bf16 %v4337_v29, %v4337_v29  ;;  %v4977_v0 = vpack.c.bf16 %v4465_v54, %v4465_v54  ;;  %v3415_v18 = vpop.f32.mrf.mxu1  ;;  %v3735_v63 = vpop.f32.mrf.mxu2  ;;  %v10258_v29 = vld [vmem:[%s10615_s13 + $0x3f8] sm:$0xff]  ;;  %5234 = vst.msk [vmem:[%s10693_s28 + $0x1b4] sm:$0xf] %vm5124_vm1, %v4721_v53 }
 0x47d   : > { %6871 = vrot.lane.b32.xlu0 %v5742_v9, %s10519_s27  ;;  %v3095_v28 = vpop.f32.mrf.mxu0  ;;  %v15336_v50 = vadd.f32 %v14986_v51, %v3415_v18  ;;  %v3992_v9 = vpop.f32.mrf.mxu3  ;;  %v10374_v54 = vld [vmem:[%s10615_s13 + $0x798] sm:$0xff]  ;;  %v15348_v43 = vadd.f32 %v14986_v51, %v3735_v63  ;;  %5593 = vst.msk [vmem:[%s10693_s28 + $0x750] sm:$0xf] %vm5124_vm1, %v5080_v38 }
 0x47e   : > { %v7104_v22 = vpop.permute.xlu2 %7103  ;;  %v7354_v39 = vpop.permute.xlu1 %7353  ;;  %v15333_v31 = vadd.f32 %v14986_v51, %v3095_v28  ;;  %5362 = vst.msk [vmem:[%s10693_s28 + $0x3b4] sm:$0xf] %vm5124_vm1, %v4849_v46  ;;  %9933 = vmatmul.msk.bf16.gmra.mxu0 %vm2042_vm0, %v10194_v55  ;;  %9997 = vmatmul.msk.bf16.gmra.mxu1 %vm2042_vm0, %v10258_v29 }
 0x47f   : > { %8418 = vst.msk [vmem:[%s11027_s6 + $0x374] sm:$0xf] %vm5124_vm1, %v7104_v22  ;;  %v7100_v15 = vpop.permute.xlu0 %7099  ;;  %v5870_v22 = vpack.c.bf16 %v15125_v47, %v15125_v47  ;;  %v4338_v28 = vmax.f32 %v15336_v50, 0.0  ;;  %v4466_v47 = vmax.f32 %v15348_v43, 0.0  ;;  %10113 = vmatmul.msk.bf16.gmra.mxu3 %vm2042_vm0, %v10374_v54 }
 0x480   : > { %8543 = vst.msk [vmem:[%s11027_s6 + $0x568] sm:$0xf] %vm5124_vm1, %v7354_v39  ;;  %v15351_v39 = vadd.f32 %v14986_v51, %v3992_v9 }
 0x481   : > { %8416 = vst.msk [vmem:[%s11027_s6 + $0x36c] sm:$0xf] %vm5124_vm1, %v7100_v15  ;;  %v4210_v15 = vmax.f32 %v15333_v31, 0.0  ;;  %v4850_v9 = vpack.c.bf16 %v4338_v28, %v4338_v28  ;;  %v4978_v38 = vpack.c.bf16 %v4466_v47, %v4466_v47  ;;  %v6000_v47 = vpack.c.bf16 %v15217_v59, %v15217_v59 }
 0x482   : > { %5490 = vst.msk [vmem:[%s10693_s28 + $0x5b4] sm:$0xf] %vm5124_vm1, %v4977_v0  ;;  %v4569_v58 = vmax.f32 %v15351_v39, 0.0  ;;  %v5743_v0 = vpack.c.bf16 %v15161_v4, %v15161_v4 }
 0x483   : > { %v4722_v18 = vpack.c.bf16 %v4210_v15, %v4210_v15  ;;  %5363 = vst.msk [vmem:[%s10693_s28 + $0x3b8] sm:$0xf] %vm5124_vm1, %v4850_v9 }
 0x484   : > { %7127 = vrot.lane.b32.xlu2 %v5870_v22, %s10519_s27  ;;  %7383 = vrot.lane.b32.xlu1 %v5998_v25, %s10519_s27  ;;  %v3417_v29 = vpop.f32.mrf.mxu1  ;;  %v5081_v54 = vpack.c.bf16 %v4569_v58, %v4569_v58  ;;  %v3737_v4 = vpop.f32.mrf.mxu2  ;;  %5491 = vst.msk [vmem:[%s10693_s28 + $0x5b8] sm:$0xf] %vm5124_vm1, %v4978_v38 }
 0x485   : > { %7129 = vrot.lane.b32.xlu0 %v5871_v6, %s10519_s27  ;;  %v5999_v6 = vpack.c.bf16 %v15176_v24, %v15176_v24  ;;  %v3097_v55 = vpop.f32.mrf.mxu0  ;;  %v15383_v25 = vadd.f32 %v14986_v51, %v3417_v29  ;;  %v3995_v15 = vpop.f32.mrf.mxu3  ;;  %5235 = vst.msk [vmem:[%s10693_s28 + $0x1b8] sm:$0xf] %vm5124_vm1, %v4722_v18  ;;  %v15388_v24 = vadd.f32 %v14986_v51, %v3737_v4 }
 0x486   : > { %v7362_v53 = vpop.permute.xlu2 %7361  ;;  %v6844_v46 = vpop.permute.xlu1 %6843  ;;  %v15380_v22 = vadd.f32 %v14986_v51, %v3097_v55  ;;  %v15391_v28 = vadd.f32 %v14986_v51, %v3995_v15  ;;  %5594 = vst.msk [vmem:[%s10693_s28 + $0x754] sm:$0xf] %vm5124_vm1, %v5081_v54  ;;  %v5745_v54 = vpack.c.bf16 %v15247_v41, %v15247_v41  ;;  %v5872_v41 = vpack.c.bf16 %v15211_v37, %v15211_v37 }
 0x487   : > { %8547 = vst.msk [vmem:[%s11027_s6 + $0x578] sm:$0xf] %vm5124_vm1, %v7362_v53  ;;  %v7358_v63 = vpop.permute.xlu0 %7357  ;;  %v4339_v53 = vmax.f32 %v15383_v25, 0.0 }
 0x488   : > { %8288 = vst.msk [vmem:[%s11027_s6 + $0x16c] sm:$0xf] %vm5124_vm1, %v6844_v46  ;;  %v4211_v58 = vmax.f32 %v15380_v22, 0.0  ;;  %v4467_v46 = vmax.f32 %v15388_v24, 0.0  ;;  %v4570_v59 = vmax.f32 %v15391_v28, 0.0 }
 0x489   : > { %8545 = vst.msk [vmem:[%s11027_s6 + $0x570] sm:$0xf] %vm5124_vm1, %v7358_v63 }
 0x48a   : > { %v4723_v9 = vpack.c.bf16 %v4211_v58, %v4211_v58  ;;  %v4979_v38 = vpack.c.bf16 %v4467_v46, %v4467_v46  ;;  %v5082_v4 = vpack.c.bf16 %v4570_v59, %v4570_v59  ;;  %v10375_v46 = vld [vmem:[%s10615_s13 + $0x7a0] sm:$0xff] }
 0x48c   : > { %7385 = vrot.lane.b32.xlu2 %v5999_v6, %s10519_s27  ;;  %6873 = vrot.lane.b32.xlu1 %v5743_v0, %s10519_s27  ;;  %v4851_v0 = vpack.c.bf16 %v4339_v53, %v4339_v53  ;;  %v3420_v29 = vpop.f32.mrf.mxu1  ;;  %v3740_v58 = vpop.f32.mrf.mxu2  ;;  %5236 = vst.msk [vmem:[%s10693_s28 + $0x1bc] sm:$0xf] %vm5124_vm1, %v4723_v9 }
 0x48d   : > { %7387 = vrot.lane.b32.xlu0 %v6000_v47, %s10519_s27  ;;  %v3100_v55 = vpop.f32.mrf.mxu0  ;;  %v15420_v47 = vadd.f32 %v14986_v51, %v3420_v29  ;;  %v3997_v53 = vpop.f32.mrf.mxu3  ;;  %v15430_v59 = vadd.f32 %v14986_v51, %v3740_v58  ;;  %5492 = vst.msk [vmem:[%s10693_s28 + $0x5bc] sm:$0xf] %vm5124_vm1, %v4979_v38  ;;  %v5873_v38 = vpack.c.bf16 %v15250_v56, %v15250_v56 }
 0x48e   : > { %v6852_v18 = vpop.permute.xlu2 %6851  ;;  %v7102_v63 = vpop.permute.xlu1 %7101  ;;  %v15417_v15 = vadd.f32 %v14986_v51, %v3100_v55  ;;  %5364 = vst.msk [vmem:[%s10693_s28 + $0x3bc] sm:$0xf] %vm5124_vm1, %v4851_v0 }
 0x48f   : > { %8292 = vst.msk [vmem:[%s11027_s6 + $0x17c] sm:$0xf] %vm5124_vm1, %v6852_v18  ;;  %v6848_v6 = vpop.permute.xlu0 %6847  ;;  %v5744_v18 = vpack.c.bf16 %v15208_v40, %v15208_v40  ;;  %v4340_v55 = vmax.f32 %v15420_v47, 0.0  ;;  %v4468_v40 = vmax.f32 %v15430_v59, 0.0  ;;  %10114 = vmatmul.msk.bf16.gmra.mxu3 %vm2042_vm0, %v10375_v46 }
 0x490   : > { %8417 = vst.msk [vmem:[%s11027_s6 + $0x370] sm:$0xf] %vm5124_vm1, %v7102_v63  ;;  %v15433_v63 = vadd.f32 %v14986_v51, %v3997_v53 }
 0x491   : > { %8290 = vst.msk [vmem:[%s11027_s6 + $0x174] sm:$0xf] %vm5124_vm1, %v6848_v6  ;;  %v4212_v6 = vmax.f32 %v15417_v15, 0.0  ;;  %v4852_v53 = vpack.c.bf16 %v4340_v55, %v4340_v55 }
 0x492   : > { %5595 = vst.msk [vmem:[%s10693_s28 + $0x758] sm:$0xf] %vm5124_vm1, %v5082_v4  ;;  %v4571_v37 = vmax.f32 %v15433_v63, 0.0  ;;  %v4980_v4 = vpack.c.bf16 %v4468_v40, %v4468_v40 }
 0x493   : > { %v4724_v29 = vpack.c.bf16 %v4212_v6, %v4212_v6  ;;  %5365 = vst.msk [vmem:[%s10693_s28 + $0x3c0] sm:$0xf] %vm5124_vm1, %v4852_v53 }
 0x494   : > { %6875 = vrot.lane.b32.xlu2 %v5744_v18, %s10519_s27  ;;  %7131 = vrot.lane.b32.xlu1 %v5872_v41, %s10519_s27  ;;  %v3422_v46 = vpop.f32.mrf.mxu1  ;;  %v5083_v41 = vpack.c.bf16 %v4571_v37, %v4571_v37  ;;  %v3742_v56 = vpop.f32.mrf.mxu2  ;;  %v5874_v37 = vpack.c.bf16 %v15297_v7, %v15297_v7  ;;  %5493 = vst.msk [vmem:[%s10693_s28 + $0x5c0] sm:$0xf] %vm5124_vm1, %v4980_v4 }
 0x495   : > { %6877 = vrot.lane.b32.xlu0 %v5745_v54, %s10519_s27  ;;  %v6001_v54 = vpack.c.bf16 %v15262_v13, %v15262_v13  ;;  %v3102_v18 = vpop.f32.mrf.mxu0  ;;  %v15463_v55 = vadd.f32 %v14986_v51, %v3422_v46  ;;  %5237 = vst.msk [vmem:[%s10693_s28 + $0x1c0] sm:$0xf] %vm5124_vm1, %v4724_v29  ;;  %v15468_v13 = vadd.f32 %v14986_v51, %v3742_v56 }
 0x496   : > { %v7110_v9 = vpop.permute.xlu2 %7109  ;;  %v7360_v0 = vpop.permute.xlu1 %7359  ;;  %v15460_v6 = vadd.f32 %v14986_v51, %v3102_v18  ;;  %5596 = vst.msk [vmem:[%s10693_s28 + $0x75c] sm:$0xf] %vm5124_vm1, %v5083_v41  ;;  %v6003_v41 = vpack.c.bf16 %v15348_v43, %v15348_v43  ;;  %v6002_v43 = vpack.c.bf16 %v15303_v2, %v15303_v2 }
 0x497   : > { %8421 = vst.msk [vmem:[%s11027_s6 + $0x380] sm:$0xf] %vm5124_vm1, %v7110_v9  ;;  %v7106_v58 = vpop.permute.xlu0 %7105  ;;  %v4000_v9 = vpop.f32.mrf.mxu3  ;;  %v4469_v29 = vmax.f32 %v15468_v13, 0.0 }
 0x498   : > { %8546 = vst.msk [vmem:[%s11027_s6 + $0x574] sm:$0xf] %vm5124_vm1, %v7360_v0  ;;  %v15471_v40 = vadd.f32 %v14986_v51, %v4000_v9  ;;  %v4213_v0 = vmax.f32 %v15460_v6, 0.0 }
 0x499   : > { %8419 = vst.msk [vmem:[%s11027_s6 + $0x378] sm:$0xf] %vm5124_vm1, %v7106_v58  ;;  %v4341_v58 = vmax.f32 %v15463_v55, 0.0  ;;  %v4981_v4 = vpack.c.bf16 %v4469_v29, %v4469_v29  ;;  %v10376_v29 = vld [vmem:[%s10615_s13 + $0x7a8] sm:$0xff] }
 0x49a   : > { %16805 = vst [vmem:[#allocation5_spill] sm:$0xff] %v15471_v40  ;;  %v4572_v7 = vmax.f32 %v15471_v40, 0.0  ;;  %v4725_v46 = vpack.c.bf16 %v4213_v0, %v4213_v0  ;;  %v5746_v40 = vpack.c.bf16 %v15294_v36, %v15294_v36 }
 0x49b   : > { %5494 = vst.msk [vmem:[%s10693_s28 + $0x5c4] sm:$0xf] %vm5124_vm1, %v4981_v4  ;;  %v5747_v4 = vpack.c.bf16 %v15333_v31, %v15333_v31 }
 0x49c   : > { %7133 = vrot.lane.b32.xlu2 %v5873_v38, %s10519_s27  ;;  %7389 = vrot.lane.b32.xlu1 %v6001_v54, %s10519_s27  ;;  %v4853_v54 = vpack.c.bf16 %v4341_v58, %v4341_v58  ;;  %v3425_v9 = vpop.f32.mrf.mxu1  ;;  %v3745_v58 = vpop.f32.mrf.mxu2  ;;  %5238 = vst.msk [vmem:[%s10693_s28 + $0x1c4] sm:$0xf] %vm5124_vm1, %v4725_v46 }
 0x49d   : > { %7135 = vrot.lane.b32.xlu0 %v5874_v37, %s10519_s27  ;;  %v3105_v56 = vpop.f32.mrf.mxu0  ;;  %v5084_v37 = vpack.c.bf16 %v4572_v7, %v4572_v7  ;;  %v15510_v7 = vadd.f32 %v14986_v51, %v3745_v58 }
 0x49e   : > { %v7368_v53 = vpop.permute.xlu2 %7367  ;;  %v6850_v18 = vpop.permute.xlu1 %6849  ;;  %v15497_v0 = vadd.f32 %v14986_v51, %v3105_v56  ;;  %5366 = vst.msk [vmem:[%s10693_s28 + $0x3c4] sm:$0xf] %vm5124_vm1, %v4853_v54 }
 0x49f   : > { %8550 = vst.msk [vmem:[%s11027_s6 + $0x584] sm:$0xf] %vm5124_vm1, %v7368_v53  ;;  %v7364_v38 = vpop.permute.xlu0 %7363  ;;  %v15500_v53 = vadd.f32 %v14986_v51, %v3425_v9  ;;  %v4470_v36 = vmax.f32 %v15510_v7, 0.0  ;;  %10115 = vmatmul.msk.bf16.gmra.mxu3 %vm2042_vm0, %v10376_v29 }
 0x4a0   : > { %8291 = vst.msk [vmem:[%s11027_s6 + $0x178] sm:$0xf] %vm5124_vm1, %v6850_v18  ;;  %v4002_v18 = vpop.f32.mrf.mxu3  ;;  %v4214_v56 = vmax.f32 %v15497_v0, 0.0 }
 0x4a1   : > { %8548 = vst.msk [vmem:[%s11027_s6 + $0x57c] sm:$0xf] %vm5124_vm1, %v7364_v38  ;;  %v15513_v38 = vadd.f32 %v14986_v51, %v4002_v18  ;;  %v4342_v9 = vmax.f32 %v15500_v53, 0.0 }
 0x4a2   : > { %5597 = vst.msk [vmem:[%s10693_s28 + $0x760] sm:$0xf] %vm5124_vm1, %v5084_v37  ;;  %v4726_v58 = vpack.c.bf16 %v4214_v56, %v4214_v56  ;;  %v4982_v37 = vpack.c.bf16 %v4470_v36, %v4470_v36 }
 0x4a3   : > { %16806 = vst [vmem:[#allocation6_spill] sm:$0xff] %v15513_v38  ;;  %v4573_v2 = vmax.f32 %v15513_v38, 0.0  ;;  %v4854_v18 = vpack.c.bf16 %v4342_v9, %v4342_v9 }
 0x4a4   : > { %7391 = vrot.lane.b32.xlu2 %v6002_v43, %s10519_s27  ;;  %6879 = vrot.lane.b32.xlu1 %v5746_v40, %s10519_s27  ;;  %v3427_v29 = vpop.f32.mrf.mxu1  ;;  %v3747_v31 = vpop.f32.mrf.mxu2  ;;  %5239 = vst.msk [vmem:[%s10693_s28 + $0x1c8] sm:$0xf] %vm5124_vm1, %v4726_v58 }
 0x4a5   : > { %7393 = vrot.lane.b32.xlu0 %v6003_v41, %s10519_s27  ;;  %v5875_v41 = vpack.c.bf16 %v15336_v50, %v15336_v50  ;;  %v3107_v43 = vpop.f32.mrf.mxu0  ;;  %v5085_v56 = vpack.c.bf16 %v4573_v2, %v4573_v2  ;;  %v15543_v9 = vadd.f32 %v14986_v51, %v3427_v29  ;;  %v15548_v50 = vadd.f32 %v14986_v51, %v3747_v31 }
 0x4a6   : > { %v6858_v46 = vpop.permute.xlu2 %6857  ;;  %v7108_v54 = vpop.permute.xlu1 %7107  ;;  %v5748_v2 = vpack.c.bf16 %v15380_v22, %v15380_v22  ;;  %5367 = vst.msk [vmem:[%s10693_s28 + $0x3c8] sm:$0xf] %vm5124_vm1, %v4854_v18 }
 0x4a7   : > { %8295 = vst.msk [vmem:[%s11027_s6 + $0x188] sm:$0xf] %vm5124_vm1, %v6858_v46  ;;  %v6854_v40 = vpop.permute.xlu0 %6853  ;;  %v15540_v46 = vadd.f32 %v14986_v51, %v3107_v43 }
 0x4a8   : > { %8420 = vst.msk [vmem:[%s11027_s6 + $0x37c] sm:$0xf] %vm5124_vm1, %v7108_v54  ;;  %v4005_v38 = vpop.f32.mrf.mxu3 }
 0x4a9   : > { %8293 = vst.msk [vmem:[%s11027_s6 + $0x180] sm:$0xf] %vm5124_vm1, %v6854_v40  ;;  %v15551_v36 = vadd.f32 %v14986_v51, %v4005_v38  ;;  %v4215_v54 = vmax.f32 %v15540_v46, 0.0  ;;  %v4343_v40 = vmax.f32 %v15543_v9, 0.0  ;;  %v4471_v38 = vmax.f32 %v15548_v50, 0.0 }
 0x4aa   : > { %5495 = vst.msk [vmem:[%s10693_s28 + $0x5c8] sm:$0xf] %vm5124_vm1, %v4982_v37 }
 0x4ab   : > { %16807 = vst [vmem:[#allocation7_spill] sm:$0xff] %v15551_v36  ;;  %v4574_v22 = vmax.f32 %v15551_v36, 0.0  ;;  %v4727_v43 = vpack.c.bf16 %v4215_v54, %v4215_v54  ;;  %v4983_v37 = vpack.c.bf16 %v4471_v38, %v4471_v38  ;;  %v10377_v38 = vld [vmem:[%s10615_s13 + $0x7b0] sm:$0xff]  ;;  %v5876_v36 = vpack.c.bf16 %v15383_v25, %v15383_v25 }
 0x4ac   : > { %6881 = vrot.lane.b32.xlu2 %v5747_v4, %s10519_s27  ;;  %7137 = vrot.lane.b32.xlu1 %v5875_v41, %s10519_s27  ;;  %5598 = vst.msk [vmem:[%s10693_s28 + $0x764] sm:$0xf] %vm5124_vm1, %v5085_v56  ;;  %v4855_v41 = vpack.c.bf16 %v4343_v40, %v4343_v40  ;;  %v3430_v31 = vpop.f32.mrf.mxu1  ;;  %v5877_v56 = vpack.c.bf16 %v15420_v47, %v15420_v47  ;;  %v3750_v40 = vpop.f32.mrf.mxu2 }
 0x4ad   : > { %6883 = vrot.lane.b32.xlu0 %v5748_v2, %s10519_s27  ;;  %v3110_v29 = vpop.f32.mrf.mxu0  ;;  %v5086_v2 = vpack.c.bf16 %v4574_v22, %v4574_v22  ;;  %v6004_v47 = vpack.c.bf16 %v15388_v24, %v15388_v24  ;;  %5240 = vst.msk [vmem:[%s10693_s28 + $0x1cc] sm:$0xf] %vm5124_vm1, %v4727_v43  ;;  %v15590_v22 = vadd.f32 %v14986_v51, %v3750_v40 }
 0x4ae   : > { %v7116_v58 = vpop.permute.xlu2 %7115  ;;  %v7366_v18 = vpop.permute.xlu1 %7365  ;;  %v15577_v54 = vadd.f32 %v14986_v51, %v3110_v29  ;;  %5368 = vst.msk [vmem:[%s10693_s28 + $0x3cc] sm:$0xf] %vm5124_vm1, %v4855_v41 }
 0x4af   : > { %8424 = vst.msk [vmem:[%s11027_s6 + $0x38c] sm:$0xf] %vm5124_vm1, %v7116_v58  ;;  %v7112_v4 = vpop.permute.xlu0 %7111  ;;  %v15580_v58 = vadd.f32 %v14986_v51, %v3430_v31  ;;  %v4472_v25 = vmax.f32 %v15590_v22, 0.0  ;;  %10116 = vmatmul.msk.bf16.gmra.mxu3 %vm2042_vm0, %v10377_v38 }
 0x4b0   : > { %8549 = vst.msk [vmem:[%s11027_s6 + $0x580] sm:$0xf] %vm5124_vm1, %v7366_v18  ;;  %v4007_v18 = vpop.f32.mrf.mxu3  ;;  %v4216_v29 = vmax.f32 %v15577_v54, 0.0 }
 0x4b1   : > { %8422 = vst.msk [vmem:[%s11027_s6 + $0x384] sm:$0xf] %vm5124_vm1, %v7112_v4  ;;  %v15593_v4 = vadd.f32 %v14986_v51, %v4007_v18  ;;  %v4344_v31 = vmax.f32 %v15580_v58, 0.0 }
 0x4b2   : > { %5496 = vst.msk [vmem:[%s10693_s28 + $0x5cc] sm:$0xf] %vm5124_vm1, %v4983_v37  ;;  %v4728_v41 = vpack.c.bf16 %v4216_v29, %v4216_v29  ;;  %v5749_v37 = vpack.c.bf16 %v15417_v15, %v15417_v15  ;;  %v15622_v29 = vld [vmem:[%s16786_s2] ss:$0 sm:$0xff] }
 0x4b3   : > { %16808 = vst [vmem:[#allocation8_spill] sm:$0xff] %v15593_v4  ;;  %v4575_v51 = vmax.f32 %v15593_v4, 0.0  ;;  %v4856_v40 = vpack.c.bf16 %v4344_v31, %v4344_v31 }
 0x4b4   : > { %7139 = vrot.lane.b32.xlu2 %v5876_v36, %s10519_s27  ;;  %7395 = vrot.lane.b32.xlu1 %v6004_v47, %s10519_s27  ;;  %5599 = vst.msk [vmem:[%s10693_s28 + $0x768] sm:$0xf] %vm5124_vm1, %v5086_v2  ;;  %v4984_v2 = vpack.c.bf16 %v4472_v25, %v4472_v25  ;;  %v3432_v38 = vpop.f32.mrf.mxu1  ;;  %v3752_v31 = vpop.f32.mrf.mxu2 }
 0x4b5   : > { %7141 = vrot.lane.b32.xlu0 %v5877_v56, %s10519_s27  ;;  %v6005_v56 = vpack.c.bf16 %v15430_v59, %v15430_v59  ;;  %v3112_v18 = vpop.f32.mrf.mxu0  ;;  %v5087_v47 = vpack.c.bf16 %v4575_v51, %v4575_v51  ;;  %v15628_v59 = vadd.f32 %v15622_v29, %v3432_v38  ;;  %5241 = vst.msk [vmem:[%s10693_s28 + $0x1d0] sm:$0xf] %vm5124_vm1, %v4728_v41 }
 0x4b6   : > { %v7374_v24 = vpop.permute.xlu2 %7373  ;;  %v6856_v43 = vpop.permute.xlu1 %6855  ;;  %v15625_v15 = vadd.f32 %v15622_v29, %v3112_v18  ;;  %5369 = vst.msk [vmem:[%s10693_s28 + $0x3d0] sm:$0xf] %vm5124_vm1, %v4856_v40 }
 0x4b7   : > { %8553 = vst.msk [vmem:[%s11027_s6 + $0x590] sm:$0xf] %vm5124_vm1, %v7374_v24  ;;  %v7370_v36 = vpop.permute.xlu0 %7369  ;;  %v15633_v24 = vadd.f32 %v15622_v29, %v3752_v31  ;;  %v4345_v18 = vmax.f32 %v15628_v59, 0.0 }
 0x4b8   : > { %8294 = vst.msk [vmem:[%s11027_s6 + $0x184] sm:$0xf] %vm5124_vm1, %v6856_v43  ;;  %v4010_v25 = vpop.f32.mrf.mxu3  ;;  %v6006_v43 = vpack.c.bf16 %v15468_v13, %v15468_v13 }
 0x4b9   : > { %8551 = vst.msk [vmem:[%s11027_s6 + $0x588] sm:$0xf] %vm5124_vm1, %v7370_v36  ;;  %v15636_v51 = vadd.f32 %v15622_v29, %v4010_v25  ;;  %v4217_v36 = vmax.f32 %v15625_v15, 0.0  ;;  %v4473_v41 = vmax.f32 %v15633_v24, 0.0 }
 0x4ba   : > { %5497 = vst.msk [vmem:[%s10693_s28 + $0x5d0] sm:$0xf] %vm5124_vm1, %v4984_v2 }
 0x4bb   : > { %16809 = vst [vmem:[#allocation9_spill] sm:$0xff] %v15636_v51  ;;  %v4576_v13 = vmax.f32 %v15636_v51, 0.0  ;;  %v4729_v31 = vpack.c.bf16 %v4217_v36, %v4217_v36  ;;  %v4985_v2 = vpack.c.bf16 %v4473_v41, %v4473_v41  ;;  %v10378_v41 = vld [vmem:[%s10615_s13 + $0x7b8] sm:$0xff]  ;;  %v5750_v51 = vpack.c.bf16 %v15460_v6, %v15460_v6 }
 0x4bc   : > { %7397 = vrot.lane.b32.xlu2 %v6005_v56, %s10519_s27  ;;  %6885 = vrot.lane.b32.xlu1 %v5749_v37, %s10519_s27  ;;  %5600 = vst.msk [vmem:[%s10693_s28 + $0x76c] sm:$0xf] %vm5124_vm1, %v5087_v47  ;;  %v4857_v37 = vpack.c.bf16 %v4345_v18, %v4345_v18  ;;  %v3435_v4 = vpop.f32.mrf.mxu1  ;;  %v5751_v47 = vpack.c.bf16 %v15497_v0, %v15497_v0  ;;  %v3755_v18 = vpop.f32.mrf.mxu2 }
 0x4bd   : > { %7399 = vrot.lane.b32.xlu0 %v6006_v43, %s10519_s27  ;;  %v3115_v25 = vpop.f32.mrf.mxu0  ;;  %v5088_v43 = vpack.c.bf16 %v4576_v13, %v4576_v13  ;;  %v5878_v0 = vpack.c.bf16 %v15463_v55, %v15463_v55  ;;  %5242 = vst.msk [vmem:[%s10693_s28 + $0x1d4] sm:$0xf] %vm5124_vm1, %v4729_v31  ;;  %v15675_v13 = vadd.f32 %v15622_v29, %v3755_v18 }
 0x4be   : > { %v6864_v40 = vpop.permute.xlu2 %6863  ;;  %v7114_v38 = vpop.permute.xlu1 %7113  ;;  %v15662_v36 = vadd.f32 %v15622_v29, %v3115_v25  ;;  %5370 = vst.msk [vmem:[%s10693_s28 + $0x3d4] sm:$0xf] %vm5124_vm1, %v4857_v37 }
 0x4bf   : > { %8298 = vst.msk [vmem:[%s11027_s6 + $0x194] sm:$0xf] %vm5124_vm1, %v6864_v40  ;;  %v6860_v56 = vpop.permute.xlu0 %6859  ;;  %v15665_v40 = vadd.f32 %v15622_v29, %v3435_v4  ;;  %v4474_v6 = vmax.f32 %v15675_v13, 0.0  ;;  %10117 = vmatmul.msk.bf16.gmra.mxu3 %vm2042_vm0, %v10378_v41 }
 0x4c0   : > { %8423 = vst.msk [vmem:[%s11027_s6 + $0x388] sm:$0xf] %vm5124_vm1, %v7114_v38  ;;  %v4012_v38 = vpop.f32.mrf.mxu3  ;;  %v4218_v4 = vmax.f32 %v15662_v36, 0.0 }
 0x4c1   : > { %8296 = vst.msk [vmem:[%s11027_s6 + $0x18c] sm:$0xf] %vm5124_vm1, %v6860_v56  ;;  %v15678_v56 = vadd.f32 %v15622_v29, %v4012_v38  ;;  %v4346_v25 = vmax.f32 %v15665_v40, 0.0 }
 0x4c2   : > { %5498 = vst.msk [vmem:[%s10693_s28 + $0x5d4] sm:$0xf] %vm5124_vm1, %v4985_v2  ;;  %v4730_v18 = vpack.c.bf16 %v4218_v4, %v4218_v4  ;;  %v5879_v2 = vpack.c.bf16 %v15500_v53, %v15500_v53 }
 0x4c3   : > { %16810 = vst [vmem:[#allocation10_spill] sm:$0xff] %v15678_v56  ;;  %v4577_v55 = vmax.f32 %v15678_v56, 0.0  ;;  %v4858_v38 = vpack.c.bf16 %v4346_v25, %v4346_v25 }
 0x4c4   : > { %6887 = vrot.lane.b32.xlu2 %v5750_v51, %s10519_s27  ;;  %7143 = vrot.lane.b32.xlu1 %v5878_v0, %s10519_s27  ;;  %5601 = vst.msk [vmem:[%s10693_s28 + $0x770] sm:$0xf] %vm5124_vm1, %v5088_v43  ;;  %v4986_v43 = vpack.c.bf16 %v4474_v6, %v4474_v6  ;;  %v3437_v41 = vpop.f32.mrf.mxu1  ;;  %v3757_v53 = vpop.f32.mrf.mxu2 }
 0x4c5   : > { %6889 = vrot.lane.b32.xlu0 %v5751_v47, %s10519_s27  ;;  %v6007_v47 = vpack.c.bf16 %v15510_v7, %v15510_v7  ;;  %v3117_v0 = vpop.f32.mrf.mxu0  ;;  %v5089_v4 = vpack.c.bf16 %v4577_v55, %v4577_v55  ;;  %v15708_v25 = vadd.f32 %v15622_v29, %v3437_v41  ;;  %5243 = vst.msk [vmem:[%s10693_s28 + $0x1d8] sm:$0xf] %vm5124_vm1, %v4730_v18 }
 0x4c6   : > { %v7122_v31 = vpop.permute.xlu2 %7121  ;;  %v7372_v37 = vpop.permute.xlu1 %7371  ;;  %v15713_v7 = vadd.f32 %v15622_v29, %v3757_v53  ;;  %v5880_v55 = vpack.c.bf16 %v15543_v9, %v15543_v9  ;;  %5371 = vst.msk [vmem:[%s10693_s28 + $0x3d8] sm:$0xf] %vm5124_vm1, %v4858_v38 }
 0x4c7   : > { %8427 = vst.msk [vmem:[%s11027_s6 + $0x398] sm:$0xf] %vm5124_vm1, %v7122_v31  ;;  %v7118_v51 = vpop.permute.xlu0 %7117  ;;  %v15705_v31 = vadd.f32 %v15622_v29, %v3117_v0 }
 0x4c8   : > { %8552 = vst.msk [vmem:[%s11027_s6 + $0x58c] sm:$0xf] %vm5124_vm1, %v7372_v37  ;;  %v4015_v56 = vpop.f32.mrf.mxu3 }
 0x4c9   : > { %8425 = vst.msk [vmem:[%s11027_s6 + $0x390] sm:$0xf] %vm5124_vm1, %v7118_v51  ;;  %v15716_v6 = vadd.f32 %v15622_v29, %v4015_v56  ;;  %v4219_v37 = vmax.f32 %v15705_v31, 0.0  ;;  %v4347_v51 = vmax.f32 %v15708_v25, 0.0  ;;  %v4475_v56 = vmax.f32 %v15713_v7, 0.0 }
 0x4ca   : > { %5499 = vst.msk [vmem:[%s10693_s28 + $0x5d8] sm:$0xf] %vm5124_vm1, %v4986_v43 }
 0x4cb   : > { %16811 = vst [vmem:[#allocation11_spill] sm:$0xff] %v15716_v6  ;;  %v4578_v9 = vmax.f32 %v15716_v6, 0.0  ;;  %v4731_v0 = vpack.c.bf16 %v4219_v37, %v4219_v37  ;;  %v4987_v43 = vpack.c.bf16 %v4475_v56, %v4475_v56  ;;  %v10379_v56 = vld [vmem:[%s10615_s13 + $0x7c0] sm:$0xff]  ;;  %v5752_v6 = vpack.c.bf16 %v15540_v46, %v15540_v46 }
 0x4cc   : > { %7145 = vrot.lane.b32.xlu2 %v5879_v2, %s10519_s27  ;;  %7401 = vrot.lane.b32.xlu1 %v6007_v47, %s10519_s27  ;;  %5602 = vst.msk [vmem:[%s10693_s28 + $0x774] sm:$0xf] %vm5124_vm1, %v5089_v4  ;;  %v4859_v47 = vpack.c.bf16 %v4347_v51, %v4347_v51  ;;  %v3440_v53 = vpop.f32.mrf.mxu1  ;;  %v6009_v4 = vpack.c.bf16 %v15590_v22, %v15590_v22  ;;  %v3760_v51 = vpop.f32.mrf.mxu2 }
 0x4cd   : > { %7147 = vrot.lane.b32.xlu0 %v5880_v55, %s10519_s27  ;;  %v3120_v41 = vpop.f32.mrf.mxu0  ;;  %v5090_v55 = vpack.c.bf16 %v4578_v9, %v4578_v9  ;;  %v6008_v22 = vpack.c.bf16 %v15548_v50, %v15548_v50  ;;  %5244 = vst.msk [vmem:[%s10693_s28 + $0x1dc] sm:$0xf] %vm5124_vm1, %v4731_v0  ;;  %v15755_v9 = vadd.f32 %v15622_v29, %v3760_v51 }
 0x4ce   : > { %v7380_v18 = vpop.permute.xlu2 %7379  ;;  %v6862_v38 = vpop.permute.xlu1 %6861  ;;  %v15742_v37 = vadd.f32 %v15622_v29, %v3120_v41  ;;  %5372 = vst.msk [vmem:[%s10693_s28 + $0x3dc] sm:$0xf] %vm5124_vm1, %v4859_v47 }
 0x4cf   : > { %8556 = vst.msk [vmem:[%s11027_s6 + $0x59c] sm:$0xf] %vm5124_vm1, %v7380_v18  ;;  %v7376_v2 = vpop.permute.xlu0 %7375  ;;  %v15745_v18 = vadd.f32 %v15622_v29, %v3440_v53  ;;  %v4476_v46 = vmax.f32 %v15755_v9, 0.0  ;;  %10118 = vmatmul.msk.bf16.gmra.mxu3 %vm2042_vm0, %v10379_v56 }
 0x4d0   : > { %8297 = vst.msk [vmem:[%s11027_s6 + $0x190] sm:$0xf] %vm5124_vm1, %v6862_v38  ;;  %v4017_v38 = vpop.f32.mrf.mxu3  ;;  %v4220_v41 = vmax.f32 %v15742_v37, 0.0 }
 0x4d1   : > { %8554 = vst.msk [vmem:[%s11027_s6 + $0x594] sm:$0xf] %vm5124_vm1, %v7376_v2  ;;  %v15758_v2 = vadd.f32 %v15622_v29, %v4017_v38  ;;  %v4348_v53 = vmax.f32 %v15745_v18, 0.0 }
 0x4d2   : > { %5500 = vst.msk [vmem:[%s10693_s28 + $0x5dc] sm:$0xf] %vm5124_vm1, %v4987_v43  ;;  %v4732_v51 = vpack.c.bf16 %v4220_v41, %v4220_v41  ;;  %v5753_v43 = vpack.c.bf16 %v15577_v54, %v15577_v54 }
 0x4d3   : > { %16812 = vst [vmem:[#allocation12_spill] sm:$0xff] %v15758_v2  ;;  %v4579_v50 = vmax.f32 %v15758_v2, 0.0  ;;  %v4860_v38 = vpack.c.bf16 %v4348_v53, %v4348_v53 }
 0x4d4   : > { %7403 = vrot.lane.b32.xlu2 %v6008_v22, %s10519_s27  ;;  %6891 = vrot.lane.b32.xlu1 %v5752_v6, %s10519_s27  ;;  %5603 = vst.msk [vmem:[%s10693_s28 + $0x778] sm:$0xf] %vm5124_vm1, %v5090_v55  ;;  %v4988_v55 = vpack.c.bf16 %v4476_v46, %v4476_v46  ;;  %v3442_v56 = vpop.f32.mrf.mxu1  ;;  %v3762_v54 = vpop.f32.mrf.mxu2 }
 0x4d5   : > { %7405 = vrot.lane.b32.xlu0 %v6009_v4, %s10519_s27  ;;  %v5881_v4 = vpack.c.bf16 %v15580_v58, %v15580_v58  ;;  %v3122_v22 = vpop.f32.mrf.mxu0  ;;  %v5091_v41 = vpack.c.bf16 %v4579_v50, %v4579_v50  ;;  %v15788_v53 = vadd.f32 %v15622_v29, %v3442_v56  ;;  %5245 = vst.msk [vmem:[%s10693_s28 + $0x1e0] sm:$0xf] %vm5124_vm1, %v4732_v51 }
 0x4d6   : > { %v6870_v0 = vpop.permute.xlu2 %6869  ;;  %v7120_v47 = vpop.permute.xlu1 %7119  ;;  %v15793_v58 = vadd.f32 %v15622_v29, %v3762_v54  ;;  %v5754_v50 = vpack.c.bf16 %v15625_v15, %v15625_v15  ;;  %5373 = vst.msk [vmem:[%s10693_s28 + $0x3e0] sm:$0xf] %vm5124_vm1, %v4860_v38 }
 0x4d7   : > { %8301 = vst.msk [vmem:[%s11027_s6 + $0x1a0] sm:$0xf] %vm5124_vm1, %v6870_v0  ;;  %v6866_v6 = vpop.permute.xlu0 %6865  ;;  %v15785_v0 = vadd.f32 %v15622_v29, %v3122_v22 }
 0x4d8   : > { %8426 = vst.msk [vmem:[%s11027_s6 + $0x394] sm:$0xf] %vm5124_vm1, %v7120_v47  ;;  %v4020_v2 = vpop.f32.mrf.mxu3 }
 0x4d9   : > { %8299 = vst.msk [vmem:[%s11027_s6 + $0x198] sm:$0xf] %vm5124_vm1, %v6866_v6  ;;  %v15796_v46 = vadd.f32 %v15622_v29, %v4020_v2  ;;  %v4221_v47 = vmax.f32 %v15785_v0, 0.0  ;;  %v4349_v6 = vmax.f32 %v15788_v53, 0.0  ;;  %v4477_v2 = vmax.f32 %v15793_v58, 0.0 }
 0x4da   : > { %5501 = vst.msk [vmem:[%s10693_s28 + $0x5e0] sm:$0xf] %vm5124_vm1, %v4988_v55 }
 0x4db   : > { %16813 = vst [vmem:[#allocation13_spill] sm:$0xff] %v15796_v46  ;;  %v4580_v15 = vmax.f32 %v15796_v46, 0.0  ;;  %v4733_v22 = vpack.c.bf16 %v4221_v47, %v4221_v47  ;;  %v4989_v55 = vpack.c.bf16 %v4477_v2, %v4477_v2  ;;  %v10380_v2 = vld [vmem:[%s10615_s13 + $0x7c8] sm:$0xff]  ;;  %v5882_v46 = vpack.c.bf16 %v15628_v59, %v15628_v59 }
 0x4dc   : > { %6893 = vrot.lane.b32.xlu2 %v5753_v43, %s10519_s27  ;;  %7149 = vrot.lane.b32.xlu1 %v5881_v4, %s10519_s27  ;;  %5604 = vst.msk [vmem:[%s10693_s28 + $0x77c] sm:$0xf] %vm5124_vm1, %v5091_v41  ;;  %v4861_v4 = vpack.c.bf16 %v4349_v6, %v4349_v6  ;;  %v3445_v54 = vpop.f32.mrf.mxu1  ;;  %v5883_v41 = vpack.c.bf16 %v15665_v40, %v15665_v40  ;;  %v3765_v6 = vpop.f32.mrf.mxu2 }
 0x4dd   : > { %6895 = vrot.lane.b32.xlu0 %v5754_v50, %s10519_s27  ;;  %v3125_v56 = vpop.f32.mrf.mxu0  ;;  %v5092_v50 = vpack.c.bf16 %v4580_v15, %v4580_v15  ;;  %v6010_v40 = vpack.c.bf16 %v15633_v24, %v15633_v24  ;;  %5246 = vst.msk [vmem:[%s10693_s28 + $0x1e4] sm:$0xf] %vm5124_vm1, %v4733_v22  ;;  %v15835_v15 = vadd.f32 %v15622_v29, %v3765_v6 }
 0x4de   : > { %v7128_v51 = vpop.permute.xlu2 %7127  ;;  %v7378_v38 = vpop.permute.xlu1 %7377  ;;  %v15822_v47 = vadd.f32 %v15622_v29, %v3125_v56  ;;  %5374 = vst.msk [vmem:[%s10693_s28 + $0x3e4] sm:$0xf] %vm5124_vm1, %v4861_v4 }
 0x4df   : > { %8430 = vst.msk [vmem:[%s11027_s6 + $0x3a4] sm:$0xf] %vm5124_vm1, %v7128_v51  ;;  %v7124_v43 = vpop.permute.xlu0 %7123  ;;  %v15825_v51 = vadd.f32 %v15622_v29, %v3445_v54  ;;  %v4478_v59 = vmax.f32 %v15835_v15, 0.0  ;;  %10119 = vmatmul.msk.bf16.gmra.mxu3 %vm2042_vm0, %v10380_v2 }
 0x4e0   : > { %8555 = vst.msk [vmem:[%s11027_s6 + $0x598] sm:$0xf] %vm5124_vm1, %v7378_v38  ;;  %v4022_v38 = vpop.f32.mrf.mxu3  ;;  %v4222_v56 = vmax.f32 %v15822_v47, 0.0 }
 0x4e1   : > { %8428 = vst.msk [vmem:[%s11027_s6 + $0x39c] sm:$0xf] %vm5124_vm1, %v7124_v43  ;;  %v15838_v43 = vadd.f32 %v15622_v29, %v4022_v38  ;;  %v4350_v54 = vmax.f32 %v15825_v51, 0.0 }
 0x4e2   : > { %5502 = vst.msk [vmem:[%s10693_s28 + $0x5e4] sm:$0xf] %vm5124_vm1, %v4989_v55  ;;  %v4734_v6 = vpack.c.bf16 %v4222_v56, %v4222_v56  ;;  %v5755_v55 = vpack.c.bf16 %v15662_v36, %v15662_v36 }
 0x4e3   : > { %16814 = vst [vmem:[#allocation14_spill] sm:$0xff] %v15838_v43  ;;  %v4581_v24 = vmax.f32 %v15838_v43, 0.0  ;;  %v4862_v38 = vpack.c.bf16 %v4350_v54, %v4350_v54 }
 0x4e4   : > { %7151 = vrot.lane.b32.xlu2 %v5882_v46, %s10519_s27  ;;  %7407 = vrot.lane.b32.xlu1 %v6010_v40, %s10519_s27  ;;  %5605 = vst.msk [vmem:[%s10693_s28 + $0x780] sm:$0xf] %vm5124_vm1, %v5092_v50  ;;  %v4990_v50 = vpack.c.bf16 %v4478_v59, %v4478_v59  ;;  %v3447_v2 = vpop.f32.mrf.mxu1  ;;  %v3767_v36 = vpop.f32.mrf.mxu2 }
 0x4e5   : > { %7153 = vrot.lane.b32.xlu0 %v5883_v41, %s10519_s27  ;;  %v6011_v41 = vpack.c.bf16 %v15675_v13, %v15675_v13  ;;  %v3127_v40 = vpop.f32.mrf.mxu0  ;;  %v5093_v56 = vpack.c.bf16 %v4581_v24, %v4581_v24  ;;  %v15868_v54 = vadd.f32 %v15622_v29, %v3447_v2  ;;  %5247 = vst.msk [vmem:[%s10693_s28 + $0x1e8] sm:$0xf] %vm5124_vm1, %v4734_v6 }
 0x4e6   : > { %v7386_v22 = vpop.permute.xlu2 %7385  ;;  %v6868_v4 = vpop.permute.xlu1 %6867  ;;  %v15873_v13 = vadd.f32 %v15622_v29, %v3767_v36  ;;  %v6012_v24 = vpack.c.bf16 %v15713_v7, %v15713_v7  ;;  %5375 = vst.msk [vmem:[%s10693_s28 + $0x3e8] sm:$0xf] %vm5124_vm1, %v4862_v38 }
 0x4e7   : > { %8559 = vst.msk [vmem:[%s11027_s6 + $0x5a8] sm:$0xf] %vm5124_vm1, %v7386_v22  ;;  %v7382_v46 = vpop.permute.xlu0 %7381  ;;  %v15865_v22 = vadd.f32 %v15622_v29, %v3127_v40 }
 0x4e8   : > { %8300 = vst.msk [vmem:[%s11027_s6 + $0x19c] sm:$0xf] %vm5124_vm1, %v6868_v4  ;;  %v4025_v43 = vpop.f32.mrf.mxu3 }
 0x4e9   : > { %8557 = vst.msk [vmem:[%s11027_s6 + $0x5a0] sm:$0xf] %vm5124_vm1, %v7382_v46  ;;  %v15876_v59 = vadd.f32 %v15622_v29, %v4025_v43  ;;  %v4223_v4 = vmax.f32 %v15865_v22, 0.0  ;;  %v4351_v46 = vmax.f32 %v15868_v54, 0.0  ;;  %v4479_v43 = vmax.f32 %v15873_v13, 0.0 }
 0x4ea   : > { %5503 = vst.msk [vmem:[%s10693_s28 + $0x5e8] sm:$0xf] %vm5124_vm1, %v4990_v50 }
 0x4eb   : > { %16815 = vst [vmem:[#allocation15_spill] sm:$0xff] %v15876_v59  ;;  %v4582_v7 = vmax.f32 %v15876_v59, 0.0  ;;  %v4735_v40 = vpack.c.bf16 %v4223_v4, %v4223_v4  ;;  %v4991_v50 = vpack.c.bf16 %v4479_v43, %v4479_v43  ;;  %v10381_v43 = vld [vmem:[%s10615_s13 + $0x7d0] sm:$0xff]  ;;  %v5756_v59 = vpack.c.bf16 %v15705_v31, %v15705_v31 }
 0x4ec   : > { %7409 = vrot.lane.b32.xlu2 %v6011_v41, %s10519_s27  ;;  %6897 = vrot.lane.b32.xlu1 %v5755_v55, %s10519_s27  ;;  %5606 = vst.msk [vmem:[%s10693_s28 + $0x784] sm:$0xf] %vm5124_vm1, %v5093_v56  ;;  %v4863_v55 = vpack.c.bf16 %v4351_v46, %v4351_v46  ;;  %v3450_v36 = vpop.f32.mrf.mxu1  ;;  %v5757_v56 = vpack.c.bf16 %v15742_v37, %v15742_v37  ;;  %v3770_v46 = vpop.f32.mrf.mxu2 }
 0x4ed   : > { %7411 = vrot.lane.b32.xlu0 %v6012_v24, %s10519_s27  ;;  %v3130_v2 = vpop.f32.mrf.mxu0  ;;  %v5094_v24 = vpack.c.bf16 %v4582_v7, %v4582_v7  ;;  %v5884_v37 = vpack.c.bf16 %v15708_v25, %v15708_v25  ;;  %5248 = vst.msk [vmem:[%s10693_s28 + $0x1ec] sm:$0xf] %vm5124_vm1, %v4735_v40  ;;  %v15915_v7 = vadd.f32 %v15622_v29, %v3770_v46 }
 0x4ee   : > { %v6876_v6 = vpop.permute.xlu2 %6875  ;;  %v7126_v38 = vpop.permute.xlu1 %7125  ;;  %v15902_v4 = vadd.f32 %v15622_v29, %v3130_v2  ;;  %5376 = vst.msk [vmem:[%s10693_s28 + $0x3ec] sm:$0xf] %vm5124_vm1, %v4863_v55 }
 0x4ef   : > { %8304 = vst.msk [vmem:[%s11027_s6 + $0x1ac] sm:$0xf] %vm5124_vm1, %v6876_v6  ;;  %v6872_v41 = vpop.permute.xlu0 %6871  ;;  %v15905_v6 = vadd.f32 %v15622_v29, %v3450_v36  ;;  %v4480_v31 = vmax.f32 %v15915_v7, 0.0  ;;  %10120 = vmatmul.msk.bf16.gmra.mxu3 %vm2042_vm0, %v10381_v43 }
 0x4f0   : > { %8429 = vst.msk [vmem:[%s11027_s6 + $0x3a0] sm:$0xf] %vm5124_vm1, %v7126_v38  ;;  %v4027_v38 = vpop.f32.mrf.mxu3  ;;  %v4224_v2 = vmax.f32 %v15902_v4, 0.0 }
 0x4f1   : > { %8302 = vst.msk [vmem:[%s11027_s6 + $0x1a4] sm:$0xf] %vm5124_vm1, %v6872_v41  ;;  %v15918_v41 = vadd.f32 %v15622_v29, %v4027_v38  ;;  %v4352_v36 = vmax.f32 %v15905_v6, 0.0 }
 0x4f2   : > { %5504 = vst.msk [vmem:[%s10693_s28 + $0x5ec] sm:$0xf] %vm5124_vm1, %v4991_v50  ;;  %v4736_v46 = vpack.c.bf16 %v4224_v2, %v4224_v2  ;;  %v5885_v50 = vpack.c.bf16 %v15745_v18, %v15745_v18 }
 0x4f3   : > { %16816 = vst [vmem:[#allocation16_spill] sm:$0xff] %v15918_v41  ;;  %v4583_v25 = vmax.f32 %v15918_v41, 0.0  ;;  %v4864_v38 = vpack.c.bf16 %v4352_v36, %v4352_v36 }
 0x4f4   : > { %6899 = vrot.lane.b32.xlu2 %v5756_v59, %s10519_s27  ;;  %7155 = vrot.lane.b32.xlu1 %v5884_v37, %s10519_s27  ;;  %5607 = vst.msk [vmem:[%s10693_s28 + $0x788] sm:$0xf] %vm5124_vm1, %v5094_v24  ;;  %v4992_v24 = vpack.c.bf16 %v4480_v31, %v4480_v31  ;;  %v3452_v43 = vpop.f32.mrf.mxu1  ;;  %v3772_v18 = vpop.f32.mrf.mxu2 }
 0x4f5   : > { %6901 = vrot.lane.b32.xlu0 %v5757_v56, %s10519_s27  ;;  %v6013_v56 = vpack.c.bf16 %v15755_v9, %v15755_v9  ;;  %v3132_v37 = vpop.f32.mrf.mxu0  ;;  %v5095_v2 = vpack.c.bf16 %v4583_v25, %v4583_v25  ;;  %v15948_v36 = vadd.f32 %v15622_v29, %v3452_v43  ;;  %5249 = vst.msk [vmem:[%s10693_s28 + $0x1f0] sm:$0xf] %vm5124_vm1, %v4736_v46 }
 0x4f6   : > { %v7134_v40 = vpop.permute.xlu2 %7133  ;;  %v7384_v55 = vpop.permute.xlu1 %7383  ;;  %v15953_v9 = vadd.f32 %v15622_v29, %v3772_v18  ;;  %v5886_v25 = vpack.c.bf16 %v15788_v53, %v15788_v53  ;;  %5377 = vst.msk [vmem:[%s10693_s28 + $0x3f0] sm:$0xf] %vm5124_vm1, %v4864_v38 }
 0x4f7   : > { %8433 = vst.msk [vmem:[%s11027_s6 + $0x3b0] sm:$0xf] %vm5124_vm1, %v7134_v40  ;;  %v7130_v59 = vpop.permute.xlu0 %7129  ;;  %v15945_v40 = vadd.f32 %v15622_v29, %v3132_v37 }
 0x4f8   : > { %8558 = vst.msk [vmem:[%s11027_s6 + $0x5a4] sm:$0xf] %vm5124_vm1, %v7384_v55  ;;  %v4030_v41 = vpop.f32.mrf.mxu3 }
 0x4f9   : > { %8431 = vst.msk [vmem:[%s11027_s6 + $0x3a8] sm:$0xf] %vm5124_vm1, %v7130_v59  ;;  %v15956_v31 = vadd.f32 %v15622_v29, %v4030_v41  ;;  %v4225_v55 = vmax.f32 %v15945_v40, 0.0  ;;  %v4353_v59 = vmax.f32 %v15948_v36, 0.0  ;;  %v4481_v41 = vmax.f32 %v15953_v9, 0.0 }
 0x4fa   : > { %5505 = vst.msk [vmem:[%s10693_s28 + $0x5f0] sm:$0xf] %vm5124_vm1, %v4992_v24 }
 0x4fb   : > { %16817 = vst [vmem:[#allocation17_spill] sm:$0xff] %v15956_v31  ;;  %v4584_v53 = vmax.f32 %v15956_v31, 0.0  ;;  %v4737_v37 = vpack.c.bf16 %v4225_v55, %v4225_v55  ;;  %v4993_v24 = vpack.c.bf16 %v4481_v41, %v4481_v41  ;;  %v10382_v41 = vld [vmem:[%s10615_s13 + $0x7d8] sm:$0xff]  ;;  %v5758_v31 = vpack.c.bf16 %v15785_v0, %v15785_v0 }
 0x4fc   : > { %7157 = vrot.lane.b32.xlu2 %v5885_v50, %s10519_s27  ;;  %7413 = vrot.lane.b32.xlu1 %v6013_v56, %s10519_s27  ;;  %5608 = vst.msk [vmem:[%s10693_s28 + $0x78c] sm:$0xf] %vm5124_vm1, %v5095_v2  ;;  %v4865_v56 = vpack.c.bf16 %v4353_v59, %v4353_v59  ;;  %v3455_v18 = vpop.f32.mrf.mxu1  ;;  %v6015_v2 = vpack.c.bf16 %v15835_v15, %v15835_v15  ;;  %v3775_v59 = vpop.f32.mrf.mxu2 }
 0x4fd   : > { %7159 = vrot.lane.b32.xlu0 %v5886_v25, %s10519_s27  ;;  %v3135_v43 = vpop.f32.mrf.mxu0  ;;  %v5096_v25 = vpack.c.bf16 %v4584_v53, %v4584_v53  ;;  %v6014_v15 = vpack.c.bf16 %v15793_v58, %v15793_v58  ;;  %5250 = vst.msk [vmem:[%s10693_s28 + $0x1f4] sm:$0xf] %vm5124_vm1, %v4737_v37  ;;  %v15995_v53 = vadd.f32 %v15622_v29, %v3775_v59 }
 0x4fe   : > { %v7392_v46 = vpop.permute.xlu2 %7391  ;;  %v6874_v38 = vpop.permute.xlu1 %6873  ;;  %v15982_v55 = vadd.f32 %v15622_v29, %v3135_v43  ;;  %5378 = vst.msk [vmem:[%s10693_s28 + $0x3f4] sm:$0xf] %vm5124_vm1, %v4865_v56 }
 0x4ff   : > { %8562 = vst.msk [vmem:[%s11027_s6 + $0x5b4] sm:$0xf] %vm5124_vm1, %v7392_v46  ;;  %v7388_v50 = vpop.permute.xlu0 %7387  ;;  %v15985_v46 = vadd.f32 %v15622_v29, %v3455_v18  ;;  %v4482_v0 = vmax.f32 %v15995_v53, 0.0  ;;  %10121 = vmatmul.msk.bf16.gmra.mxu3 %vm2042_vm0, %v10382_v41 }
 0x500   : > { %8303 = vst.msk [vmem:[%s11027_s6 + $0x1a8] sm:$0xf] %vm5124_vm1, %v6874_v38  ;;  %v4032_v38 = vpop.f32.mrf.mxu3  ;;  %v4226_v43 = vmax.f32 %v15982_v55, 0.0 }
 0x501   : > { %8560 = vst.msk [vmem:[%s11027_s6 + $0x5ac] sm:$0xf] %vm5124_vm1, %v7388_v50  ;;  %v15998_v50 = vadd.f32 %v15622_v29, %v4032_v38  ;;  %v4354_v18 = vmax.f32 %v15985_v46, 0.0 }
 0x502   : > { %5506 = vst.msk [vmem:[%s10693_s28 + $0x5f4] sm:$0xf] %vm5124_vm1, %v4993_v24  ;;  %v4738_v59 = vpack.c.bf16 %v4226_v43, %v4226_v43  ;;  %v5759_v24 = vpack.c.bf16 %v15822_v47, %v15822_v47 }
 0x503   : > { %16818 = vst [vmem:[#allocation18_spill] sm:$0xff] %v15998_v50  ;;  %v4585_v58 = vmax.f32 %v15998_v50, 0.0  ;;  %v4866_v38 = vpack.c.bf16 %v4354_v18, %v4354_v18 }
 0x504   : > { %7415 = vrot.lane.b32.xlu2 %v6014_v15, %s10519_s27  ;;  %6903 = vrot.lane.b32.xlu1 %v5758_v31, %s10519_s27  ;;  %5609 = vst.msk [vmem:[%s10693_s28 + $0x790] sm:$0xf] %vm5124_vm1, %v5096_v25  ;;  %v4994_v25 = vpack.c.bf16 %v4482_v0, %v4482_v0  ;;  %v3457_v41 = vpop.f32.mrf.mxu1  ;;  %v3777_v47 = vpop.f32.mrf.mxu2 }
 0x505   : > { %7417 = vrot.lane.b32.xlu0 %v6015_v2, %s10519_s27  ;;  %v5887_v2 = vpack.c.bf16 %v15825_v51, %v15825_v51  ;;  %v3137_v15 = vpop.f32.mrf.mxu0  ;;  %v5097_v43 = vpack.c.bf16 %v4585_v58, %v4585_v58  ;;  %v16028_v18 = vadd.f32 %v15622_v29, %v3457_v41  ;;  %5251 = vst.msk [vmem:[%s10693_s28 + $0x1f8] sm:$0xf] %vm5124_vm1, %v4738_v59 }
 0x506   : > { %v6882_v37 = vpop.permute.xlu2 %6881  ;;  %v7132_v56 = vpop.permute.xlu1 %7131  ;;  %v16033_v51 = vadd.f32 %v15622_v29, %v3777_v47  ;;  %v5760_v58 = vpack.c.bf16 %v15865_v22, %v15865_v22  ;;  %5379 = vst.msk [vmem:[%s10693_s28 + $0x3f8] sm:$0xf] %vm5124_vm1, %v4866_v38  ;;  %v5889_v41 = vpack.c.bf16 %v15905_v6, %v15905_v6 }
 0x507   : > { %8307 = vst.msk [vmem:[%s11027_s6 + $0x1b8] sm:$0xf] %vm5124_vm1, %v6882_v37  ;;  %v6878_v31 = vpop.permute.xlu0 %6877  ;;  %v16025_v37 = vadd.f32 %v15622_v29, %v3137_v15 }
 0x508   : > { %8432 = vst.msk [vmem:[%s11027_s6 + $0x3ac] sm:$0xf] %vm5124_vm1, %v7132_v56  ;;  %v4035_v50 = vpop.f32.mrf.mxu3 }
 0x509   : > { %8305 = vst.msk [vmem:[%s11027_s6 + $0x1b0] sm:$0xf] %vm5124_vm1, %v6878_v31  ;;  %v16036_v0 = vadd.f32 %v15622_v29, %v4035_v50  ;;  %v4227_v56 = vmax.f32 %v16025_v37, 0.0  ;;  %v4355_v31 = vmax.f32 %v16028_v18, 0.0  ;;  %v4483_v50 = vmax.f32 %v16033_v51, 0.0 }
 0x50a   : > { %5507 = vst.msk [vmem:[%s10693_s28 + $0x5f8] sm:$0xf] %vm5124_vm1, %v4994_v25 }
 0x50b   : > { %5610 = vst.msk [vmem:[%s10693_s28 + $0x794] sm:$0xf] %vm5124_vm1, %v5097_v43  ;;  %v4586_v22 = vmax.f32 %v16036_v0, 0.0  ;;  %v4739_v15 = vpack.c.bf16 %v4227_v56, %v4227_v56  ;;  %v4995_v25 = vpack.c.bf16 %v4483_v50, %v4483_v50  ;;  %v5888_v56 = vpack.c.bf16 %v15868_v54, %v15868_v54 }
 0x50c   : > { %6905 = vrot.lane.b32.xlu2 %v5759_v24, %s10519_s27  ;;  %7161 = vrot.lane.b32.xlu1 %v5887_v2, %s10519_s27  ;;  %v4867_v2 = vpack.c.bf16 %v4355_v31, %v4355_v31 }
 0x50d   : > { %6907 = vrot.lane.b32.xlu0 %v5760_v58, %s10519_s27  ;;  %v5098_v43 = vpack.c.bf16 %v4586_v22, %v4586_v22  ;;  %v10383_v58 = vld [vmem:[%s10615_s13 + $0x7e0] sm:$0xff]  ;;  %5252 = vst.msk [vmem:[%s10693_s28 + $0x1fc] sm:$0xf] %vm5124_vm1, %v4739_v15  ;;  %v6017_v15 = vpack.c.bf16 %v15915_v7, %v15915_v7 }
 0x50e   : > { %v7140_v59 = vpop.permute.xlu2 %7139  ;;  %v7390_v38 = vpop.permute.xlu1 %7389  ;;  %5380 = vst.msk [vmem:[%s10693_s28 + $0x3fc] sm:$0xf] %vm5124_vm1, %v4867_v2 }
 0x50f   : > { %8436 = vst.msk [vmem:[%s11027_s6 + $0x3bc] sm:$0xf] %vm5124_vm1, %v7140_v59  ;;  %v7136_v24 = vpop.permute.xlu0 %7135  ;;  %v6016_v59 = vpack.c.bf16 %v15873_v13, %v15873_v13  ;;  %10122 = vmatmul.msk.bf16.gmra.mxu3 %vm2042_vm0, %v10383_v58 }
 0x510   : > { %8561 = vst.msk [vmem:[%s11027_s6 + $0x5b0] sm:$0xf] %vm5124_vm1, %v7390_v38  ;;  %v4037_v47 = vpop.f32.mrf.mxu3  ;;  %v5761_v38 = vpack.c.bf16 %v15902_v4, %v15902_v4 }
 0x511   : > { %8434 = vst.msk [vmem:[%s11027_s6 + $0x3b4] sm:$0xf] %vm5124_vm1, %v7136_v24  ;;  %v16069_v31 = vadd.f32 %v15622_v29, %v4037_v47 }
 0x512   : > { %5508 = vst.msk [vmem:[%s10693_s28 + $0x5fc] sm:$0xf] %vm5124_vm1, %v4995_v25  ;;  %v6018_v25 = vpack.c.bf16 %v15953_v9, %v15953_v9  ;;  %v5763_v9 = vpack.c.bf16 %v15982_v55, %v15982_v55 }
 0x513   : > { %v4587_v54 = vmax.f32 %v16069_v31, 0.0  ;;  %5611 = vst.msk [vmem:[%s10693_s28 + $0x798] sm:$0xf] %vm5124_vm1, %v5098_v43 }
 0x514   : > { %7163 = vrot.lane.b32.xlu2 %v5888_v56, %s10519_s27  ;;  %7419 = vrot.lane.b32.xlu1 %v6016_v59, %s10519_s27  ;;  %v10384_v56 = vld [vmem:[%s10615_s13 + $0x7e8] sm:$0xff]  ;;  %v5762_v59 = vpack.c.bf16 %v15945_v40, %v15945_v40 }
 0x515   : > { %7165 = vrot.lane.b32.xlu0 %v5889_v41, %s10519_s27  ;;  %v5099_v50 = vpack.c.bf16 %v4587_v54, %v4587_v54  ;;  %v5890_v54 = vpack.c.bf16 %v15948_v36, %v15948_v36 }
 0x516   : > { %v7398_v13 = vpop.permute.xlu2 %7397  ;;  %v6880_v6 = vpop.permute.xlu1 %6879 }
 0x517   : > { %8565 = vst.msk [vmem:[%s11027_s6 + $0x5c0] sm:$0xf] %vm5124_vm1, %v7398_v13  ;;  %v7394_v22 = vpop.permute.xlu0 %7393 }
 0x518   : > { %8306 = vst.msk [vmem:[%s11027_s6 + $0x1b4] sm:$0xf] %vm5124_vm1, %v6880_v6  ;;  %v4040_v24 = vpop.f32.mrf.mxu3 }
 0x519   : > { %8563 = vst.msk [vmem:[%s11027_s6 + $0x5b8] sm:$0xf] %vm5124_vm1, %v7394_v22  ;;  %v16095_v2 = vadd.f32 %v15622_v29, %v4040_v24  ;;  %v5891_v22 = vpack.c.bf16 %v15985_v46, %v15985_v46 }
 0x51a   : > { %5612 = vst.msk [vmem:[%s10693_s28 + $0x79c] sm:$0xf] %vm5124_vm1, %v5099_v50 }
 0x51b   : > { %v4588_v4 = vmax.f32 %v16095_v2, 0.0 }
 0x51c   : > { %7421 = vrot.lane.b32.xlu2 %v6017_v15, %s10519_s27  ;;  %6909 = vrot.lane.b32.xlu1 %v5761_v38, %s10519_s27  ;;  %v6019_v38 = vpack.c.bf16 %v15995_v53, %v15995_v53 }
 0x51d   : > { %7423 = vrot.lane.b32.xlu0 %v6018_v25, %s10519_s27  ;;  %v5100_v43 = vpack.c.bf16 %v4588_v4, %v4588_v4  ;;  %v5892_v25 = vpack.c.bf16 %v16028_v18, %v16028_v18 }
 0x51e   : > { %v6888_v7 = vpop.permute.xlu2 %6887  ;;  %v7138_v41 = vpop.permute.xlu1 %7137 }
 0x51f   : > { %8310 = vst.msk [vmem:[%s11027_s6 + $0x1c4] sm:$0xf] %vm5124_vm1, %v6888_v7  ;;  %v6884_v47 = vpop.permute.xlu0 %6883  ;;  %10123 = vmatmul.msk.bf16.gmra.mxu3 %vm2042_vm0, %v10384_v56  ;;  %v6075_v56 = vpack.c.bf16 %v14008_v19, %v14008_v19 }
 0x520   : > { %8435 = vst.msk [vmem:[%s11027_s6 + $0x3b8] sm:$0xf] %vm5124_vm1, %v7138_v41  ;;  %v4042_v58 = vpop.f32.mrf.mxu3 }
 0x521   : > { %8308 = vst.msk [vmem:[%s11027_s6 + $0x1bc] sm:$0xf] %vm5124_vm1, %v6884_v47  ;;  %v16119_v13 = vadd.f32 %v15622_v29, %v4042_v58  ;;  %v6077_v47 = vpack.c.bf16 %v14092_v45, %v14092_v45 }
 0x522   : > { %5613 = vst.msk [vmem:[%s10693_s28 + $0x7a0] sm:$0xf] %vm5124_vm1, %v5100_v43  ;;  %v10385_v43 = vld [vmem:[%s10615_s13 + $0x7f0] sm:$0xff] }
 0x523   : > { %v4589_v55 = vmax.f32 %v16119_v13, 0.0 }
 0x524   : > { %6911 = vrot.lane.b32.xlu2 %v5762_v59, %s10519_s27  ;;  %7167 = vrot.lane.b32.xlu1 %v5890_v54, %s10519_s27 }
 0x525   : > { %6913 = vrot.lane.b32.xlu0 %v5763_v9, %s10519_s27  ;;  %v5101_v36 = vpack.c.bf16 %v4589_v55, %v4589_v55  ;;  %v5764_v9 = vpack.c.bf16 %v16025_v37, %v16025_v37 }
 0x526   : > { %v7146_v40 = vpop.permute.xlu2 %7145  ;;  %v7396_v6 = vpop.permute.xlu1 %7395 }
 0x527   : > { %8439 = vst.msk [vmem:[%s11027_s6 + $0x3c8] sm:$0xf] %vm5124_vm1, %v7146_v40  ;;  %v7142_v50 = vpop.permute.xlu0 %7141  ;;  %v6076_v40 = vpack.c.bf16 %v14051_v52, %v14051_v52 }
 0x528   : > { %8564 = vst.msk [vmem:[%s11027_s6 + $0x5bc] sm:$0xf] %vm5124_vm1, %v7396_v6  ;;  %v4045_v15 = vpop.f32.mrf.mxu3  ;;  %v6020_v6 = vpack.c.bf16 %v16033_v51, %v16033_v51 }
 0x529   : > { %8437 = vst.msk [vmem:[%s11027_s6 + $0x3c0] sm:$0xf] %vm5124_vm1, %v7142_v50  ;;  %v16139_v24 = vadd.f32 %v15622_v29, %v4045_v15  ;;  %v6078_v50 = vpack.c.bf16 %v14137_v12, %v14137_v12 }
 0x52a   : > { %5614 = vst.msk [vmem:[%s10693_s28 + $0x7a4] sm:$0xf] %vm5124_vm1, %v5101_v36 }
 0x52b   : > { %v4590_v46 = vmax.f32 %v16139_v24, 0.0 }
 0x52c   : > { %7169 = vrot.lane.b32.xlu2 %v5891_v22, %s10519_s27  ;;  %7425 = vrot.lane.b32.xlu1 %v6019_v38, %s10519_s27 }
 0x52d   : > { %7171 = vrot.lane.b32.xlu0 %v5892_v25, %s10519_s27  ;;  %v5102_v7 = vpack.c.bf16 %v4590_v46, %v4590_v46  ;;  %v10386_v25 = vld [vmem:[%s10615_s13 + $0x7f8] sm:$0xff]  ;;  %v6079_v46 = vpack.c.bf16 %v14178_v20, %v14178_v20 }
 0x52e   : > { %v7404_v53 = vpop.permute.xlu2 %7403  ;;  %v6886_v4 = vpop.permute.xlu1 %6885 }
 0x52f   : > { %8568 = vst.msk [vmem:[%s11027_s6 + $0x5cc] sm:$0xf] %vm5124_vm1, %v7404_v53  ;;  %v7400_v41 = vpop.permute.xlu0 %7399  ;;  %10124 = vmatmul.msk.bf16.gmra.mxu3 %vm2042_vm0, %v10385_v43  ;;  %v6080_v53 = vpack.c.bf16 %v14223_v10, %v14223_v10 }
 0x530   : > { %8309 = vst.msk [vmem:[%s11027_s6 + $0x1c0] sm:$0xf] %vm5124_vm1, %v6886_v4  ;;  %v4047_v18 = vpop.f32.mrf.mxu3 }
 0x531   : > { %8566 = vst.msk [vmem:[%s11027_s6 + $0x5c4] sm:$0xf] %vm5124_vm1, %v7400_v41  ;;  %v16161_v58 = vadd.f32 %v15622_v29, %v4047_v18 }
 0x532   : > { %5615 = vst.msk [vmem:[%s10693_s28 + $0x7a8] sm:$0xf] %vm5124_vm1, %v5102_v7  ;;  %v6081_v7 = vpack.c.bf16 %v14264_v61, %v14264_v61 }
 0x533   : > { %v4591_v59 = vmax.f32 %v16161_v58, 0.0 }
 0x534   : > { %7541 = vrot.lane.b32.xlu2 %v6077_v47, %s10519_s27  ;;  %6915 = vrot.lane.b32.xlu1 %v5764_v9, %s10519_s27  ;;  %v6082_v47 = vpack.c.bf16 %v14309_v1, %v14309_v1  ;;  %v6083_v9 = vpack.c.bf16 %v14355_v11, %v14355_v11 }
 0x535   : > { %7537 = vrot.lane.b32.xlu0 %v6075_v56, %s10519_s27  ;;  %v5103_v54 = vpack.c.bf16 %v4591_v59, %v4591_v59  ;;  %v6084_v59 = vpack.c.bf16 %v14400_v21, %v14400_v21 }
 0x536   : > { %v6894_v45 = vpop.permute.xlu2 %6893  ;;  %v7144_v37 = vpop.permute.xlu1 %7143 }
 0x537   : > { %8313 = vst.msk [vmem:[%s11027_s6 + $0x1d0] sm:$0xf] %vm5124_vm1, %v6894_v45  ;;  %v6890_v55 = vpop.permute.xlu0 %6889 }
 0x538   : > { %8438 = vst.msk [vmem:[%s11027_s6 + $0x3c4] sm:$0xf] %vm5124_vm1, %v7144_v37  ;;  %v4050_v19 = vpop.f32.mrf.mxu3 }
 0x539   : > { %8311 = vst.msk [vmem:[%s11027_s6 + $0x1c8] sm:$0xf] %vm5124_vm1, %v6890_v55  ;;  %v16183_v36 = vadd.f32 %v15622_v29, %v4050_v19  ;;  %v6085_v55 = vpack.c.bf16 %v14441_v49, %v14441_v49  ;;  %v6086_v19 = vpack.c.bf16 %v14486_v8, %v14486_v8 }
 0x53a   : > { %5616 = vst.msk [vmem:[%s10693_s28 + $0x7ac] sm:$0xf] %vm5124_vm1, %v5103_v54 }
 0x53b   : > { %v4592_v22 = vmax.f32 %v16183_v36, 0.0 }
 0x53c   : > { %7427 = vrot.lane.b32.xlu2 %v6020_v6, %s10519_s27  ;;  %7539 = vrot.lane.b32.xlu1 %v6076_v40, %s10519_s27  ;;  %v6087_v6 = vpack.c.bf16 %v14527_v42, %v14527_v42 }
 0x53d   : > { %7543 = vrot.lane.b32.xlu0 %v6078_v50, %s10519_s27  ;;  %v5104_v38 = vpack.c.bf16 %v4592_v22, %v4592_v22 }
 0x53e   : > { %v7152_v52 = vpop.permute.xlu2 %7151  ;;  %v7402_v51 = vpop.permute.xlu1 %7401 }
 0x53f   : > { %8442 = vst.msk [vmem:[%s11027_s6 + $0x3d4] sm:$0xf] %vm5124_vm1, %v7152_v52  ;;  %v7148_v15 = vpop.permute.xlu0 %7147  ;;  %10125 = vmatmul.msk.bf16.gmra.mxu3 %vm2042_vm0, %v10386_v25 }
 0x540   : > { %8567 = vst.msk [vmem:[%s11027_s6 + $0x5c8] sm:$0xf] %vm5124_vm1, %v7402_v51  ;;  %v4052_v12 = vpop.f32.mrf.mxu3  ;;  %v6089_v51 = vpack.c.bf16 %v14613_v60, %v14613_v60 }
 0x541   : > { %8440 = vst.msk [vmem:[%s11027_s6 + $0x3cc] sm:$0xf] %vm5124_vm1, %v7148_v15  ;;  %v16205_v4 = vadd.f32 %v15622_v29, %v4052_v12  ;;  %v6090_v12 = vpack.c.bf16 %v14658_v14, %v14658_v14 }
 0x542   : > { %5617 = vst.msk [vmem:[%s10693_s28 + $0x7b0] sm:$0xf] %vm5124_vm1, %v5104_v38  ;;  %v16271_v38 = vld [vmem:[%s16786_s2] ss:$0 sm:$0xff] }
 0x543   : > { %v4593_v41 = vmax.f32 %v16205_v4, 0.0 }
 0x544   : > { %7547 = vrot.lane.b32.xlu2 %v6080_v53, %s10519_s27  ;;  %7545 = vrot.lane.b32.xlu1 %v6079_v46, %s10519_s27 }
 0x545   : > { %7549 = vrot.lane.b32.xlu0 %v6081_v7, %s10519_s27  ;;  %v5105_v18 = vpack.c.bf16 %v4593_v41, %v4593_v41  ;;  %v6091_v7 = vpack.c.bf16 %v14699_v62, %v14699_v62  ;;  %v6092_v41 = vpack.c.bf16 %v14744_v5, %v14744_v5 }
 0x546   : > { %v7410_v20 = vpop.permute.xlu2 %7409  ;;  %v6892_v10 = vpop.permute.xlu1 %6891 }
 0x547   : > { %8571 = vst.msk [vmem:[%s11027_s6 + $0x5d8] sm:$0xf] %vm5124_vm1, %v7410_v20  ;;  %v7406_v43 = vpop.permute.xlu0 %7405 }
 0x548   : > { %8312 = vst.msk [vmem:[%s11027_s6 + $0x1cc] sm:$0xf] %vm5124_vm1, %v6892_v10  ;;  %v4055_v61 = vpop.f32.mrf.mxu3  ;;  %v6093_v10 = vpack.c.bf16 %v14785_v57, %v14785_v57 }
 0x549   : > { %8569 = vst.msk [vmem:[%s11027_s6 + $0x5d0] sm:$0xf] %vm5124_vm1, %v7406_v43  ;;  %v16227_v56 = vadd.f32 %v15622_v29, %v4055_v61 }
 0x54a   : > { %5618 = vst.msk [vmem:[%s10693_s28 + $0x7b4] sm:$0xf] %vm5124_vm1, %v5105_v18 }
 0x54b   : > { %v4594_v45 = vmax.f32 %v16227_v56, 0.0 }
 0x54c   : > { %7553 = vrot.lane.b32.xlu2 %v6083_v9, %s10519_s27  ;;  %7551 = vrot.lane.b32.xlu1 %v6082_v47, %s10519_s27  ;;  %v6094_v47 = vpack.c.bf16 %v14830_v17, %v14830_v17  ;;  %v6095_v9 = vpack.c.bf16 %v14871_v34, %v14871_v34 }
 0x54d   : > { %7555 = vrot.lane.b32.xlu0 %v6084_v59, %s10519_s27  ;;  %v5106_v11 = vpack.c.bf16 %v4594_v45, %v4594_v45  ;;  %v6096_v45 = vpack.c.bf16 %v14916_v33, %v14916_v33 }
 0x54e   : > { %v6900_v1 = vpop.permute.xlu2 %6899  ;;  %v7150_v37 = vpop.permute.xlu1 %7149 }
 0x54f   : > { %8316 = vst.msk [vmem:[%s11027_s6 + $0x1dc] sm:$0xf] %vm5124_vm1, %v6900_v1  ;;  %v6896_v54 = vpop.permute.xlu0 %6895 }
 0x550   : > { %8441 = vst.msk [vmem:[%s11027_s6 + $0x3d0] sm:$0xf] %vm5124_vm1, %v7150_v37  ;;  %v4057_v21 = vpop.f32.mrf.mxu3 }
 0x551   : > { %8314 = vst.msk [vmem:[%s11027_s6 + $0x1d4] sm:$0xf] %vm5124_vm1, %v6896_v54  ;;  %v16248_v40 = vadd.f32 %v15622_v29, %v4057_v21  ;;  %v6088_v29 = vpack.c.bf16 %v14572_v23, %v14572_v23  ;;  %v6097_v54 = vpack.c.bf16 %v14957_v26, %v14957_v26  ;;  %v6098_v21 = vpack.c.bf16 %v15007_v3, %v15007_v3 }
 0x552   : > { %5619 = vst.msk [vmem:[%s10693_s28 + $0x7b8] sm:$0xf] %vm5124_vm1, %v5106_v11 }
 0x553   : > { %v4595_v50 = vmax.f32 %v16248_v40, 0.0 }
 0x554   : > { %7559 = vrot.lane.b32.xlu2 %v6086_v19, %s10519_s27  ;;  %7557 = vrot.lane.b32.xlu1 %v6085_v55, %s10519_s27  ;;  %v6099_v19 = vpack.c.bf16 %v15048_v35, %v15048_v35 }
 0x555   : > { %7561 = vrot.lane.b32.xlu0 %v6087_v6, %s10519_s27  ;;  %v5107_v8 = vpack.c.bf16 %v4595_v50, %v4595_v50 }
 0x556   : > { %v7158_v49 = vpop.permute.xlu2 %7157  ;;  %v7408_v22 = vpop.permute.xlu1 %7407 }
 0x557   : > { %8445 = vst.msk [vmem:[%s11027_s6 + $0x3e0] sm:$0xf] %vm5124_vm1, %v7158_v49  ;;  %v7154_v52 = vpop.permute.xlu0 %7153 }
 0x558   : > { %8570 = vst.msk [vmem:[%s11027_s6 + $0x5d4] sm:$0xf] %vm5124_vm1, %v7408_v22  ;;  %v4060_v42 = vpop.f32.mrf.mxu3  ;;  %v6100_v22 = vpack.c.bf16 %v15093_v16, %v15093_v16 }
 0x559   : > { %8443 = vst.msk [vmem:[%s11027_s6 + $0x3d8] sm:$0xf] %vm5124_vm1, %v7154_v52  ;;  %v16274_v15 = vadd.f32 %v16271_v38, %v4060_v42  ;;  %v6102_v42 = vpack.c.bf16 %v15179_v27, %v15179_v27 }
 0x55a   : > { %5620 = vst.msk [vmem:[%s10693_s28 + $0x7bc] sm:$0xf] %vm5124_vm1, %v5107_v8  ;;  %v6101_v8 = vpack.c.bf16 %v15134_v44, %v15134_v44 }
 0x55b   : > { %v4596_v23 = vmax.f32 %v16274_v15, 0.0 }
 0x55c   : > { %7565 = vrot.lane.b32.xlu2 %v6089_v51, %s10519_s27  ;;  %7563 = vrot.lane.b32.xlu1 %v6088_v29, %s10519_s27 }
 0x55d   : > { %7567 = vrot.lane.b32.xlu0 %v6090_v12, %s10519_s27  ;;  %v5108_v46 = vpack.c.bf16 %v4596_v23, %v4596_v23  ;;  %v6103_v23 = vpack.c.bf16 %v15220_v30, %v15220_v30 }
 0x55e   : > { %v7416_v60 = vpop.permute.xlu2 %7415  ;;  %v6898_v25 = vpop.permute.xlu1 %6897 }
 0x55f   : > { %8574 = vst.msk [vmem:[%s11027_s6 + $0x5e4] sm:$0xf] %vm5124_vm1, %v7416_v60  ;;  %v7412_v53 = vpop.permute.xlu0 %7411  ;;  %v6104_v60 = vpack.c.bf16 %v15265_v32, %v15265_v32 }
 0x560   : > { %8315 = vst.msk [vmem:[%s11027_s6 + $0x1d8] sm:$0xf] %vm5124_vm1, %v6898_v25  ;;  %v4062_v14 = vpop.f32.mrf.mxu3 }
 0x561   : > { %8572 = vst.msk [vmem:[%s11027_s6 + $0x5dc] sm:$0xf] %vm5124_vm1, %v7412_v53  ;;  %v16295_v20 = vadd.f32 %v16271_v38, %v4062_v14 }
 0x562   : > { %5621 = vst.msk [vmem:[%s10693_s28 + $0x7c0] sm:$0xf] %vm5124_vm1, %v5108_v46  ;;  %v6105_v46 = vpack.c.bf16 %v15306_v48, %v15306_v48 }
 0x563   : > { %v4597_v18 = vmax.f32 %v16295_v20, 0.0 }
 0x564   : > { %7571 = vrot.lane.b32.xlu2 %v6092_v41, %s10519_s27  ;;  %7569 = vrot.lane.b32.xlu1 %v6091_v7, %s10519_s27  ;;  %v6106_v41 = vpack.c.bf16 %v15351_v39, %v15351_v39 }
 0x565   : > { %7573 = vrot.lane.b32.xlu0 %v6093_v10, %s10519_s27  ;;  %v5109_v5 = vpack.c.bf16 %v4597_v18, %v4597_v18  ;;  %v6107_v10 = vpack.c.bf16 %v15391_v28, %v15391_v28 }
 0x566   : > { %v6906_v62 = vpop.permute.xlu2 %6905  ;;  %v7156_v43 = vpop.permute.xlu1 %7155 }
 0x567   : > { %8319 = vst.msk [vmem:[%s11027_s6 + $0x1e8] sm:$0xf] %vm5124_vm1, %v6906_v62  ;;  %v6902_v61 = vpop.permute.xlu0 %6901  ;;  %v6108_v62 = vpack.c.bf16 %v15433_v63, %v15433_v63 }
 0x568   : > { %8444 = vst.msk [vmem:[%s11027_s6 + $0x3dc] sm:$0xf] %vm5124_vm1, %v7156_v43  ;;  %v4065_v57 = vpop.f32.mrf.mxu3 }
 0x569   : > { %8317 = vst.msk [vmem:[%s11027_s6 + $0x1e0] sm:$0xf] %vm5124_vm1, %v6902_v61  ;;  %v16316_v59 = vadd.f32 %v16271_v38, %v4065_v57  ;;  %v16819_v57 = vld [vmem:[#allocation5_spill] sm:$0xff] }
 0x56a   : > { %5622 = vst.msk [vmem:[%s10693_s28 + $0x7c4] sm:$0xf] %vm5124_vm1, %v5109_v5 }
 0x56b   : > { %v4598_v1 = vmax.f32 %v16316_v59, 0.0 }
 0x56c   : > { %7577 = vrot.lane.b32.xlu2 %v6095_v9, %s10519_s27  ;;  %7575 = vrot.lane.b32.xlu1 %v6094_v47, %s10519_s27  ;;  %v6109_v47 = vpack.c.bf16 %v16819_v57, %v16819_v57  ;;  %v16820_v9 = vld [vmem:[#allocation6_spill] sm:$0xff] }
 0x56d   : > { %7579 = vrot.lane.b32.xlu0 %v6096_v45, %s10519_s27  ;;  %v5110_v34 = vpack.c.bf16 %v4598_v1, %v4598_v1  ;;  %v6110_v45 = vpack.c.bf16 %v16820_v9, %v16820_v9 }
 0x56e   : > { %v7164_v17 = vpop.permute.xlu2 %7163  ;;  %v7414_v37 = vpop.permute.xlu1 %7413 }
 0x56f   : > { %8448 = vst.msk [vmem:[%s11027_s6 + $0x3ec] sm:$0xf] %vm5124_vm1, %v7164_v17  ;;  %v7160_v11 = vpop.permute.xlu0 %7159  ;;  %v16821_v17 = vld [vmem:[#allocation7_spill] sm:$0xff] }
 0x570   : > { %8573 = vst.msk [vmem:[%s11027_s6 + $0x5e0] sm:$0xf] %vm5124_vm1, %v7414_v37  ;;  %v4067_v33 = vpop.f32.mrf.mxu3  ;;  %v6111_v37 = vpack.c.bf16 %v16821_v17, %v16821_v17 }
 0x571   : > { %8446 = vst.msk [vmem:[%s11027_s6 + $0x3e4] sm:$0xf] %vm5124_vm1, %v7160_v11  ;;  %v16337_v55 = vadd.f32 %v16271_v38, %v4067_v33 }
 0x572   : > { %5623 = vst.msk [vmem:[%s10693_s28 + $0x7c8] sm:$0xf] %vm5124_vm1, %v5110_v34 }
 0x573   : > { %v4599_v6 = vmax.f32 %v16337_v55, 0.0 }
 0x574   : > { %7583 = vrot.lane.b32.xlu2 %v6098_v21, %s10519_s27  ;;  %7581 = vrot.lane.b32.xlu1 %v6097_v54, %s10519_s27 }
 0x575   : > { %7585 = vrot.lane.b32.xlu0 %v6099_v19, %s10519_s27  ;;  %v5111_v3 = vpack.c.bf16 %v4599_v6, %v4599_v6  ;;  %v16822_v6 = vld [vmem:[#allocation8_spill] sm:$0xff] }
 0x576   : > { %v7422_v26 = vpop.permute.xlu2 %7421  ;;  %v6904_v50 = vpop.permute.xlu1 %6903 }
 0x577   : > { %8577 = vst.msk [vmem:[%s11027_s6 + $0x5f0] sm:$0xf] %vm5124_vm1, %v7422_v26  ;;  %v7418_v49 = vpop.permute.xlu0 %7417  ;;  %v6112_v26 = vpack.c.bf16 %v16822_v6, %v16822_v6 }
 0x578   : > { %8318 = vst.msk [vmem:[%s11027_s6 + $0x1e4] sm:$0xf] %vm5124_vm1, %v6904_v50  ;;  %v4070_v35 = vpop.f32.mrf.mxu3  ;;  %v16823_v50 = vld [vmem:[#allocation9_spill] sm:$0xff] }
 0x579   : > { %8575 = vst.msk [vmem:[%s11027_s6 + $0x5e8] sm:$0xf] %vm5124_vm1, %v7418_v49  ;;  %v16358_v52 = vadd.f32 %v16271_v38, %v4070_v35  ;;  %v16824_v35 = vld [vmem:[#allocation10_spill] sm:$0xff] }
 0x57a   : > { %5624 = vst.msk [vmem:[%s10693_s28 + $0x7cc] sm:$0xf] %vm5124_vm1, %v5111_v3  ;;  %v6113_v3 = vpack.c.bf16 %v16823_v50, %v16823_v50 }
 0x57b   : > { %v4600_v29 = vmax.f32 %v16358_v52, 0.0 }
 0x57c   : > { %7589 = vrot.lane.b32.xlu2 %v6101_v8, %s10519_s27  ;;  %7587 = vrot.lane.b32.xlu1 %v6100_v22, %s10519_s27  ;;  %v6114_v22 = vpack.c.bf16 %v16824_v35, %v16824_v35 }
 0x57d   : > { %7591 = vrot.lane.b32.xlu0 %v6102_v42, %s10519_s27  ;;  %v5112_v44 = vpack.c.bf16 %v4600_v29, %v4600_v29 }
 0x57e   : > { %v6912_v16 = vpop.permute.xlu2 %6911  ;;  %v7162_v51 = vpop.permute.xlu1 %7161 }
 0x57f   : > { %8322 = vst.msk [vmem:[%s11027_s6 + $0x1f4] sm:$0xf] %vm5124_vm1, %v6912_v16  ;;  %v6908_v12 = vpop.permute.xlu0 %6907 }
 0x580   : > { %8447 = vst.msk [vmem:[%s11027_s6 + $0x3e8] sm:$0xf] %vm5124_vm1, %v7162_v51  ;;  %v4072_v27 = vpop.f32.mrf.mxu3 }
 0x581   : > { %8320 = vst.msk [vmem:[%s11027_s6 + $0x1ec] sm:$0xf] %vm5124_vm1, %v6908_v12  ;;  %v16379_v25 = vadd.f32 %v16271_v38, %v4072_v27  ;;  %v16825_v12 = vld [vmem:[#allocation11_spill] sm:$0xff] }
 0x582   : > { %5625 = vst.msk [vmem:[%s10693_s28 + $0x7d0] sm:$0xf] %vm5124_vm1, %v5112_v44  ;;  %v6115_v27 = vpack.c.bf16 %v16825_v12, %v16825_v12  ;;  %v6127_v12 = vpack.c.bf16 %v16139_v24, %v16139_v24 }
 0x583   : > { %v4601_v53 = vmax.f32 %v16379_v25, 0.0 }
 0x584   : > { %7595 = vrot.lane.b32.xlu2 %v6104_v60, %s10519_s27  ;;  %7593 = vrot.lane.b32.xlu1 %v6103_v23, %s10519_s27  ;;  %v16826_v23 = vld [vmem:[#allocation12_spill] sm:$0xff] }
 0x585   : > { %7597 = vrot.lane.b32.xlu0 %v6105_v46, %s10519_s27  ;;  %v5113_v32 = vpack.c.bf16 %v4601_v53, %v4601_v53  ;;  %v6116_v60 = vpack.c.bf16 %v16826_v23, %v16826_v23  ;;  %v16827_v53 = vld [vmem:[#allocation13_spill] sm:$0xff] }
 0x586   : > { %v7170_v30 = vpop.permute.xlu2 %7169  ;;  %v7420_v14 = vpop.permute.xlu1 %7419 }
 0x587   : > { %8451 = vst.msk [vmem:[%s11027_s6 + $0x3f8] sm:$0xf] %vm5124_vm1, %v7170_v30  ;;  %v7166_v7 = vpop.permute.xlu0 %7165  ;;  %v6117_v30 = vpack.c.bf16 %v16827_v53, %v16827_v53 }
 0x588   : > { %8576 = vst.msk [vmem:[%s11027_s6 + $0x5ec] sm:$0xf] %vm5124_vm1, %v7420_v14  ;;  %v4075_v48 = vpop.f32.mrf.mxu3 }
 0x589   : > { %8449 = vst.msk [vmem:[%s11027_s6 + $0x3f0] sm:$0xf] %vm5124_vm1, %v7166_v7  ;;  %v16400_v18 = vadd.f32 %v16271_v38, %v4075_v48 }
 0x58a   : > { %5626 = vst.msk [vmem:[%s10693_s28 + $0x7d4] sm:$0xf] %vm5124_vm1, %v5113_v32 }
 0x58b   : > { %v4602_v43 = vmax.f32 %v16400_v18, 0.0 }
 0x58c   : > { %7601 = vrot.lane.b32.xlu2 %v6107_v10, %s10519_s27  ;;  %7599 = vrot.lane.b32.xlu1 %v6106_v41, %s10519_s27 }
 0x58d   : > { %7603 = vrot.lane.b32.xlu0 %v6108_v62, %s10519_s27  ;;  %v5114_v28 = vpack.c.bf16 %v4602_v43, %v4602_v43  ;;  %v16828_v62 = vld [vmem:[#allocation14_spill] sm:$0xff] }
 0x58e   : > { %v7542_v39 = vpop.permute.xlu2 %7541  ;;  %v6910_v5 = vpop.permute.xlu1 %6909  ;;  %v6118_v43 = vpack.c.bf16 %v16828_v62, %v16828_v62 }
 0x58f   : > { %8637 = vst.msk [vmem:[%s11027_s6 + $0x6e0] sm:$0xf] %vm5124_vm1, %v7542_v39  ;;  %v7424_v61 = vpop.permute.xlu0 %7423  ;;  %v16829_v39 = vld [vmem:[#allocation15_spill] sm:$0xff] }
 0x590   : > { %8321 = vst.msk [vmem:[%s11027_s6 + $0x1f0] sm:$0xf] %vm5124_vm1, %v6910_v5  ;;  %v4077_v63 = vpop.f32.mrf.mxu3  ;;  %v6119_v5 = vpack.c.bf16 %v16829_v39, %v16829_v39  ;;  %v6133_v39 = vpack.c.bf16 %v16274_v15, %v16274_v15 }
 0x591   : > { %8578 = vst.msk [vmem:[%s11027_s6 + $0x5f4] sm:$0xf] %vm5124_vm1, %v7424_v61  ;;  %v16421_v1 = vadd.f32 %v16271_v38, %v4077_v63  ;;  %v16830_v61 = vld [vmem:[#allocation16_spill] sm:$0xff] }
 0x592   : > { %5627 = vst.msk [vmem:[%s10693_s28 + $0x7d8] sm:$0xf] %vm5124_vm1, %v5114_v28  ;;  %v6120_v63 = vpack.c.bf16 %v16830_v61, %v16830_v61 }
 0x593   : > { %v4603_v34 = vmax.f32 %v16421_v1, 0.0 }
 0x594   : > { %7607 = vrot.lane.b32.xlu2 %v6110_v45, %s10519_s27  ;;  %7605 = vrot.lane.b32.xlu1 %v6109_v47, %s10519_s27 }
 0x595   : > { %7609 = vrot.lane.b32.xlu0 %v6111_v37, %s10519_s27  ;;  %v5115_v54 = vpack.c.bf16 %v4603_v34, %v4603_v34  ;;  %v16831_v34 = vld [vmem:[#allocation17_spill] sm:$0xff] }
 0x596   : > { %v7428_v11 = vpop.permute.xlu2 %7427  ;;  %v7168_v33 = vpop.permute.xlu1 %7167 }
 0x597   : > { %8580 = vst.msk [vmem:[%s11027_s6 + $0x5fc] sm:$0xf] %vm5124_vm1, %v7428_v11  ;;  %v6914_v21 = vpop.permute.xlu0 %6913  ;;  %v6121_v11 = vpack.c.bf16 %v16831_v34, %v16831_v34 }
 0x598   : > { %8450 = vst.msk [vmem:[%s11027_s6 + $0x3f4] sm:$0xf] %vm5124_vm1, %v7168_v33  ;;  %v4080_v19 = vpop.f32.mrf.mxu3  ;;  %v16832_v33 = vld [vmem:[#allocation18_spill] sm:$0xff] }
 0x599   : > { %8323 = vst.msk [vmem:[%s11027_s6 + $0x1f8] sm:$0xf] %vm5124_vm1, %v6914_v21  ;;  %v16442_v49 = vadd.f32 %v16271_v38, %v4080_v19  ;;  %v6123_v19 = vpack.c.bf16 %v16036_v0, %v16036_v0 }
 0x59a   : > { %5628 = vst.msk [vmem:[%s10693_s28 + $0x7dc] sm:$0xf] %vm5124_vm1, %v5115_v54  ;;  %v6122_v54 = vpack.c.bf16 %v16832_v33, %v16832_v33 }
 0x59b   : > { %v4604_v8 = vmax.f32 %v16442_v49, 0.0  ;;  %v6141_v34 = vpack.c.bf16 %v16442_v49, %v16442_v49 }
 0x59c   : > { %7613 = vrot.lane.b32.xlu2 %v6113_v3, %s10519_s27  ;;  %7611 = vrot.lane.b32.xlu1 %v6112_v26, %s10519_s27 }
 0x59d   : > { %7615 = vrot.lane.b32.xlu0 %v6114_v22, %s10519_s27  ;;  %v5116_v16 = vpack.c.bf16 %v4604_v8, %v4604_v8  ;;  %v6124_v22 = vpack.c.bf16 %v16069_v31, %v16069_v31  ;;  %v6125_v8 = vpack.c.bf16 %v16095_v2, %v16095_v2 }
 0x59e   : > { %v7548_v42 = vpop.permute.xlu2 %7547  ;;  %v7426_v29 = vpop.permute.xlu1 %7425 }
 0x59f   : > { %8640 = vst.msk [vmem:[%s11027_s6 + $0x6ec] sm:$0xf] %vm5124_vm1, %v7548_v42  ;;  %v7172_v51 = vpop.permute.xlu0 %7171 }
 0x5a0   : > { %8579 = vst.msk [vmem:[%s11027_s6 + $0x5f8] sm:$0xf] %vm5124_vm1, %v7426_v29  ;;  %v4082_v44 = vpop.f32.mrf.mxu3  ;;  %v6126_v29 = vpack.c.bf16 %v16119_v13, %v16119_v13 }
 0x5a1   : > { %8452 = vst.msk [vmem:[%s11027_s6 + $0x3fc] sm:$0xf] %vm5124_vm1, %v7172_v51  ;;  %v16463_v46 = vadd.f32 %v16271_v38, %v4082_v44 }
 0x5a2   : > { %5629 = vst.msk [vmem:[%s10693_s28 + $0x7e0] sm:$0xf] %vm5124_vm1, %v5116_v16 }
 0x5a3   : > { %v4605_v14 = vmax.f32 %v16463_v46, 0.0 }
 0x5a4   : > { %7619 = vrot.lane.b32.xlu2 %v6116_v60, %s10519_s27  ;;  %7617 = vrot.lane.b32.xlu1 %v6115_v27, %s10519_s27  ;;  %v6128_v27 = vpack.c.bf16 %v16161_v58, %v16161_v58  ;;  %v6129_v60 = vpack.c.bf16 %v16183_v36, %v16183_v36 }
 0x5a5   : > { %7621 = vrot.lane.b32.xlu0 %v6117_v30, %s10519_s27  ;;  %v5117_v48 = vpack.c.bf16 %v4605_v14, %v4605_v14 }
 0x5a6   : > { %v7554_v32 = vpop.permute.xlu2 %7553  ;;  %v6916_v7 = vpop.permute.xlu1 %6915 }
 0x5a7   : > { %8643 = vst.msk [vmem:[%s11027_s6 + $0x6f8] sm:$0xf] %vm5124_vm1, %v7554_v32  ;;  %v7538_v41 = vpop.permute.xlu0 %7537  ;;  %v6130_v32 = vpack.c.bf16 %v16205_v4, %v16205_v4 }
 0x5a8   : > { %8324 = vst.msk [vmem:[%s11027_s6 + $0x1fc] sm:$0xf] %vm5124_vm1, %v6916_v7  ;;  %v4085_v10 = vpop.f32.mrf.mxu3  ;;  %v6131_v7 = vpack.c.bf16 %v16227_v56, %v16227_v56 }
 0x5a9   : > { %8635 = vst.msk [vmem:[%s11027_s6 + $0x6d8] sm:$0xf] %vm5124_vm1, %v7538_v41  ;;  %v16484_v28 = vadd.f32 %v16271_v38, %v4085_v10  ;;  %v6132_v41 = vpack.c.bf16 %v16248_v40, %v16248_v40 }
 0x5aa   : > { %5630 = vst.msk [vmem:[%s10693_s28 + $0x7e4] sm:$0xf] %vm5124_vm1, %v5117_v48 }
 0x5ab   : > { %v4606_v57 = vmax.f32 %v16484_v28, 0.0  ;;  %v6143_v49 = vpack.c.bf16 %v16484_v28, %v16484_v28 }
 0x5ac   : > { %7625 = vrot.lane.b32.xlu2 %v6119_v5, %s10519_s27  ;;  %7623 = vrot.lane.b32.xlu1 %v6118_v43, %s10519_s27  ;;  %v6134_v5 = vpack.c.bf16 %v16295_v20, %v16295_v20 }
 0x5ad   : > { %7627 = vrot.lane.b32.xlu0 %v6120_v63, %s10519_s27  ;;  %v5118_v45 = vpack.c.bf16 %v4606_v57, %v4606_v57  ;;  %v6135_v63 = vpack.c.bf16 %v16316_v59, %v16316_v59  ;;  %v6136_v59 = vpack.c.bf16 %v16337_v55, %v16337_v55 }
 0x5ae   : > { %v7560_v47 = vpop.permute.xlu2 %7559  ;;  %v7540_v9 = vpop.permute.xlu1 %7539 }
 0x5af   : > { %8646 = vst.msk [vmem:[%s11027_s6 + $0x704] sm:$0xf] %vm5124_vm1, %v7560_v47  ;;  %v7544_v17 = vpop.permute.xlu0 %7543 }
 0x5b0   : > { %8636 = vst.msk [vmem:[%s11027_s6 + $0x6dc] sm:$0xf] %vm5124_vm1, %v7540_v9  ;;  %v4087_v37 = vpop.f32.mrf.mxu3  ;;  %v6137_v9 = vpack.c.bf16 %v16358_v52, %v16358_v52  ;;  %v6139_v52 = vpack.c.bf16 %v16400_v18, %v16400_v18 }
 0x5b1   : > { %8638 = vst.msk [vmem:[%s11027_s6 + $0x6e4] sm:$0xf] %vm5124_vm1, %v7544_v17  ;;  %v16505_v21 = vadd.f32 %v16271_v38, %v4087_v37 }
 0x5b2   : > { %5631 = vst.msk [vmem:[%s10693_s28 + $0x7e8] sm:$0xf] %vm5124_vm1, %v5118_v45  ;;  %v6138_v45 = vpack.c.bf16 %v16379_v25, %v16379_v25  ;;  %v6140_v25 = vpack.c.bf16 %v16421_v1, %v16421_v1  ;;  %v6142_v1 = vpack.c.bf16 %v16463_v46, %v16463_v46 }
 0x5b3   : > { %v4607_v6 = vmax.f32 %v16505_v21, 0.0 }
 0x5b4   : > { %7631 = vrot.lane.b32.xlu2 %v6122_v54, %s10519_s27  ;;  %7629 = vrot.lane.b32.xlu1 %v6121_v11, %s10519_s27  ;;  %v6144_v54 = vpack.c.bf16 %v16505_v21, %v16505_v21 }
 0x5b5   : > { %7633 = vrot.lane.b32.xlu0 %v6123_v19, %s10519_s27  ;;  %v5119_v3 = vpack.c.bf16 %v4607_v6, %v4607_v6 }
 0x5b6   : > { %v7566_v26 = vpop.permute.xlu2 %7565  ;;  %v7546_v50 = vpop.permute.xlu1 %7545 }
 0x5b7   : > { %8649 = vst.msk [vmem:[%s11027_s6 + $0x710] sm:$0xf] %vm5124_vm1, %v7566_v26  ;;  %v7550_v35 = vpop.permute.xlu0 %7549 }
 0x5b8   : > { %8639 = vst.msk [vmem:[%s11027_s6 + $0x6e8] sm:$0xf] %vm5124_vm1, %v7546_v50  ;;  %v4090_v0 = vpop.f32.mrf.mxu3 }
 0x5b9   : > { %8641 = vst.msk [vmem:[%s11027_s6 + $0x6f0] sm:$0xf] %vm5124_vm1, %v7550_v35  ;;  %v16526_v42 = vadd.f32 %v16271_v38, %v4090_v0 }
 0x5ba   : > { %5632 = vst.msk [vmem:[%s10693_s28 + $0x7ec] sm:$0xf] %vm5124_vm1, %v5119_v3 }
 0x5bb   : > { %v4608_v16 = vmax.f32 %v16526_v42, 0.0  ;;  %v6145_v21 = vpack.c.bf16 %v16526_v42, %v16526_v42 }
 0x5bc   : > { %7637 = vrot.lane.b32.xlu2 %v6125_v8, %s10519_s27  ;;  %7635 = vrot.lane.b32.xlu1 %v6124_v22, %s10519_s27 }
 0x5bd   : > { %7639 = vrot.lane.b32.xlu0 %v6126_v29, %s10519_s27  ;;  %v5120_v2 = vpack.c.bf16 %v4608_v16, %v4608_v16 }
 0x5be   : > { %v7572_v31 = vpop.permute.xlu2 %7571  ;;  %v7552_v51 = vpop.permute.xlu1 %7551 }
 0x5bf   : > { %8652 = vst.msk [vmem:[%s11027_s6 + $0x71c] sm:$0xf] %vm5124_vm1, %v7572_v31  ;;  %v7556_v44 = vpop.permute.xlu0 %7555 }
 0x5c0   : > { %8642 = vst.msk [vmem:[%s11027_s6 + $0x6f4] sm:$0xf] %vm5124_vm1, %v7552_v51  ;;  %v4092_v13 = vpop.f32.mrf.mxu3 }
 0x5c1   : > { %8644 = vst.msk [vmem:[%s11027_s6 + $0x6fc] sm:$0xf] %vm5124_vm1, %v7556_v44  ;;  %v16547_v23 = vadd.f32 %v16271_v38, %v4092_v13 }
 0x5c2   : > { %5633 = vst.msk [vmem:[%s10693_s28 + $0x7f0] sm:$0xf] %vm5124_vm1, %v5120_v2 }
 0x5c3   : > { %v4609_v53 = vmax.f32 %v16547_v23, 0.0  ;;  %v6146_v6 = vpack.c.bf16 %v16547_v23, %v16547_v23 }
 0x5c4   : > { %7643 = vrot.lane.b32.xlu2 %v6128_v27, %s10519_s27  ;;  %7641 = vrot.lane.b32.xlu1 %v6127_v12, %s10519_s27 }
 0x5c5   : > { %7645 = vrot.lane.b32.xlu0 %v6129_v60, %s10519_s27  ;;  %v5121_v58 = vpack.c.bf16 %v4609_v53, %v4609_v53 }
 0x5c6   : > { %v7578_v24 = vpop.permute.xlu2 %7577  ;;  %v7558_v30 = vpop.permute.xlu1 %7557 }
 0x5c7   : > { %8655 = vst.msk [vmem:[%s11027_s6 + $0x728] sm:$0xf] %vm5124_vm1, %v7578_v24  ;;  %v7562_v14 = vpop.permute.xlu0 %7561 }
 0x5c8   : > { %8645 = vst.msk [vmem:[%s11027_s6 + $0x700] sm:$0xf] %vm5124_vm1, %v7558_v30  ;;  %v4095_v36 = vpop.f32.mrf.mxu3 }
 0x5c9   : > { %8647 = vst.msk [vmem:[%s11027_s6 + $0x708] sm:$0xf] %vm5124_vm1, %v7562_v14  ;;  %v16568_v48 = vadd.f32 %v16271_v38, %v4095_v36 }
 0x5ca   : > { %5634 = vst.msk [vmem:[%s10693_s28 + $0x7f4] sm:$0xf] %vm5124_vm1, %v5121_v58 }
 0x5cb   : > { %v4610_v10 = vmax.f32 %v16568_v48, 0.0 }
 0x5cc   : > { %7649 = vrot.lane.b32.xlu2 %v6131_v7, %s10519_s27  ;;  %7647 = vrot.lane.b32.xlu1 %v6130_v32, %s10519_s27 }
 0x5cd   : > { %7651 = vrot.lane.b32.xlu0 %v6132_v41, %s10519_s27  ;;  %v5122_v56 = vpack.c.bf16 %v4610_v10, %v4610_v10 }
 0x5ce   : > { %v7584_v4 = vpop.permute.xlu2 %7583  ;;  %v7564_v62 = vpop.permute.xlu1 %7563 }
 0x5cf   : > { %8658 = vst.msk [vmem:[%s11027_s6 + $0x734] sm:$0xf] %vm5124_vm1, %v7584_v4  ;;  %v7568_v43 = vpop.permute.xlu0 %7567 }
 0x5d0   : > { %8648 = vst.msk [vmem:[%s11027_s6 + $0x70c] sm:$0xf] %vm5124_vm1, %v7564_v62  ;;  %v4097_v40 = vpop.f32.mrf.mxu3 }
 0x5d1   : > { %8650 = vst.msk [vmem:[%s11027_s6 + $0x714] sm:$0xf] %vm5124_vm1, %v7568_v43  ;;  %v16589_v61 = vadd.f32 %v16271_v38, %v4097_v40 }
 0x5d2   : > { %5635 = vst.msk [vmem:[%s10693_s28 + $0x7f8] sm:$0xf] %vm5124_vm1, %v5122_v56 }
 0x5d3   : > { %v4611_v57 = vmax.f32 %v16589_v61, 0.0 }
 0x5d4   : > { %7655 = vrot.lane.b32.xlu2 %v6134_v5, %s10519_s27  ;;  %7653 = vrot.lane.b32.xlu1 %v6133_v39, %s10519_s27 }
 0x5d5   : > { %7657 = vrot.lane.b32.xlu0 %v6135_v63, %s10519_s27  ;;  %v5123_v47 = vpack.c.bf16 %v4611_v57, %v4611_v57 }
 0x5d6   : > { %v7590_v15 = vpop.permute.xlu2 %7589  ;;  %v7570_v20 = vpop.permute.xlu1 %7569 }
 0x5d7   : > { %8661 = vst.msk [vmem:[%s11027_s6 + $0x740] sm:$0xf] %vm5124_vm1, %v7590_v15  ;;  %v7574_v38 = vpop.permute.xlu0 %7573 }
 0x5d8   : > { %8651 = vst.msk [vmem:[%s11027_s6 + $0x718] sm:$0xf] %vm5124_vm1, %v7570_v20 }
 0x5d9   : > { %8653 = vst.msk [vmem:[%s11027_s6 + $0x720] sm:$0xf] %vm5124_vm1, %v7574_v38 }
 0x5da   : > { %5636 = vst.msk [vmem:[%s10693_s28 + $0x7fc] sm:$0xf] %vm5124_vm1, %v5123_v47  ;;  %s10471_s28 = scalar_lea.hbm %s10470_s5, 2048 }
 0x5db   : > { %p10472_p11 = scmp.ne.s32.totalorder %s10470_s5, %s10471_s28  ;;  %p10477_p1 = scmp.lt.s32.totalorder %s10475_s8, %s10471_s28 }
 0x5dc   : > { %7661 = vrot.lane.b32.xlu2 %v6137_v9, %s10519_s27  ;;  %7659 = vrot.lane.b32.xlu1 %v6136_v59, %s10519_s27 }
 0x5dd   : > { %7663 = vrot.lane.b32.xlu0 %v6138_v45, %s10519_s27  ;;  %p10473_p12 = pnand %p10472_p11, %p10584_p5  ;;  %p10478_p2 = por %p10477_p1, %p10476_p0 }
 0x5de   : > { %v7596_v17 = vpop.permute.xlu2 %7595  ;;  %v7576_v37 = vpop.permute.xlu1 %7575 }
 0x5df   : > { %8664 = vst.msk [vmem:[%s11027_s6 + $0x74c] sm:$0xf] %vm5124_vm1, %v7596_v17  ;;  %v7580_v55 = vpop.permute.xlu0 %7579  ;;  %p10474_p13 = pneg %p10473_p12 }
 0x5e0   : > { %8654 = vst.msk [vmem:[%s11027_s6 + $0x724] sm:$0xf] %vm5124_vm1, %v7576_v37 }
 0x5e1   : > { %8656 = vst.msk [vmem:[%s11027_s6 + $0x72c] sm:$0xf] %vm5124_vm1, %v7580_v55  ;;  %p10479_p3 = pnand %p10478_p2, %p10474_p13 }
 0x5e4   : > { %7667 = vrot.lane.b32.xlu2 %v6140_v25, %s10519_s27  ;;  %7665 = vrot.lane.b32.xlu1 %v6139_v52, %s10519_s27 }
 0x5e5   : > { %7669 = vrot.lane.b32.xlu0 %v6141_v34, %s10519_s27 }
 0x5e6   : > { %v7602_v11 = vpop.permute.xlu2 %7601  ;;  %v7582_v33 = vpop.permute.xlu1 %7581 }
 0x5e7   : > { %8667 = vst.msk [vmem:[%s11027_s6 + $0x758] sm:$0xf] %vm5124_vm1, %v7602_v11  ;;  %v7586_v18 = vpop.permute.xlu0 %7585 }
 0x5e8   : > { %8657 = vst.msk [vmem:[%s11027_s6 + $0x730] sm:$0xf] %vm5124_vm1, %v7582_v33 }
 0x5e9   : > { %8659 = vst.msk [vmem:[%s11027_s6 + $0x738] sm:$0xf] %vm5124_vm1, %v7586_v18 }
 0x5ec   : > { %7673 = vrot.lane.b32.xlu2 %v6143_v49, %s10519_s27  ;;  %7671 = vrot.lane.b32.xlu1 %v6142_v1, %s10519_s27 }
 0x5ed   : > { %7675 = vrot.lane.b32.xlu0 %v6144_v54, %s10519_s27 }
 0x5ee   : > { %v7608_v46 = vpop.permute.xlu2 %7607  ;;  %v7588_v19 = vpop.permute.xlu1 %7587 }
 0x5ef   : > { %8670 = vst.msk [vmem:[%s11027_s6 + $0x764] sm:$0xf] %vm5124_vm1, %v7608_v46  ;;  %v7592_v28 = vpop.permute.xlu0 %7591 }
 0x5f0   : > { %8660 = vst.msk [vmem:[%s11027_s6 + $0x73c] sm:$0xf] %vm5124_vm1, %v7588_v19 }
 0x5f1   : > { %8662 = vst.msk [vmem:[%s11027_s6 + $0x744] sm:$0xf] %vm5124_vm1, %v7592_v28 }
 0x5f2   : > { %10482 = shalt.err (!%p10479_p3)
}
 0x5f3   : > { %s10520_s22 = smov 4   ;;  %v6147_v26 = vpack.c.bf16 %v16568_v48, %v16568_v48  ;;  %v6148_v0 = vpack.c.bf16 %v16589_v61, %v16589_v61 }
 0x5f4   : > { %10404 = dma.vmem_to_hbm [thread:$0]  (%p10584_p5), %s8728_s23, 32768, %s8730_s30, %s8710_s19, %s10519_s27, %s10519_s27, %s10520_s22  }
 0x5f5   : > { %7679 = vrot.lane.b32.xlu2 %v6146_v6, %s10519_s27  ;;  %7677 = vrot.lane.b32.xlu1 %v6145_v21, %s10519_s27 }
 0x5f6   : > { %7681 = vrot.lane.b32.xlu0 %v6147_v26, %s10519_s27  ;;  %v7614_v50 = vpop.permute.xlu2 %7613  ;;  %v7594_v3 = vpop.permute.xlu1 %7593 }
 0x5f7   : > { %8673 = vst.msk [vmem:[%s11027_s6 + $0x770] sm:$0xf] %vm5124_vm1, %v7614_v50  ;;  %v7598_v35 = vpop.permute.xlu0 %7597 }
 0x5f8   : > { %8663 = vst.msk [vmem:[%s11027_s6 + $0x748] sm:$0xf] %vm5124_vm1, %v7594_v3 }
 0x5f9   : > { %8665 = vst.msk [vmem:[%s11027_s6 + $0x750] sm:$0xf] %vm5124_vm1, %v7598_v35 }
 0x5fd   : > { %7683 = vrot.lane.b32.xlu1 %v6148_v0, %s10519_s27 }
 0x5fe   : > { %v7620_v22 = vpop.permute.xlu2 %7619  ;;  %v7600_v8 = vpop.permute.xlu1 %7599 }
 0x5ff   : > { %8676 = vst.msk [vmem:[%s11027_s6 + $0x77c] sm:$0xf] %vm5124_vm1, %v7620_v22  ;;  %v7604_v42 = vpop.permute.xlu0 %7603 }
 0x600   : > { %8666 = vst.msk [vmem:[%s11027_s6 + $0x754] sm:$0xf] %vm5124_vm1, %v7600_v8 }
 0x601   : > { %8668 = vst.msk [vmem:[%s11027_s6 + $0x75c] sm:$0xf] %vm5124_vm1, %v7604_v42 }
 0x606   : > { %v7626_v29 = vpop.permute.xlu2 %7625  ;;  %v7606_v16 = vpop.permute.xlu1 %7605 }
 0x607   : > { %8679 = vst.msk [vmem:[%s11027_s6 + $0x788] sm:$0xf] %vm5124_vm1, %v7626_v29  ;;  %v7610_v31 = vpop.permute.xlu0 %7609 }
 0x608   : > { %8669 = vst.msk [vmem:[%s11027_s6 + $0x760] sm:$0xf] %vm5124_vm1, %v7606_v16 }
 0x609   : > { %8671 = vst.msk [vmem:[%s11027_s6 + $0x768] sm:$0xf] %vm5124_vm1, %v7610_v31 }
 0x60e   : > { %v7632_v51 = vpop.permute.xlu2 %7631  ;;  %v7612_v2 = vpop.permute.xlu1 %7611 }
 0x60f   : > { %8682 = vst.msk [vmem:[%s11027_s6 + $0x794] sm:$0xf] %vm5124_vm1, %v7632_v51  ;;  %v7616_v44 = vpop.permute.xlu0 %7615 }
 0x610   : > { %8672 = vst.msk [vmem:[%s11027_s6 + $0x76c] sm:$0xf] %vm5124_vm1, %v7612_v2 }
 0x611   : > { %8674 = vst.msk [vmem:[%s11027_s6 + $0x774] sm:$0xf] %vm5124_vm1, %v7616_v44 }
 0x616   : > { %v7638_v13 = vpop.permute.xlu2 %7637  ;;  %v7618_v12 = vpop.permute.xlu1 %7617 }
 0x617   : > { %8685 = vst.msk [vmem:[%s11027_s6 + $0x7a0] sm:$0xf] %vm5124_vm1, %v7638_v13  ;;  %v7622_v27 = vpop.permute.xlu0 %7621 }
 0x618   : > { %8675 = vst.msk [vmem:[%s11027_s6 + $0x778] sm:$0xf] %vm5124_vm1, %v7618_v12 }
 0x619   : > { %8677 = vst.msk [vmem:[%s11027_s6 + $0x780] sm:$0xf] %vm5124_vm1, %v7622_v27 }
 0x61e   : > { %v7644_v23 = vpop.permute.xlu2 %7643  ;;  %v7624_v60 = vpop.permute.xlu1 %7623 }
 0x61f   : > { %8688 = vst.msk [vmem:[%s11027_s6 + $0x7ac] sm:$0xf] %vm5124_vm1, %v7644_v23  ;;  %v7628_v53 = vpop.permute.xlu0 %7627 }
 0x620   : > { %8678 = vst.msk [vmem:[%s11027_s6 + $0x784] sm:$0xf] %vm5124_vm1, %v7624_v60 }
 0x621   : > { %8680 = vst.msk [vmem:[%s11027_s6 + $0x78c] sm:$0xf] %vm5124_vm1, %v7628_v53 }
 0x626   : > { %v7650_v24 = vpop.permute.xlu2 %7649  ;;  %v7630_v30 = vpop.permute.xlu1 %7629 }
 0x627   : > { %8691 = vst.msk [vmem:[%s11027_s6 + $0x7b8] sm:$0xf] %vm5124_vm1, %v7650_v24  ;;  %v7634_v58 = vpop.permute.xlu0 %7633 }
 0x628   : > { %8681 = vst.msk [vmem:[%s11027_s6 + $0x790] sm:$0xf] %vm5124_vm1, %v7630_v30 }
 0x629   : > { %8683 = vst.msk [vmem:[%s11027_s6 + $0x798] sm:$0xf] %vm5124_vm1, %v7634_v58 }
 0x62e   : > { %v7656_v14 = vpop.permute.xlu2 %7655  ;;  %v7636_v36 = vpop.permute.xlu1 %7635 }
 0x62f   : > { %8694 = vst.msk [vmem:[%s11027_s6 + $0x7c4] sm:$0xf] %vm5124_vm1, %v7656_v14  ;;  %v7640_v32 = vpop.permute.xlu0 %7639 }
 0x630   : > { %8684 = vst.msk [vmem:[%s11027_s6 + $0x79c] sm:$0xf] %vm5124_vm1, %v7636_v36 }
 0x631   : > { %8686 = vst.msk [vmem:[%s11027_s6 + $0x7a4] sm:$0xf] %vm5124_vm1, %v7640_v32 }
 0x636   : > { %v7662_v7 = vpop.permute.xlu2 %7661  ;;  %v7642_v48 = vpop.permute.xlu1 %7641 }
 0x637   : > { %8697 = vst.msk [vmem:[%s11027_s6 + $0x7d0] sm:$0xf] %vm5124_vm1, %v7662_v7  ;;  %v7646_v41 = vpop.permute.xlu0 %7645 }
 0x638   : > { %8687 = vst.msk [vmem:[%s11027_s6 + $0x7a8] sm:$0xf] %vm5124_vm1, %v7642_v48 }
 0x639   : > { %8689 = vst.msk [vmem:[%s11027_s6 + $0x7b0] sm:$0xf] %vm5124_vm1, %v7646_v41 }
 0x63e   : > { %v7668_v10 = vpop.permute.xlu2 %7667  ;;  %v7648_v4 = vpop.permute.xlu1 %7647 }
 0x63f   : > { %8700 = vst.msk [vmem:[%s11027_s6 + $0x7dc] sm:$0xf] %vm5124_vm1, %v7668_v10  ;;  %v7652_v62 = vpop.permute.xlu0 %7651 }
 0x640   : > { %8690 = vst.msk [vmem:[%s11027_s6 + $0x7b4] sm:$0xf] %vm5124_vm1, %v7648_v4 }
 0x641   : > { %8692 = vst.msk [vmem:[%s11027_s6 + $0x7bc] sm:$0xf] %vm5124_vm1, %v7652_v62 }
 0x646   : > { %v7674_v56 = vpop.permute.xlu2 %7673  ;;  %v7654_v43 = vpop.permute.xlu1 %7653 }
 0x647   : > { %8703 = vst.msk [vmem:[%s11027_s6 + $0x7e8] sm:$0xf] %vm5124_vm1, %v7674_v56  ;;  %v7658_v40 = vpop.permute.xlu0 %7657 }
 0x648   : > { %8693 = vst.msk [vmem:[%s11027_s6 + $0x7c0] sm:$0xf] %vm5124_vm1, %v7654_v43 }
 0x649   : > { %8695 = vst.msk [vmem:[%s11027_s6 + $0x7c8] sm:$0xf] %vm5124_vm1, %v7658_v40 }
 0x64e   : > { %v7660_v5 = vpop.permute.xlu1 %7659 }
 0x64f   : > { %v7680_v39 = vpop.permute.xlu2 %7679  ;;  %v7664_v61 = vpop.permute.xlu0 %7663  ;;  %8696 = vst.msk [vmem:[%s11027_s6 + $0x7cc] sm:$0xf] %vm5124_vm1, %v7660_v5 }
 0x650   : > { %8706 = vst.msk [vmem:[%s11027_s6 + $0x7f4] sm:$0xf] %vm5124_vm1, %v7680_v39 }
 0x651   : > { %8698 = vst.msk [vmem:[%s11027_s6 + $0x7d4] sm:$0xf] %vm5124_vm1, %v7664_v61 }
 0x656   : > { %v7666_v63 = vpop.permute.xlu1 %7665 }
 0x657   : > { %8699 = vst.msk [vmem:[%s11027_s6 + $0x7d8] sm:$0xf] %vm5124_vm1, %v7666_v63  ;;  %v7670_v57 = vpop.permute.xlu0 %7669 }
 0x658   : > { %8701 = vst.msk [vmem:[%s11027_s6 + $0x7e0] sm:$0xf] %vm5124_vm1, %v7670_v57 }
 0x65e   : > { %v7672_v15 = vpop.permute.xlu1 %7671 }
 0x65f   : > { %8702 = vst.msk [vmem:[%s11027_s6 + $0x7e4] sm:$0xf] %vm5124_vm1, %v7672_v15  ;;  %v7676_v20 = vpop.permute.xlu0 %7675 }
 0x660   : > { %8704 = vst.msk [vmem:[%s11027_s6 + $0x7ec] sm:$0xf] %vm5124_vm1, %v7676_v20 }
 0x667   : > { %v7678_v47 = vpop.permute.xlu1 %7677 }
 0x668   : > { %8705 = vst.msk [vmem:[%s11027_s6 + $0x7f0] sm:$0xf] %vm5124_vm1, %v7678_v47  ;;  %v7682_v38 = vpop.permute.xlu0 %7681 }
 0x669   : > { %8707 = vst.msk [vmem:[%s11027_s6 + $0x7f8] sm:$0xf] %vm5124_vm1, %v7682_v38 }
 0x66f   : > { %v7684_v59 = vpop.permute.xlu1 %7683 }
 0x670   : > { %8708 = vst.msk [vmem:[%s11027_s6 + $0x7fc] sm:$0xf] %vm5124_vm1, %v7684_v59 }
 0x671 PF: > { %p10410_p4 = scmp.ge.s32.totalorder %s10517_s18, 2  ;;  %s8748_s25 = sand.u32 1, %s10505_s15  }
 0x672   : > { %s8749_s27 = scalar_lea.sflag [#allocation3], %s8748_s25 }
 0x673   : > { %p10407_p5 = pnand %p10410_p4, %p10588_p6 }
 0x675   : > { %p10408_p7 = pneg %p10407_p5 }
 0x677   : > { %10500 = dma.done.wait (%p10408_p7), %s8749_s27, 32768  }
 0x678   : > { %10502 = vsyncadd (%p10408_p7), %s8749_s27, 4294934528  ;;  %p15_p8 = scmp.ge.s32.totalorder %s10571_s21, 34   ;;  %s16833_s15 = smov %s10509_s16 }
 0x679   : > { %s16834_s16 = smov %s10513_s17  ;;  %s16835_s17 = smov %s10582_s24 }
 0x67a   : > { %s16836_s18 = smov %s10571_s21  ;;  %17 = sbr.rel (!%p15_p8) target bundleno = 3 (0x3), region = 79 }
 0x67f   :  { %8763 = vsyncpa [#allocation3], 1 }
 0x680   :  { %8765 = vsyncpa [#allocation3 + $0x1], 1 }

</bundles_post_ra>
